<compile_context>
chip_gen: v6e
topology: v6e:2x2x1
jax: 0.10.0
libtpu: 0.0.40
codegen_flags: <defaults>
</compile_context>

<pallas_src>
import functools

import jax
import jax.numpy as jnp
from jax import lax
from jax.experimental import pallas as pl
from jax.experimental.pallas import tpu as pltpu

BN_EPS = 1e-5


def _stacked_attention_kernel(
    x_ref,                        # (C, B*N)        bf16
    w1_ref, g1_ref, b1_ref,       # (C, C) bf16, (C,1) f32, (C,1) f32
    w2_ref, g2_ref, b2_ref,       # (C, C) bf16, (C,1) f32, (C,1) f32
    pw_ref,                       # (4, C + C//4, C) bf16  stacked [v_w ; qk_w]
    vb_ref,                       # (4, C, 1) f32          v_conv bias
    tw_ref, tb_ref,               # (4, C, C) bf16, (4, C, 1) f32
    sag_ref, sab_ref,             # (4, C, 1) f32 BN gamma/beta per SA layer
    out_ref,                      # (4*C, B*N)      f32
    cur_ref,                      # scratch (C, B*N)     f32  (stem output only)
    curbf_ref,                    # scratch (C, B*N)     bf16 (residual-stream shadow)
    xk_ref,                       # scratch (C//4, B*N)  bf16
    xv_ref,                       # scratch (C, B*N)     bf16
    diff_ref,                     # scratch (C, B*N)     bf16
    *, batch, n_points,
):
    C = cur_ref.shape[0]
    B, N = batch, n_points
    lane_align = 128 if N % 128 == 0 else N

    def mm(w_bf16, m_bf16):
        # bf16 operands, f32 accumulation on the MXU.
        return jnp.dot(w_bf16, m_bf16, preferred_element_type=jnp.float32)

    def bn_relu(y, gamma, beta):
        # Training-mode BN over the folded (B*N) lane axis, biased variance.
        # Single-pass statistics: var = E[y^2] - mean^2 (clamped at 0).
        mean = jnp.mean(y, axis=1, keepdims=True)                      # (C, 1)
        mean_sq = jnp.mean(y * y, axis=1, keepdims=True)               # (C, 1)
        var = jnp.maximum(mean_sq - mean * mean, 0.0)
        scale = lax.rsqrt(var + BN_EPS) * gamma                        # (C, 1)
        return jnp.maximum((y - mean) * scale + beta, 0.0)

    # ---- stem: relu(bn1(conv1(x))) ; relu(bn2(conv2(.))) -----------------------
    h = bn_relu(mm(w1_ref[...], x_ref[...]), g1_ref[...], b1_ref[...])
    h = bn_relu(mm(w2_ref[...], h.astype(jnp.bfloat16)), g2_ref[...], b2_ref[...])
    cur_ref[...] = h
    curbf_ref[...] = h.astype(jnp.bfloat16)

    # ---- 4 stacked SA layers ---------------------------------------------------
    for layer in range(4):
        p_w = pw_ref[layer]          # (C + C//4, C) bf16  [v_w ; qk_w]
        v_b = vb_ref[layer]          # (C, 1)    f32
        t_w = tw_ref[layer]          # (C, C)    bf16
        t_b = tb_ref[layer]          # (C, 1)    f32
        gamma = sag_ref[layer]       # (C, 1)    f32
        beta = sab_ref[layer]        # (C, 1)    f32

        # f32 input of this layer: stem output for layer 0, previous layer's
        # out_ref slab afterwards (no redundant residual-stream store).
        if layer == 0:
            def read_full():
                return cur_ref[...]
            def read_cols(off):
                return cur_ref[:, pl.ds(off, N)]
        else:
            r0 = (layer - 1) * C
            def read_full(r0=r0):
                return out_ref[r0:r0 + C, :]
            def read_cols(off, r0=r0):
                return out_ref[r0:r0 + C, pl.ds(off, N)]

        # Fused q/k + v projection: one wide MXU matmul, then static slices.
        proj = mm(p_w, curbf_ref[...])                                 # (C + C//4, B*N) f32
        xv_ref[...] = (proj[:C] + v_b).astype(jnp.bfloat16)            # (C, B*N)
        xk_ref[...] = proj[C:].astype(jnp.bfloat16)                    # (C//4, B*N)

        # Per-batch (N, N) attention; everything else stays batch-folded.
        @pl.loop(0, B, unroll=(B <= 4))
        def _(b):
            off = pl.multiple_of(b * N, lane_align)
            xk_b = xk_ref[:, pl.ds(off, N)]                            # (C//4, N) bf16
            xv_b = xv_ref[:, pl.ds(off, N)]                            # (C, N)    bf16
            x_b = read_cols(off)                                       # (C, N)    f32

            # energy = x_q @ x_k with x_q = x_k^T  -> (N, N), f32 accumulation
            energy = lax.dot_general(
                xk_b, xk_b,
                dimension_numbers=(((0,), (0,)), ((), ())),
                preferred_element_type=jnp.float32,
            )
            energy = energy - jnp.max(energy, axis=-1, keepdims=True)
            e = jnp.exp(energy)
            attn = e * pl.reciprocal(jnp.sum(e, axis=-1, keepdims=True), approx=True)
            attn = attn * pl.reciprocal(
                1e-9 + jnp.sum(attn, axis=0, keepdims=True), approx=True)

            x_r = jnp.dot(xv_b, attn.astype(jnp.bfloat16),
                          preferred_element_type=jnp.float32)          # (C, N) f32
            diff_ref[:, pl.ds(off, N)] = (x_b - x_r).astype(jnp.bfloat16)

        # trans-conv + BN + ReLU + residual, all on the folded (C, B*N) slab.
        t = mm(t_w, diff_ref[...]) + t_b                               # (C, B*N) f32
        new_cur = read_full() + bn_relu(t, gamma, beta)
        out_ref[layer * C:(layer + 1) * C, :] = new_cur                # lane-dense store
        curbf_ref[...] = new_cur.astype(jnp.bfloat16)                  # shadow for next layer


def _vmem_limit_bytes(C, BN):
    f32, bf16 = 4, 2
    weights = (2 * C * C + 4 * (C + C // 4) * C + 4 * C * C) * bf16 \
              + (4 * C + 16 * C) * f32
    slabs = (C * BN * bf16            # x (bf16 input)
             + 4 * C * BN * f32       # out (resident)
             + C * BN * f32           # cur
             + 3 * C * BN * bf16      # curbf, xv, diff
             + (C // 4) * BN * bf16)  # xk
    # headroom for compiler scratch / double buffering, capped well under the
    # v7x 64 MiB physical VMEM, floored at the usual scoped default.
    return max(32 << 20, min(2 * (weights + slabs) + (8 << 20), 56 << 20))


def stacked_attention_pallas(x, params):
    B, C, N = x.shape
    assert C % 16 == 0, "C must be a multiple of 16 for sublane-aligned bf16 slabs"
    assert N % 128 == 0, "N must be a multiple of 128 for lane-aligned per-batch slices"

    # Layout plumbing outside the kernel: (B, C, N) -> lane-dense bf16 (C, B*N).
    x2d = jnp.transpose(x, (1, 0, 2)).reshape(C, B * N).astype(jnp.bfloat16)

    bf = lambda a: a.astype(jnp.bfloat16)
    # Fused per-layer projection weight: rows [0:C] = v_w, rows [C:C+C//4] = qk_w.
    pw = jnp.concatenate([params["v_w"], params["qk_w"]], axis=1)      # (4, C + C//4, C)

    args = (
        x2d,
        bf(params["w1"]), params["g1"], params["b1"],
        bf(params["w2"]), params["g2"], params["b2"],
        bf(pw),
        params["v_b"],
        bf(params["t_w"]), params["t_b"],
        params["sa_g"], params["sa_b"],
    )
    vmem_spec = pl.BlockSpec(memory_space=pltpu.MemorySpace.VMEM)

    out2d = pl.pallas_call(
        functools.partial(_stacked_attention_kernel, batch=B, n_points=N),
        out_shape=jax.ShapeDtypeStruct((4 * C, B * N), jnp.float32),
        in_specs=[vmem_spec] * len(args),
        out_specs=vmem_spec,
        scratch_shapes=[
            pltpu.VMEM((C, B * N), jnp.float32),        # cur (stem output / layer-0 input)
            pltpu.VMEM((C, B * N), jnp.bfloat16),       # curbf (bf16 residual shadow)
            pltpu.VMEM((C // 4, B * N), jnp.bfloat16),  # x_k
            pltpu.VMEM((C, B * N), jnp.bfloat16),       # x_v
            pltpu.VMEM((C, B * N), jnp.bfloat16),       # x - x_r
        ],
        compiler_params=pltpu.CompilerParams(
            vmem_limit_bytes=_vmem_limit_bytes(C, B * N)),
    )(*args)

    return jnp.transpose(out2d.reshape(4 * C, B, N), (1, 0, 2))


# ------------------------- plain-JAX reference (for checking) -------------------------
def _reference(x, p):
    hi = lax.Precision.HIGHEST

    def conv(w, xin, bias=None):
        y = jnp.einsum("oc,bcn->bon", w, xin, precision=hi)
        if bias is not None:
            y = y + bias[None]
        return y

    def bn(y, g, b):
        mean = jnp.mean(y, axis=(0, 2), keepdims=True)
        var = jnp.mean((y - mean) ** 2, axis=(0, 2), keepdims=True)
        return (y - mean) / jnp.sqrt(var + BN_EPS) * g[None] + b[None]

    def sa(xin, qkw, vw, vb, tw, tb, g, bb):
        x_k = conv(qkw, xin)                                  # (B, C/4, N)
        x_q = jnp.transpose(x_k, (0, 2, 1))                   # (B, N, C/4)
        x_v = conv(vw, xin, vb)                               # (B, C, N)
        energy = jnp.einsum("bnd,bdm->bnm", x_q, x_k, precision=hi)
        attn = jax.nn.softmax(energy, axis=-1)
        attn = attn / (1e-9 + jnp.sum(attn, axis=1, keepdims=True))
        x_r = jnp.einsum("bcn,bnm->bcm", x_v, attn, precision=hi)
        t = conv(tw, xin - x_r, tb)
        return xin + jnp.maximum(bn(t, g, bb), 0.0)

    h = jnp.maximum(bn(conv(p["w1"], x), p["g1"], p["b1"]), 0.0)
    h = jnp.maximum(bn(conv(p["w2"], h), p["g2"], p["b2"]), 0.0)
    outs = []
    cur = h
    for i in range(4):
        cur = sa(cur, p["qk_w"][i], p["v_w"][i], p["v_b"][i],
                 p["t_w"][i], p["t_b"][i], p["sa_g"][i], p["sa_b"][i])
        outs.append(cur)
    return jnp.concatenate(outs, axis=1)


def _init_params(key, C):
    ks = jax.random.split(key, 16)
    n = lambda k, shape, s: (s * jax.random.normal(k, shape)).astype(jnp.float32)
    params = {
        "w1": n(ks[0], (C, C), 0.1),
        "w2": n(ks[1], (C, C), 0.1),
        "g1": (1.0 + 0.1 * jax.random.normal(ks[2], (C, 1))).astype(jnp.float32),
        "b1": n(ks[3], (C, 1), 0.1),
        "g2": (1.0 + 0.1 * jax.random.normal(ks[4], (C, 1))).astype(jnp.float32),
        "b2": n(ks[5], (C, 1), 0.1),
        "qk_w": n(ks[6], (4, C // 4, C), 0.1),
        "v_w": n(ks[7], (4, C, C), 0.1),
        "v_b": n(ks[8], (4, C, 1), 0.1),
        "t_w": n(ks[9], (4, C, C), 0.1),
        "t_b": n(ks[10], (4, C, 1), 0.1),
        "sa_g": (1.0 + 0.1 * jax.random.normal(ks[11], (4, C, 1))).astype(jnp.float32),
        "sa_b": n(ks[12], (4, C, 1), 0.1),
    }
    return params


if __name__ == "__main__":
    B, C, N = 2, 32, 128   # small shapes consistent with the module (channels, points)
    key = jax.random.PRNGKey(0)
    kx, kp = jax.random.split(key)
    x = jax.random.normal(kx, (B, C, N), dtype=jnp.float32)
    params = _init_params(kp, C)

    out = jax.block_until_ready(stacked_attention_pallas(x, params))
    ref = jax.block_until_ready(_reference(x, params))

    assert out.shape == (B, 4 * C, N)
    assert bool(jnp.all(jnp.isfinite(out)))
    assert bool(jnp.allclose(out, ref, rtol=5e-2, atol=5e-2))
    print("KERNEL_OK")
</pallas_src>

<mosaic_0001>
module attributes {stable_mosaic.version = 11 : i64} {
  func.func @_stacked_attention_kernel(%arg0: memref<32x256xbf16, #tpu.memory_space<vmem>>, %arg1: memref<32x32xbf16, #tpu.memory_space<vmem>>, %arg2: memref<32x1xf32, #tpu.memory_space<vmem>>, %arg3: memref<32x1xf32, #tpu.memory_space<vmem>>, %arg4: memref<32x32xbf16, #tpu.memory_space<vmem>>, %arg5: memref<32x1xf32, #tpu.memory_space<vmem>>, %arg6: memref<32x1xf32, #tpu.memory_space<vmem>>, %arg7: memref<4x40x32xbf16, #tpu.memory_space<vmem>>, %arg8: memref<4x32x1xf32, #tpu.memory_space<vmem>>, %arg9: memref<4x32x32xbf16, #tpu.memory_space<vmem>>, %arg10: memref<4x32x1xf32, #tpu.memory_space<vmem>>, %arg11: memref<4x32x1xf32, #tpu.memory_space<vmem>>, %arg12: memref<4x32x1xf32, #tpu.memory_space<vmem>>, %arg13: memref<128x256xf32, #tpu.memory_space<vmem>>, %arg14: memref<32x256xf32, #tpu.memory_space<vmem>>, %arg15: memref<32x256xbf16, #tpu.memory_space<vmem>>, %arg16: memref<8x256xbf16, #tpu.memory_space<vmem>>, %arg17: memref<32x256xbf16, #tpu.memory_space<vmem>>, %arg18: memref<32x256xbf16, #tpu.memory_space<vmem>>) attributes {dimension_semantics = [], scalar_prefetch = 0 : i64, scratch_operands = 5 : i64, tpu.core_type = #tpu.core_type<tc>} {
    %c0 = arith.constant 0 : index
    %c0_0 = arith.constant 0 : index
    %0 = vector.load %arg1[%c0, %c0_0] : memref<32x32xbf16, #tpu.memory_space<vmem>>, vector<32x32xbf16>
    %c0_1 = arith.constant 0 : index
    %c0_2 = arith.constant 0 : index
    %1 = vector.load %arg0[%c0_1, %c0_2] : memref<32x256xbf16, #tpu.memory_space<vmem>>, vector<32x256xbf16>
    %cst = arith.constant dense<0.000000e+00> : vector<32x256xf32>
    %2 = tpu.matmul %0, %1, %cst {dimension_numbers = #tpu.dot_dimension_numbers<[1], [0], [0], [1], [0, 0, 1, 1], [], []>} : vector<32x32xbf16>, vector<32x256xbf16>, vector<32x256xf32> -> vector<32x256xf32>
    %c0_3 = arith.constant 0 : index
    %c0_4 = arith.constant 0 : index
    %3 = vector.load %arg2[%c0_3, %c0_4] : memref<32x1xf32, #tpu.memory_space<vmem>>, vector<32x1xf32>
    %c0_5 = arith.constant 0 : index
    %c0_6 = arith.constant 0 : index
    %4 = vector.load %arg3[%c0_5, %c0_6] : memref<32x1xf32, #tpu.memory_space<vmem>>, vector<32x1xf32>
    %cst_7 = arith.constant dense<0.000000e+00> : vector<32xf32>
    %5 = vector.multi_reduction <add>, %2, %cst_7 [1] : vector<32x256xf32> to vector<32xf32>
    %6 = vector.shape_cast %5 : vector<32xf32> to vector<32x1xf32>
    %cst_8 = arith.constant 2.560000e+02 : f32
    %7 = vector.broadcast %cst_8 : f32 to vector<32x1xf32>
    %8 = arith.divf %6, %7 : vector<32x1xf32>
    %9 = arith.mulf %2, %2 : vector<32x256xf32>
    %cst_9 = arith.constant dense<0.000000e+00> : vector<32xf32>
    %10 = vector.multi_reduction <add>, %9, %cst_9 [1] : vector<32x256xf32> to vector<32xf32>
    %11 = vector.shape_cast %10 : vector<32xf32> to vector<32x1xf32>
    %cst_10 = arith.constant 2.560000e+02 : f32
    %12 = vector.broadcast %cst_10 : f32 to vector<32x1xf32>
    %13 = arith.divf %11, %12 : vector<32x1xf32>
    %14 = arith.mulf %8, %8 : vector<32x1xf32>
    %15 = arith.subf %13, %14 : vector<32x1xf32>
    %cst_11 = arith.constant 0.000000e+00 : f32
    %16 = vector.broadcast %cst_11 : f32 to vector<32x1xf32>
    %17 = arith.maximumf %15, %16 : vector<32x1xf32>
    %cst_12 = arith.constant 9.99999974E-6 : f32
    %18 = vector.broadcast %cst_12 : f32 to vector<32x1xf32>
    %19 = arith.addf %17, %18 : vector<32x1xf32>
    %20 = math.rsqrt %19 : vector<32x1xf32>
    %21 = arith.mulf %20, %3 : vector<32x1xf32>
    %22 = vector.broadcast %8 : vector<32x1xf32> to vector<32x256xf32>
    %23 = arith.subf %2, %22 : vector<32x256xf32>
    %24 = vector.broadcast %21 : vector<32x1xf32> to vector<32x256xf32>
    %25 = arith.mulf %23, %24 : vector<32x256xf32>
    %26 = vector.broadcast %4 : vector<32x1xf32> to vector<32x256xf32>
    %27 = arith.addf %25, %26 : vector<32x256xf32>
    %cst_13 = arith.constant 0.000000e+00 : f32
    %28 = vector.broadcast %cst_13 : f32 to vector<32x256xf32>
    %29 = arith.maximumf %27, %28 : vector<32x256xf32>
    %c0_14 = arith.constant 0 : index
    %c0_15 = arith.constant 0 : index
    %30 = vector.load %arg4[%c0_14, %c0_15] : memref<32x32xbf16, #tpu.memory_space<vmem>>, vector<32x32xbf16>
    %31 = arith.truncf %29 : vector<32x256xf32> to vector<32x256xbf16>
    %cst_16 = arith.constant dense<0.000000e+00> : vector<32x256xf32>
    %32 = tpu.matmul %30, %31, %cst_16 {dimension_numbers = #tpu.dot_dimension_numbers<[1], [0], [0], [1], [0, 0, 1, 1], [], []>} : vector<32x32xbf16>, vector<32x256xbf16>, vector<32x256xf32> -> vector<32x256xf32>
    %c0_17 = arith.constant 0 : index
    %c0_18 = arith.constant 0 : index
    %33 = vector.load %arg5[%c0_17, %c0_18] : memref<32x1xf32, #tpu.memory_space<vmem>>, vector<32x1xf32>
    %c0_19 = arith.constant 0 : index
    %c0_20 = arith.constant 0 : index
    %34 = vector.load %arg6[%c0_19, %c0_20] : memref<32x1xf32, #tpu.memory_space<vmem>>, vector<32x1xf32>
    %cst_21 = arith.constant dense<0.000000e+00> : vector<32xf32>
    %35 = vector.multi_reduction <add>, %32, %cst_21 [1] : vector<32x256xf32> to vector<32xf32>
    %36 = vector.shape_cast %35 : vector<32xf32> to vector<32x1xf32>
    %cst_22 = arith.constant 2.560000e+02 : f32
    %37 = vector.broadcast %cst_22 : f32 to vector<32x1xf32>
    %38 = arith.divf %36, %37 : vector<32x1xf32>
    %39 = arith.mulf %32, %32 : vector<32x256xf32>
    %cst_23 = arith.constant dense<0.000000e+00> : vector<32xf32>
    %40 = vector.multi_reduction <add>, %39, %cst_23 [1] : vector<32x256xf32> to vector<32xf32>
    %41 = vector.shape_cast %40 : vector<32xf32> to vector<32x1xf32>
    %cst_24 = arith.constant 2.560000e+02 : f32
    %42 = vector.broadcast %cst_24 : f32 to vector<32x1xf32>
    %43 = arith.divf %41, %42 : vector<32x1xf32>
    %44 = arith.mulf %38, %38 : vector<32x1xf32>
    %45 = arith.subf %43, %44 : vector<32x1xf32>
    %cst_25 = arith.constant 0.000000e+00 : f32
    %46 = vector.broadcast %cst_25 : f32 to vector<32x1xf32>
    %47 = arith.maximumf %45, %46 : vector<32x1xf32>
    %cst_26 = arith.constant 9.99999974E-6 : f32
    %48 = vector.broadcast %cst_26 : f32 to vector<32x1xf32>
    %49 = arith.addf %47, %48 : vector<32x1xf32>
    %50 = math.rsqrt %49 : vector<32x1xf32>
    %51 = arith.mulf %50, %33 : vector<32x1xf32>
    %52 = vector.broadcast %38 : vector<32x1xf32> to vector<32x256xf32>
    %53 = arith.subf %32, %52 : vector<32x256xf32>
    %54 = vector.broadcast %51 : vector<32x1xf32> to vector<32x256xf32>
    %55 = arith.mulf %53, %54 : vector<32x256xf32>
    %56 = vector.broadcast %34 : vector<32x1xf32> to vector<32x256xf32>
    %57 = arith.addf %55, %56 : vector<32x256xf32>
    %cst_27 = arith.constant 0.000000e+00 : f32
    %58 = vector.broadcast %cst_27 : f32 to vector<32x256xf32>
    %59 = arith.maximumf %57, %58 : vector<32x256xf32>
    %c0_28 = arith.constant 0 : index
    %c0_29 = arith.constant 0 : index
    %60 = vector.load %arg14[%c0_28, %c0_29] : memref<32x256xf32, #tpu.memory_space<vmem>>, vector<32x256xf32>
    tpu.vector_store %arg14[%c0_28, %c0_29], %59 {strides = array<i32>} : memref<32x256xf32, #tpu.memory_space<vmem>>, vector<32x256xf32>,
    %61 = arith.truncf %59 : vector<32x256xf32> to vector<32x256xbf16>
    %c0_30 = arith.constant 0 : index
    %c0_31 = arith.constant 0 : index
    %62 = vector.load %arg15[%c0_30, %c0_31] : memref<32x256xbf16, #tpu.memory_space<vmem>>, vector<32x256xbf16>
    tpu.vector_store %arg15[%c0_30, %c0_31], %61 {strides = array<i32>} : memref<32x256xbf16, #tpu.memory_space<vmem>>, vector<32x256xbf16>,
    %c0_32 = arith.constant 0 : index
    %c0_33 = arith.constant 0 : index
    %c0_34 = arith.constant 0 : index
    %63 = vector.load %arg7[%c0_32, %c0_33, %c0_34] : memref<4x40x32xbf16, #tpu.memory_space<vmem>>, vector<1x40x32xbf16>
    %64 = vector.shape_cast %63 : vector<1x40x32xbf16> to vector<40x32xbf16>
    %c0_35 = arith.constant 0 : index
    %c0_36 = arith.constant 0 : index
    %c0_37 = arith.constant 0 : index
    %65 = vector.load %arg8[%c0_35, %c0_36, %c0_37] : memref<4x32x1xf32, #tpu.memory_space<vmem>>, vector<1x32x1xf32>
    %66 = vector.shape_cast %65 : vector<1x32x1xf32> to vector<32x1xf32>
    %c0_38 = arith.constant 0 : index
    %c0_39 = arith.constant 0 : index
    %c0_40 = arith.constant 0 : index
    %67 = vector.load %arg9[%c0_38, %c0_39, %c0_40] : memref<4x32x32xbf16, #tpu.memory_space<vmem>>, vector<1x32x32xbf16>
    %68 = vector.shape_cast %67 : vector<1x32x32xbf16> to vector<32x32xbf16>
    %c0_41 = arith.constant 0 : index
    %c0_42 = arith.constant 0 : index
    %c0_43 = arith.constant 0 : index
    %69 = vector.load %arg10[%c0_41, %c0_42, %c0_43] : memref<4x32x1xf32, #tpu.memory_space<vmem>>, vector<1x32x1xf32>
    %70 = vector.shape_cast %69 : vector<1x32x1xf32> to vector<32x1xf32>
    %c0_44 = arith.constant 0 : index
    %c0_45 = arith.constant 0 : index
    %c0_46 = arith.constant 0 : index
    %71 = vector.load %arg11[%c0_44, %c0_45, %c0_46] : memref<4x32x1xf32, #tpu.memory_space<vmem>>, vector<1x32x1xf32>
    %72 = vector.shape_cast %71 : vector<1x32x1xf32> to vector<32x1xf32>
    %c0_47 = arith.constant 0 : index
    %c0_48 = arith.constant 0 : index
    %c0_49 = arith.constant 0 : index
    %73 = vector.load %arg12[%c0_47, %c0_48, %c0_49] : memref<4x32x1xf32, #tpu.memory_space<vmem>>, vector<1x32x1xf32>
    %74 = vector.shape_cast %73 : vector<1x32x1xf32> to vector<32x1xf32>
    %c0_50 = arith.constant 0 : index
    %c0_51 = arith.constant 0 : index
    %75 = vector.load %arg15[%c0_50, %c0_51] : memref<32x256xbf16, #tpu.memory_space<vmem>>, vector<32x256xbf16>
    %cst_52 = arith.constant dense<0.000000e+00> : vector<40x256xf32>
    %76 = tpu.matmul %64, %75, %cst_52 {dimension_numbers = #tpu.dot_dimension_numbers<[1], [0], [0], [1], [0, 0, 1, 1], [], []>} : vector<40x32xbf16>, vector<32x256xbf16>, vector<40x256xf32> -> vector<40x256xf32>
    %77 = vector.extract_strided_slice %76 {offsets = [0, 0], sizes = [32, 256], strides = [1, 1]} : vector<40x256xf32> to vector<32x256xf32>
    %78 = vector.broadcast %66 : vector<32x1xf32> to vector<32x256xf32>
    %79 = arith.addf %77, %78 : vector<32x256xf32>
    %80 = arith.truncf %79 : vector<32x256xf32> to vector<32x256xbf16>
    %c0_53 = arith.constant 0 : index
    %c0_54 = arith.constant 0 : index
    %81 = vector.load %arg17[%c0_53, %c0_54] : memref<32x256xbf16, #tpu.memory_space<vmem>>, vector<32x256xbf16>
    tpu.vector_store %arg17[%c0_53, %c0_54], %80 {strides = array<i32>} : memref<32x256xbf16, #tpu.memory_space<vmem>>, vector<32x256xbf16>,
    %82 = vector.extract_strided_slice %76 {offsets = [32, 0], sizes = [8, 256], strides = [1, 1]} : vector<40x256xf32> to vector<8x256xf32>
    %83 = arith.truncf %82 : vector<8x256xf32> to vector<8x256xbf16>
    %c0_55 = arith.constant 0 : index
    %c0_56 = arith.constant 0 : index
    %84 = vector.load %arg16[%c0_55, %c0_56] : memref<8x256xbf16, #tpu.memory_space<vmem>>, vector<8x256xbf16>
    tpu.vector_store %arg16[%c0_55, %c0_56], %83 {strides = array<i32>} : memref<8x256xbf16, #tpu.memory_space<vmem>>, vector<8x256xbf16>,
    %c0_i32 = arith.constant 0 : i32
    %c1_i32 = arith.constant 1 : i32
    %85 = arith.muli %c0_i32, %c1_i32 : i32
    %c0_i32_57 = arith.constant 0 : i32
    %86 = arith.addi %c0_i32_57, %85 : i32
    %c128_i32 = arith.constant 128 : i32
    %87 = arith.muli %86, %c128_i32 : i32
    %88 = tpu.assume_multiple %87, 128 : i32
    %c0_58 = arith.constant 0 : index
    %89 = arith.index_cast %88 : i32 to index
    %90 = vector.load %arg16[%c0_58, %89] : memref<8x256xbf16, #tpu.memory_space<vmem>>, vector<8x128xbf16>
    %c0_59 = arith.constant 0 : index
    %91 = arith.index_cast %88 : i32 to index
    %92 = vector.load %arg17[%c0_59, %91] : memref<32x256xbf16, #tpu.memory_space<vmem>>, vector<32x128xbf16>
    %c0_60 = arith.constant 0 : index
    %93 = arith.index_cast %88 : i32 to index
    %94 = vector.load %arg14[%c0_60, %93] : memref<32x256xf32, #tpu.memory_space<vmem>>, vector<32x128xf32>
    %cst_61 = arith.constant dense<0.000000e+00> : vector<128x128xf32>
    %95 = tpu.matmul %90, %90, %cst_61 {dimension_numbers = #tpu.dot_dimension_numbers<[0], [0], [1], [1], [0, 1, 1, 1], [], []>} : vector<8x128xbf16>, vector<8x128xbf16>, vector<128x128xf32> -> vector<128x128xf32>
    %cst_62 = arith.constant dense<0xFF800000> : vector<128xf32>
    %96 = vector.multi_reduction <maximumf>, %95, %cst_62 [1] : vector<128x128xf32> to vector<128xf32>
    %97 = vector.shape_cast %96 : vector<128xf32> to vector<128x1xf32>
    %98 = vector.broadcast %97 : vector<128x1xf32> to vector<128x128xf32>
    %99 = arith.subf %95, %98 : vector<128x128xf32>
    %100 = math.exp %99 : vector<128x128xf32>
    %cst_63 = arith.constant dense<0.000000e+00> : vector<128xf32>
    %101 = vector.multi_reduction <add>, %100, %cst_63 [1] : vector<128x128xf32> to vector<128xf32>
    %102 = vector.shape_cast %101 : vector<128xf32> to vector<128x1xf32>
    %103 = tpu.reciprocal %102 {approx = true} : vector<128x1xf32> -> vector<128x1xf32>
    %104 = vector.broadcast %103 : vector<128x1xf32> to vector<128x128xf32>
    %105 = arith.mulf %100, %104 : vector<128x128xf32>
    %cst_64 = arith.constant dense<0.000000e+00> : vector<128xf32>
    %106 = vector.multi_reduction <add>, %105, %cst_64 [0] : vector<128x128xf32> to vector<128xf32>
    %107 = vector.shape_cast %106 : vector<128xf32> to vector<1x128xf32>
    %cst_65 = arith.constant 9.99999971E-10 : f32
    %108 = vector.broadcast %cst_65 : f32 to vector<1x128xf32>
    %109 = arith.addf %108, %107 : vector<1x128xf32>
    %110 = tpu.reciprocal %109 {approx = true} : vector<1x128xf32> -> vector<1x128xf32>
    %111 = vector.broadcast %110 : vector<1x128xf32> to vector<128x128xf32>
    %112 = arith.mulf %105, %111 : vector<128x128xf32>
    %113 = arith.truncf %112 : vector<128x128xf32> to vector<128x128xbf16>
    %cst_66 = arith.constant dense<0.000000e+00> : vector<32x128xf32>
    %114 = tpu.matmul %92, %113, %cst_66 {dimension_numbers = #tpu.dot_dimension_numbers<[1], [0], [0], [1], [0, 0, 1, 1], [], []>} : vector<32x128xbf16>, vector<128x128xbf16>, vector<32x128xf32> -> vector<32x128xf32>
    %115 = arith.subf %94, %114 : vector<32x128xf32>
    %116 = arith.truncf %115 : vector<32x128xf32> to vector<32x128xbf16>
    %c0_67 = arith.constant 0 : index
    %117 = arith.index_cast %88 : i32 to index
    %118 = vector.load %arg18[%c0_67, %117] : memref<32x256xbf16, #tpu.memory_space<vmem>>, vector<32x128xbf16>
    tpu.vector_store %arg18[%c0_67, %117], %116 {strides = array<i32>} : memref<32x256xbf16, #tpu.memory_space<vmem>>, vector<32x128xbf16>,
    %c1_i32_68 = arith.constant 1 : i32
    %c1_i32_69 = arith.constant 1 : i32
    %119 = arith.muli %c1_i32_68, %c1_i32_69 : i32
    %c0_i32_70 = arith.constant 0 : i32
    %120 = arith.addi %c0_i32_70, %119 : i32
    %c128_i32_71 = arith.constant 128 : i32
    %121 = arith.muli %120, %c128_i32_71 : i32
    %122 = tpu.assume_multiple %121, 128 : i32
    %c0_72 = arith.constant 0 : index
    %123 = arith.index_cast %122 : i32 to index
    %124 = vector.load %arg16[%c0_72, %123] : memref<8x256xbf16, #tpu.memory_space<vmem>>, vector<8x128xbf16>
    %c0_73 = arith.constant 0 : index
    %125 = arith.index_cast %122 : i32 to index
    %126 = vector.load %arg17[%c0_73, %125] : memref<32x256xbf16, #tpu.memory_space<vmem>>, vector<32x128xbf16>
    %c0_74 = arith.constant 0 : index
    %127 = arith.index_cast %122 : i32 to index
    %128 = vector.load %arg14[%c0_74, %127] : memref<32x256xf32, #tpu.memory_space<vmem>>, vector<32x128xf32>
    %cst_75 = arith.constant dense<0.000000e+00> : vector<128x128xf32>
    %129 = tpu.matmul %124, %124, %cst_75 {dimension_numbers = #tpu.dot_dimension_numbers<[0], [0], [1], [1], [0, 1, 1, 1], [], []>} : vector<8x128xbf16>, vector<8x128xbf16>, vector<128x128xf32> -> vector<128x128xf32>
    %cst_76 = arith.constant dense<0xFF800000> : vector<128xf32>
    %130 = vector.multi_reduction <maximumf>, %129, %cst_76 [1] : vector<128x128xf32> to vector<128xf32>
    %131 = vector.shape_cast %130 : vector<128xf32> to vector<128x1xf32>
    %132 = vector.broadcast %131 : vector<128x1xf32> to vector<128x128xf32>
    %133 = arith.subf %129, %132 : vector<128x128xf32>
    %134 = math.exp %133 : vector<128x128xf32>
    %cst_77 = arith.constant dense<0.000000e+00> : vector<128xf32>
    %135 = vector.multi_reduction <add>, %134, %cst_77 [1] : vector<128x128xf32> to vector<128xf32>
    %136 = vector.shape_cast %135 : vector<128xf32> to vector<128x1xf32>
    %137 = tpu.reciprocal %136 {approx = true} : vector<128x1xf32> -> vector<128x1xf32>
    %138 = vector.broadcast %137 : vector<128x1xf32> to vector<128x128xf32>
    %139 = arith.mulf %134, %138 : vector<128x128xf32>
    %cst_78 = arith.constant dense<0.000000e+00> : vector<128xf32>
    %140 = vector.multi_reduction <add>, %139, %cst_78 [0] : vector<128x128xf32> to vector<128xf32>
    %141 = vector.shape_cast %140 : vector<128xf32> to vector<1x128xf32>
    %cst_79 = arith.constant 9.99999971E-10 : f32
    %142 = vector.broadcast %cst_79 : f32 to vector<1x128xf32>
    %143 = arith.addf %142, %141 : vector<1x128xf32>
    %144 = tpu.reciprocal %143 {approx = true} : vector<1x128xf32> -> vector<1x128xf32>
    %145 = vector.broadcast %144 : vector<1x128xf32> to vector<128x128xf32>
    %146 = arith.mulf %139, %145 : vector<128x128xf32>
    %147 = arith.truncf %146 : vector<128x128xf32> to vector<128x128xbf16>
    %cst_80 = arith.constant dense<0.000000e+00> : vector<32x128xf32>
    %148 = tpu.matmul %126, %147, %cst_80 {dimension_numbers = #tpu.dot_dimension_numbers<[1], [0], [0], [1], [0, 0, 1, 1], [], []>} : vector<32x128xbf16>, vector<128x128xbf16>, vector<32x128xf32> -> vector<32x128xf32>
    %149 = arith.subf %128, %148 : vector<32x128xf32>
    %150 = arith.truncf %149 : vector<32x128xf32> to vector<32x128xbf16>
    %c0_81 = arith.constant 0 : index
    %151 = arith.index_cast %122 : i32 to index
    %152 = vector.load %arg18[%c0_81, %151] : memref<32x256xbf16, #tpu.memory_space<vmem>>, vector<32x128xbf16>
    tpu.vector_store %arg18[%c0_81, %151], %150 {strides = array<i32>} : memref<32x256xbf16, #tpu.memory_space<vmem>>, vector<32x128xbf16>,
    %c2_i32 = arith.constant 2 : i32
    %c0_82 = arith.constant 0 : index
    %c0_83 = arith.constant 0 : index
    %153 = vector.load %arg18[%c0_82, %c0_83] : memref<32x256xbf16, #tpu.memory_space<vmem>>, vector<32x256xbf16>
    %cst_84 = arith.constant dense<0.000000e+00> : vector<32x256xf32>
    %154 = tpu.matmul %68, %153, %cst_84 {dimension_numbers = #tpu.dot_dimension_numbers<[1], [0], [0], [1], [0, 0, 1, 1], [], []>} : vector<32x32xbf16>, vector<32x256xbf16>, vector<32x256xf32> -> vector<32x256xf32>
    %155 = vector.broadcast %70 : vector<32x1xf32> to vector<32x256xf32>
    %156 = arith.addf %154, %155 : vector<32x256xf32>
    %c0_85 = arith.constant 0 : index
    %c0_86 = arith.constant 0 : index
    %157 = vector.load %arg14[%c0_85, %c0_86] : memref<32x256xf32, #tpu.memory_space<vmem>>, vector<32x256xf32>
    %cst_87 = arith.constant dense<0.000000e+00> : vector<32xf32>
    %158 = vector.multi_reduction <add>, %156, %cst_87 [1] : vector<32x256xf32> to vector<32xf32>
    %159 = vector.shape_cast %158 : vector<32xf32> to vector<32x1xf32>
    %cst_88 = arith.constant 2.560000e+02 : f32
    %160 = vector.broadcast %cst_88 : f32 to vector<32x1xf32>
    %161 = arith.divf %159, %160 : vector<32x1xf32>
    %162 = arith.mulf %156, %156 : vector<32x256xf32>
    %cst_89 = arith.constant dense<0.000000e+00> : vector<32xf32>
    %163 = vector.multi_reduction <add>, %162, %cst_89 [1] : vector<32x256xf32> to vector<32xf32>
    %164 = vector.shape_cast %163 : vector<32xf32> to vector<32x1xf32>
    %cst_90 = arith.constant 2.560000e+02 : f32
    %165 = vector.broadcast %cst_90 : f32 to vector<32x1xf32>
    %166 = arith.divf %164, %165 : vector<32x1xf32>
    %167 = arith.mulf %161, %161 : vector<32x1xf32>
    %168 = arith.subf %166, %167 : vector<32x1xf32>
    %cst_91 = arith.constant 0.000000e+00 : f32
    %169 = vector.broadcast %cst_91 : f32 to vector<32x1xf32>
    %170 = arith.maximumf %168, %169 : vector<32x1xf32>
    %cst_92 = arith.constant 9.99999974E-6 : f32
    %171 = vector.broadcast %cst_92 : f32 to vector<32x1xf32>
    %172 = arith.addf %170, %171 : vector<32x1xf32>
    %173 = math.rsqrt %172 : vector<32x1xf32>
    %174 = arith.mulf %173, %72 : vector<32x1xf32>
    %175 = vector.broadcast %161 : vector<32x1xf32> to vector<32x256xf32>
    %176 = arith.subf %156, %175 : vector<32x256xf32>
    %177 = vector.broadcast %174 : vector<32x1xf32> to vector<32x256xf32>
    %178 = arith.mulf %176, %177 : vector<32x256xf32>
    %179 = vector.broadcast %74 : vector<32x1xf32> to vector<32x256xf32>
    %180 = arith.addf %178, %179 : vector<32x256xf32>
    %cst_93 = arith.constant 0.000000e+00 : f32
    %181 = vector.broadcast %cst_93 : f32 to vector<32x256xf32>
    %182 = arith.maximumf %180, %181 : vector<32x256xf32>
    %183 = arith.addf %157, %182 : vector<32x256xf32>
    %c0_94 = arith.constant 0 : index
    %c0_95 = arith.constant 0 : index
    %184 = vector.load %arg13[%c0_94, %c0_95] : memref<128x256xf32, #tpu.memory_space<vmem>>, vector<32x256xf32>
    tpu.vector_store %arg13[%c0_94, %c0_95], %183 {strides = array<i32>} : memref<128x256xf32, #tpu.memory_space<vmem>>, vector<32x256xf32>,
    %185 = arith.truncf %183 : vector<32x256xf32> to vector<32x256xbf16>
    %c0_96 = arith.constant 0 : index
    %c0_97 = arith.constant 0 : index
    %186 = vector.load %arg15[%c0_96, %c0_97] : memref<32x256xbf16, #tpu.memory_space<vmem>>, vector<32x256xbf16>
    tpu.vector_store %arg15[%c0_96, %c0_97], %185 {strides = array<i32>} : memref<32x256xbf16, #tpu.memory_space<vmem>>, vector<32x256xbf16>,
    %c1 = arith.constant 1 : index
    %c0_98 = arith.constant 0 : index
    %c0_99 = arith.constant 0 : index
    %187 = vector.load %arg7[%c1, %c0_98, %c0_99] : memref<4x40x32xbf16, #tpu.memory_space<vmem>>, vector<1x40x32xbf16>
    %188 = vector.shape_cast %187 : vector<1x40x32xbf16> to vector<40x32xbf16>
    %c1_100 = arith.constant 1 : index
    %c0_101 = arith.constant 0 : index
    %c0_102 = arith.constant 0 : index
    %189 = vector.load %arg8[%c1_100, %c0_101, %c0_102] : memref<4x32x1xf32, #tpu.memory_space<vmem>>, vector<1x32x1xf32>
    %190 = vector.shape_cast %189 : vector<1x32x1xf32> to vector<32x1xf32>
    %c1_103 = arith.constant 1 : index
    %c0_104 = arith.constant 0 : index
    %c0_105 = arith.constant 0 : index
    %191 = vector.load %arg9[%c1_103, %c0_104, %c0_105] : memref<4x32x32xbf16, #tpu.memory_space<vmem>>, vector<1x32x32xbf16>
    %192 = vector.shape_cast %191 : vector<1x32x32xbf16> to vector<32x32xbf16>
    %c1_106 = arith.constant 1 : index
    %c0_107 = arith.constant 0 : index
    %c0_108 = arith.constant 0 : index
    %193 = vector.load %arg10[%c1_106, %c0_107, %c0_108] : memref<4x32x1xf32, #tpu.memory_space<vmem>>, vector<1x32x1xf32>
    %194 = vector.shape_cast %193 : vector<1x32x1xf32> to vector<32x1xf32>
    %c1_109 = arith.constant 1 : index
    %c0_110 = arith.constant 0 : index
    %c0_111 = arith.constant 0 : index
    %195 = vector.load %arg11[%c1_109, %c0_110, %c0_111] : memref<4x32x1xf32, #tpu.memory_space<vmem>>, vector<1x32x1xf32>
    %196 = vector.shape_cast %195 : vector<1x32x1xf32> to vector<32x1xf32>
    %c1_112 = arith.constant 1 : index
    %c0_113 = arith.constant 0 : index
    %c0_114 = arith.constant 0 : index
    %197 = vector.load %arg12[%c1_112, %c0_113, %c0_114] : memref<4x32x1xf32, #tpu.memory_space<vmem>>, vector<1x32x1xf32>
    %198 = vector.shape_cast %197 : vector<1x32x1xf32> to vector<32x1xf32>
    %c0_115 = arith.constant 0 : index
    %c0_116 = arith.constant 0 : index
    %199 = vector.load %arg15[%c0_115, %c0_116] : memref<32x256xbf16, #tpu.memory_space<vmem>>, vector<32x256xbf16>
    %cst_117 = arith.constant dense<0.000000e+00> : vector<40x256xf32>
    %200 = tpu.matmul %188, %199, %cst_117 {dimension_numbers = #tpu.dot_dimension_numbers<[1], [0], [0], [1], [0, 0, 1, 1], [], []>} : vector<40x32xbf16>, vector<32x256xbf16>, vector<40x256xf32> -> vector<40x256xf32>
    %201 = vector.extract_strided_slice %200 {offsets = [0, 0], sizes = [32, 256], strides = [1, 1]} : vector<40x256xf32> to vector<32x256xf32>
    %202 = vector.broadcast %190 : vector<32x1xf32> to vector<32x256xf32>
    %203 = arith.addf %201, %202 : vector<32x256xf32>
    %204 = arith.truncf %203 : vector<32x256xf32> to vector<32x256xbf16>
    %c0_118 = arith.constant 0 : index
    %c0_119 = arith.constant 0 : index
    %205 = vector.load %arg17[%c0_118, %c0_119] : memref<32x256xbf16, #tpu.memory_space<vmem>>, vector<32x256xbf16>
    tpu.vector_store %arg17[%c0_118, %c0_119], %204 {strides = array<i32>} : memref<32x256xbf16, #tpu.memory_space<vmem>>, vector<32x256xbf16>,
    %206 = vector.extract_strided_slice %200 {offsets = [32, 0], sizes = [8, 256], strides = [1, 1]} : vector<40x256xf32> to vector<8x256xf32>
    %207 = arith.truncf %206 : vector<8x256xf32> to vector<8x256xbf16>
    %c0_120 = arith.constant 0 : index
    %c0_121 = arith.constant 0 : index
    %208 = vector.load %arg16[%c0_120, %c0_121] : memref<8x256xbf16, #tpu.memory_space<vmem>>, vector<8x256xbf16>
    tpu.vector_store %arg16[%c0_120, %c0_121], %207 {strides = array<i32>} : memref<8x256xbf16, #tpu.memory_space<vmem>>, vector<8x256xbf16>,
    %c0_i32_122 = arith.constant 0 : i32
    %c1_i32_123 = arith.constant 1 : i32
    %209 = arith.muli %c0_i32_122, %c1_i32_123 : i32
    %c0_i32_124 = arith.constant 0 : i32
    %210 = arith.addi %c0_i32_124, %209 : i32
    %c128_i32_125 = arith.constant 128 : i32
    %211 = arith.muli %210, %c128_i32_125 : i32
    %212 = tpu.assume_multiple %211, 128 : i32
    %c0_126 = arith.constant 0 : index
    %213 = arith.index_cast %212 : i32 to index
    %214 = vector.load %arg16[%c0_126, %213] : memref<8x256xbf16, #tpu.memory_space<vmem>>, vector<8x128xbf16>
    %c0_127 = arith.constant 0 : index
    %215 = arith.index_cast %212 : i32 to index
    %216 = vector.load %arg17[%c0_127, %215] : memref<32x256xbf16, #tpu.memory_space<vmem>>, vector<32x128xbf16>
    %c0_128 = arith.constant 0 : index
    %217 = arith.index_cast %212 : i32 to index
    %218 = vector.load %arg13[%c0_128, %217] : memref<128x256xf32, #tpu.memory_space<vmem>>, vector<32x128xf32>
    %cst_129 = arith.constant dense<0.000000e+00> : vector<128x128xf32>
    %219 = tpu.matmul %214, %214, %cst_129 {dimension_numbers = #tpu.dot_dimension_numbers<[0], [0], [1], [1], [0, 1, 1, 1], [], []>} : vector<8x128xbf16>, vector<8x128xbf16>, vector<128x128xf32> -> vector<128x128xf32>
    %cst_130 = arith.constant dense<0xFF800000> : vector<128xf32>
    %220 = vector.multi_reduction <maximumf>, %219, %cst_130 [1] : vector<128x128xf32> to vector<128xf32>
    %221 = vector.shape_cast %220 : vector<128xf32> to vector<128x1xf32>
    %222 = vector.broadcast %221 : vector<128x1xf32> to vector<128x128xf32>
    %223 = arith.subf %219, %222 : vector<128x128xf32>
    %224 = math.exp %223 : vector<128x128xf32>
    %cst_131 = arith.constant dense<0.000000e+00> : vector<128xf32>
    %225 = vector.multi_reduction <add>, %224, %cst_131 [1] : vector<128x128xf32> to vector<128xf32>
    %226 = vector.shape_cast %225 : vector<128xf32> to vector<128x1xf32>
    %227 = tpu.reciprocal %226 {approx = true} : vector<128x1xf32> -> vector<128x1xf32>
    %228 = vector.broadcast %227 : vector<128x1xf32> to vector<128x128xf32>
    %229 = arith.mulf %224, %228 : vector<128x128xf32>
    %cst_132 = arith.constant dense<0.000000e+00> : vector<128xf32>
    %230 = vector.multi_reduction <add>, %229, %cst_132 [0] : vector<128x128xf32> to vector<128xf32>
    %231 = vector.shape_cast %230 : vector<128xf32> to vector<1x128xf32>
    %cst_133 = arith.constant 9.99999971E-10 : f32
    %232 = vector.broadcast %cst_133 : f32 to vector<1x128xf32>
    %233 = arith.addf %232, %231 : vector<1x128xf32>
    %234 = tpu.reciprocal %233 {approx = true} : vector<1x128xf32> -> vector<1x128xf32>
    %235 = vector.broadcast %234 : vector<1x128xf32> to vector<128x128xf32>
    %236 = arith.mulf %229, %235 : vector<128x128xf32>
    %237 = arith.truncf %236 : vector<128x128xf32> to vector<128x128xbf16>
    %cst_134 = arith.constant dense<0.000000e+00> : vector<32x128xf32>
    %238 = tpu.matmul %216, %237, %cst_134 {dimension_numbers = #tpu.dot_dimension_numbers<[1], [0], [0], [1], [0, 0, 1, 1], [], []>} : vector<32x128xbf16>, vector<128x128xbf16>, vector<32x128xf32> -> vector<32x128xf32>
    %239 = arith.subf %218, %238 : vector<32x128xf32>
    %240 = arith.truncf %239 : vector<32x128xf32> to vector<32x128xbf16>
    %c0_135 = arith.constant 0 : index
    %241 = arith.index_cast %212 : i32 to index
    %242 = vector.load %arg18[%c0_135, %241] : memref<32x256xbf16, #tpu.memory_space<vmem>>, vector<32x128xbf16>
    tpu.vector_store %arg18[%c0_135, %241], %240 {strides = array<i32>} : memref<32x256xbf16, #tpu.memory_space<vmem>>, vector<32x128xbf16>,
    %c1_i32_136 = arith.constant 1 : i32
    %c1_i32_137 = arith.constant 1 : i32
    %243 = arith.muli %c1_i32_136, %c1_i32_137 : i32
    %c0_i32_138 = arith.constant 0 : i32
    %244 = arith.addi %c0_i32_138, %243 : i32
    %c128_i32_139 = arith.constant 128 : i32
    %245 = arith.muli %244, %c128_i32_139 : i32
    %246 = tpu.assume_multiple %245, 128 : i32
    %c0_140 = arith.constant 0 : index
    %247 = arith.index_cast %246 : i32 to index
    %248 = vector.load %arg16[%c0_140, %247] : memref<8x256xbf16, #tpu.memory_space<vmem>>, vector<8x128xbf16>
    %c0_141 = arith.constant 0 : index
    %249 = arith.index_cast %246 : i32 to index
    %250 = vector.load %arg17[%c0_141, %249] : memref<32x256xbf16, #tpu.memory_space<vmem>>, vector<32x128xbf16>
    %c0_142 = arith.constant 0 : index
    %251 = arith.index_cast %246 : i32 to index
    %252 = vector.load %arg13[%c0_142, %251] : memref<128x256xf32, #tpu.memory_space<vmem>>, vector<32x128xf32>
    %cst_143 = arith.constant dense<0.000000e+00> : vector<128x128xf32>
    %253 = tpu.matmul %248, %248, %cst_143 {dimension_numbers = #tpu.dot_dimension_numbers<[0], [0], [1], [1], [0, 1, 1, 1], [], []>} : vector<8x128xbf16>, vector<8x128xbf16>, vector<128x128xf32> -> vector<128x128xf32>
    %cst_144 = arith.constant dense<0xFF800000> : vector<128xf32>
    %254 = vector.multi_reduction <maximumf>, %253, %cst_144 [1] : vector<128x128xf32> to vector<128xf32>
    %255 = vector.shape_cast %254 : vector<128xf32> to vector<128x1xf32>
    %256 = vector.broadcast %255 : vector<128x1xf32> to vector<128x128xf32>
    %257 = arith.subf %253, %256 : vector<128x128xf32>
    %258 = math.exp %257 : vector<128x128xf32>
    %cst_145 = arith.constant dense<0.000000e+00> : vector<128xf32>
    %259 = vector.multi_reduction <add>, %258, %cst_145 [1] : vector<128x128xf32> to vector<128xf32>
    %260 = vector.shape_cast %259 : vector<128xf32> to vector<128x1xf32>
    %261 = tpu.reciprocal %260 {approx = true} : vector<128x1xf32> -> vector<128x1xf32>
    %262 = vector.broadcast %261 : vector<128x1xf32> to vector<128x128xf32>
    %263 = arith.mulf %258, %262 : vector<128x128xf32>
    %cst_146 = arith.constant dense<0.000000e+00> : vector<128xf32>
    %264 = vector.multi_reduction <add>, %263, %cst_146 [0] : vector<128x128xf32> to vector<128xf32>
    %265 = vector.shape_cast %264 : vector<128xf32> to vector<1x128xf32>
    %cst_147 = arith.constant 9.99999971E-10 : f32
    %266 = vector.broadcast %cst_147 : f32 to vector<1x128xf32>
    %267 = arith.addf %266, %265 : vector<1x128xf32>
    %268 = tpu.reciprocal %267 {approx = true} : vector<1x128xf32> -> vector<1x128xf32>
    %269 = vector.broadcast %268 : vector<1x128xf32> to vector<128x128xf32>
    %270 = arith.mulf %263, %269 : vector<128x128xf32>
    %271 = arith.truncf %270 : vector<128x128xf32> to vector<128x128xbf16>
    %cst_148 = arith.constant dense<0.000000e+00> : vector<32x128xf32>
    %272 = tpu.matmul %250, %271, %cst_148 {dimension_numbers = #tpu.dot_dimension_numbers<[1], [0], [0], [1], [0, 0, 1, 1], [], []>} : vector<32x128xbf16>, vector<128x128xbf16>, vector<32x128xf32> -> vector<32x128xf32>
    %273 = arith.subf %252, %272 : vector<32x128xf32>
    %274 = arith.truncf %273 : vector<32x128xf32> to vector<32x128xbf16>
    %c0_149 = arith.constant 0 : index
    %275 = arith.index_cast %246 : i32 to index
    %276 = vector.load %arg18[%c0_149, %275] : memref<32x256xbf16, #tpu.memory_space<vmem>>, vector<32x128xbf16>
    tpu.vector_store %arg18[%c0_149, %275], %274 {strides = array<i32>} : memref<32x256xbf16, #tpu.memory_space<vmem>>, vector<32x128xbf16>,
    %c2_i32_150 = arith.constant 2 : i32
    %c0_151 = arith.constant 0 : index
    %c0_152 = arith.constant 0 : index
    %277 = vector.load %arg18[%c0_151, %c0_152] : memref<32x256xbf16, #tpu.memory_space<vmem>>, vector<32x256xbf16>
    %cst_153 = arith.constant dense<0.000000e+00> : vector<32x256xf32>
    %278 = tpu.matmul %192, %277, %cst_153 {dimension_numbers = #tpu.dot_dimension_numbers<[1], [0], [0], [1], [0, 0, 1, 1], [], []>} : vector<32x32xbf16>, vector<32x256xbf16>, vector<32x256xf32> -> vector<32x256xf32>
    %279 = vector.broadcast %194 : vector<32x1xf32> to vector<32x256xf32>
    %280 = arith.addf %278, %279 : vector<32x256xf32>
    %c0_154 = arith.constant 0 : index
    %c0_155 = arith.constant 0 : index
    %281 = vector.load %arg13[%c0_154, %c0_155] : memref<128x256xf32, #tpu.memory_space<vmem>>, vector<32x256xf32>
    %cst_156 = arith.constant dense<0.000000e+00> : vector<32xf32>
    %282 = vector.multi_reduction <add>, %280, %cst_156 [1] : vector<32x256xf32> to vector<32xf32>
    %283 = vector.shape_cast %282 : vector<32xf32> to vector<32x1xf32>
    %cst_157 = arith.constant 2.560000e+02 : f32
    %284 = vector.broadcast %cst_157 : f32 to vector<32x1xf32>
    %285 = arith.divf %283, %284 : vector<32x1xf32>
    %286 = arith.mulf %280, %280 : vector<32x256xf32>
    %cst_158 = arith.constant dense<0.000000e+00> : vector<32xf32>
    %287 = vector.multi_reduction <add>, %286, %cst_158 [1] : vector<32x256xf32> to vector<32xf32>
    %288 = vector.shape_cast %287 : vector<32xf32> to vector<32x1xf32>
    %cst_159 = arith.constant 2.560000e+02 : f32
    %289 = vector.broadcast %cst_159 : f32 to vector<32x1xf32>
    %290 = arith.divf %288, %289 : vector<32x1xf32>
    %291 = arith.mulf %285, %285 : vector<32x1xf32>
    %292 = arith.subf %290, %291 : vector<32x1xf32>
    %cst_160 = arith.constant 0.000000e+00 : f32
    %293 = vector.broadcast %cst_160 : f32 to vector<32x1xf32>
    %294 = arith.maximumf %292, %293 : vector<32x1xf32>
    %cst_161 = arith.constant 9.99999974E-6 : f32
    %295 = vector.broadcast %cst_161 : f32 to vector<32x1xf32>
    %296 = arith.addf %294, %295 : vector<32x1xf32>
    %297 = math.rsqrt %296 : vector<32x1xf32>
    %298 = arith.mulf %297, %196 : vector<32x1xf32>
    %299 = vector.broadcast %285 : vector<32x1xf32> to vector<32x256xf32>
    %300 = arith.subf %280, %299 : vector<32x256xf32>
    %301 = vector.broadcast %298 : vector<32x1xf32> to vector<32x256xf32>
    %302 = arith.mulf %300, %301 : vector<32x256xf32>
    %303 = vector.broadcast %198 : vector<32x1xf32> to vector<32x256xf32>
    %304 = arith.addf %302, %303 : vector<32x256xf32>
    %cst_162 = arith.constant 0.000000e+00 : f32
    %305 = vector.broadcast %cst_162 : f32 to vector<32x256xf32>
    %306 = arith.maximumf %304, %305 : vector<32x256xf32>
    %307 = arith.addf %281, %306 : vector<32x256xf32>
    %c32 = arith.constant 32 : index
    %c0_163 = arith.constant 0 : index
    %308 = vector.load %arg13[%c32, %c0_163] : memref<128x256xf32, #tpu.memory_space<vmem>>, vector<32x256xf32>
    tpu.vector_store %arg13[%c32, %c0_163], %307 {strides = array<i32>} : memref<128x256xf32, #tpu.memory_space<vmem>>, vector<32x256xf32>,
    %309 = arith.truncf %307 : vector<32x256xf32> to vector<32x256xbf16>
    %c0_164 = arith.constant 0 : index
    %c0_165 = arith.constant 0 : index
    %310 = vector.load %arg15[%c0_164, %c0_165] : memref<32x256xbf16, #tpu.memory_space<vmem>>, vector<32x256xbf16>
    tpu.vector_store %arg15[%c0_164, %c0_165], %309 {strides = array<i32>} : memref<32x256xbf16, #tpu.memory_space<vmem>>, vector<32x256xbf16>,
    %c2 = arith.constant 2 : index
    %c0_166 = arith.constant 0 : index
    %c0_167 = arith.constant 0 : index
    %311 = vector.load %arg7[%c2, %c0_166, %c0_167] : memref<4x40x32xbf16, #tpu.memory_space<vmem>>, vector<1x40x32xbf16>
    %312 = vector.shape_cast %311 : vector<1x40x32xbf16> to vector<40x32xbf16>
    %c2_168 = arith.constant 2 : index
    %c0_169 = arith.constant 0 : index
    %c0_170 = arith.constant 0 : index
    %313 = vector.load %arg8[%c2_168, %c0_169, %c0_170] : memref<4x32x1xf32, #tpu.memory_space<vmem>>, vector<1x32x1xf32>
    %314 = vector.shape_cast %313 : vector<1x32x1xf32> to vector<32x1xf32>
    %c2_171 = arith.constant 2 : index
    %c0_172 = arith.constant 0 : index
    %c0_173 = arith.constant 0 : index
    %315 = vector.load %arg9[%c2_171, %c0_172, %c0_173] : memref<4x32x32xbf16, #tpu.memory_space<vmem>>, vector<1x32x32xbf16>
    %316 = vector.shape_cast %315 : vector<1x32x32xbf16> to vector<32x32xbf16>
    %c2_174 = arith.constant 2 : index
    %c0_175 = arith.constant 0 : index
    %c0_176 = arith.constant 0 : index
    %317 = vector.load %arg10[%c2_174, %c0_175, %c0_176] : memref<4x32x1xf32, #tpu.memory_space<vmem>>, vector<1x32x1xf32>
    %318 = vector.shape_cast %317 : vector<1x32x1xf32> to vector<32x1xf32>
    %c2_177 = arith.constant 2 : index
    %c0_178 = arith.constant 0 : index
    %c0_179 = arith.constant 0 : index
    %319 = vector.load %arg11[%c2_177, %c0_178, %c0_179] : memref<4x32x1xf32, #tpu.memory_space<vmem>>, vector<1x32x1xf32>
    %320 = vector.shape_cast %319 : vector<1x32x1xf32> to vector<32x1xf32>
    %c2_180 = arith.constant 2 : index
    %c0_181 = arith.constant 0 : index
    %c0_182 = arith.constant 0 : index
    %321 = vector.load %arg12[%c2_180, %c0_181, %c0_182] : memref<4x32x1xf32, #tpu.memory_space<vmem>>, vector<1x32x1xf32>
    %322 = vector.shape_cast %321 : vector<1x32x1xf32> to vector<32x1xf32>
    %c0_183 = arith.constant 0 : index
    %c0_184 = arith.constant 0 : index
    %323 = vector.load %arg15[%c0_183, %c0_184] : memref<32x256xbf16, #tpu.memory_space<vmem>>, vector<32x256xbf16>
    %cst_185 = arith.constant dense<0.000000e+00> : vector<40x256xf32>
    %324 = tpu.matmul %312, %323, %cst_185 {dimension_numbers = #tpu.dot_dimension_numbers<[1], [0], [0], [1], [0, 0, 1, 1], [], []>} : vector<40x32xbf16>, vector<32x256xbf16>, vector<40x256xf32> -> vector<40x256xf32>
    %325 = vector.extract_strided_slice %324 {offsets = [0, 0], sizes = [32, 256], strides = [1, 1]} : vector<40x256xf32> to vector<32x256xf32>
    %326 = vector.broadcast %314 : vector<32x1xf32> to vector<32x256xf32>
    %327 = arith.addf %325, %326 : vector<32x256xf32>
    %328 = arith.truncf %327 : vector<32x256xf32> to vector<32x256xbf16>
    %c0_186 = arith.constant 0 : index
    %c0_187 = arith.constant 0 : index
    %329 = vector.load %arg17[%c0_186, %c0_187] : memref<32x256xbf16, #tpu.memory_space<vmem>>, vector<32x256xbf16>
    tpu.vector_store %arg17[%c0_186, %c0_187], %328 {strides = array<i32>} : memref<32x256xbf16, #tpu.memory_space<vmem>>, vector<32x256xbf16>,
    %330 = vector.extract_strided_slice %324 {offsets = [32, 0], sizes = [8, 256], strides = [1, 1]} : vector<40x256xf32> to vector<8x256xf32>
    %331 = arith.truncf %330 : vector<8x256xf32> to vector<8x256xbf16>
    %c0_188 = arith.constant 0 : index
    %c0_189 = arith.constant 0 : index
    %332 = vector.load %arg16[%c0_188, %c0_189] : memref<8x256xbf16, #tpu.memory_space<vmem>>, vector<8x256xbf16>
    tpu.vector_store %arg16[%c0_188, %c0_189], %331 {strides = array<i32>} : memref<8x256xbf16, #tpu.memory_space<vmem>>, vector<8x256xbf16>,
    %c0_i32_190 = arith.constant 0 : i32
    %c1_i32_191 = arith.constant 1 : i32
    %333 = arith.muli %c0_i32_190, %c1_i32_191 : i32
    %c0_i32_192 = arith.constant 0 : i32
    %334 = arith.addi %c0_i32_192, %333 : i32
    %c128_i32_193 = arith.constant 128 : i32
    %335 = arith.muli %334, %c128_i32_193 : i32
    %336 = tpu.assume_multiple %335, 128 : i32
    %c0_194 = arith.constant 0 : index
    %337 = arith.index_cast %336 : i32 to index
    %338 = vector.load %arg16[%c0_194, %337] : memref<8x256xbf16, #tpu.memory_space<vmem>>, vector<8x128xbf16>
    %c0_195 = arith.constant 0 : index
    %339 = arith.index_cast %336 : i32 to index
    %340 = vector.load %arg17[%c0_195, %339] : memref<32x256xbf16, #tpu.memory_space<vmem>>, vector<32x128xbf16>
    %c32_196 = arith.constant 32 : index
    %341 = arith.index_cast %336 : i32 to index
    %342 = vector.load %arg13[%c32_196, %341] : memref<128x256xf32, #tpu.memory_space<vmem>>, vector<32x128xf32>
    %cst_197 = arith.constant dense<0.000000e+00> : vector<128x128xf32>
    %343 = tpu.matmul %338, %338, %cst_197 {dimension_numbers = #tpu.dot_dimension_numbers<[0], [0], [1], [1], [0, 1, 1, 1], [], []>} : vector<8x128xbf16>, vector<8x128xbf16>, vector<128x128xf32> -> vector<128x128xf32>
    %cst_198 = arith.constant dense<0xFF800000> : vector<128xf32>
    %344 = vector.multi_reduction <maximumf>, %343, %cst_198 [1] : vector<128x128xf32> to vector<128xf32>
    %345 = vector.shape_cast %344 : vector<128xf32> to vector<128x1xf32>
    %346 = vector.broadcast %345 : vector<128x1xf32> to vector<128x128xf32>
    %347 = arith.subf %343, %346 : vector<128x128xf32>
    %348 = math.exp %347 : vector<128x128xf32>
    %cst_199 = arith.constant dense<0.000000e+00> : vector<128xf32>
    %349 = vector.multi_reduction <add>, %348, %cst_199 [1] : vector<128x128xf32> to vector<128xf32>
    %350 = vector.shape_cast %349 : vector<128xf32> to vector<128x1xf32>
    %351 = tpu.reciprocal %350 {approx = true} : vector<128x1xf32> -> vector<128x1xf32>
    %352 = vector.broadcast %351 : vector<128x1xf32> to vector<128x128xf32>
    %353 = arith.mulf %348, %352 : vector<128x128xf32>
    %cst_200 = arith.constant dense<0.000000e+00> : vector<128xf32>
    %354 = vector.multi_reduction <add>, %353, %cst_200 [0] : vector<128x128xf32> to vector<128xf32>
    %355 = vector.shape_cast %354 : vector<128xf32> to vector<1x128xf32>
    %cst_201 = arith.constant 9.99999971E-10 : f32
    %356 = vector.broadcast %cst_201 : f32 to vector<1x128xf32>
    %357 = arith.addf %356, %355 : vector<1x128xf32>
    %358 = tpu.reciprocal %357 {approx = true} : vector<1x128xf32> -> vector<1x128xf32>
    %359 = vector.broadcast %358 : vector<1x128xf32> to vector<128x128xf32>
    %360 = arith.mulf %353, %359 : vector<128x128xf32>
    %361 = arith.truncf %360 : vector<128x128xf32> to vector<128x128xbf16>
    %cst_202 = arith.constant dense<0.000000e+00> : vector<32x128xf32>
    %362 = tpu.matmul %340, %361, %cst_202 {dimension_numbers = #tpu.dot_dimension_numbers<[1], [0], [0], [1], [0, 0, 1, 1], [], []>} : vector<32x128xbf16>, vector<128x128xbf16>, vector<32x128xf32> -> vector<32x128xf32>
    %363 = arith.subf %342, %362 : vector<32x128xf32>
    %364 = arith.truncf %363 : vector<32x128xf32> to vector<32x128xbf16>
    %c0_203 = arith.constant 0 : index
    %365 = arith.index_cast %336 : i32 to index
    %366 = vector.load %arg18[%c0_203, %365] : memref<32x256xbf16, #tpu.memory_space<vmem>>, vector<32x128xbf16>
    tpu.vector_store %arg18[%c0_203, %365], %364 {strides = array<i32>} : memref<32x256xbf16, #tpu.memory_space<vmem>>, vector<32x128xbf16>,
    %c1_i32_204 = arith.constant 1 : i32
    %c1_i32_205 = arith.constant 1 : i32
    %367 = arith.muli %c1_i32_204, %c1_i32_205 : i32
    %c0_i32_206 = arith.constant 0 : i32
    %368 = arith.addi %c0_i32_206, %367 : i32
    %c128_i32_207 = arith.constant 128 : i32
    %369 = arith.muli %368, %c128_i32_207 : i32
    %370 = tpu.assume_multiple %369, 128 : i32
    %c0_208 = arith.constant 0 : index
    %371 = arith.index_cast %370 : i32 to index
    %372 = vector.load %arg16[%c0_208, %371] : memref<8x256xbf16, #tpu.memory_space<vmem>>, vector<8x128xbf16>
    %c0_209 = arith.constant 0 : index
    %373 = arith.index_cast %370 : i32 to index
    %374 = vector.load %arg17[%c0_209, %373] : memref<32x256xbf16, #tpu.memory_space<vmem>>, vector<32x128xbf16>
    %c32_210 = arith.constant 32 : index
    %375 = arith.index_cast %370 : i32 to index
    %376 = vector.load %arg13[%c32_210, %375] : memref<128x256xf32, #tpu.memory_space<vmem>>, vector<32x128xf32>
    %cst_211 = arith.constant dense<0.000000e+00> : vector<128x128xf32>
    %377 = tpu.matmul %372, %372, %cst_211 {dimension_numbers = #tpu.dot_dimension_numbers<[0], [0], [1], [1], [0, 1, 1, 1], [], []>} : vector<8x128xbf16>, vector<8x128xbf16>, vector<128x128xf32> -> vector<128x128xf32>
    %cst_212 = arith.constant dense<0xFF800000> : vector<128xf32>
    %378 = vector.multi_reduction <maximumf>, %377, %cst_212 [1] : vector<128x128xf32> to vector<128xf32>
    %379 = vector.shape_cast %378 : vector<128xf32> to vector<128x1xf32>
    %380 = vector.broadcast %379 : vector<128x1xf32> to vector<128x128xf32>
    %381 = arith.subf %377, %380 : vector<128x128xf32>
    %382 = math.exp %381 : vector<128x128xf32>
    %cst_213 = arith.constant dense<0.000000e+00> : vector<128xf32>
    %383 = vector.multi_reduction <add>, %382, %cst_213 [1] : vector<128x128xf32> to vector<128xf32>
    %384 = vector.shape_cast %383 : vector<128xf32> to vector<128x1xf32>
    %385 = tpu.reciprocal %384 {approx = true} : vector<128x1xf32> -> vector<128x1xf32>
    %386 = vector.broadcast %385 : vector<128x1xf32> to vector<128x128xf32>
    %387 = arith.mulf %382, %386 : vector<128x128xf32>
    %cst_214 = arith.constant dense<0.000000e+00> : vector<128xf32>
    %388 = vector.multi_reduction <add>, %387, %cst_214 [0] : vector<128x128xf32> to vector<128xf32>
    %389 = vector.shape_cast %388 : vector<128xf32> to vector<1x128xf32>
    %cst_215 = arith.constant 9.99999971E-10 : f32
    %390 = vector.broadcast %cst_215 : f32 to vector<1x128xf32>
    %391 = arith.addf %390, %389 : vector<1x128xf32>
    %392 = tpu.reciprocal %391 {approx = true} : vector<1x128xf32> -> vector<1x128xf32>
    %393 = vector.broadcast %392 : vector<1x128xf32> to vector<128x128xf32>
    %394 = arith.mulf %387, %393 : vector<128x128xf32>
    %395 = arith.truncf %394 : vector<128x128xf32> to vector<128x128xbf16>
    %cst_216 = arith.constant dense<0.000000e+00> : vector<32x128xf32>
    %396 = tpu.matmul %374, %395, %cst_216 {dimension_numbers = #tpu.dot_dimension_numbers<[1], [0], [0], [1], [0, 0, 1, 1], [], []>} : vector<32x128xbf16>, vector<128x128xbf16>, vector<32x128xf32> -> vector<32x128xf32>
    %397 = arith.subf %376, %396 : vector<32x128xf32>
    %398 = arith.truncf %397 : vector<32x128xf32> to vector<32x128xbf16>
    %c0_217 = arith.constant 0 : index
    %399 = arith.index_cast %370 : i32 to index
    %400 = vector.load %arg18[%c0_217, %399] : memref<32x256xbf16, #tpu.memory_space<vmem>>, vector<32x128xbf16>
    tpu.vector_store %arg18[%c0_217, %399], %398 {strides = array<i32>} : memref<32x256xbf16, #tpu.memory_space<vmem>>, vector<32x128xbf16>,
    %c2_i32_218 = arith.constant 2 : i32
    %c0_219 = arith.constant 0 : index
    %c0_220 = arith.constant 0 : index
    %401 = vector.load %arg18[%c0_219, %c0_220] : memref<32x256xbf16, #tpu.memory_space<vmem>>, vector<32x256xbf16>
    %cst_221 = arith.constant dense<0.000000e+00> : vector<32x256xf32>
    %402 = tpu.matmul %316, %401, %cst_221 {dimension_numbers = #tpu.dot_dimension_numbers<[1], [0], [0], [1], [0, 0, 1, 1], [], []>} : vector<32x32xbf16>, vector<32x256xbf16>, vector<32x256xf32> -> vector<32x256xf32>
    %403 = vector.broadcast %318 : vector<32x1xf32> to vector<32x256xf32>
    %404 = arith.addf %402, %403 : vector<32x256xf32>
    %c32_222 = arith.constant 32 : index
    %c0_223 = arith.constant 0 : index
    %405 = vector.load %arg13[%c32_222, %c0_223] : memref<128x256xf32, #tpu.memory_space<vmem>>, vector<32x256xf32>
    %cst_224 = arith.constant dense<0.000000e+00> : vector<32xf32>
    %406 = vector.multi_reduction <add>, %404, %cst_224 [1] : vector<32x256xf32> to vector<32xf32>
    %407 = vector.shape_cast %406 : vector<32xf32> to vector<32x1xf32>
    %cst_225 = arith.constant 2.560000e+02 : f32
    %408 = vector.broadcast %cst_225 : f32 to vector<32x1xf32>
    %409 = arith.divf %407, %408 : vector<32x1xf32>
    %410 = arith.mulf %404, %404 : vector<32x256xf32>
    %cst_226 = arith.constant dense<0.000000e+00> : vector<32xf32>
    %411 = vector.multi_reduction <add>, %410, %cst_226 [1] : vector<32x256xf32> to vector<32xf32>
    %412 = vector.shape_cast %411 : vector<32xf32> to vector<32x1xf32>
    %cst_227 = arith.constant 2.560000e+02 : f32
    %413 = vector.broadcast %cst_227 : f32 to vector<32x1xf32>
    %414 = arith.divf %412, %413 : vector<32x1xf32>
    %415 = arith.mulf %409, %409 : vector<32x1xf32>
    %416 = arith.subf %414, %415 : vector<32x1xf32>
    %cst_228 = arith.constant 0.000000e+00 : f32
    %417 = vector.broadcast %cst_228 : f32 to vector<32x1xf32>
    %418 = arith.maximumf %416, %417 : vector<32x1xf32>
    %cst_229 = arith.constant 9.99999974E-6 : f32
    %419 = vector.broadcast %cst_229 : f32 to vector<32x1xf32>
    %420 = arith.addf %418, %419 : vector<32x1xf32>
    %421 = math.rsqrt %420 : vector<32x1xf32>
    %422 = arith.mulf %421, %320 : vector<32x1xf32>
    %423 = vector.broadcast %409 : vector<32x1xf32> to vector<32x256xf32>
    %424 = arith.subf %404, %423 : vector<32x256xf32>
    %425 = vector.broadcast %422 : vector<32x1xf32> to vector<32x256xf32>
    %426 = arith.mulf %424, %425 : vector<32x256xf32>
    %427 = vector.broadcast %322 : vector<32x1xf32> to vector<32x256xf32>
    %428 = arith.addf %426, %427 : vector<32x256xf32>
    %cst_230 = arith.constant 0.000000e+00 : f32
    %429 = vector.broadcast %cst_230 : f32 to vector<32x256xf32>
    %430 = arith.maximumf %428, %429 : vector<32x256xf32>
    %431 = arith.addf %405, %430 : vector<32x256xf32>
    %c64 = arith.constant 64 : index
    %c0_231 = arith.constant 0 : index
    %432 = vector.load %arg13[%c64, %c0_231] : memref<128x256xf32, #tpu.memory_space<vmem>>, vector<32x256xf32>
    tpu.vector_store %arg13[%c64, %c0_231], %431 {strides = array<i32>} : memref<128x256xf32, #tpu.memory_space<vmem>>, vector<32x256xf32>,
    %433 = arith.truncf %431 : vector<32x256xf32> to vector<32x256xbf16>
    %c0_232 = arith.constant 0 : index
    %c0_233 = arith.constant 0 : index
    %434 = vector.load %arg15[%c0_232, %c0_233] : memref<32x256xbf16, #tpu.memory_space<vmem>>, vector<32x256xbf16>
    tpu.vector_store %arg15[%c0_232, %c0_233], %433 {strides = array<i32>} : memref<32x256xbf16, #tpu.memory_space<vmem>>, vector<32x256xbf16>,
    %c3 = arith.constant 3 : index
    %c0_234 = arith.constant 0 : index
    %c0_235 = arith.constant 0 : index
    %435 = vector.load %arg7[%c3, %c0_234, %c0_235] : memref<4x40x32xbf16, #tpu.memory_space<vmem>>, vector<1x40x32xbf16>
    %436 = vector.shape_cast %435 : vector<1x40x32xbf16> to vector<40x32xbf16>
    %c3_236 = arith.constant 3 : index
    %c0_237 = arith.constant 0 : index
    %c0_238 = arith.constant 0 : index
    %437 = vector.load %arg8[%c3_236, %c0_237, %c0_238] : memref<4x32x1xf32, #tpu.memory_space<vmem>>, vector<1x32x1xf32>
    %438 = vector.shape_cast %437 : vector<1x32x1xf32> to vector<32x1xf32>
    %c3_239 = arith.constant 3 : index
    %c0_240 = arith.constant 0 : index
    %c0_241 = arith.constant 0 : index
    %439 = vector.load %arg9[%c3_239, %c0_240, %c0_241] : memref<4x32x32xbf16, #tpu.memory_space<vmem>>, vector<1x32x32xbf16>
    %440 = vector.shape_cast %439 : vector<1x32x32xbf16> to vector<32x32xbf16>
    %c3_242 = arith.constant 3 : index
    %c0_243 = arith.constant 0 : index
    %c0_244 = arith.constant 0 : index
    %441 = vector.load %arg10[%c3_242, %c0_243, %c0_244] : memref<4x32x1xf32, #tpu.memory_space<vmem>>, vector<1x32x1xf32>
    %442 = vector.shape_cast %441 : vector<1x32x1xf32> to vector<32x1xf32>
    %c3_245 = arith.constant 3 : index
    %c0_246 = arith.constant 0 : index
    %c0_247 = arith.constant 0 : index
    %443 = vector.load %arg11[%c3_245, %c0_246, %c0_247] : memref<4x32x1xf32, #tpu.memory_space<vmem>>, vector<1x32x1xf32>
    %444 = vector.shape_cast %443 : vector<1x32x1xf32> to vector<32x1xf32>
    %c3_248 = arith.constant 3 : index
    %c0_249 = arith.constant 0 : index
    %c0_250 = arith.constant 0 : index
    %445 = vector.load %arg12[%c3_248, %c0_249, %c0_250] : memref<4x32x1xf32, #tpu.memory_space<vmem>>, vector<1x32x1xf32>
    %446 = vector.shape_cast %445 : vector<1x32x1xf32> to vector<32x1xf32>
    %c0_251 = arith.constant 0 : index
    %c0_252 = arith.constant 0 : index
    %447 = vector.load %arg15[%c0_251, %c0_252] : memref<32x256xbf16, #tpu.memory_space<vmem>>, vector<32x256xbf16>
    %cst_253 = arith.constant dense<0.000000e+00> : vector<40x256xf32>
    %448 = tpu.matmul %436, %447, %cst_253 {dimension_numbers = #tpu.dot_dimension_numbers<[1], [0], [0], [1], [0, 0, 1, 1], [], []>} : vector<40x32xbf16>, vector<32x256xbf16>, vector<40x256xf32> -> vector<40x256xf32>
    %449 = vector.extract_strided_slice %448 {offsets = [0, 0], sizes = [32, 256], strides = [1, 1]} : vector<40x256xf32> to vector<32x256xf32>
    %450 = vector.broadcast %438 : vector<32x1xf32> to vector<32x256xf32>
    %451 = arith.addf %449, %450 : vector<32x256xf32>
    %452 = arith.truncf %451 : vector<32x256xf32> to vector<32x256xbf16>
    %c0_254 = arith.constant 0 : index
    %c0_255 = arith.constant 0 : index
    %453 = vector.load %arg17[%c0_254, %c0_255] : memref<32x256xbf16, #tpu.memory_space<vmem>>, vector<32x256xbf16>
    tpu.vector_store %arg17[%c0_254, %c0_255], %452 {strides = array<i32>} : memref<32x256xbf16, #tpu.memory_space<vmem>>, vector<32x256xbf16>,
    %454 = vector.extract_strided_slice %448 {offsets = [32, 0], sizes = [8, 256], strides = [1, 1]} : vector<40x256xf32> to vector<8x256xf32>
    %455 = arith.truncf %454 : vector<8x256xf32> to vector<8x256xbf16>
    %c0_256 = arith.constant 0 : index
    %c0_257 = arith.constant 0 : index
    %456 = vector.load %arg16[%c0_256, %c0_257] : memref<8x256xbf16, #tpu.memory_space<vmem>>, vector<8x256xbf16>
    tpu.vector_store %arg16[%c0_256, %c0_257], %455 {strides = array<i32>} : memref<8x256xbf16, #tpu.memory_space<vmem>>, vector<8x256xbf16>,
    %c0_i32_258 = arith.constant 0 : i32
    %c1_i32_259 = arith.constant 1 : i32
    %457 = arith.muli %c0_i32_258, %c1_i32_259 : i32
    %c0_i32_260 = arith.constant 0 : i32
    %458 = arith.addi %c0_i32_260, %457 : i32
    %c128_i32_261 = arith.constant 128 : i32
    %459 = arith.muli %458, %c128_i32_261 : i32
    %460 = tpu.assume_multiple %459, 128 : i32
    %c0_262 = arith.constant 0 : index
    %461 = arith.index_cast %460 : i32 to index
    %462 = vector.load %arg16[%c0_262, %461] : memref<8x256xbf16, #tpu.memory_space<vmem>>, vector<8x128xbf16>
    %c0_263 = arith.constant 0 : index
    %463 = arith.index_cast %460 : i32 to index
    %464 = vector.load %arg17[%c0_263, %463] : memref<32x256xbf16, #tpu.memory_space<vmem>>, vector<32x128xbf16>
    %c64_264 = arith.constant 64 : index
    %465 = arith.index_cast %460 : i32 to index
    %466 = vector.load %arg13[%c64_264, %465] : memref<128x256xf32, #tpu.memory_space<vmem>>, vector<32x128xf32>
    %cst_265 = arith.constant dense<0.000000e+00> : vector<128x128xf32>
    %467 = tpu.matmul %462, %462, %cst_265 {dimension_numbers = #tpu.dot_dimension_numbers<[0], [0], [1], [1], [0, 1, 1, 1], [], []>} : vector<8x128xbf16>, vector<8x128xbf16>, vector<128x128xf32> -> vector<128x128xf32>
    %cst_266 = arith.constant dense<0xFF800000> : vector<128xf32>
    %468 = vector.multi_reduction <maximumf>, %467, %cst_266 [1] : vector<128x128xf32> to vector<128xf32>
    %469 = vector.shape_cast %468 : vector<128xf32> to vector<128x1xf32>
    %470 = vector.broadcast %469 : vector<128x1xf32> to vector<128x128xf32>
    %471 = arith.subf %467, %470 : vector<128x128xf32>
    %472 = math.exp %471 : vector<128x128xf32>
    %cst_267 = arith.constant dense<0.000000e+00> : vector<128xf32>
    %473 = vector.multi_reduction <add>, %472, %cst_267 [1] : vector<128x128xf32> to vector<128xf32>
    %474 = vector.shape_cast %473 : vector<128xf32> to vector<128x1xf32>
    %475 = tpu.reciprocal %474 {approx = true} : vector<128x1xf32> -> vector<128x1xf32>
    %476 = vector.broadcast %475 : vector<128x1xf32> to vector<128x128xf32>
    %477 = arith.mulf %472, %476 : vector<128x128xf32>
    %cst_268 = arith.constant dense<0.000000e+00> : vector<128xf32>
    %478 = vector.multi_reduction <add>, %477, %cst_268 [0] : vector<128x128xf32> to vector<128xf32>
    %479 = vector.shape_cast %478 : vector<128xf32> to vector<1x128xf32>
    %cst_269 = arith.constant 9.99999971E-10 : f32
    %480 = vector.broadcast %cst_269 : f32 to vector<1x128xf32>
    %481 = arith.addf %480, %479 : vector<1x128xf32>
    %482 = tpu.reciprocal %481 {approx = true} : vector<1x128xf32> -> vector<1x128xf32>
    %483 = vector.broadcast %482 : vector<1x128xf32> to vector<128x128xf32>
    %484 = arith.mulf %477, %483 : vector<128x128xf32>
    %485 = arith.truncf %484 : vector<128x128xf32> to vector<128x128xbf16>
    %cst_270 = arith.constant dense<0.000000e+00> : vector<32x128xf32>
    %486 = tpu.matmul %464, %485, %cst_270 {dimension_numbers = #tpu.dot_dimension_numbers<[1], [0], [0], [1], [0, 0, 1, 1], [], []>} : vector<32x128xbf16>, vector<128x128xbf16>, vector<32x128xf32> -> vector<32x128xf32>
    %487 = arith.subf %466, %486 : vector<32x128xf32>
    %488 = arith.truncf %487 : vector<32x128xf32> to vector<32x128xbf16>
    %c0_271 = arith.constant 0 : index
    %489 = arith.index_cast %460 : i32 to index
    %490 = vector.load %arg18[%c0_271, %489] : memref<32x256xbf16, #tpu.memory_space<vmem>>, vector<32x128xbf16>
    tpu.vector_store %arg18[%c0_271, %489], %488 {strides = array<i32>} : memref<32x256xbf16, #tpu.memory_space<vmem>>, vector<32x128xbf16>,
    %c1_i32_272 = arith.constant 1 : i32
    %c1_i32_273 = arith.constant 1 : i32
    %491 = arith.muli %c1_i32_272, %c1_i32_273 : i32
    %c0_i32_274 = arith.constant 0 : i32
    %492 = arith.addi %c0_i32_274, %491 : i32
    %c128_i32_275 = arith.constant 128 : i32
    %493 = arith.muli %492, %c128_i32_275 : i32
    %494 = tpu.assume_multiple %493, 128 : i32
    %c0_276 = arith.constant 0 : index
    %495 = arith.index_cast %494 : i32 to index
    %496 = vector.load %arg16[%c0_276, %495] : memref<8x256xbf16, #tpu.memory_space<vmem>>, vector<8x128xbf16>
    %c0_277 = arith.constant 0 : index
    %497 = arith.index_cast %494 : i32 to index
    %498 = vector.load %arg17[%c0_277, %497] : memref<32x256xbf16, #tpu.memory_space<vmem>>, vector<32x128xbf16>
    %c64_278 = arith.constant 64 : index
    %499 = arith.index_cast %494 : i32 to index
    %500 = vector.load %arg13[%c64_278, %499] : memref<128x256xf32, #tpu.memory_space<vmem>>, vector<32x128xf32>
    %cst_279 = arith.constant dense<0.000000e+00> : vector<128x128xf32>
    %501 = tpu.matmul %496, %496, %cst_279 {dimension_numbers = #tpu.dot_dimension_numbers<[0], [0], [1], [1], [0, 1, 1, 1], [], []>} : vector<8x128xbf16>, vector<8x128xbf16>, vector<128x128xf32> -> vector<128x128xf32>
    %cst_280 = arith.constant dense<0xFF800000> : vector<128xf32>
    %502 = vector.multi_reduction <maximumf>, %501, %cst_280 [1] : vector<128x128xf32> to vector<128xf32>
    %503 = vector.shape_cast %502 : vector<128xf32> to vector<128x1xf32>
    %504 = vector.broadcast %503 : vector<128x1xf32> to vector<128x128xf32>
    %505 = arith.subf %501, %504 : vector<128x128xf32>
    %506 = math.exp %505 : vector<128x128xf32>
    %cst_281 = arith.constant dense<0.000000e+00> : vector<128xf32>
    %507 = vector.multi_reduction <add>, %506, %cst_281 [1] : vector<128x128xf32> to vector<128xf32>
    %508 = vector.shape_cast %507 : vector<128xf32> to vector<128x1xf32>
    %509 = tpu.reciprocal %508 {approx = true} : vector<128x1xf32> -> vector<128x1xf32>
    %510 = vector.broadcast %509 : vector<128x1xf32> to vector<128x128xf32>
    %511 = arith.mulf %506, %510 : vector<128x128xf32>
    %cst_282 = arith.constant dense<0.000000e+00> : vector<128xf32>
    %512 = vector.multi_reduction <add>, %511, %cst_282 [0] : vector<128x128xf32> to vector<128xf32>
    %513 = vector.shape_cast %512 : vector<128xf32> to vector<1x128xf32>
    %cst_283 = arith.constant 9.99999971E-10 : f32
    %514 = vector.broadcast %cst_283 : f32 to vector<1x128xf32>
    %515 = arith.addf %514, %513 : vector<1x128xf32>
    %516 = tpu.reciprocal %515 {approx = true} : vector<1x128xf32> -> vector<1x128xf32>
    %517 = vector.broadcast %516 : vector<1x128xf32> to vector<128x128xf32>
    %518 = arith.mulf %511, %517 : vector<128x128xf32>
    %519 = arith.truncf %518 : vector<128x128xf32> to vector<128x128xbf16>
    %cst_284 = arith.constant dense<0.000000e+00> : vector<32x128xf32>
    %520 = tpu.matmul %498, %519, %cst_284 {dimension_numbers = #tpu.dot_dimension_numbers<[1], [0], [0], [1], [0, 0, 1, 1], [], []>} : vector<32x128xbf16>, vector<128x128xbf16>, vector<32x128xf32> -> vector<32x128xf32>
    %521 = arith.subf %500, %520 : vector<32x128xf32>
    %522 = arith.truncf %521 : vector<32x128xf32> to vector<32x128xbf16>
    %c0_285 = arith.constant 0 : index
    %523 = arith.index_cast %494 : i32 to index
    %524 = vector.load %arg18[%c0_285, %523] : memref<32x256xbf16, #tpu.memory_space<vmem>>, vector<32x128xbf16>
    tpu.vector_store %arg18[%c0_285, %523], %522 {strides = array<i32>} : memref<32x256xbf16, #tpu.memory_space<vmem>>, vector<32x128xbf16>,
    %c2_i32_286 = arith.constant 2 : i32
    %c0_287 = arith.constant 0 : index
    %c0_288 = arith.constant 0 : index
    %525 = vector.load %arg18[%c0_287, %c0_288] : memref<32x256xbf16, #tpu.memory_space<vmem>>, vector<32x256xbf16>
    %cst_289 = arith.constant dense<0.000000e+00> : vector<32x256xf32>
    %526 = tpu.matmul %440, %525, %cst_289 {dimension_numbers = #tpu.dot_dimension_numbers<[1], [0], [0], [1], [0, 0, 1, 1], [], []>} : vector<32x32xbf16>, vector<32x256xbf16>, vector<32x256xf32> -> vector<32x256xf32>
    %527 = vector.broadcast %442 : vector<32x1xf32> to vector<32x256xf32>
    %528 = arith.addf %526, %527 : vector<32x256xf32>
    %c64_290 = arith.constant 64 : index
    %c0_291 = arith.constant 0 : index
    %529 = vector.load %arg13[%c64_290, %c0_291] : memref<128x256xf32, #tpu.memory_space<vmem>>, vector<32x256xf32>
    %cst_292 = arith.constant dense<0.000000e+00> : vector<32xf32>
    %530 = vector.multi_reduction <add>, %528, %cst_292 [1] : vector<32x256xf32> to vector<32xf32>
    %531 = vector.shape_cast %530 : vector<32xf32> to vector<32x1xf32>
    %cst_293 = arith.constant 2.560000e+02 : f32
    %532 = vector.broadcast %cst_293 : f32 to vector<32x1xf32>
    %533 = arith.divf %531, %532 : vector<32x1xf32>
    %534 = arith.mulf %528, %528 : vector<32x256xf32>
    %cst_294 = arith.constant dense<0.000000e+00> : vector<32xf32>
    %535 = vector.multi_reduction <add>, %534, %cst_294 [1] : vector<32x256xf32> to vector<32xf32>
    %536 = vector.shape_cast %535 : vector<32xf32> to vector<32x1xf32>
    %cst_295 = arith.constant 2.560000e+02 : f32
    %537 = vector.broadcast %cst_295 : f32 to vector<32x1xf32>
    %538 = arith.divf %536, %537 : vector<32x1xf32>
    %539 = arith.mulf %533, %533 : vector<32x1xf32>
    %540 = arith.subf %538, %539 : vector<32x1xf32>
    %cst_296 = arith.constant 0.000000e+00 : f32
    %541 = vector.broadcast %cst_296 : f32 to vector<32x1xf32>
    %542 = arith.maximumf %540, %541 : vector<32x1xf32>
    %cst_297 = arith.constant 9.99999974E-6 : f32
    %543 = vector.broadcast %cst_297 : f32 to vector<32x1xf32>
    %544 = arith.addf %542, %543 : vector<32x1xf32>
    %545 = math.rsqrt %544 : vector<32x1xf32>
    %546 = arith.mulf %545, %444 : vector<32x1xf32>
    %547 = vector.broadcast %533 : vector<32x1xf32> to vector<32x256xf32>
    %548 = arith.subf %528, %547 : vector<32x256xf32>
    %549 = vector.broadcast %546 : vector<32x1xf32> to vector<32x256xf32>
    %550 = arith.mulf %548, %549 : vector<32x256xf32>
    %551 = vector.broadcast %446 : vector<32x1xf32> to vector<32x256xf32>
    %552 = arith.addf %550, %551 : vector<32x256xf32>
    %cst_298 = arith.constant 0.000000e+00 : f32
    %553 = vector.broadcast %cst_298 : f32 to vector<32x256xf32>
    %554 = arith.maximumf %552, %553 : vector<32x256xf32>
    %555 = arith.addf %529, %554 : vector<32x256xf32>
    %c96 = arith.constant 96 : index
    %c0_299 = arith.constant 0 : index
    %556 = vector.load %arg13[%c96, %c0_299] : memref<128x256xf32, #tpu.memory_space<vmem>>, vector<32x256xf32>
    tpu.vector_store %arg13[%c96, %c0_299], %555 {strides = array<i32>} : memref<128x256xf32, #tpu.memory_space<vmem>>, vector<32x256xf32>,
    %557 = arith.truncf %555 : vector<32x256xf32> to vector<32x256xbf16>
    %c0_300 = arith.constant 0 : index
    %c0_301 = arith.constant 0 : index
    %558 = vector.load %arg15[%c0_300, %c0_301] : memref<32x256xbf16, #tpu.memory_space<vmem>>, vector<32x256xbf16>
    tpu.vector_store %arg15[%c0_300, %c0_301], %557 {strides = array<i32>} : memref<32x256xbf16, #tpu.memory_space<vmem>>, vector<32x256xbf16>,
    return
  }
}

</mosaic_0001>

<bundles_post_ra>
// kernel: tpu_custom_call.1
= control target key start
LH: loop header
LB: loop body
LE: loop exit
PB: predicated region body
PF: predicated region fallthrough
CT: control target
= control target key end

     0   :  { %v9965_v2 = vmov 0   ;;  %vm84_vm0 = vcmask 261120   ;;  %s9951_s0 = inlined_call_operand.vmem [shape: bf16[32,256], index: 0, kind: input, shape index: {}]   ;;  %s9952_s1 = inlined_call_operand.vmem [shape: bf16[32,32], index: 1, kind: input, shape index: {}]   ;;  %s9953_s2 = inlined_call_operand.vmem [shape: f32[32,1], index: 2, kind: input, shape index: {}]   ;;  %s9954_s3 = inlined_call_operand.vmem [shape: f32[32,1], index: 3, kind: input, shape index: {}]   ;;  %s9955_s4 = inlined_call_operand.vmem [shape: bf16[32,32], index: 4, kind: input, shape index: {}]   ;;  %s9956_s5 = inlined_call_operand.vmem [shape: f32[32,1], index: 5, kind: input, shape index: {}]   ;;  %s9957_s6 = inlined_call_operand.vmem [shape: f32[32,1], index: 6, kind: input, shape index: {}]   ;;  %s9958_s7 = inlined_call_operand.vmem [shape: bf16[4,40,32], index: 7, kind: input, shape index: {}]   ;;  %s9959_s8 = inlined_call_operand.vmem [shape: f32[4,32,1], index: 8, kind: input, shape index: {}]   ;;  %s9960_s9 = inlined_call_operand.vmem [shape: bf16[4,32,32], index: 9, kind: input, shape index: {}]   ;;  %s9961_s10 = inlined_call_operand.vmem [shape: f32[4,32,1], index: 10, kind: input, shape index: {}]   ;;  %s9962_s11 = inlined_call_operand.vmem [shape: f32[4,32,1], index: 11, kind: input, shape index: {}]   ;;  %s9963_s12 = inlined_call_operand.vmem [shape: f32[4,32,1], index: 12, kind: input, shape index: {}]   ;;  %s9964_s13 = inlined_call_operand.hbm [shape: f32[128,256], index: 13, kind: output, shape index: {}]  }
   0x1   :  { %v6848_v0 = vld [vmem:[%s9951_s0 + $0x14] ss:$8 sps:$4 sm:$0xff]   ;;  %v6850_v1 = vld [vmem:[%s9951_s0 + $0x10] ss:$8 sps:$4 sm:$0xff]   ;;  %123 = vmatprep.mubr.bf16.mxu0 %v9965_v2  ;;  %6847 = vset.pattern.permute.xlu1 %v9965_v2  ;;  %v6851_v3 = vld [vmem:[%s9951_s0 + $0x4] ss:$8 sps:$4 sm:$0xff]  }
   0x2   :  { %103 = vmatprep.subr.bf16.mxu0 %v6848_v0  ;;  %6846 = vset.pattern.permute.xlu0 %v9965_v2  ;;  %v6853_v4 = vld [vmem:[%s9951_s0] ss:$8 sps:$4 sm:$0xff]  }
   0x3   :  { %104 = vmatpush1.bf16.msra.mxu0 %v6850_v1  ;;  %345 = vmatprep.mubr.bf16.mxu1 %v9965_v2  ;;  %v6854_v5 = vld [vmem:[%s9952_s1] sm:$0xff]   ;;  %v6855_v6 = vld [vmem:[%s9952_s1 + $0x8] sm:$0xff]  }
   0x4   :  { %105 = vmatprep.subr.bf16.mxu0 %v6851_v3 }
   0x7   :  { %106 = vmatpush1.bf16.msra.mxu0 %v6853_v4 }
   0xa   :  { %5985 = vmatmul.mubr.msk.bf16.vlgmr.msra.gmra.mxu0 %vm84_vm0, %v6854_v5 }
   0xb   :  { %133 = vmatprep.mubr.bf16.mxu0 %v9965_v2 }
  0x12   :  { %5986 = vmatmul.mubr.msk.bf16.gmra.mxu0 %vm84_vm0, %v6855_v6 }
  0x13   :  { %18 = vsyncpa [#allocation8], 0  ;;  %649 = vmatprep.mubr.bf16.mxu0 %v9965_v2  ;;  %v150_v31 = vld [vmem:[%s9954_s3 + $0x10] sm:$0xff]  ;;  %v151_v32 = vld [vmem:[%s9954_s3 + $0x18] sm:$0xff]  ;;  %vm793_vm1 = vcmask 1043456   ;;  %vm768_vm2 = vcmask 64512  }
  0x14   :  { %v146_v0 = vld [vmem:[%s9953_s2 + $0x10] sm:$0xff]  ;;  %v144_v5 = vld [vmem:[%s9953_s2] sm:$0xff] }
  0xca   :  { %v7616_v7 = vpop.f32.mrf.mxu0 }
  0xcb   :  { %v169_v26 = vmul.f32 %v7616_v7, %v7616_v7 }
  0xcc   :  { %v7618_v8 = vpop.f32.mrf.mxu0 }
  0xcd   :  { %v152_v22 = vadd.f32 %v7618_v8, %v7616_v7  ;;  %v170_v24 = vmul.f32 %v7618_v8, %v7618_v8 }
  0xce   :  { %v7620_v9 = vpop.f32.mrf.mxu0 }
  0xcf   :  { %v177_v28 = vadd.f32 %v170_v24, %v169_v26  ;;  %v171_v29 = vmul.f32 %v7620_v9, %v7620_v9 }
  0xd0   :  { %v7622_v10 = vpop.f32.mrf.mxu0 }
  0xd1   :  { %v155_v20 = vadd.f32 %v7622_v10, %v7620_v9  ;;  %v172_v27 = vmul.f32 %v7622_v10, %v7622_v10 }
  0xd2   :  { %v7624_v11 = vpop.f32.mrf.mxu0 }
  0xd3   :  { %v173_v14 = vmul.f32 %v7624_v11, %v7624_v11  ;;  %v180_v30 = vadd.f32 %v172_v27, %v171_v29 }
  0xd4   :  { %v7626_v12 = vpop.f32.mrf.mxu0 }
  0xd5   :  { %v158_v13 = vadd.f32 %v7626_v12, %v7624_v11  ;;  %v174_v15 = vmul.f32 %v7626_v12, %v7626_v12 }
  0xd6   :  { %v7634_v16 = vpop.f32.mrf.mxu0 }
  0xd7   :  { %159 = vadd.xlane.f32.xlu0 %v158_v13  ;;  %v183_v17 = vadd.f32 %v174_v15, %v173_v14  ;;  %v175_v23 = vmul.f32 %v7634_v16, %v7634_v16  ;;  %v145_v15 = vld [vmem:[%s9953_s2 + $0x8] sm:$0xff] }
  0xd8   :  { %v7636_v18 = vpop.f32.mrf.mxu0 }
  0xd9   :  { %184 = vadd.xlane.f32.xlu1 %v183_v17  ;;  %v161_v19 = vadd.f32 %v7636_v18, %v7634_v16  ;;  %v176_v21 = vmul.f32 %v7636_v18, %v7636_v18 }
  0xdb   :  { %162 = vadd.xlane.f32.xlu0 %v161_v19  ;;  %v186_v25 = vadd.f32 %v176_v21, %v175_v23  ;;  %v149_v23 = vld [vmem:[%s9954_s3 + $0x8] sm:$0xff] }
  0xdd   :  { %156 = vadd.xlane.f32.xlu1 %v155_v20  ;;  %v147_v20 = vld [vmem:[%s9953_s2 + $0x18] sm:$0xff] }
  0xdf   :  { %153 = vadd.xlane.f32.xlu0 %v152_v22  ;;  %v148_v22 = vld [vmem:[%s9954_s3] sm:$0xff] }
  0xe1   :  { %187 = vadd.xlane.f32.xlu1 %v186_v25 }
  0xe3   :  { %178 = vadd.xlane.f32.xlu0 %v177_v28 }
  0xe5   :  { %181 = vadd.xlane.f32.xlu1 %v180_v30 }
  0xf6   :  { %265 = vperm.xlu1 %6847, %v150_v31  }
  0xfa   :  { %270 = vperm.xlu1 %6847, %v151_v32  }
 0x160   :  { %v160_v33 = vpop.xlane.xlu0 %159 }
 0x161   :  { %v7662_v34 = vmul.f32 0.00390625, %v160_v33 }
 0x162   :  { %v185_v35 = vpop.xlane.xlu1 %184 }
 0x163   :  { %v191_v36 = vmul.f32 0.00390625, %v185_v35  ;;  %v195_v37 = vmul.f32 %v7662_v34, %v7662_v34  ;;  %v221_v28 = vsub.f32 %v7624_v11, %v7662_v34  ;;  %v222_v29 = vsub.f32 %v7626_v12, %v7662_v34 }
 0x164   :  { %v163_v38 = vpop.xlane.xlu0 %162 }
 0x165   :  { %v199_v39 = vsub.f32 %v191_v36, %v195_v37  ;;  %v168_v44 = vmul.f32 0.00390625, %v163_v38 }
 0x166   :  { %v157_v40 = vpop.xlane.xlu1 %156 }
 0x167   :  { %v203_v41 = vmax.f32 %v199_v39, 0.0  ;;  %v7668_v47 = vmul.f32 0.00390625, %v157_v40  ;;  %v196_v50 = vmul.f32 %v168_v44, %v168_v44  ;;  %v223_v33 = vsub.f32 %v7634_v16, %v168_v44 }
 0x168   :  { %v154_v42 = vpop.xlane.xlu0 %153  ;;  %v224_v35 = vsub.f32 %v7636_v18, %v168_v44 }
 0x169   :  { %v207_v43 = vadd.f32 1e-05, %v203_v41  ;;  %v7666_v45 = vmul.f32 0.00390625, %v154_v42  ;;  %v194_v56 = vmul.f32 %v7668_v47, %v7668_v47  ;;  %v219_v34 = vsub.f32 %v7620_v9, %v7668_v47 }
 0x16a   :  { %v188_v46 = vpop.xlane.xlu1 %187  ;;  %v220_v16 = vsub.f32 %v7622_v10, %v7668_v47 }
 0x16b   :  { %6918 = vrsqrt.f32 %v207_v43  ;;  %v192_v48 = vmul.f32 0.00390625, %v188_v46  ;;  %v193_v51 = vmul.f32 %v7666_v45, %v7666_v45  ;;  %v217_v41 = vsub.f32 %v7616_v7, %v7666_v45 }
 0x16c   :  { %v179_v49 = vpop.xlane.xlu0 %178  ;;  %v218_v11 = vsub.f32 %v7618_v8, %v7666_v45 }
 0x16d   :  { %v189_v52 = vmul.f32 0.00390625, %v179_v49  ;;  %v200_v54 = vsub.f32 %v192_v48, %v196_v50 }
 0x16e   :  { %v182_v53 = vpop.xlane.xlu1 %181 }
 0x16f   :  { %v197_v55 = vsub.f32 %v189_v52, %v193_v51  ;;  %v190_v57 = vmul.f32 0.00390625, %v182_v53  ;;  %v204_v60 = vmax.f32 %v200_v54, 0.0 }
 0x171   :  { %v201_v58 = vmax.f32 %v197_v55, 0.0  ;;  %v198_v59 = vsub.f32 %v190_v57, %v194_v56  ;;  %v208_v1 = vadd.f32 1e-05, %v204_v60  ;;  %v6856_v60 = vld [vmem:[%s9955_s4] sm:$0xff]  }
 0x172   :  { %v266_v24 = vpop.permute.xlu1 %265 }
 0x173   :  { %v205_v61 = vadd.f32 1e-05, %v201_v58  ;;  %v202_v62 = vmax.f32 %v198_v59, 0.0 }
 0x175   :  { %6920 = vrsqrt.f32 %v205_v61  ;;  %v206_v63 = vadd.f32 1e-05, %v202_v62  ;;  %v6857_v61 = vld [vmem:[%s9955_s4 + $0x8] sm:$0xff]  }
 0x176   :  { %v271_v25 = vpop.permute.xlu1 %270 }
 0x177   :  { %6922 = vrsqrt.f32 %v206_v63 }
 0x178   :  { %v6919_v3 = vpop.eup %6918  ;;  %6924 = vrsqrt.f32 %v208_v1 }
 0x179   :  { %v215_v4 = vmul.f32 %v6919_v3, %v146_v0 }
 0x17b   :  { %237 = vperm.xlu0 %6846, %v215_v4  }
 0x182   :  { %v6921_v6 = vpop.eup %6920 }
 0x183   :  { %v213_v13 = vmul.f32 %v6921_v6, %v144_v5 }
 0x184   :  { %v6923_v14 = vpop.eup %6922 }
 0x185   :  { %227 = vperm.xlu1 %6847, %v213_v13   ;;  %v214_v17 = vmul.f32 %v6923_v14, %v145_v15  ;;  %v6925_v19 = vpop.eup %6924 }
 0x186   :  { %v216_v21 = vmul.f32 %v6925_v19, %v147_v20 }
 0x189   :  { %232 = vperm.xlu1 %6847, %v214_v17  }
 0x18d   :  { %242 = vperm.xlu1 %6847, %v216_v21  }
 0x191   :  { %255 = vperm.xlu1 %6847, %v148_v22  }
 0x195   :  { %260 = vperm.xlu1 %6847, %v149_v23  }
 0x1f6   :  { %v238_v27 = vpop.permute.xlu0 %237 }
 0x1f7   :  { %v249_v30 = vmul.f32 %v238_v27, %v221_v28  ;;  %v250_v31 = vmul.f32 %v238_v27, %v222_v29 }
 0x1f9   :  { %v278_v37 = vadd.f32 %v266_v24, %v250_v31  ;;  %v277_v38 = vadd.f32 %v266_v24, %v249_v30  ;;  %v372_v31 = vld [vmem:[%s9957_s6 + $0x10] sm:$0xff] }
 0x1fb   :  { %v286_v43 = vmax.f32 %v278_v37, 0.0  ;;  %v285_v44 = vmax.f32 %v277_v38, 0.0 }
 0x200   :  { %v228_v26 = vpop.permute.xlu1 %227 }
 0x201   :  { %v245_v46 = vmul.f32 %v228_v26, %v217_v41  ;;  %v246_v48 = vmul.f32 %v228_v26, %v218_v11 }
 0x204   :  { %v233_v32 = vpop.permute.xlu1 %232 }
 0x205   :  { %v247_v51 = vmul.f32 %v233_v32, %v219_v34  ;;  %v248_v7 = vmul.f32 %v233_v32, %v220_v16  ;;  %v373_v32 = vld [vmem:[%s9957_s6 + $0x18] sm:$0xff] }
 0x208   :  { %v243_v36 = vpop.permute.xlu1 %242 }
 0x209   :  { %v251_v39 = vmul.f32 %v243_v36, %v223_v33  ;;  %v252_v40 = vmul.f32 %v243_v36, %v224_v35 }
 0x20b   :  { %v280_v42 = vadd.f32 %v271_v25, %v252_v40  ;;  %v279_v12 = vadd.f32 %v271_v25, %v251_v39 }
 0x20c   :  { %v256_v18 = vpop.permute.xlu1 %255 }
 0x20d   :  { %v288_v49 = vmax.f32 %v280_v42, 0.0  ;;  %v287_v50 = vmax.f32 %v279_v12, 0.0  ;;  %v273_v52 = vadd.f32 %v256_v18, %v245_v46  ;;  %v274_v53 = vadd.f32 %v256_v18, %v246_v48 }
 0x20f   :  { %v296_v8 = vpack.c.bf16 %v288_v49, %v286_v43  ;;  %v295_v45 = vpack.c.bf16 %v287_v50, %v285_v44  ;;  %v281_v9 = vmax.f32 %v273_v52, 0.0  ;;  %v282_v10 = vmax.f32 %v274_v53, 0.0 }
 0x210   :  { %v261_v54 = vpop.permute.xlu1 %260 }
 0x211   :  { %v275_v55 = vadd.f32 %v261_v54, %v247_v51  ;;  %v276_v56 = vadd.f32 %v261_v54, %v248_v7  ;;  %325 = vmatprep.subr.bf16.mxu1 %v296_v8 }
 0x212   :  { %326 = vmatpush1.bf16.msra.mxu1 %v295_v45 }
 0x213   :  { %v283_v47 = vmax.f32 %v275_v55, 0.0  ;;  %v284_v57 = vmax.f32 %v276_v56, 0.0 }
 0x215   :  { %v294_v58 = vpack.c.bf16 %v284_v57, %v282_v10  ;;  %v293_v59 = vpack.c.bf16 %v283_v47, %v281_v9  ;;  %v368_v57 = vld [vmem:[%s9956_s5 + $0x10] sm:$0xff] }
 0x217   :  { %327 = vmatprep.subr.bf16.mxu1 %v294_v58 }
 0x218   :  { %328 = vmatpush1.bf16.msra.mxu1 %v293_v59 }
 0x21b   :  { %5989 = vmatmul.mubr.msk.bf16.vlgmr.msra.gmra.mxu1 %vm84_vm0, %v6856_v60  ;;  %v369_v60 = vld [vmem:[%s9956_s5 + $0x18] sm:$0xff] }
 0x21c   :  { %355 = vmatprep.mubr.bf16.mxu1 %v9965_v2 }
 0x223   :  { %5990 = vmatmul.mubr.msk.bf16.gmra.mxu1 %vm84_vm0, %v6857_v61 }
 0x2db   :  { %v7715_v62 = vpop.f32.mrf.mxu1 }
 0x2dc   :  { %v390_v29 = vmul.f32 %v7715_v62, %v7715_v62 }
 0x2dd   :  { %v7717_v63 = vpop.f32.mrf.mxu1 }
 0x2de   :  { %v374_v25 = vadd.f32 %v7717_v63, %v7715_v62  ;;  %v391_v27 = vmul.f32 %v7717_v63, %v7717_v63 }
 0x2df   :  { %v7719_v0 = vpop.f32.mrf.mxu1 }
 0x2e0   :  { %v392_v26 = vmul.f32 %v7719_v0, %v7719_v0  ;;  %v398_v30 = vadd.f32 %v391_v27, %v390_v29 }
 0x2e1   :  { %v7721_v1 = vpop.f32.mrf.mxu1 }
 0x2e2   :  { %v377_v19 = vadd.f32 %v7721_v1, %v7719_v0  ;;  %v393_v24 = vmul.f32 %v7721_v1, %v7721_v1 }
 0x2e3   :  { %v7723_v3 = vpop.f32.mrf.mxu1 }
 0x2e4   :  { %v394_v6 = vmul.f32 %v7723_v3, %v7723_v3  ;;  %v401_v28 = vadd.f32 %v393_v24, %v392_v26 }
 0x2e5   :  { %v7725_v4 = vpop.f32.mrf.mxu1 }
 0x2e6   :  { %v380_v5 = vadd.f32 %v7725_v4, %v7723_v3  ;;  %v395_v13 = vmul.f32 %v7725_v4, %v7725_v4 }
 0x2e7   :  { %v7733_v14 = vpop.f32.mrf.mxu1 }
 0x2e8   :  { %381 = vadd.xlane.f32.xlu1 %v380_v5  ;;  %v404_v15 = vadd.f32 %v395_v13, %v394_v6  ;;  %v396_v22 = vmul.f32 %v7733_v14, %v7733_v14  ;;  %v367_v6 = vld [vmem:[%s9956_s5 + $0x8] sm:$0xff] }
 0x2e9   :  { %v7735_v17 = vpop.f32.mrf.mxu1 }
 0x2ea   :  { %405 = vadd.xlane.f32.xlu0 %v404_v15  ;;  %v397_v20 = vmul.f32 %v7735_v17, %v7735_v17  ;;  %v383_v21 = vadd.f32 %v7735_v17, %v7733_v14  ;;  %v366_v15 = vld [vmem:[%s9956_s5] sm:$0xff] }
 0x2ec   :  { %378 = vadd.xlane.f32.xlu1 %v377_v19  ;;  %v407_v23 = vadd.f32 %v397_v20, %v396_v22  ;;  %v371_v22 = vld [vmem:[%s9957_s6 + $0x8] sm:$0xff] }
 0x2ee   :  { %384 = vadd.xlane.f32.xlu0 %v383_v21 }
 0x2f0   :  { %408 = vadd.xlane.f32.xlu1 %v407_v23  ;;  %v370_v23 = vld [vmem:[%s9957_s6] sm:$0xff] }
 0x2f2   :  { %375 = vadd.xlane.f32.xlu0 %v374_v25 }
 0x2f4   :  { %402 = vadd.xlane.f32.xlu1 %v401_v28 }
 0x2f6   :  { %399 = vadd.xlane.f32.xlu0 %v398_v30 }
 0x305   :  { %486 = vperm.xlu1 %6847, %v372_v31  }
 0x30c   :  { %491 = vperm.xlu0 %6846, %v373_v32  }
 0x371   :  { %v382_v33 = vpop.xlane.xlu1 %381 }
 0x372   :  { %v388_v35 = vmul.f32 0.00390625, %v382_v33 }
 0x373   :  { %v406_v36 = vpop.xlane.xlu0 %405 }
 0x374   :  { %v412_v37 = vmul.f32 0.00390625, %v406_v36  ;;  %v416_v38 = vmul.f32 %v388_v35, %v388_v35  ;;  %v442_v26 = vsub.f32 %v7723_v3, %v388_v35  ;;  %v443_v27 = vsub.f32 %v7725_v4, %v388_v35 }
 0x375   :  { %v379_v39 = vpop.xlane.xlu1 %378 }
 0x376   :  { %v420_v40 = vsub.f32 %v412_v37, %v416_v38  ;;  %v7761_v16 = vmul.f32 0.00390625, %v379_v39 }
 0x377   :  { %v385_v41 = vpop.xlane.xlu0 %384 }
 0x378   :  { %v424_v11 = vmax.f32 %v420_v40, 0.0  ;;  %v389_v42 = vmul.f32 0.00390625, %v385_v41  ;;  %v415_v51 = vmul.f32 %v7761_v16, %v7761_v16  ;;  %v441_v3 = vsub.f32 %v7721_v1, %v7761_v16 }
 0x379   :  { %v409_v12 = vpop.xlane.xlu1 %408 }
 0x37a   :  { %v428_v34 = vadd.f32 1e-05, %v424_v11  ;;  %v413_v18 = vmul.f32 0.00390625, %v409_v12  ;;  %v417_v43 = vmul.f32 %v389_v42, %v389_v42  ;;  %v444_v31 = vsub.f32 %v7733_v14, %v389_v42 }
 0x37b   :  { %v376_v44 = vpop.xlane.xlu0 %375  ;;  %v445_v32 = vsub.f32 %v7735_v17, %v389_v42  ;;  %v440_v11 = vsub.f32 %v7719_v0, %v7761_v16 }
 0x37c   :  { %6926 = vrsqrt.f32 %v428_v34  ;;  %v421_v46 = vsub.f32 %v413_v18, %v417_v43  ;;  %v7763_v48 = vmul.f32 0.00390625, %v376_v44 }
 0x37d   :  { %v403_v49 = vpop.xlane.xlu1 %402 }
 0x37e   :  { %v425_v50 = vmax.f32 %v421_v46, 0.0  ;;  %v411_v7 = vmul.f32 0.00390625, %v403_v49  ;;  %v414_v45 = vmul.f32 %v7763_v48, %v7763_v48  ;;  %v438_v42 = vsub.f32 %v7715_v62, %v7763_v48 }
 0x37f   :  { %v400_v52 = vpop.xlane.xlu0 %399  ;;  %v439_v34 = vsub.f32 %v7717_v63, %v7763_v48 }
 0x380   :  { %v429_v53 = vadd.f32 1e-05, %v425_v50  ;;  %v419_v8 = vsub.f32 %v411_v7, %v415_v51  ;;  %v410_v54 = vmul.f32 0.00390625, %v400_v52 }
 0x381   :  { %v487_v28 = vpop.permute.xlu1 %486 }
 0x382   :  { %6928 = vrsqrt.f32 %v429_v53  ;;  %v423_v55 = vmax.f32 %v419_v8, 0.0  ;;  %v418_v56 = vsub.f32 %v410_v54, %v414_v45 }
 0x384   :  { %v427_v9 = vadd.f32 1e-05, %v423_v55  ;;  %v422_v10 = vmax.f32 %v418_v56, 0.0  ;;  %v6858_v55 = vld [vmem:[%s9958_s7] sm:$0xff]   ;;  %v6859_v56 = vld [vmem:[%s9958_s7 + $0x8] sm:$0xff]  }
 0x386   :  { %6930 = vrsqrt.f32 %v427_v9  ;;  %v426_v47 = vadd.f32 1e-05, %v422_v10  ;;  %v6860_v9 = vld [vmem:[%s9958_s7 + $0x10] ss:$0 sps:$4 sm:$0xff]  }
 0x387   :  { %v492_v24 = vpop.permute.xlu0 %491 }
 0x388   :  { %6932 = vrsqrt.f32 %v426_v47 }
 0x389   :  { %v6927_v58 = vpop.eup %6926 }
 0x38a   :  { %v436_v59 = vmul.f32 %v6927_v58, %v368_v57 }
 0x38c   :  { %458 = vperm.xlu0 %6846, %v436_v59  }
 0x38f   :  { %v6929_v61 = vpop.eup %6928 }
 0x390   :  { %v437_v5 = vmul.f32 %v6929_v61, %v369_v60 }
 0x392   :  { %463 = vperm.xlu1 %6847, %v437_v5  }
 0x393   :  { %v6931_v13 = vpop.eup %6930 }
 0x394   :  { %v435_v19 = vmul.f32 %v6931_v13, %v367_v6 }
 0x395   :  { %v6933_v20 = vpop.eup %6932 }
 0x396   :  { %453 = vperm.xlu0 %6846, %v435_v19   ;;  %v434_v21 = vmul.f32 %v6933_v20, %v366_v15 }
 0x398   :  { %448 = vperm.xlu1 %6847, %v434_v21  }
 0x39a   :  { %481 = vperm.xlu0 %6846, %v371_v22  }
 0x39c   :  { %476 = vperm.xlu1 %6847, %v370_v23  }
 0x407   :  { %v459_v25 = vpop.permute.xlu0 %458 }
 0x408   :  { %v470_v29 = vmul.f32 %v459_v25, %v442_v26  ;;  %v471_v30 = vmul.f32 %v459_v25, %v443_v27 }
 0x40a   :  { %v498_v36 = vadd.f32 %v487_v28, %v470_v29  ;;  %v499_v37 = vadd.f32 %v487_v28, %v471_v30 }
 0x40c   :  { %v7795_v35 = vmax.f32 %v498_v36, 0.0  ;;  %v7797_v12 = vmax.f32 %v499_v37, 0.0 }
 0x40d   :  { %v464_v33 = vpop.permute.xlu1 %463 }
 0x40e   :  { %v472_v38 = vmul.f32 %v464_v33, %v444_v31  ;;  %v473_v39 = vmul.f32 %v464_v33, %v445_v32 }
 0x410   :  { %v500_v40 = vadd.f32 %v492_v24, %v472_v38  ;;  %v501_v41 = vadd.f32 %v492_v24, %v473_v39 }
 0x411   :  { %v454_v4 = vpop.permute.xlu0 %453 }
 0x412   :  { %v7799_v14 = vmax.f32 %v500_v40, 0.0  ;;  %v7801_v17 = vmax.f32 %v501_v41, 0.0  ;;  %v468_v0 = vmul.f32 %v454_v4, %v440_v11  ;;  %v469_v43 = vmul.f32 %v454_v4, %v441_v3 }
 0x413   :  { %v449_v18 = vpop.permute.xlu1 %448 }
 0x414   :  { %9971 = vst [vmem:[#allocation10_spill] sm:$0xff] %v7801_v17  ;;  %v6365_v1 = vpack.c.bf16 %v7801_v17, %v7797_v12  ;;  %v6364_v16 = vpack.c.bf16 %v7799_v14, %v7795_v35  ;;  %v466_v46 = vmul.f32 %v449_v18, %v438_v42  ;;  %v467_v49 = vmul.f32 %v449_v18, %v439_v34 }
 0x415   :  { %v482_v44 = vpop.permute.xlu0 %481 }
 0x416   :  { %v496_v50 = vadd.f32 %v482_v44, %v468_v0  ;;  %v497_v51 = vadd.f32 %v482_v44, %v469_v43  ;;  %629 = vmatprep.subr.bf16.mxu0 %v6365_v1 }
 0x417   :  { %v477_v7 = vpop.permute.xlu1 %476  ;;  %630 = vmatpush1.bf16.msra.mxu0 %v6364_v16 }
 0x418   :  { %v494_v62 = vadd.f32 %v477_v7, %v466_v46  ;;  %v495_v52 = vadd.f32 %v477_v7, %v467_v49  ;;  %v7811_v63 = vmax.f32 %v496_v50, 0.0  ;;  %v7813_v48 = vmax.f32 %v497_v51, 0.0 }
 0x41a   :  { %9972 = vst [vmem:[#allocation11_spill] sm:$0xff] %v7813_v48  ;;  %v7815_v53 = vmax.f32 %v494_v62, 0.0  ;;  %v7817_v8 = vmax.f32 %v495_v52, 0.0 }
 0x41c   :  { %v6363_v45 = vpack.c.bf16 %v7813_v48, %v7817_v8  ;;  %v6362_v54 = vpack.c.bf16 %v7811_v63, %v7815_v53 }
 0x41e   :  { %631 = vmatprep.subr.bf16.mxu0 %v6363_v45 }
 0x41f   :  { %632 = vmatpush1.bf16.msra.mxu0 %v6362_v54 }
 0x422   :  { %6002 = vmatmul.mubr.msk.bf16.vlgmr.msra.gmra.mxu0 %vm84_vm0, %v6858_v55 }
 0x423   :  { %659 = vmatprep.mubr.bf16.mxu0 %v9965_v2 }
 0x42a   :  { %6003 = vmatmul.mubr.msk.bf16.gmra.mxu0 %vm84_vm0, %v6859_v56 }
 0x42b   :  { %669 = vmatprep.mubr.bf16.mxu0 %v9965_v2 }
 0x432   :  { %6004 = vmatmul.mubr.msk.bf16.gmra.mxu0 %vm84_vm0, %v6860_v9 }
 0x4e2   :  { %v7837_v10 = vpop.f32.mrf.mxu0 }
 0x4e4   :  { %v7839_v47 = vpop.f32.mrf.mxu0 }
 0x4e6   :  { %v7841_v57 = vpop.f32.mrf.mxu0 }
 0x4e8   :  { %v7843_v58 = vpop.f32.mrf.mxu0 }
 0x4ea   :  { %v7845_v59 = vpop.f32.mrf.mxu0 }
 0x4ec   :  { %v7847_v60 = vpop.f32.mrf.mxu0 }
 0x4ee   :  { %v7849_v61 = vpop.f32.mrf.mxu0 }
 0x4f0   :  { %v7851_v5 = vpop.f32.mrf.mxu0 }
 0x4f2   :  { %v671_v6 = vpop.f32.mrf.mxu0 }
 0x4f4   :  { %v673_v13 = vpop.f32.mrf.mxu0 }
 0x4f5   :  { %v6298_v15 = vpack.c.bf16 %v673_v13, %v671_v6 }
 0x4f6   :  { %v675_v19 = vpop.f32.mrf.mxu0 }
 0x4f7   :  { %742 = vst [vmem:[#allocation4] sm:$0xff] %v6298_v15 }
 0x4f8   :  { %v676_v20 = vpop.f32.mrf.mxu0 }
 0x4fe   :  { %v1171_v21 = vld [vmem:[#allocation4 + $0x4] sm:$0xf]  ;;  %v743_v22 = vld [vmem:[#allocation4] sm:$0xf] }
 0x4ff   :  { %1182 = vxpose.xlu0.c.b16.start.end [1/1] (short) %v1171_v21, 128  ;;  %752 = vxpose.xlu1.c.b16.start.end [1/1] (short) %v743_v22, 128  ;;  %v795_v23 = vsel %vm793_vm1, %v743_v22, 0  ;;  %v1223_v26 = vsel %vm793_vm1, %v1171_v21, 0 }
 0x500   :  { %6834 = vmatprep.subr.msk.bf16.mxu1 %vm793_vm1, %v743_v22 }
 0x501   :  { %6531 = vmatpush3.bf16.msra.mxu1 %v795_v23 }
 0x502   :  { %6835 = vmatprep.subr.msk.bf16.mxu1 %vm793_vm1, %v1171_v21 }
 0x561   :  { %v760_v24 = vpop.trf.xlu1  ;;  %v1190_v29 = vpop.trf.xlu0 }
 0x562   :  { %6532 = vmatprep.mubr.msk.bf16.mxu1 %vm768_vm2, %v760_v24 }
 0x565   :  { %v761_v25 = vpop.trf.xlu1  ;;  %v1191_v32 = vpop.trf.xlu0 }
 0x566   :  { %6533 = vmatmul.mubr.msk.bf16.vlgmr.msra.gmra.mxu1 %vm768_vm2, %v761_v25 }
 0x567   :  { %6569 = vmatpush3.bf16.msra.mxu1 %v1223_v26 }
 0x569   :  { %v762_v27 = vpop.trf.xlu1  ;;  %v1192_v36 = vpop.trf.xlu0 }
 0x56a   :  { %6536 = vmatprep.mubr.msk.bf16.mxu1 %vm768_vm2, %v762_v27 }
 0x56d   :  { %v763_v28 = vpop.trf.xlu1  ;;  %v1193_v38 = vpop.trf.xlu0 }
 0x56e   :  { %6537 = vmatmul.mubr.msk.bf16.gmra.mxu1 %vm768_vm2, %v763_v28 }
 0x571   :  { %v764_v30 = vpop.trf.xlu1  ;;  %v1194_v39 = vpop.trf.xlu0 }
 0x572   :  { %6540 = vmatprep.mubr.msk.bf16.mxu1 %vm768_vm2, %v764_v30 }
 0x575   :  { %v765_v31 = vpop.trf.xlu1  ;;  %v1195_v40 = vpop.trf.xlu0 }
 0x576   :  { %6541 = vmatmul.mubr.msk.bf16.gmra.mxu1 %vm768_vm2, %v765_v31 }
 0x579   :  { %v766_v33 = vpop.trf.xlu1  ;;  %v1196_v41 = vpop.trf.xlu0 }
 0x57a   :  { %6544 = vmatprep.mubr.msk.bf16.mxu1 %vm768_vm2, %v766_v33 }
 0x57d   :  { %v767_v37 = vpop.trf.xlu1  ;;  %v1197_v11 = vpop.trf.xlu0 }
 0x57e   :  { %6545 = vmatmul.mubr.msk.bf16.gmra.mxu1 %vm768_vm2, %v767_v37 }
 0x57f   :  { %6570 = vmatprep.mubr.msk.bf16.mxu1 %vm768_vm2, %v1190_v29 }
 0x586   :  { %6571 = vmatmul.mubr.msk.bf16.vlgmr.msra.gmra.mxu1 %vm768_vm2, %v1191_v32 }
 0x587   :  { %6574 = vmatprep.mubr.msk.bf16.mxu1 %vm768_vm2, %v1192_v36 }
 0x58e   :  { %6575 = vmatmul.mubr.msk.bf16.gmra.mxu1 %vm768_vm2, %v1193_v38 }
 0x58f   :  { %6578 = vmatprep.mubr.msk.bf16.mxu1 %vm768_vm2, %v1194_v39 }
 0x596   :  { %6579 = vmatmul.mubr.msk.bf16.gmra.mxu1 %vm768_vm2, %v1195_v40 }
 0x597   :  { %6582 = vmatprep.mubr.msk.bf16.mxu1 %vm768_vm2, %v1196_v41 }
 0x59e   :  { %6583 = vmatmul.mubr.msk.bf16.gmra.mxu1 %vm768_vm2, %v1197_v11 }
 0x59f   :  { %1691 = vmatprep.mubr.bf16.mxu1 %v9965_v2 }
 0x626   :  { %v7874_v3 = vpop.f32.mrf.mxu1 }
 0x628   :  { %v7876_v4 = vpop.f32.mrf.mxu1 }
 0x629   :  { %894 = vmax.xlane.f32.xlu0 %v7876_v4 }
 0x62a   :  { %v7879_v42 = vpop.f32.mrf.mxu1 }
 0x62c   :  { %v7881_v34 = vpop.f32.mrf.mxu1 }
 0x62d   :  { %898 = vmax.xlane.f32.xlu0 %v7874_v3  ;;  %896 = vmax.xlane.f32.xlu1 %v7881_v34 }
 0x62e   :  { %v7885_v18 = vpop.f32.mrf.mxu1 }
 0x630   :  { %v7887_v0 = vpop.f32.mrf.mxu1 }
 0x631   :  { %900 = vmax.xlane.f32.xlu1 %v7879_v42  ;;  %902 = vmax.xlane.f32.xlu0 %v7887_v0 }
 0x632   :  { %v7891_v43 = vpop.f32.mrf.mxu1 }
 0x634   :  { %v7893_v1 = vpop.f32.mrf.mxu1 }
 0x635   :  { %906 = vmax.xlane.f32.xlu0 %v7885_v18  ;;  %904 = vmax.xlane.f32.xlu1 %v7893_v1 }
 0x636   :  { %v7897_v16 = vpop.f32.mrf.mxu1 }
 0x638   :  { %v7899_v44 = vpop.f32.mrf.mxu1 }
 0x639   :  { %908 = vmax.xlane.f32.xlu1 %v7891_v43  ;;  %910 = vmax.xlane.f32.xlu0 %v7899_v44 }
 0x63a   :  { %v7903_v46 = vpop.f32.mrf.mxu1 }
 0x63c   :  { %v7905_v49 = vpop.f32.mrf.mxu1 }
 0x63d   :  { %914 = vmax.xlane.f32.xlu0 %v7897_v16  ;;  %912 = vmax.xlane.f32.xlu1 %v7905_v49 }
 0x63e   :  { %v7909_v50 = vpop.f32.mrf.mxu1 }
 0x640   :  { %v7911_v51 = vpop.f32.mrf.mxu1 }
 0x641   :  { %916 = vmax.xlane.f32.xlu1 %v7903_v46  ;;  %918 = vmax.xlane.f32.xlu0 %v7911_v51 }
 0x642   :  { %v7915_v7 = vpop.f32.mrf.mxu1 }
 0x644   :  { %v7917_v62 = vpop.f32.mrf.mxu1 }
 0x645   :  { %922 = vmax.xlane.f32.xlu0 %v7909_v50  ;;  %920 = vmax.xlane.f32.xlu1 %v7917_v62 }
 0x646   :  { %v7921_v52 = vpop.f32.mrf.mxu1 }
 0x648   :  { %v7923_v45 = vpop.f32.mrf.mxu1 }
 0x649   :  { %924 = vmax.xlane.f32.xlu1 %v7915_v7  ;;  %1322 = vmax.xlane.f32.xlu0 %v7923_v45 }
 0x64a   :  { %v7927_v54 = vpop.f32.mrf.mxu1 }
 0x64c   :  { %v7929_v55 = vpop.f32.mrf.mxu1 }
 0x64d   :  { %1326 = vmax.xlane.f32.xlu0 %v7921_v52  ;;  %1324 = vmax.xlane.f32.xlu1 %v7929_v55 }
 0x64e   :  { %v7933_v56 = vpop.f32.mrf.mxu1 }
 0x650   :  { %v7935_v9 = vpop.f32.mrf.mxu1 }
 0x651   :  { %1328 = vmax.xlane.f32.xlu1 %v7927_v54  ;;  %1330 = vmax.xlane.f32.xlu0 %v7935_v9 }
 0x652   :  { %v7939_v6 = vpop.f32.mrf.mxu1 }
 0x654   :  { %v7941_v13 = vpop.f32.mrf.mxu1 }
 0x655   :  { %1334 = vmax.xlane.f32.xlu0 %v7933_v56  ;;  %1332 = vmax.xlane.f32.xlu1 %v7941_v13 }
 0x656   :  { %v7945_v15 = vpop.f32.mrf.mxu1 }
 0x658   :  { %v7947_v19 = vpop.f32.mrf.mxu1 }
 0x659   :  { %1336 = vmax.xlane.f32.xlu1 %v7939_v6  ;;  %1338 = vmax.xlane.f32.xlu0 %v7947_v19 }
 0x65a   :  { %v7951_v20 = vpop.f32.mrf.mxu1 }
 0x65c   :  { %v7953_v21 = vpop.f32.mrf.mxu1 }
 0x65d   :  { %1342 = vmax.xlane.f32.xlu0 %v7945_v15  ;;  %1340 = vmax.xlane.f32.xlu1 %v7953_v21 }
 0x65e   :  { %v7957_v22 = vpop.f32.mrf.mxu1 }
 0x660   :  { %v7959_v23 = vpop.f32.mrf.mxu1 }
 0x661   :  { %1344 = vmax.xlane.f32.xlu1 %v7951_v20  ;;  %1346 = vmax.xlane.f32.xlu0 %v7959_v23 }
 0x662   :  { %v7963_v24 = vpop.f32.mrf.mxu1 }
 0x664   :  { %v7965_v25 = vpop.f32.mrf.mxu1 }
 0x665   :  { %1350 = vmax.xlane.f32.xlu0 %v7957_v22  ;;  %1348 = vmax.xlane.f32.xlu1 %v7965_v25 }
 0x669   :  { %1352 = vmax.xlane.f32.xlu1 %v7963_v24 }
 0x6b2   :  { %v895_v26 = vpop.xlane.xlu0 %894 }
 0x6b3   :  { %v926_v27 = vsub.f32 %v7876_v4, %v895_v26 }
 0x6b5   :  { %v942_v28 = vmul.f32 1.442695, %v926_v27 }
 0x6b6   :  { %v899_v29 = vpop.xlane.xlu0 %898  ;;  %v897_v30 = vpop.xlane.xlu1 %896 }
 0x6b7   :  { %6934 = vpow2.f32 %v942_v28  ;;  %v928_v31 = vsub.f32 %v7874_v3, %v899_v29  ;;  %v927_v32 = vsub.f32 %v7881_v34, %v897_v30 }
 0x6b9   :  { %v946_v33 = vmul.f32 1.442695, %v928_v31  ;;  %v944_v36 = vmul.f32 1.442695, %v927_v32 }
 0x6ba   :  { %v901_v37 = vpop.xlane.xlu1 %900  ;;  %v903_v38 = vpop.xlane.xlu0 %902 }
 0x6bb   :  { %6936 = vpow2.f32 %v946_v33  ;;  %v929_v39 = vsub.f32 %v7879_v42, %v901_v37  ;;  %v930_v40 = vsub.f32 %v7887_v0, %v903_v38 }
 0x6bc   :  { %6938 = vpow2.f32 %v944_v36 }
 0x6bd   :  { %v948_v41 = vmul.f32 1.442695, %v929_v39  ;;  %v950_v11 = vmul.f32 1.442695, %v930_v40 }
 0x6be   :  { %v907_v4 = vpop.xlane.xlu0 %906  ;;  %v905_v26 = vpop.xlane.xlu1 %904 }
 0x6bf   :  { %6940 = vpow2.f32 %v948_v41  ;;  %v932_v27 = vsub.f32 %v7885_v18, %v907_v4  ;;  %v931_v3 = vsub.f32 %v7893_v1, %v905_v26 }
 0x6c0   :  { %6942 = vpow2.f32 %v950_v11 }
 0x6c1   :  { %v954_v34 = vmul.f32 1.442695, %v932_v27  ;;  %v952_v28 = vmul.f32 1.442695, %v931_v3 }
 0x6c2   :  { %v909_v29 = vpop.xlane.xlu1 %908  ;;  %v911_v30 = vpop.xlane.xlu0 %910 }
 0x6c3   :  { %6944 = vpow2.f32 %v954_v34  ;;  %v933_v42 = vsub.f32 %v7891_v43, %v909_v29  ;;  %v934_v0 = vsub.f32 %v7899_v44, %v911_v30 }
 0x6c4   :  { %v7979_v31 = vpop.eup %6934  ;;  %6946 = vpow2.f32 %v952_v28 }
 0x6c5   :  { %v956_v32 = vmul.f32 1.442695, %v933_v42  ;;  %v958_v33 = vmul.f32 1.442695, %v934_v0  ;;  %974 = vadd.xlane.f32.xlu0 %v7979_v31 }
 0x6c6   :  { %v915_v18 = vpop.xlane.xlu0 %914  ;;  %v913_v36 = vpop.xlane.xlu1 %912 }
 0x6c7   :  { %6948 = vpow2.f32 %v956_v32  ;;  %v936_v1 = vsub.f32 %v7897_v16, %v915_v18  ;;  %v935_v37 = vsub.f32 %v7905_v49, %v913_v36 }
 0x6c8   :  { %v7984_v38 = vpop.eup %6936  ;;  %6950 = vpow2.f32 %v958_v33 }
 0x6c9   :  { %v7986_v43 = vpop.eup %6938  ;;  %v962_v44 = vmul.f32 1.442695, %v936_v1  ;;  %v960_v39 = vmul.f32 1.442695, %v935_v37  ;;  %978 = vadd.xlane.f32.xlu0 %v7984_v38 }
 0x6ca   :  { %976 = vadd.xlane.f32.xlu1 %v7986_v43  ;;  %v917_v40 = vpop.xlane.xlu1 %916  ;;  %v919_v41 = vpop.xlane.xlu0 %918 }
 0x6cb   :  { %6952 = vpow2.f32 %v962_v44  ;;  %v937_v11 = vsub.f32 %v7903_v46, %v917_v40  ;;  %v938_v16 = vsub.f32 %v7911_v51, %v919_v41 }
 0x6cc   :  { %v7992_v4 = vpop.eup %6940  ;;  %6954 = vpow2.f32 %v960_v39 }
 0x6cd   :  { %v7994_v49 = vpop.eup %6942  ;;  %v964_v26 = vmul.f32 1.442695, %v937_v11  ;;  %v966_v27 = vmul.f32 1.442695, %v938_v16 }
 0x6ce   :  { %982 = vadd.xlane.f32.xlu0 %v7994_v49  ;;  %980 = vadd.xlane.f32.xlu1 %v7992_v4  ;;  %v923_v3 = vpop.xlane.xlu0 %922  ;;  %v921_v34 = vpop.xlane.xlu1 %920 }
 0x6cf   :  { %6956 = vpow2.f32 %v964_v26  ;;  %v940_v28 = vsub.f32 %v7909_v50, %v923_v3  ;;  %v939_v46 = vsub.f32 %v7917_v62, %v921_v34 }
 0x6d0   :  { %v8000_v29 = vpop.eup %6944  ;;  %6958 = vpow2.f32 %v966_v27 }
 0x6d1   :  { %v8002_v51 = vpop.eup %6946  ;;  %v970_v30 = vmul.f32 1.442695, %v940_v28  ;;  %v968_v42 = vmul.f32 1.442695, %v939_v46 }
 0x6d2   :  { %986 = vadd.xlane.f32.xlu0 %v8000_v29  ;;  %984 = vadd.xlane.f32.xlu1 %v8002_v51  ;;  %v925_v0 = vpop.xlane.xlu1 %924  ;;  %v1323_v32 = vpop.xlane.xlu0 %1322 }
 0x6d3   :  { %6960 = vpow2.f32 %v970_v30  ;;  %v941_v33 = vsub.f32 %v7915_v7, %v925_v0  ;;  %v1354_v50 = vsub.f32 %v7923_v45, %v1323_v32 }
 0x6d4   :  { %v8008_v18 = vpop.eup %6948  ;;  %6962 = vpow2.f32 %v968_v42 }
 0x6d5   :  { %v8010_v62 = vpop.eup %6950  ;;  %v972_v36 = vmul.f32 1.442695, %v941_v33  ;;  %v1370_v1 = vmul.f32 1.442695, %v1354_v50 }
 0x6d6   :  { %990 = vadd.xlane.f32.xlu0 %v8010_v62  ;;  %988 = vadd.xlane.f32.xlu1 %v8008_v18  ;;  %v1327_v37 = vpop.xlane.xlu0 %1326  ;;  %v1325_v44 = vpop.xlane.xlu1 %1324 }
 0x6d7   :  { %6964 = vpow2.f32 %v972_v36  ;;  %v1356_v39 = vsub.f32 %v7921_v52, %v1327_v37  ;;  %v1355_v7 = vsub.f32 %v7929_v55, %v1325_v44 }
 0x6d8   :  { %v8016_v40 = vpop.eup %6952  ;;  %6966 = vpow2.f32 %v1370_v1 }
 0x6d9   :  { %v8018_v45 = vpop.eup %6954  ;;  %v1374_v41 = vmul.f32 1.442695, %v1356_v39  ;;  %v1372_v11 = vmul.f32 1.442695, %v1355_v7 }
 0x6da   :  { %994 = vadd.xlane.f32.xlu0 %v8016_v40  ;;  %992 = vadd.xlane.f32.xlu1 %v8018_v45  ;;  %v1329_v16 = vpop.xlane.xlu1 %1328  ;;  %v1331_v26 = vpop.xlane.xlu0 %1330 }
 0x6db   :  { %6968 = vpow2.f32 %v1374_v41  ;;  %v1357_v27 = vsub.f32 %v7927_v54, %v1329_v16  ;;  %v1358_v52 = vsub.f32 %v7935_v9, %v1331_v26 }
 0x6dc   :  { %v8024_v3 = vpop.eup %6956  ;;  %6970 = vpow2.f32 %v1372_v11 }
 0x6dd   :  { %v8026_v55 = vpop.eup %6958  ;;  %v1376_v34 = vmul.f32 1.442695, %v1357_v27  ;;  %v1378_v28 = vmul.f32 1.442695, %v1358_v52 }
 0x6de   :  { %998 = vadd.xlane.f32.xlu0 %v8026_v55  ;;  %996 = vadd.xlane.f32.xlu1 %v8024_v3  ;;  %v1335_v46 = vpop.xlane.xlu0 %1334  ;;  %v1333_v30 = vpop.xlane.xlu1 %1332 }
 0x6df   :  { %6972 = vpow2.f32 %v1376_v34  ;;  %v1360_v42 = vsub.f32 %v7933_v56, %v1335_v46  ;;  %v1359_v54 = vsub.f32 %v7941_v13, %v1333_v30 }
 0x6e0   :  { %v8032_v0 = vpop.eup %6960  ;;  %6974 = vpow2.f32 %v1378_v28 }
 0x6e1   :  { %v8034_v9 = vpop.eup %6962  ;;  %v1382_v32 = vmul.f32 1.442695, %v1360_v42  ;;  %v1380_v33 = vmul.f32 1.442695, %v1359_v54 }
 0x6e2   :  { %1002 = vadd.xlane.f32.xlu0 %v8032_v0  ;;  %1000 = vadd.xlane.f32.xlu1 %v8034_v9  ;;  %v1337_v50 = vpop.xlane.xlu1 %1336  ;;  %v1339_v36 = vpop.xlane.xlu0 %1338 }
 0x6e3   :  { %6976 = vpow2.f32 %v1382_v32  ;;  %v1361_v1 = vsub.f32 %v7939_v6, %v1337_v50  ;;  %v1362_v56 = vsub.f32 %v7947_v19, %v1339_v36 }
 0x6e4   :  { %v8040_v37 = vpop.eup %6964  ;;  %6978 = vpow2.f32 %v1380_v33 }
 0x6e5   :  { %v8042_v13 = vpop.eup %6966  ;;  %v1384_v44 = vmul.f32 1.442695, %v1361_v1  ;;  %v1386_v39 = vmul.f32 1.442695, %v1362_v56 }
 0x6e6   :  { %1402 = vadd.xlane.f32.xlu0 %v8042_v13  ;;  %1004 = vadd.xlane.f32.xlu1 %v8040_v37  ;;  %v1343_v7 = vpop.xlane.xlu0 %1342  ;;  %v1341_v41 = vpop.xlane.xlu1 %1340 }
 0x6e7   :  { %6980 = vpow2.f32 %v1384_v44  ;;  %v1364_v11 = vsub.f32 %v7945_v15, %v1343_v7  ;;  %v1363_v6 = vsub.f32 %v7953_v21, %v1341_v41 }
 0x6e8   :  { %v8048_v16 = vpop.eup %6968  ;;  %6982 = vpow2.f32 %v1386_v39 }
 0x6e9   :  { %v8050_v19 = vpop.eup %6970  ;;  %v1390_v26 = vmul.f32 1.442695, %v1364_v11  ;;  %v1388_v27 = vmul.f32 1.442695, %v1363_v6 }
 0x6ea   :  { %1406 = vadd.xlane.f32.xlu0 %v8048_v16  ;;  %1404 = vadd.xlane.f32.xlu1 %v8050_v19  ;;  %v1345_v52 = vpop.xlane.xlu1 %1344  ;;  %v1347_v34 = vpop.xlane.xlu0 %1346 }
 0x6eb   :  { %6984 = vpow2.f32 %v1390_v26  ;;  %v1365_v28 = vsub.f32 %v7951_v20, %v1345_v52  ;;  %v1366_v15 = vsub.f32 %v7959_v23, %v1347_v34  ;;  %v552_v52 = vld [vmem:[%s9959_s8 + $0x8] sm:$0xff]  ;;  %v551_v34 = vld [vmem:[%s9959_s8] sm:$0xff] }
 0x6ec   :  { %v8056_v46 = vpop.eup %6972  ;;  %6986 = vpow2.f32 %v1388_v27 }
 0x6ed   :  { %v8058_v21 = vpop.eup %6974  ;;  %v1392_v30 = vmul.f32 1.442695, %v1365_v28  ;;  %v1394_v42 = vmul.f32 1.442695, %v1366_v15  ;;  %v553_v28 = vld [vmem:[%s9959_s8 + $0x10] sm:$0xff]  ;;  %v554_v15 = vld [vmem:[%s9959_s8 + $0x18] sm:$0xff] }
 0x6ee   :  { %1410 = vadd.xlane.f32.xlu0 %v8058_v21  ;;  %1408 = vadd.xlane.f32.xlu1 %v8056_v46  ;;  %v1351_v54 = vpop.xlane.xlu0 %1350  ;;  %v1349_v32 = vpop.xlane.xlu1 %1348 }
 0x6ef   :  { %6988 = vpow2.f32 %v1392_v30  ;;  %v1368_v33 = vsub.f32 %v7957_v22, %v1351_v54  ;;  %v1367_v20 = vsub.f32 %v7965_v25, %v1349_v32  ;;  %v561_v30 = vld [vmem:[%s9961_s10 + $0x10] sm:$0xff]  ;;  %v559_v54 = vld [vmem:[%s9961_s10] sm:$0xff]  ;;  %v560_v32 = vld [vmem:[%s9961_s10 + $0x8] sm:$0xff] }
 0x6f0   :  { %v8064_v50 = vpop.eup %6976  ;;  %6990 = vpow2.f32 %v1394_v42  ;;  %v562_v42 = vld [vmem:[%s9961_s10 + $0x18] sm:$0xff] }
 0x6f1   :  { %v8066_v23 = vpop.eup %6978  ;;  %v1398_v36 = vmul.f32 1.442695, %v1368_v33  ;;  %v1396_v1 = vmul.f32 1.442695, %v1367_v20 }
 0x6f2   :  { %1414 = vadd.xlane.f32.xlu0 %v8064_v50  ;;  %1412 = vadd.xlane.f32.xlu1 %v8066_v23  ;;  %v1353_v56 = vpop.xlane.xlu1 %1352 }
 0x6f3   :  { %6992 = vpow2.f32 %v1398_v36  ;;  %v1369_v44 = vsub.f32 %v7963_v24, %v1353_v56 }
 0x6f4   :  { %v8071_v39 = vpop.eup %6980  ;;  %6994 = vpow2.f32 %v1396_v1 }
 0x6f5   :  { %v8073_v22 = vpop.eup %6982  ;;  %v1400_v25 = vmul.f32 1.442695, %v1369_v44 }
 0x6f6   :  { %1418 = vadd.xlane.f32.xlu0 %v8073_v22  ;;  %1416 = vadd.xlane.f32.xlu1 %v8071_v39 }
 0x6f7   :  { %6996 = vpow2.f32 %v1400_v25 }
 0x6f8   :  { %v8077_v7 = vpop.eup %6984 }
 0x6f9   :  { %v8079_v41 = vpop.eup %6986 }
 0x6fa   :  { %1422 = vadd.xlane.f32.xlu0 %v8077_v7  ;;  %1420 = vadd.xlane.f32.xlu1 %v8079_v41 }
 0x6fc   :  { %v8083_v24 = vpop.eup %6988 }
 0x6fd   :  { %v8085_v11 = vpop.eup %6990 }
 0x6fe   :  { %1426 = vadd.xlane.f32.xlu0 %v8085_v11  ;;  %1424 = vadd.xlane.f32.xlu1 %v8083_v24 }
 0x700   :  { %v8089_v6 = vpop.eup %6992 }
 0x701   :  { %v8091_v26 = vpop.eup %6994 }
 0x702   :  { %1430 = vadd.xlane.f32.xlu0 %v8089_v6  ;;  %1428 = vadd.xlane.f32.xlu1 %v8091_v26 }
 0x704   :  { %v8095_v27 = vpop.eup %6996 }
 0x706   :  { %1432 = vadd.xlane.f32.xlu1 %v8095_v27 }
 0x717   :  { %685 = vperm.xlu1 %6847, %v552_v52  }
 0x718   :  { %680 = vperm.xlu0 %6846, %v551_v34  }
 0x71b   :  { %690 = vperm.xlu1 %6847, %v553_v28  }
 0x71c   :  { %695 = vperm.xlu0 %6846, %v554_v15  }
 0x71f   :  { %1615 = vperm.xlu1 %6847, %v561_v30  }
 0x720   :  { %1620 = vperm.xlu0 %6846, %v562_v42  }
 0x723   :  { %1605 = vperm.xlu1 %6847, %v559_v54  }
 0x724   :  { %1610 = vperm.xlu0 %6846, %v560_v32  }
 0x74e   :  { %v975_v33 = vpop.xlane.xlu0 %974 }
 0x74f   :  { %6998 = vrcp.f32 %v975_v33 }
 0x752   :  { %v979_v20 = vpop.xlane.xlu0 %978 }
 0x753   :  { %7000 = vrcp.f32 %v979_v20  ;;  %v977_v36 = vpop.xlane.xlu1 %976 }
 0x754   :  { %7002 = vrcp.f32 %v977_v36 }
 0x757   :  { %v983_v1 = vpop.xlane.xlu0 %982  ;;  %v981_v56 = vpop.xlane.xlu1 %980 }
 0x758   :  { %7004 = vrcp.f32 %v983_v1 }
 0x759   :  { %7006 = vrcp.f32 %v981_v56 }
 0x75b   :  { %v987_v44 = vpop.xlane.xlu0 %986  ;;  %v985_v25 = vpop.xlane.xlu1 %984 }
 0x75c   :  { %7008 = vrcp.f32 %v987_v44  ;;  %v6999_v52 = vpop.eup %6998 }
 0x75d   :  { %7010 = vrcp.f32 %v985_v25  ;;  %v8123_v42 = vmul.f32 %v6999_v52, %v7979_v31 }
 0x75f   :  { %v991_v34 = vpop.xlane.xlu0 %990  ;;  %v989_v28 = vpop.xlane.xlu1 %988 }
 0x760   :  { %v7001_v15 = vpop.eup %7000  ;;  %7012 = vrcp.f32 %v991_v34 }
 0x761   :  { %v7003_v30 = vpop.eup %7002  ;;  %7014 = vrcp.f32 %v989_v28  ;;  %v8129_v20 = vmul.f32 %v7001_v15, %v7984_v38 }
 0x762   :  { %v8126_v54 = vmul.f32 %v7003_v30, %v7986_v43 }
 0x763   :  { %v995_v32 = vpop.xlane.xlu0 %994  ;;  %v993_v33 = vpop.xlane.xlu1 %992 }
 0x764   :  { %v1038_v36 = vadd.f32 %v8126_v54, %v8123_v42  ;;  %7016 = vrcp.f32 %v995_v32 }
 0x765   :  { %v7005_v1 = vpop.eup %7004  ;;  %7018 = vrcp.f32 %v993_v33 }
 0x766   :  { %v7007_v56 = vpop.eup %7006  ;;  %v1039_v44 = vadd.f32 %v1038_v36, %v8129_v20  ;;  %v8138_v34 = vmul.f32 %v7005_v1, %v7994_v49 }
 0x767   :  { %v8135_v31 = vmul.f32 %v7007_v56, %v7992_v4  ;;  %v999_v25 = vpop.xlane.xlu0 %998  ;;  %v997_v43 = vpop.xlane.xlu1 %996 }
 0x768   :  { %7020 = vrcp.f32 %v999_v25 }
 0x769   :  { %v7009_v52 = vpop.eup %7008  ;;  %v1040_v38 = vadd.f32 %v1039_v44, %v8135_v31  ;;  %7022 = vrcp.f32 %v997_v43 }
 0x76a   :  { %v7011_v28 = vpop.eup %7010  ;;  %v8146_v36 = vmul.f32 %v7009_v52, %v8000_v29 }
 0x76b   :  { %v1041_v15 = vadd.f32 %v1040_v38, %v8138_v34  ;;  %v8143_v30 = vmul.f32 %v7011_v28, %v8002_v51  ;;  %v1003_v32 = vpop.xlane.xlu0 %1002  ;;  %v1001_v33 = vpop.xlane.xlu1 %1000 }
 0x76c   :  { %7024 = vrcp.f32 %v1003_v32 }
 0x76d   :  { %v7013_v4 = vpop.eup %7012  ;;  %v1042_v56 = vadd.f32 %v1041_v15, %v8143_v30  ;;  %7026 = vrcp.f32 %v1001_v33 }
 0x76e   :  { %v7015_v49 = vpop.eup %7014  ;;  %v8154_v38 = vmul.f32 %v7013_v4, %v8010_v62 }
 0x76f   :  { %v1043_v1 = vadd.f32 %v1042_v56, %v8146_v36  ;;  %v8151_v44 = vmul.f32 %v7015_v49, %v8008_v18  ;;  %v1403_v25 = vpop.xlane.xlu0 %1402  ;;  %v1005_v43 = vpop.xlane.xlu1 %1004 }
 0x770   :  { %7028 = vrcp.f32 %v1005_v43 }
 0x771   :  { %v7017_v51 = vpop.eup %7016  ;;  %v1044_v28 = vadd.f32 %v1043_v1, %v8151_v44  ;;  %7030 = vrcp.f32 %v1403_v25 }
 0x772   :  { %v7019_v29 = vpop.eup %7018  ;;  %v8162_v56 = vmul.f32 %v7017_v51, %v8016_v40 }
 0x773   :  { %v1045_v52 = vadd.f32 %v1044_v28, %v8154_v38  ;;  %v8159_v15 = vmul.f32 %v7019_v29, %v8018_v45  ;;  %v1407_v32 = vpop.xlane.xlu0 %1406  ;;  %v1405_v33 = vpop.xlane.xlu1 %1404 }
 0x774   :  { %7032 = vrcp.f32 %v1407_v32 }
 0x775   :  { %v7021_v18 = vpop.eup %7020  ;;  %v1046_v62 = vadd.f32 %v1045_v52, %v8159_v15  ;;  %7034 = vrcp.f32 %v1405_v33 }
 0x776   :  { %v7023_v4 = vpop.eup %7022  ;;  %v8170_v28 = vmul.f32 %v7021_v18, %v8026_v55 }
 0x777   :  { %v8166_v49 = vmul.f32 %v7023_v4, %v8024_v3  ;;  %v1411_v1 = vpop.xlane.xlu0 %1410  ;;  %v1409_v43 = vpop.xlane.xlu1 %1408  ;;  %v1047_v45 = vadd.f32 %v1046_v62, %v8162_v56 }
 0x778   :  { %7036 = vrcp.f32 %v1411_v1 }
 0x779   :  { %v7025_v25 = vpop.eup %7024  ;;  %7038 = vrcp.f32 %v1409_v43  ;;  %v1048_v40 = vadd.f32 %v1047_v45, %v8166_v49 }
 0x77a   :  { %v7027_v51 = vpop.eup %7026  ;;  %v8178_v33 = vmul.f32 %v7025_v25, %v8032_v0 }
 0x77b   :  { %v1415_v29 = vpop.xlane.xlu0 %1414  ;;  %v1413_v52 = vpop.xlane.xlu1 %1412  ;;  %v8174_v32 = vmul.f32 %v7027_v51, %v8034_v9  ;;  %v1049_v3 = vadd.f32 %v1048_v40, %v8170_v28 }
 0x77c   :  { %7040 = vrcp.f32 %v1415_v29 }
 0x77d   :  { %7042 = vrcp.f32 %v1413_v52  ;;  %v1050_v62 = vadd.f32 %v1049_v3, %v8174_v32  ;;  %v7029_v55 = vpop.eup %7028 }
 0x77e   :  { %v8182_v1 = vmul.f32 %v7029_v55, %v8040_v37  ;;  %v7031_v45 = vpop.eup %7030 }
 0x77f   :  { %v1419_v18 = vpop.xlane.xlu0 %1418  ;;  %v1417_v4 = vpop.xlane.xlu1 %1416  ;;  %v1051_v43 = vadd.f32 %v1050_v62, %v8178_v33  ;;  %v8187_v0 = vmul.f32 %v7031_v45, %v8042_v13 }
 0x780   :  { %7044 = vrcp.f32 %v1419_v18 }
 0x781   :  { %v7033_v9 = vpop.eup %7032  ;;  %7046 = vrcp.f32 %v1417_v4  ;;  %v1052_v40 = vadd.f32 %v1051_v43, %v8182_v1 }
 0x782   :  { %v7035_v51 = vpop.eup %7034  ;;  %v8193_v62 = vmul.f32 %v7033_v9, %v8048_v16 }
 0x783   :  { %v8190_v25 = vmul.f32 %v7035_v51, %v8050_v19  ;;  %v1423_v29 = vpop.xlane.xlu0 %1422  ;;  %v1421_v52 = vpop.xlane.xlu1 %1420  ;;  %v1053_v3 = vrot.slane %v1052_v40, 4 }
 0x784   :  { %7048 = vrcp.f32 %v1423_v29 }
 0x785   :  { %v7037_v37 = vpop.eup %7036  ;;  %v1466_v55 = vadd.f32 %v8190_v25, %v8187_v0  ;;  %7050 = vrcp.f32 %v1421_v52  ;;  %v1054_v18 = vadd.f32 %v1053_v3, %v1052_v40 }
 0x786   :  { %v7039_v4 = vpop.eup %7038  ;;  %v8202_v29 = vmul.f32 %v7037_v37, %v8058_v21 }
 0x787   :  { %v1467_v13 = vadd.f32 %v1466_v55, %v8193_v62  ;;  %v8199_v43 = vmul.f32 %v7039_v4, %v8056_v46  ;;  %v1427_v19 = vpop.xlane.xlu0 %1426  ;;  %v1425_v45 = vpop.xlane.xlu1 %1424  ;;  %v1055_v51 = vrot.slane %v1054_v18, 2 }
 0x788   :  { %7052 = vrcp.f32 %v1425_v45 }
 0x789   :  { %v7041_v2 = vpop.eup %7040  ;;  %v1468_v16 = vadd.f32 %v1467_v13, %v8199_v43  ;;  %v1056_v9 = vadd.f32 %v1055_v51, %v1054_v18  ;;  %7054 = vrcp.f32 %v1427_v19 }
 0x78a   :  { %v7043_v48 = vpop.eup %7042  ;;  %v8210_v17 = vmul.f32 %v7041_v2, %v8064_v50 }
 0x78b   :  { %v1469_v40 = vadd.f32 %v1468_v16, %v8202_v29  ;;  %v8207_v52 = vmul.f32 %v7043_v48, %v8066_v23  ;;  %v1429_v46 = vpop.xlane.xlu1 %1428  ;;  %v1057_v3 = vrot.slane %v1056_v9, 1  ;;  %v1431_v55 = vpop.xlane.xlu0 %1430 }
 0x78c   :  { %7056 = vrcp.f32 %v1429_v46 }
 0x78d   :  { %v7045_v4 = vpop.eup %7044  ;;  %v1470_v21 = vadd.f32 %v1469_v40, %v8207_v52  ;;  %v1058_v37 = vadd.f32 %v1057_v3, %v1056_v9  ;;  %7058 = vrcp.f32 %v1431_v55 }
 0x78e   :  { %v7047_v13 = vpop.eup %7046  ;;  %v8218_v51 = vmul.f32 %v7045_v4, %v8073_v22 }
 0x78f   :  { %v1471_v18 = vadd.f32 %v1470_v21, %v8210_v17  ;;  %v8215_v19 = vmul.f32 %v7047_v13, %v8071_v39  ;;  %v1433_v48 = vpop.xlane.xlu1 %1432  ;;  %v1059_v23 = vadd.f32 1e-09, %v1058_v37 }
 0x790   :  { %7060 = vrcp.f32 %v1433_v48 }
 0x791   :  { %v7049_v45 = vpop.eup %7048  ;;  %v1472_v2 = vadd.f32 %v1471_v18, %v8215_v19  ;;  %7062 = vrcp.f32 %v1059_v23 }
 0x792   :  { %v7051_v50 = vpop.eup %7050  ;;  %v8230_v4 = vmul.f32 %v7049_v45, %v8077_v7 }
 0x793   :  { %v1473_v16 = vadd.f32 %v1472_v2, %v8218_v51  ;;  %v8223_v9 = vmul.f32 %v7051_v50, %v8079_v41  ;;  %v681_v40 = vpop.permute.xlu0 %680  ;;  %v686_v39 = vpop.permute.xlu1 %685 }
 0x794   :  { %v698_v46 = vadd.f32 %v681_v40, %v7837_v10  ;;  %v699_v3 = vadd.f32 %v681_v40, %v7839_v47  ;;  %v700_v55 = vadd.f32 %v686_v39, %v7841_v57  ;;  %v701_v22 = vadd.f32 %v686_v39, %v7843_v58 }
 0x795   :  { %v1474_v21 = vadd.f32 %v1473_v16, %v8223_v9  ;;  %v7053_v37 = vpop.eup %7052 }
 0x796   :  { %v6294_v13 = vpack.c.bf16 %v699_v3, %v698_v46  ;;  %v6295_v18 = vpack.c.bf16 %v701_v22, %v700_v55  ;;  %v7055_v41 = vpop.eup %7054  ;;  %v8234_v48 = vmul.f32 %v7053_v37, %v8083_v24 }
 0x797   :  { %v696_v23 = vpop.permute.xlu0 %695  ;;  %v691_v10 = vpop.permute.xlu1 %690  ;;  %v1475_v47 = vadd.f32 %v1474_v21, %v8230_v4  ;;  %v8243_v24 = vmul.f32 %v7055_v41, %v8085_v11 }
 0x798   :  { %730 = vst [vmem:[#allocation5] sm:$0xff] %v6294_v13  ;;  %731 = vst [vmem:[#allocation5 + $0x8] sm:$0xff] %v6295_v18  ;;  %v704_v57 = vadd.f32 %v696_v23, %v7849_v61  ;;  %v705_v58 = vadd.f32 %v696_v23, %v7851_v5  ;;  %v702_v7 = vadd.f32 %v691_v10, %v7845_v59 }
 0x799   :  { %v703_v45 = vadd.f32 %v691_v10, %v7847_v60  ;;  %v1476_v2 = vadd.f32 %v1475_v47, %v8234_v48  ;;  %v7057_v50 = vpop.eup %7056 }
 0x79a   :  { %v6297_v16 = vpack.c.bf16 %v705_v58, %v704_v57  ;;  %v7059_v39 = vpop.eup %7058  ;;  %v8246_v46 = vmul.f32 %v7057_v50, %v8091_v26 }
 0x79b   :  { %v6296_v40 = vpack.c.bf16 %v703_v45, %v702_v7  ;;  %v1477_v61 = vadd.f32 %v1476_v2, %v8243_v24  ;;  %v1464_v26 = vmul.f32 %v7059_v39, %v8089_v6 }
 0x79c   :  { %733 = vst [vmem:[#allocation5 + $0x18] sm:$0xff] %v6297_v16 }
 0x79d   :  { %732 = vst [vmem:[#allocation5 + $0x10] sm:$0xff] %v6296_v40  ;;  %v7061_v5 = vpop.eup %7060  ;;  %v1478_v21 = vadd.f32 %v1477_v61, %v8246_v46 }
 0x79e   :  { %v7063_v59 = vpop.eup %7062  ;;  %v1465_v13 = vmul.f32 %v7061_v5, %v8095_v27 }
 0x79f   :  { %v1075_v60 = vmul.f32 %v7063_v59, %v8178_v33  ;;  %v1076_v3 = vmul.f32 %v7063_v59, %v8182_v1  ;;  %v6861_v55 = vld [vmem:[#allocation5] ss:$8 sps:$4 sm:$0xff]   ;;  %v1073_v11 = vmul.f32 %v7063_v59, %v8170_v28  ;;  %v1074_v22 = vmul.f32 %v7063_v59, %v8174_v32 }
 0x7a0   :  { %6564 = vmatprep.mubr.bf16.mxu0 %v6861_v55  ;;  %v1071_v18 = vmul.f32 %v7063_v59, %v8162_v56  ;;  %v1072_v41 = vmul.f32 %v7063_v59, %v8166_v49  ;;  %v1065_v33 = vmul.f32 %v7063_v59, %v8138_v34  ;;  %v1066_v1 = vmul.f32 %v7063_v59, %v8143_v30 }
 0x7a1   :  { %v1084_v37 = vpack.c.bf16 %v1076_v3, %v1075_v60  ;;  %v1083_v28 = vpack.c.bf16 %v1074_v22, %v1073_v11  ;;  %v1063_v32 = vmul.f32 %v7063_v59, %v8129_v20  ;;  %v1064_v23 = vmul.f32 %v7063_v59, %v8135_v31 }
 0x7a2   :  { %v1061_v10 = vmul.f32 %v7063_v59, %v8123_v42  ;;  %v1079_v6 = vpack.c.bf16 %v1066_v1, %v1065_v33  ;;  %v1062_v27 = vmul.f32 %v7063_v59, %v8126_v54  ;;  %v1479_v47 = vadd.f32 %v1478_v21, %v1464_v26 }
 0x7a3   :  { %6548 = vmatprep.subr.bf16.mxu0 %v1084_v37  ;;  %v1078_v56 = vpack.c.bf16 %v1064_v23, %v1063_v32  ;;  %v1082_v34 = vpack.c.bf16 %v1072_v41, %v1071_v18  ;;  %v1069_v30 = vmul.f32 %v7063_v59, %v8154_v38  ;;  %v1070_v58 = vmul.f32 %v7063_v59, %v8159_v15 }
 0x7a4   :  { %6549 = vmatpush3.bf16.msra.mxu0 %v1084_v37  ;;  %v1077_v49 = vpack.c.bf16 %v1062_v27, %v1061_v10  ;;  %v1480_v57 = vadd.f32 %v1479_v47, %v1465_v13  ;;  %v1067_v42 = vmul.f32 %v7063_v59, %v8146_v36  ;;  %v1068_v45 = vmul.f32 %v7063_v59, %v8151_v44  ;;  %v6862_v36 = vld [vmem:[#allocation5 + $0x10] ss:$8 sps:$4 sm:$0xff]   ;;  %v6863_v44 = vld [vmem:[#allocation5 + $0x4] ss:$8 sps:$4 sm:$0xff]  }
 0x7a5   :  { %6550 = vmatprep.subr.bf16.mxu0 %v1083_v28  ;;  %v1081_v7 = vpack.c.bf16 %v1070_v58, %v1069_v30  ;;  %v9973_v33 = vmov 0  }
 0x7a6   :  { %v1481_v20 = vrot.slane %v1480_v57, 4  ;;  %v1080_v50 = vpack.c.bf16 %v1068_v45, %v1067_v42 }
 0x7a8   :  { %6551 = vmatpush3.bf16.msra.mxu0 %v1083_v28  ;;  %v1482_v31 = vadd.f32 %v1481_v20, %v1480_v57 }
 0x7a9   :  { %6552 = vmatprep.subr.bf16.mxu0 %v1082_v34 }
 0x7aa   :  { %v1483_v54 = vrot.slane %v1482_v31, 2 }
 0x7ac   :  { %6553 = vmatpush3.bf16.msra.mxu0 %v1082_v34  ;;  %v1484_v2 = vadd.f32 %v1483_v54, %v1482_v31  ;;  %v9974_v31 = vld [vmem:[#allocation10_spill] sm:$0xff]  ;;  %v9975_v54 = vld [vmem:[#allocation11_spill] sm:$0xff] }
 0x7ad   :  { %6554 = vmatprep.subr.bf16.mxu0 %v1081_v7 }
 0x7ae   :  { %v1485_v16 = vrot.slane %v1484_v2, 1 }
 0x7b0   :  { %6555 = vmatpush3.bf16.msra.mxu0 %v1081_v7  ;;  %v1486_v38 = vadd.f32 %v1485_v16, %v1484_v2 }
 0x7b1   :  { %6556 = vmatprep.subr.bf16.mxu0 %v1080_v50 }
 0x7b2   :  { %v1487_v15 = vadd.f32 1e-09, %v1486_v38 }
 0x7b4   :  { %6557 = vmatpush3.bf16.msra.mxu0 %v1080_v50  ;;  %7064 = vrcp.f32 %v1487_v15 }
 0x7b5   :  { %6558 = vmatprep.subr.bf16.mxu0 %v1079_v6 }
 0x7b8   :  { %6559 = vmatpush3.bf16.msra.mxu0 %v1079_v6 }
 0x7b9   :  { %6560 = vmatprep.subr.bf16.mxu0 %v1078_v56 }
 0x7bc   :  { %6561 = vmatpush3.bf16.msra.mxu0 %v1078_v56 }
 0x7bd   :  { %6562 = vmatprep.subr.bf16.mxu0 %v1077_v49 }
 0x7c0   :  { %6563 = vmatpush3.bf16.msra.mxu0 %v1077_v49 }
 0x7c1   :  { %v7065_v40 = vpop.eup %7064 }
 0x7c2   :  { %v1503_v39 = vmul.f32 %v7065_v40, %v1464_v26  ;;  %v1504_v61 = vmul.f32 %v7065_v40, %v1465_v13  ;;  %v1501_v5 = vmul.f32 %v7065_v40, %v8243_v24  ;;  %v1502_v59 = vmul.f32 %v7065_v40, %v8246_v46 }
 0x7c3   :  { %6565 = vmatmul.mubr.bf16.vlgmr.msra.gmra.mxu0 %v6862_v36  ;;  %v1493_v3 = vmul.f32 %v7065_v40, %v8202_v29  ;;  %v1494_v55 = vmul.f32 %v7065_v40, %v8207_v52  ;;  %v1499_v22 = vmul.f32 %v7065_v40, %v8230_v4  ;;  %v1500_v21 = vmul.f32 %v7065_v40, %v8234_v48 }
 0x7c4   :  { %6602 = vmatprep.mubr.bf16.mxu0 %v6863_v44  ;;  %v1512_v60 = vpack.c.bf16 %v1504_v61, %v1503_v39  ;;  %v1511_v11 = vpack.c.bf16 %v1502_v59, %v1501_v5  ;;  %v1497_v13 = vmul.f32 %v7065_v40, %v8218_v51  ;;  %v1498_v24 = vmul.f32 %v7065_v40, %v8223_v9  ;;  %v6871_v44 = vld [vmem:[%s9960_s9] sm:$0xff]   ;;  %v1621_v59 = vpop.permute.xlu0 %1620 }
 0x7c5   :  { %v1507_v37 = vpack.c.bf16 %v1494_v55, %v1493_v3  ;;  %v1510_v26 = vpack.c.bf16 %v1500_v21, %v1499_v22  ;;  %v1495_v29 = vmul.f32 %v7065_v40, %v8210_v17  ;;  %v1496_v52 = vmul.f32 %v7065_v40, %v8215_v19  ;;  %v6864_v19 = vld [vmem:[#allocation5 + $0x14] ss:$8 sps:$4 sm:$0xff]   ;;  %v1616_v3 = vpop.permute.xlu1 %1615 }
 0x7c6   :  { %6586 = vmatprep.subr.bf16.mxu0 %v1512_v60  ;;  %v1509_v46 = vpack.c.bf16 %v1498_v24, %v1497_v13  ;;  %v1491_v48 = vmul.f32 %v7065_v40, %v8193_v62  ;;  %v1492_v18 = vmul.f32 %v7065_v40, %v8199_v43  ;;  %v1489_v9 = vmul.f32 %v7065_v40, %v8187_v0 }
 0x7c7   :  { %6587 = vmatpush3.bf16.msra.mxu0 %v1512_v60  ;;  %v1508_v4 = vpack.c.bf16 %v1496_v52, %v1495_v29  ;;  %v1490_v41 = vmul.f32 %v7065_v40, %v8190_v25  ;;  %v6872_v40 = vld [vmem:[%s9960_s9 + $0x8] sm:$0xff]  }
 0x7c8   :  { %6588 = vmatprep.subr.bf16.mxu0 %v1511_v11  ;;  %v1506_v51 = vpack.c.bf16 %v1492_v18, %v1491_v48 }
 0x7c9   :  { %v1505_v17 = vpack.c.bf16 %v1490_v41, %v1489_v9 }
 0x7cb   :  { %6589 = vmatpush3.bf16.msra.mxu0 %v1511_v11 }
 0x7cc   :  { %6590 = vmatprep.subr.bf16.mxu0 %v1510_v26 }
 0x7cf   :  { %6591 = vmatpush3.bf16.msra.mxu0 %v1510_v26 }
 0x7d0   :  { %6592 = vmatprep.subr.bf16.mxu0 %v1509_v46 }
 0x7d3   :  { %6593 = vmatpush3.bf16.msra.mxu0 %v1509_v46 }
 0x7d4   :  { %6594 = vmatprep.subr.bf16.mxu0 %v1508_v4 }
 0x7d7   :  { %6595 = vmatpush3.bf16.msra.mxu0 %v1508_v4 }
 0x7d8   :  { %6596 = vmatprep.subr.bf16.mxu0 %v1507_v37 }
 0x7db   :  { %6597 = vmatpush3.bf16.msra.mxu0 %v1507_v37  ;;  %v1611_v37 = vpop.permute.xlu0 %1610 }
 0x7dc   :  { %6598 = vmatprep.subr.bf16.mxu0 %v1506_v51 }
 0x7df   :  { %6599 = vmatpush3.bf16.msra.mxu0 %v1506_v51 }
 0x7e0   :  { %6600 = vmatprep.subr.bf16.mxu0 %v1505_v17 }
 0x7e3   :  { %6601 = vmatpush3.bf16.msra.mxu0 %v1505_v17  ;;  %v1606_v17 = vpop.permute.xlu1 %1605 }
 0x7e6   :  { %6603 = vmatmul.mubr.bf16.vlgmr.msra.gmra.mxu0 %v6864_v19 }
 0x7e7   :  { %2009 = vmatprep.mubr.bf16.mxu0 %v9973_v33 }
 0x883   :  { %v6566_v62 = vpop.f32.mrf.mxu0 }
 0x884   :  { %v1148_v43 = vsub.f32 %v7795_v35, %v6566_v62 }
 0x885   :  { %v1131_v1 = vpop.f32.mrf.mxu0 }
 0x886   :  { %v6301_v28 = vpack.c.bf16 %v1148_v43, %v1148_v43  ;;  %v1146_v32 = vsub.f32 %v7815_v53, %v1131_v1 }
 0x887   :  { %v6567_v0 = vpop.f32.mrf.mxu0 }
 0x888   :  { %1168 = vst [vmem:[#allocation6 + $0x10] sm:$0xf] %v6301_v28  ;;  %v6299_v25 = vpack.c.bf16 %v1146_v32, %v1146_v32  ;;  %v1149_v23 = vsub.f32 %v7799_v14, %v6567_v0 }
 0x889   :  { %v1134_v10 = vpop.f32.mrf.mxu0 }
 0x88a   :  { %1166 = vst [vmem:[#allocation6] sm:$0xf] %v6299_v25  ;;  %v6302_v6 = vpack.c.bf16 %v1149_v23, %v1149_v23  ;;  %v1147_v27 = vsub.f32 %v7811_v63, %v1134_v10 }
 0x88c   :  { %1169 = vst [vmem:[#allocation6 + $0x18] sm:$0xf] %v6302_v6  ;;  %v6300_v47 = vpack.c.bf16 %v1147_v27, %v1147_v27 }
 0x88e   :  { %1167 = vst [vmem:[#allocation6 + $0x8] sm:$0xf] %v6300_v47  ;;  %v569_v47 = vld [vmem:[%s9963_s12 + $0x10] sm:$0xff] }
 0x893   :  { %v6867_v38 = vld [vmem:[#allocation6 + $0x10] ss:$8 sps:$4 sm:$0xff]  }
 0x895   :  { %v6870_v36 = vld [vmem:[#allocation6] ss:$8 sps:$4 sm:$0xff]  }
 0x8a6   :  { %v6604_v56 = vpop.f32.mrf.mxu0 }
 0x8a7   :  { %v1576_v49 = vsub.f32 %v7797_v12, %v6604_v56  ;;  %v570_v56 = vld [vmem:[%s9963_s12 + $0x18] sm:$0xff] }
 0x8a8   :  { %v1559_v57 = vpop.f32.mrf.mxu0 }
 0x8a9   :  { %v6305_v34 = vpack.c.bf16 %v1576_v49, %v1576_v49  ;;  %v1574_v30 = vsub.f32 %v7817_v8, %v1559_v57 }
 0x8aa   :  { %v6605_v58 = vpop.f32.mrf.mxu0 }
 0x8ab   :  { %1597 = vst [vmem:[#allocation6 + $0x14] sm:$0xf] %v6305_v34  ;;  %v6303_v20 = vpack.c.bf16 %v1574_v30, %v1574_v30  ;;  %v1577_v7 = vsub.f32 %v9974_v31, %v6605_v58 }
 0x8ac   :  { %v1562_v42 = vpop.f32.mrf.mxu0 }
 0x8ad   :  { %1595 = vst [vmem:[#allocation6 + $0x4] sm:$0xf] %v6303_v20  ;;  %v6306_v45 = vpack.c.bf16 %v1577_v7, %v1577_v7  ;;  %v1575_v2 = vsub.f32 %v9975_v54, %v1562_v42 }
 0x8af   :  { %1598 = vst [vmem:[#allocation6 + $0x1c] sm:$0xf] %v6306_v45  ;;  %v6304_v50 = vpack.c.bf16 %v1575_v2, %v1575_v2 }
 0x8b1   :  { %1596 = vst [vmem:[#allocation6 + $0xc] sm:$0xf] %v6304_v50 }
 0x8b6   :  { %v6865_v16 = vld [vmem:[#allocation6 + $0x14] ss:$8 sps:$4 sm:$0xff]  }
 0x8b7   :  { %1671 = vmatprep.subr.bf16.mxu1 %v6865_v16 }
 0x8b8   :  { %v6868_v15 = vld [vmem:[#allocation6 + $0x4] ss:$8 sps:$4 sm:$0xff]   ;;  %1672 = vmatpush1.bf16.msra.mxu1 %v6867_v38 }
 0x8b9   :  { %1673 = vmatprep.subr.bf16.mxu1 %v6868_v15 }
 0x8bc   :  { %1674 = vmatpush1.bf16.msra.mxu1 %v6870_v36 }
 0x8bf   :  { %6044 = vmatmul.mubr.msk.bf16.vlgmr.msra.gmra.mxu1 %vm84_vm0, %v6871_v44 }
 0x8c0   :  { %1701 = vmatprep.mubr.bf16.mxu1 %v9973_v33 }
 0x8c7   :  { %6045 = vmatmul.mubr.msk.bf16.gmra.mxu1 %vm84_vm0, %v6872_v40 }
 0x97f   :  { %v1693_v39 = vpop.f32.mrf.mxu1 }
 0x980   :  { %v8328_v1 = vadd.f32 %v1693_v39, %v1606_v17 }
 0x981   :  { %v1695_v61 = vpop.f32.mrf.mxu1 }
 0x982   :  { %v8322_v19 = vadd.f32 %v1695_v61, %v1606_v17  ;;  %v1736_v10 = vmul.f32 %v8328_v1, %v8328_v1 }
 0x983   :  { %v1697_v5 = vpop.f32.mrf.mxu1 }
 0x984   :  { %v8312_v4 = vadd.f32 %v1697_v5, %v1611_v37  ;;  %v1737_v0 = vmul.f32 %v8322_v19, %v8322_v19  ;;  %v1720_v23 = vadd.f32 %v8322_v19, %v8328_v1 }
 0x985   :  { %v1699_v60 = vpop.f32.mrf.mxu1 }
 0x986   :  { %v8304_v13 = vadd.f32 %v1699_v60, %v1611_v37  ;;  %v1738_v25 = vmul.f32 %v8312_v4, %v8312_v4  ;;  %v1744_v27 = vadd.f32 %v1737_v0, %v1736_v10 }
 0x987   :  { %v1703_v55 = vpop.f32.mrf.mxu1 }
 0x988   :  { %v8300_v11 = vadd.f32 %v1703_v55, %v1616_v3  ;;  %v1723_v41 = vadd.f32 %v8304_v13, %v8312_v4  ;;  %v1739_v28 = vmul.f32 %v8304_v13, %v8304_v13 }
 0x989   :  { %v1705_v22 = vpop.f32.mrf.mxu1 }
 0x98a   :  { %v8302_v21 = vadd.f32 %v1705_v22, %v1616_v3  ;;  %v1740_v24 = vmul.f32 %v8300_v11, %v8300_v11  ;;  %v1747_v6 = vadd.f32 %v1739_v28, %v1738_v25  ;;  %v563_v25 = vld [vmem:[%s9962_s11] sm:$0xff] }
 0x98b   :  { %v1707_v26 = vpop.f32.mrf.mxu1 }
 0x98c   :  { %v1741_v46 = vmul.f32 %v8302_v21, %v8302_v21  ;;  %v1726_v29 = vadd.f32 %v8302_v21, %v8300_v11  ;;  %v8314_v48 = vadd.f32 %v1707_v26, %v1621_v59 }
 0x98d   :  { %v1709_v52 = vpop.f32.mrf.mxu1 }
 0x98e   :  { %v8316_v18 = vadd.f32 %v1709_v52, %v1621_v59  ;;  %1727 = vadd.xlane.f32.xlu1 %v1726_v29  ;;  %v1750_v51 = vadd.f32 %v1741_v46, %v1740_v24  ;;  %v1742_v62 = vmul.f32 %v8314_v48, %v8314_v48 }
 0x990   :  { %v1743_v9 = vmul.f32 %v8316_v18, %v8316_v18  ;;  %1751 = vadd.xlane.f32.xlu0 %v1750_v51  ;;  %v1729_v43 = vadd.f32 %v8316_v18, %v8314_v48 }
 0x992   :  { %1724 = vadd.xlane.f32.xlu1 %v1723_v41  ;;  %v1753_v32 = vadd.f32 %v1743_v9, %v1742_v62  ;;  %v565_v9 = vld [vmem:[%s9962_s11 + $0x10] sm:$0xff]  ;;  %v566_v62 = vld [vmem:[%s9962_s11 + $0x18] sm:$0xff] }
 0x994   :  { %1730 = vadd.xlane.f32.xlu0 %v1729_v43 }
 0x996   :  { %1754 = vadd.xlane.f32.xlu1 %v1753_v32  ;;  %v564_v32 = vld [vmem:[%s9962_s11 + $0x8] sm:$0xff] }
 0x998   :  { %1721 = vadd.xlane.f32.xlu0 %v1720_v23 }
 0x99a   :  { %1748 = vadd.xlane.f32.xlu1 %v1747_v6 }
 0x99c   :  { %1745 = vadd.xlane.f32.xlu0 %v1744_v27  ;;  %v568_v27 = vld [vmem:[%s9963_s12 + $0x8] sm:$0xff] }
 0x9ab   :  { %1832 = vperm.xlu1 %6847, %v569_v47   ;;  %v567_v47 = vld [vmem:[%s9963_s12] sm:$0xff] }
 0x9b2   :  { %1837 = vperm.xlu0 %6846, %v570_v56  }
 0xa17   :  { %v1728_v49 = vpop.xlane.xlu1 %1727 }
 0xa18   :  { %v1734_v57 = vmul.f32 0.00390625, %v1728_v49 }
 0xa19   :  { %v1752_v34 = vpop.xlane.xlu0 %1751 }
 0xa1a   :  { %v1758_v30 = vmul.f32 0.00390625, %v1752_v34  ;;  %v1762_v58 = vmul.f32 %v1734_v57, %v1734_v57  ;;  %v1788_v49 = vsub.f32 %v8300_v11, %v1734_v57  ;;  %v1789_v34 = vsub.f32 %v8302_v21, %v1734_v57 }
 0xa1b   :  { %v1725_v20 = vpop.xlane.xlu1 %1724 }
 0xa1c   :  { %v1766_v7 = vsub.f32 %v1758_v30, %v1762_v58  ;;  %v8348_v38 = vmul.f32 0.00390625, %v1725_v20 }
 0xa1d   :  { %v1731_v42 = vpop.xlane.xlu0 %1730 }
 0xa1e   :  { %v1770_v45 = vmax.f32 %v1766_v7, 0.0  ;;  %v8346_v2 = vmul.f32 0.00390625, %v1731_v42  ;;  %v1761_v59 = vmul.f32 %v8348_v38, %v8348_v38 }
 0xa1f   :  { %v1755_v50 = vpop.xlane.xlu1 %1754 }
 0xa20   :  { %v1774_v16 = vadd.f32 1e-05, %v1770_v45  ;;  %v1763_v15 = vmul.f32 %v8346_v2, %v8346_v2  ;;  %v1759_v36 = vmul.f32 0.00390625, %v1755_v50 }
 0xa21   :  { %v1722_v44 = vpop.xlane.xlu0 %1721 }
 0xa22   :  { %7066 = vrsqrt.f32 %v1774_v16  ;;  %v1767_v40 = vsub.f32 %v1759_v36, %v1763_v15  ;;  %v8352_v39 = vmul.f32 0.00390625, %v1722_v44  ;;  %v1790_v15 = vsub.f32 %v8314_v48, %v8346_v2 }
 0xa23   :  { %v1749_v61 = vpop.xlane.xlu1 %1748  ;;  %v1791_v36 = vsub.f32 %v8316_v18, %v8346_v2  ;;  %v1786_v48 = vsub.f32 %v8312_v4, %v8348_v38  ;;  %v1787_v18 = vsub.f32 %v8304_v13, %v8348_v38 }
 0xa24   :  { %v1771_v5 = vmax.f32 %v1767_v40, 0.0  ;;  %v1757_v60 = vmul.f32 0.00390625, %v1749_v61  ;;  %v1760_v37 = vmul.f32 %v8352_v39, %v8352_v39 }
 0xa25   :  { %v1746_v3 = vpop.xlane.xlu0 %1745 }
 0xa26   :  { %v1775_v55 = vadd.f32 1e-05, %v1771_v5  ;;  %v1765_v22 = vsub.f32 %v1757_v60, %v1761_v59  ;;  %v1756_v26 = vmul.f32 0.00390625, %v1746_v3 }
 0xa27   :  { %v1833_v7 = vpop.permute.xlu1 %1832 }
 0xa28   :  { %7068 = vrsqrt.f32 %v1775_v55  ;;  %v1769_v24 = vmax.f32 %v1765_v22, 0.0  ;;  %v1764_v46 = vsub.f32 %v1756_v26, %v1760_v37 }
 0xa2a   :  { %v1773_v29 = vadd.f32 1e-05, %v1769_v24  ;;  %v1768_v52 = vmax.f32 %v1764_v46, 0.0 }
 0xa2c   :  { %7070 = vrsqrt.f32 %v1773_v29  ;;  %v1772_v51 = vadd.f32 1e-05, %v1768_v52 }
 0xa2d   :  { %v1838_v56 = vpop.permute.xlu0 %1837 }
 0xa2e   :  { %7072 = vrsqrt.f32 %v1772_v51 }
 0xa2f   :  { %v7067_v41 = vpop.eup %7066 }
 0xa30   :  { %v1782_v17 = vmul.f32 %v7067_v41, %v565_v9 }
 0xa32   :  { %1804 = vperm.xlu0 %6846, %v1782_v17  }
 0xa35   :  { %v7069_v43 = vpop.eup %7068 }
 0xa36   :  { %v1783_v28 = vmul.f32 %v7069_v43, %v566_v62 }
 0xa38   :  { %1809 = vperm.xlu1 %6847, %v1783_v28  }
 0xa39   :  { %v7071_v0 = vpop.eup %7070 }
 0xa3a   :  { %v1781_v23 = vmul.f32 %v7071_v0, %v564_v32 }
 0xa3b   :  { %v7073_v10 = vpop.eup %7072 }
 0xa3c   :  { %1799 = vperm.xlu0 %6846, %v1781_v23   ;;  %v1780_v6 = vmul.f32 %v7073_v10, %v563_v25 }
 0xa3e   :  { %1794 = vperm.xlu1 %6847, %v1780_v6  }
 0xa40   :  { %1827 = vperm.xlu0 %6846, %v568_v27  }
 0xa42   :  { %1822 = vperm.xlu1 %6847, %v567_v47  }
 0xaad   :  { %v1805_v30 = vpop.permute.xlu0 %1804 }
 0xaae   :  { %v1816_v58 = vmul.f32 %v1805_v30, %v1788_v49  ;;  %v1817_v20 = vmul.f32 %v1805_v30, %v1789_v34 }
 0xab0   :  { %v1844_v42 = vadd.f32 %v1833_v7, %v1816_v58  ;;  %v1845_v45 = vadd.f32 %v1833_v7, %v1817_v20 }
 0xab2   :  { %v1852_v50 = vmax.f32 %v1844_v42, 0.0  ;;  %v1853_v16 = vmax.f32 %v1845_v45, 0.0 }
 0xab3   :  { %v1810_v44 = vpop.permute.xlu1 %1809 }
 0xab4   :  { %v8383_v40 = vadd.f32 %v1852_v50, %v7795_v35  ;;  %v1818_v11 = vmul.f32 %v1810_v44, %v1790_v15  ;;  %v1819_v21 = vmul.f32 %v1810_v44, %v1791_v36  ;;  %v1861_v57 = vadd.f32 %v1853_v16, %v7797_v12 }
 0xab5   :  { %v1784_v35 = vsub.f32 %v8328_v1, %v8352_v39  ;;  %v1785_v12 = vsub.f32 %v8322_v19, %v8352_v39 }
 0xab6   :  { %1868 = vst [vmem:[#allocation7 + $0x20] sm:$0xff] %v8383_v40  ;;  %v1846_v61 = vadd.f32 %v1838_v56, %v1818_v11  ;;  %v1847_v5 = vadd.f32 %v1838_v56, %v1819_v21  ;;  %1869 = vst [vmem:[#allocation7 + $0x28] sm:$0xff] %v1861_v57 }
 0xab7   :  { %v1800_v59 = vpop.permute.xlu0 %1799 }
 0xab8   :  { %v1854_v60 = vmax.f32 %v1846_v61, 0.0  ;;  %v1855_v3 = vmax.f32 %v1847_v5, 0.0  ;;  %v1814_v22 = vmul.f32 %v1800_v59, %v1786_v48  ;;  %v1815_v37 = vmul.f32 %v1800_v59, %v1787_v18 }
 0xab9   :  { %v1795_v2 = vpop.permute.xlu1 %1794 }
 0xaba   :  { %v8396_v55 = vadd.f32 %v1854_v60, %v7799_v14  ;;  %v1863_v26 = vadd.f32 %v1855_v3, %v9974_v31  ;;  %v1812_v24 = vmul.f32 %v1795_v2, %v1784_v35  ;;  %v1813_v46 = vmul.f32 %v1795_v2, %v1785_v12 }
 0xabb   :  { %v1828_v4 = vpop.permute.xlu0 %1827 }
 0xabc   :  { %1870 = vst [vmem:[#allocation7 + $0x30] sm:$0xff] %v8396_v55  ;;  %v1842_v13 = vadd.f32 %v1828_v4, %v1814_v22  ;;  %v1843_v38 = vadd.f32 %v1828_v4, %v1815_v37  ;;  %1871 = vst [vmem:[#allocation7 + $0x38] sm:$0xff] %v1863_v26  ;;  %v6369_v1 = vpack.c.bf16 %v1863_v26, %v1861_v57 }
 0xabd   :  { %v6368_v19 = vpack.c.bf16 %v8396_v55, %v8383_v40  ;;  %v1823_v39 = vpop.permute.xlu1 %1822 }
 0xabe   :  { %v1850_v29 = vmax.f32 %v1842_v13, 0.0  ;;  %v1851_v14 = vmax.f32 %v1843_v38, 0.0  ;;  %v1840_v52 = vadd.f32 %v1823_v39, %v1812_v24  ;;  %v1841_v51 = vadd.f32 %v1823_v39, %v1813_v46  ;;  %1989 = vmatprep.subr.bf16.mxu0 %v6369_v1 }
 0xabf   :  { %1990 = vmatpush1.bf16.msra.mxu0 %v6368_v19 }
 0xac0   :  { %v8403_v31 = vadd.f32 %v1850_v29, %v7811_v63  ;;  %v1848_v9 = vmax.f32 %v1840_v52, 0.0  ;;  %v1849_v41 = vmax.f32 %v1841_v51, 0.0  ;;  %v1859_v17 = vadd.f32 %v1851_v14, %v9975_v54  ;;  %v6873_v54 = vld [vmem:[%s9958_s7 + $0x14] sm:$0xff]  }
 0xac2   :  { %1866 = vst [vmem:[#allocation7 + $0x10] sm:$0xff] %v8403_v31  ;;  %v8408_v62 = vadd.f32 %v1848_v9, %v7815_v53  ;;  %v1857_v43 = vadd.f32 %v1849_v41, %v7817_v8  ;;  %1867 = vst [vmem:[#allocation7 + $0x18] sm:$0xff] %v1859_v17  ;;  %v6874_v53 = vld [vmem:[%s9958_s7 + $0x1c] sm:$0xff]   ;;  %v6875_v8 = vld [vmem:[%s9958_s7 + $0x24] ss:$0 sps:$4 sm:$0xff]  }
 0xac4   :  { %1864 = vst [vmem:[#allocation7] sm:$0xff] %v8408_v62  ;;  %1865 = vst [vmem:[#allocation7 + $0x8] sm:$0xff] %v1857_v43  ;;  %v6367_v28 = vpack.c.bf16 %v1859_v17, %v1857_v43  ;;  %v6366_v63 = vpack.c.bf16 %v8403_v31, %v8408_v62 }
 0xac6   :  { %1991 = vmatprep.subr.bf16.mxu0 %v6367_v28 }
 0xac7   :  { %1992 = vmatpush1.bf16.msra.mxu0 %v6366_v63 }
 0xaca   :  { %6082 = vmatmul.mubr.msk.bf16.vlgmr.msra.gmra.mxu0 %vm84_vm0, %v6873_v54 }
 0xacb   :  { %2019 = vmatprep.mubr.bf16.mxu0 %v9973_v33 }
 0xad2   :  { %6083 = vmatmul.mubr.msk.bf16.gmra.mxu0 %vm84_vm0, %v6874_v53 }
 0xad3   :  { %2029 = vmatprep.mubr.bf16.mxu0 %v9973_v33 }
 0xada   :  { %6084 = vmatmul.mubr.msk.bf16.gmra.mxu0 %vm84_vm0, %v6875_v8 }
 0xb8a   :  { %v8428_v32 = vpop.f32.mrf.mxu0 }
 0xb8c   :  { %v8430_v0 = vpop.f32.mrf.mxu0 }
 0xb8e   :  { %v8432_v25 = vpop.f32.mrf.mxu0 }
 0xb90   :  { %v8434_v23 = vpop.f32.mrf.mxu0 }
 0xb92   :  { %v8436_v10 = vpop.f32.mrf.mxu0 }
 0xb94   :  { %v8438_v6 = vpop.f32.mrf.mxu0 }
 0xb96   :  { %v8440_v27 = vpop.f32.mrf.mxu0 }
 0xb98   :  { %v8442_v47 = vpop.f32.mrf.mxu0 }
 0xb9a   :  { %v2031_v56 = vpop.f32.mrf.mxu0 }
 0xb9c   :  { %v2033_v49 = vpop.f32.mrf.mxu0 }
 0xb9d   :  { %v6315_v34 = vpack.c.bf16 %v2033_v49, %v2031_v56 }
 0xb9e   :  { %v2035_v30 = vpop.f32.mrf.mxu0 }
 0xb9f   :  { %2102 = vst [vmem:[#allocation4] sm:$0xff] %v6315_v34 }
 0xba0   :  { %v2036_v58 = vpop.f32.mrf.mxu0 }
 0xba6   :  { %v2103_v20 = vld [vmem:[#allocation4] sm:$0xf] }
 0xba7   :  { %2112 = vxpose.xlu1.c.b16.start.end [1/1] (short) %v2103_v20, 128  ;;  %6836 = vmatprep.subr.msk.bf16.mxu1 %vm793_vm1, %v2103_v20  ;;  %v2153_v7 = vsel %vm793_vm1, %v2103_v20, 0 }
 0xba8   :  { %6607 = vmatpush3.bf16.msra.mxu1 %v2153_v7 }
 0xc09   :  { %v2120_v42 = vpop.trf.xlu1 }
 0xc0a   :  { %6608 = vmatprep.mubr.msk.bf16.mxu1 %vm768_vm2, %v2120_v42 }
 0xc0d   :  { %v2121_v45 = vpop.trf.xlu1 }
 0xc0e   :  { %6609 = vmatmul.mubr.msk.bf16.vlgmr.msra.gmra.mxu1 %vm768_vm2, %v2121_v45 }
 0xc11   :  { %v2122_v50 = vpop.trf.xlu1 }
 0xc12   :  { %6612 = vmatprep.mubr.msk.bf16.mxu1 %vm768_vm2, %v2122_v50 }
 0xc15   :  { %v2123_v16 = vpop.trf.xlu1 }
 0xc16   :  { %6613 = vmatmul.mubr.msk.bf16.gmra.mxu1 %vm768_vm2, %v2123_v16 }
 0xc19   :  { %v2124_v15 = vpop.trf.xlu1 }
 0xc1a   :  { %6616 = vmatprep.mubr.msk.bf16.mxu1 %vm768_vm2, %v2124_v15 }
 0xc1d   :  { %v2125_v36 = vpop.trf.xlu1 }
 0xc1e   :  { %6617 = vmatmul.mubr.msk.bf16.gmra.mxu1 %vm768_vm2, %v2125_v36 }
 0xc21   :  { %v2126_v44 = vpop.trf.xlu1 }
 0xc22   :  { %6620 = vmatprep.mubr.msk.bf16.mxu1 %vm768_vm2, %v2126_v44 }
 0xc25   :  { %v2127_v11 = vpop.trf.xlu1 }
 0xc26   :  { %6621 = vmatmul.mubr.msk.bf16.gmra.mxu1 %vm768_vm2, %v2127_v11 }
 0xcce   :  { %v6610_v21 = vpop.f32.mrf.mxu1 }
 0xccf   :  { %2256 = vmax.xlane.f32.xlu1 %v6610_v21 }
 0xcd0   :  { %v2189_v57 = vpop.f32.mrf.mxu1 }
 0xcd1   :  { %2252 = vmax.xlane.f32.xlu0 %v2189_v57 }
 0xcd2   :  { %v6611_v61 = vpop.f32.mrf.mxu1 }
 0xcd4   :  { %v2192_v5 = vpop.f32.mrf.mxu1 }
 0xcd5   :  { %2258 = vmax.xlane.f32.xlu0 %v6611_v61 }
 0xcd6   :  { %v6614_v59 = vpop.f32.mrf.mxu1 }
 0xcd8   :  { %v2205_v60 = vpop.f32.mrf.mxu1 }
 0xcd9   :  { %2254 = vmax.xlane.f32.xlu0 %v2192_v5 }
 0xcda   :  { %v6615_v3 = vpop.f32.mrf.mxu1 }
 0xcdc   :  { %v2208_v48 = vpop.f32.mrf.mxu1 }
 0xcdd   :  { %2264 = vmax.xlane.f32.xlu0 %v6614_v59 }
 0xcde   :  { %v8454_v18 = vpop.f32.mrf.mxu1 }
 0xce0   :  { %v8456_v35 = vpop.f32.mrf.mxu1 }
 0xce1   :  { %2260 = vmax.xlane.f32.xlu0 %v2205_v60 }
 0xce2   :  { %v8458_v12 = vpop.f32.mrf.mxu1 }
 0xce4   :  { %v8460_v2 = vpop.f32.mrf.mxu1 }
 0xce5   :  { %2266 = vmax.xlane.f32.xlu0 %v6615_v3 }
 0xce6   :  { %v8462_v22 = vpop.f32.mrf.mxu1 }
 0xce8   :  { %v8464_v37 = vpop.f32.mrf.mxu1 }
 0xce9   :  { %2262 = vmax.xlane.f32.xlu0 %v2208_v48 }
 0xcea   :  { %v8466_v26 = vpop.f32.mrf.mxu1 }
 0xcec   :  { %v8468_v24 = vpop.f32.mrf.mxu1 }
 0xced   :  { %2272 = vmax.xlane.f32.xlu0 %v8454_v18  ;;  %2278 = vmax.xlane.f32.xlu1 %v8468_v24 }
 0xcf1   :  { %2268 = vmax.xlane.f32.xlu0 %v8456_v35  ;;  %2282 = vmax.xlane.f32.xlu1 %v8466_v26 }
 0xcf5   :  { %2270 = vmax.xlane.f32.xlu0 %v8460_v2 }
 0xcf9   :  { %2274 = vmax.xlane.f32.xlu0 %v8458_v12 }
 0xcfd   :  { %2276 = vmax.xlane.f32.xlu0 %v8464_v37 }
 0xd01   :  { %2280 = vmax.xlane.f32.xlu0 %v8462_v22 }
 0xd58   :  { %v2257_v46 = vpop.xlane.xlu1 %2256 }
 0xd59   :  { %v2286_v13 = vsub.f32 %v6610_v21, %v2257_v46 }
 0xd5a   :  { %v2253_v4 = vpop.xlane.xlu0 %2252 }
 0xd5b   :  { %v2284_v38 = vsub.f32 %v2189_v57, %v2253_v4  ;;  %v2304_v39 = vmul.f32 1.442695, %v2286_v13 }
 0xd5d   :  { %v2300_v1 = vmul.f32 1.442695, %v2284_v38 }
 0xd5e   :  { %v2259_v19 = vpop.xlane.xlu0 %2258 }
 0xd5f   :  { %7074 = vpow2.f32 %v2300_v1  ;;  %v2287_v14 = vsub.f32 %v6611_v61, %v2259_v19 }
 0xd60   :  { %7076 = vpow2.f32 %v2304_v39 }
 0xd61   :  { %v2306_v41 = vmul.f32 1.442695, %v2287_v14 }
 0xd62   :  { %v2255_v29 = vpop.xlane.xlu0 %2254 }
 0xd63   :  { %v2285_v52 = vsub.f32 %v2192_v5, %v2255_v29 }
 0xd65   :  { %v2302_v51 = vmul.f32 1.442695, %v2285_v52 }
 0xd66   :  { %v2265_v9 = vpop.xlane.xlu0 %2264 }
 0xd67   :  { %7078 = vpow2.f32 %v2302_v51  ;;  %v2290_v43 = vsub.f32 %v6614_v59, %v2265_v9 }
 0xd68   :  { %7080 = vpow2.f32 %v2306_v41 }
 0xd69   :  { %v2312_v8 = vmul.f32 1.442695, %v2290_v43  ;;  %v6057_v43 = vld [vmem:[%s9959_s8 + $0x30] sm:$0xff] }
 0xd6a   :  { %v2261_v17 = vpop.xlane.xlu0 %2260 }
 0xd6b   :  { %v2288_v28 = vsub.f32 %v2205_v60, %v2261_v17  ;;  %v6056_v17 = vld [vmem:[%s9959_s8 + $0x28] sm:$0xff] }
 0xd6c   :  { %v8478_v63 = vpop.eup %7074 }
 0xd6d   :  { %v2308_v54 = vmul.f32 1.442695, %v2288_v28  ;;  %2332 = vadd.xlane.f32.xlu0 %v8478_v63  ;;  %v8481_v56 = vpop.eup %7076  ;;  %v6055_v28 = vld [vmem:[%s9959_s8 + $0x20] sm:$0xff] }
 0xd6e   :  { %v2267_v53 = vpop.xlane.xlu0 %2266 }
 0xd6f   :  { %7082 = vpow2.f32 %v2308_v54  ;;  %v2291_v34 = vsub.f32 %v6615_v3, %v2267_v53  ;;  %v6058_v54 = vld [vmem:[%s9959_s8 + $0x38] sm:$0xff]  ;;  %v8546_v53 = vld [vmem:[#allocation4 + $0x4] sm:$0xf] }
 0xd70   :  { %7084 = vpow2.f32 %v2312_v8 }
 0xd71   :  { %2336 = vadd.xlane.f32.xlu0 %v8481_v56  ;;  %v2314_v42 = vmul.f32 1.442695, %v2291_v34 }
 0xd72   :  { %v2263_v49 = vpop.xlane.xlu0 %2262 }
 0xd73   :  { %v2289_v30 = vsub.f32 %v2208_v48, %v2263_v49 }
 0xd74   :  { %v8484_v58 = vpop.eup %7078 }
 0xd75   :  { %v2310_v20 = vmul.f32 1.442695, %v2289_v30  ;;  %2334 = vadd.xlane.f32.xlu1 %v8484_v58  ;;  %v8487_v45 = vpop.eup %7080 }
 0xd76   :  { %v2273_v7 = vpop.xlane.xlu0 %2272  ;;  %v2279_v44 = vpop.xlane.xlu1 %2278 }
 0xd77   :  { %7086 = vpow2.f32 %v2310_v20  ;;  %v2294_v50 = vsub.f32 %v8454_v18, %v2273_v7  ;;  %v2297_v60 = vsub.f32 %v8468_v24, %v2279_v44 }
 0xd78   :  { %7088 = vpow2.f32 %v2314_v42 }
 0xd79   :  { %2338 = vadd.xlane.f32.xlu1 %v8487_v45  ;;  %v2320_v21 = vmul.f32 1.442695, %v2294_v50  ;;  %v2326_v4 = vmul.f32 1.442695, %v2297_v60 }
 0xd7a   :  { %v2269_v16 = vpop.xlane.xlu0 %2268  ;;  %v2283_v48 = vpop.xlane.xlu1 %2282 }
 0xd7b   :  { %v2292_v15 = vsub.f32 %v8456_v35, %v2269_v16 }
 0xd7c   :  { %v8492_v36 = vpop.eup %7082 }
 0xd7d   :  { %v2316_v11 = vmul.f32 1.442695, %v2292_v15  ;;  %2340 = vadd.xlane.f32.xlu0 %v8492_v36  ;;  %v8496_v5 = vpop.eup %7084 }
 0xd7e   :  { %v2271_v57 = vpop.xlane.xlu0 %2270 }
 0xd7f   :  { %7090 = vpow2.f32 %v2316_v11  ;;  %v2293_v61 = vsub.f32 %v8460_v2, %v2271_v57  ;;  %v2299_v2 = vsub.f32 %v8466_v26, %v2283_v48 }
 0xd80   :  { %7092 = vpow2.f32 %v2320_v21 }
 0xd81   :  { %v2318_v59 = vmul.f32 1.442695, %v2293_v61  ;;  %2344 = vadd.xlane.f32.xlu0 %v8496_v5  ;;  %v2330_v19 = vmul.f32 1.442695, %v2299_v2 }
 0xd82   :  { %v2275_v3 = vpop.xlane.xlu0 %2274 }
 0xd83   :  { %7094 = vpow2.f32 %v2318_v59  ;;  %v2295_v18 = vsub.f32 %v8458_v12, %v2275_v3 }
 0xd84   :  { %v8501_v35 = vpop.eup %7086 }
 0xd85   :  { %v2322_v46 = vmul.f32 1.442695, %v2295_v18  ;;  %2342 = vadd.xlane.f32.xlu1 %v8501_v35  ;;  %v8506_v1 = vpop.eup %7088 }
 0xd86   :  { %v2277_v13 = vpop.xlane.xlu0 %2276 }
 0xd87   :  { %7096 = vpow2.f32 %v2322_v46  ;;  %v2296_v38 = vsub.f32 %v8464_v37, %v2277_v13 }
 0xd88   :  { %7098 = vpow2.f32 %v2326_v4 }
 0xd89   :  { %v2324_v24 = vmul.f32 1.442695, %v2296_v38  ;;  %2346 = vadd.xlane.f32.xlu1 %v8506_v1 }
 0xd8a   :  { %v2281_v12 = vpop.xlane.xlu0 %2280 }
 0xd8b   :  { %7100 = vpow2.f32 %v2324_v24  ;;  %v2298_v39 = vsub.f32 %v8462_v22, %v2281_v12 }
 0xd8c   :  { %v8510_v29 = vpop.eup %7090  ;;  %7102 = vpow2.f32 %v2330_v19 }
 0xd8d   :  { %v2328_v14 = vmul.f32 1.442695, %v2298_v39  ;;  %2348 = vadd.xlane.f32.xlu0 %v8510_v29  ;;  %v8513_v26 = vpop.eup %7092 }
 0xd8f   :  { %7104 = vpow2.f32 %v2328_v14 }
 0xd90   :  { %v8515_v37 = vpop.eup %7094 }
 0xd91   :  { %2352 = vadd.xlane.f32.xlu0 %v8513_v26  ;;  %2350 = vadd.xlane.f32.xlu1 %v8515_v37 }
 0xd94   :  { %v8519_v52 = vpop.eup %7096 }
 0xd95   :  { %2354 = vadd.xlane.f32.xlu1 %v8519_v52  ;;  %v8522_v22 = vpop.eup %7098 }
 0xd98   :  { %v8524_v51 = vpop.eup %7100 }
 0xd99   :  { %2356 = vadd.xlane.f32.xlu0 %v8524_v51  ;;  %2358 = vadd.xlane.f32.xlu1 %v8522_v22  ;;  %v8528_v9 = vpop.eup %7102 }
 0xd9c   :  { %v8530_v41 = vpop.eup %7104 }
 0xd9d   :  { %2360 = vadd.xlane.f32.xlu0 %v8530_v41  ;;  %2362 = vadd.xlane.f32.xlu1 %v8528_v9 }
 0xdae   :  { %2045 = vperm.xlu1 %6847, %v6056_v17  }
 0xdb2   :  { %2050 = vperm.xlu1 %6847, %v6057_v43  }
 0xdb3   :  { %2040 = vperm.xlu0 %6846, %v6055_v28  }
 0xdb7   :  { %2055 = vperm.xlu0 %6846, %v6058_v54  }
 0xdd5   :  { %2538 = vxpose.xlu1.c.b16.start.end [1/1] (short) %v8546_v53, 128 }
 0xdf6   :  { %v2333_v8 = vpop.xlane.xlu0 %2332 }
 0xdfa   :  { %v2337_v34 = vpop.xlane.xlu0 %2336 }
 0xdfe   :  { %v2335_v49 = vpop.xlane.xlu1 %2334 }
 0xdff   :  { %7106 = vrcp.f32 %v2335_v49 }
 0xe00   :  { %7108 = vrcp.f32 %v2333_v8 }
 0xe01   :  { %7110 = vrcp.f32 %v2337_v34 }
 0xe02   :  { %v2339_v30 = vpop.xlane.xlu1 %2338 }
 0xe03   :  { %7112 = vrcp.f32 %v2339_v30 }
 0xe06   :  { %v2341_v20 = vpop.xlane.xlu0 %2340 }
 0xe07   :  { %7114 = vrcp.f32 %v2341_v20 }
 0xe0a   :  { %v2345_v16 = vpop.xlane.xlu0 %2344 }
 0xe0c   :  { %v7107_v7 = vpop.eup %7106 }
 0xe0d   :  { %v7109_v50 = vpop.eup %7108  ;;  %v8550_v15 = vmul.f32 %v7107_v7, %v8484_v58 }
 0xe0e   :  { %v2343_v42 = vpop.xlane.xlu1 %2342  ;;  %v8553_v44 = vmul.f32 %v7109_v50, %v8478_v63  ;;  %v7111_v21 = vpop.eup %7110 }
 0xe0f   :  { %7116 = vrcp.f32 %v2343_v42  ;;  %v8558_v59 = vmul.f32 %v7111_v21, %v8481_v56 }
 0xe10   :  { %7118 = vrcp.f32 %v2345_v16  ;;  %v2396_v57 = vadd.f32 %v8550_v15, %v8553_v44  ;;  %v7113_v61 = vpop.eup %7112 }
 0xe11   :  { %v8562_v48 = vmul.f32 %v7113_v61, %v8487_v45 }
 0xe12   :  { %v2347_v11 = vpop.xlane.xlu1 %2346  ;;  %v2397_v58 = vadd.f32 %v2396_v57, %v8558_v59 }
 0xe13   :  { %7120 = vrcp.f32 %v2347_v11 }
 0xe14   :  { %v7115_v3 = vpop.eup %7114  ;;  %v2398_v2 = vadd.f32 %v2397_v58, %v8562_v48 }
 0xe15   :  { %v8565_v63 = vmul.f32 %v7115_v3, %v8492_v36 }
 0xe16   :  { %v2349_v60 = vpop.xlane.xlu0 %2348 }
 0xe17   :  { %7122 = vrcp.f32 %v2349_v60  ;;  %v2399_v13 = vadd.f32 %v2398_v2, %v8565_v63 }
 0xe1a   :  { %v2353_v18 = vpop.xlane.xlu0 %2352  ;;  %v2351_v46 = vpop.xlane.xlu1 %2350 }
 0xe1b   :  { %7124 = vrcp.f32 %v2353_v18 }
 0xe1c   :  { %v7117_v4 = vpop.eup %7116  ;;  %7126 = vrcp.f32 %v2351_v46 }
 0xe1d   :  { %v8569_v56 = vmul.f32 %v7117_v4, %v8501_v35  ;;  %v7119_v24 = vpop.eup %7118 }
 0xe1e   :  { %v2355_v38 = vpop.xlane.xlu1 %2354  ;;  %v8574_v36 = vmul.f32 %v7119_v24, %v8496_v5 }
 0xe1f   :  { %7128 = vrcp.f32 %v2355_v38  ;;  %v2400_v45 = vadd.f32 %v2399_v13, %v8569_v56 }
 0xe20   :  { %v7121_v19 = vpop.eup %7120 }
 0xe21   :  { %v2401_v17 = vadd.f32 %v2400_v45, %v8574_v36  ;;  %v8578_v35 = vmul.f32 %v7121_v19, %v8506_v1 }
 0xe22   :  { %v2357_v12 = vpop.xlane.xlu0 %2356  ;;  %v2359_v39 = vpop.xlane.xlu1 %2358 }
 0xe23   :  { %7130 = vrcp.f32 %v2357_v12  ;;  %v2402_v5 = vadd.f32 %v2401_v17, %v8578_v35 }
 0xe24   :  { %v7123_v14 = vpop.eup %7122  ;;  %7132 = vrcp.f32 %v2359_v39 }
 0xe25   :  { %v8581_v43 = vmul.f32 %v7123_v14, %v8510_v29 }
 0xe26   :  { %v2361_v28 = vpop.xlane.xlu0 %2360  ;;  %v2363_v54 = vpop.xlane.xlu1 %2362 }
 0xe27   :  { %7134 = vrcp.f32 %v2361_v28  ;;  %v2403_v34 = vadd.f32 %v2402_v5, %v8581_v43 }
 0xe28   :  { %v7125_v8 = vpop.eup %7124  ;;  %7136 = vrcp.f32 %v2363_v54 }
 0xe29   :  { %v7127_v49 = vpop.eup %7126  ;;  %v2390_v42 = vmul.f32 %v7125_v8, %v8513_v26 }
 0xe2a   :  { %v8586_v30 = vmul.f32 %v7127_v49, %v8515_v37  ;;  %v2046_v20 = vpop.permute.xlu1 %2045 }
 0xe2b   :  { %v2060_v1 = vadd.f32 %v2046_v20, %v8432_v25  ;;  %v2061_v7 = vadd.f32 %v2046_v20, %v8434_v23 }
 0xe2c   :  { %v7129_v29 = vpop.eup %7128  ;;  %v2404_v50 = vadd.f32 %v2403_v34, %v8586_v30 }
 0xe2d   :  { %v2391_v16 = vmul.f32 %v7129_v29, %v8519_v52  ;;  %v6312_v11 = vpack.c.bf16 %v2061_v7, %v2060_v1 }
 0xe2e   :  { %v2041_v21 = vpop.permute.xlu0 %2040  ;;  %v2051_v57 = vpop.permute.xlu1 %2050  ;;  %v2405_v61 = vadd.f32 %v2404_v50, %v2390_v42 }
 0xe2f   :  { %2091 = vst [vmem:[#allocation5 + $0x8] sm:$0xff] %v6312_v11  ;;  %v2058_v37 = vadd.f32 %v2041_v21, %v8428_v32  ;;  %v2059_v60 = vadd.f32 %v2041_v21, %v8430_v0  ;;  %v2062_v25 = vadd.f32 %v2051_v57, %v8436_v10  ;;  %v2063_v23 = vadd.f32 %v2051_v57, %v8438_v6 }
 0xe30   :  { %v7131_v3 = vpop.eup %7130  ;;  %v2406_v52 = vadd.f32 %v2405_v61, %v2391_v16 }
 0xe31   :  { %v7133_v58 = vpop.eup %7132  ;;  %v2392_v26 = vmul.f32 %v7131_v3, %v8524_v51  ;;  %v6311_v18 = vpack.c.bf16 %v2059_v60, %v2058_v37  ;;  %v6313_v46 = vpack.c.bf16 %v2063_v23, %v2062_v25 }
 0xe32   :  { %v2056_v4 = vpop.permute.xlu0 %2055  ;;  %v2393_v0 = vmul.f32 %v7133_v58, %v8522_v22  ;;  %v2579_v58 = vsel %vm793_vm1, %v8546_v53, 0 }
 0xe33   :  { %2090 = vst [vmem:[#allocation5] sm:$0xff] %v6311_v18  ;;  %2092 = vst [vmem:[#allocation5 + $0x10] sm:$0xff] %v6313_v46  ;;  %v2064_v2 = vadd.f32 %v2056_v4, %v8440_v27  ;;  %v2065_v32 = vadd.f32 %v2056_v4, %v8442_v47  ;;  %v2407_v13 = vadd.f32 %v2406_v52, %v2392_v26 }
 0xe34   :  { %v7135_v10 = vpop.eup %7134 }
 0xe35   :  { %v7137_v38 = vpop.eup %7136  ;;  %v6314_v6 = vpack.c.bf16 %v2065_v32, %v2064_v2  ;;  %v2394_v24 = vmul.f32 %v7135_v10, %v8530_v41  ;;  %v2408_v45 = vadd.f32 %v2407_v13, %v2393_v0 }
 0xe36   :  { %v2395_v51 = vmul.f32 %v7137_v38, %v8528_v9 }
 0xe37   :  { %2093 = vst [vmem:[#allocation5 + $0x18] sm:$0xff] %v6314_v6  ;;  %v2409_v19 = vadd.f32 %v2408_v45, %v2394_v24  ;;  %v2546_v23 = vpop.trf.xlu1 }
 0xe39   :  { %v2410_v12 = vadd.f32 %v2409_v19, %v2395_v51 }
 0xe3a   :  { %v6876_v39 = vld [vmem:[#allocation5] ss:$8 sps:$4 sm:$0xff]   ;;  %v6877_v14 = vld [vmem:[#allocation5 + $0x4] ss:$8 sps:$4 sm:$0xff]  }
 0xe3b   :  { %v2411_v17 = vrot.slane %v2410_v12, 4  ;;  %6640 = vmatprep.mubr.bf16.mxu0 %v6876_v39  ;;  %6678 = vmatprep.mubr.bf16.mxu1 %v6877_v14 }
 0xe3d   :  { %v2412_v27 = vadd.f32 %v2411_v17, %v2410_v12 }
 0xe3f   :  { %v2413_v47 = vrot.slane %v2412_v27, 2 }
 0xe41   :  { %v2414_v22 = vadd.f32 %v2413_v47, %v2412_v27 }
 0xe43   :  { %v2415_v28 = vrot.slane %v2414_v22, 1 }
 0xe45   :  { %v2416_v54 = vadd.f32 %v2415_v28, %v2414_v22 }
 0xe47   :  { %v2417_v8 = vadd.f32 1e-09, %v2416_v54 }
 0xe49   :  { %7138 = vrcp.f32 %v2417_v8 }
 0xe56   :  { %v7139_v5 = vpop.eup %7138 }
 0xe57   :  { %v2433_v41 = vmul.f32 %v7139_v5, %v2394_v24  ;;  %v2434_v49 = vmul.f32 %v7139_v5, %v2395_v51  ;;  %v2431_v34 = vmul.f32 %v7139_v5, %v2392_v26  ;;  %v2432_v20 = vmul.f32 %v7139_v5, %v2393_v0 }
 0xe58   :  { %v2429_v7 = vmul.f32 %v7139_v5, %v2390_v42  ;;  %v2430_v29 = vmul.f32 %v7139_v5, %v2391_v16  ;;  %v2427_v11 = vmul.f32 %v7139_v5, %v8581_v43  ;;  %v2428_v21 = vmul.f32 %v7139_v5, %v8586_v30 }
 0xe59   :  { %v2442_v9 = vpack.c.bf16 %v2434_v49, %v2433_v41  ;;  %v2441_v1 = vpack.c.bf16 %v2432_v20, %v2431_v34  ;;  %v2425_v61 = vmul.f32 %v7139_v5, %v8574_v36  ;;  %v2426_v37 = vmul.f32 %v7139_v5, %v8578_v35 }
 0xe5a   :  { %v2440_v50 = vpack.c.bf16 %v2430_v29, %v2429_v7  ;;  %v2439_v57 = vpack.c.bf16 %v2428_v21, %v2427_v11  ;;  %v2423_v42 = vmul.f32 %v7139_v5, %v8565_v63  ;;  %v2424_v16 = vmul.f32 %v7139_v5, %v8569_v56  ;;  %v2547_v56 = vpop.trf.xlu1 }
 0xe5b   :  { %6624 = vmatprep.subr.bf16.mxu0 %v2442_v9  ;;  %v2438_v60 = vpack.c.bf16 %v2426_v37, %v2425_v61  ;;  %v2421_v43 = vmul.f32 %v7139_v5, %v8558_v59  ;;  %v2422_v30 = vmul.f32 %v7139_v5, %v8562_v48  ;;  %v2419_v35 = vmul.f32 %v7139_v5, %v8553_v44  ;;  %v6878_v59 = vld [vmem:[#allocation5 + $0x10] ss:$8 sps:$4 sm:$0xff]  }
 0xe5c   :  { %6625 = vmatpush3.bf16.msra.mxu0 %v2442_v9  ;;  %v2437_v25 = vpack.c.bf16 %v2424_v16, %v2423_v42  ;;  %v2420_v3 = vmul.f32 %v7139_v5, %v8550_v15 }
 0xe5d   :  { %6626 = vmatprep.subr.bf16.mxu0 %v2441_v1  ;;  %v2436_v36 = vpack.c.bf16 %v2422_v30, %v2421_v43 }
 0xe5e   :  { %v2435_v63 = vpack.c.bf16 %v2420_v3, %v2419_v35  ;;  %v2548_v48 = vpop.trf.xlu1 }
 0xe60   :  { %6627 = vmatpush3.bf16.msra.mxu0 %v2441_v1 }
 0xe61   :  { %6628 = vmatprep.subr.bf16.mxu0 %v2440_v50 }
 0xe62   :  { %v2549_v15 = vpop.trf.xlu1 }
 0xe64   :  { %6629 = vmatpush3.bf16.msra.mxu0 %v2440_v50 }
 0xe65   :  { %6630 = vmatprep.subr.bf16.mxu0 %v2439_v57 }
 0xe66   :  { %v2550_v44 = vpop.trf.xlu1 }
 0xe68   :  { %6631 = vmatpush3.bf16.msra.mxu0 %v2439_v57 }
 0xe69   :  { %6632 = vmatprep.subr.bf16.mxu0 %v2438_v60 }
 0xe6a   :  { %v2551_v26 = vpop.trf.xlu1 }
 0xe6c   :  { %6633 = vmatpush3.bf16.msra.mxu0 %v2438_v60 }
 0xe6d   :  { %6634 = vmatprep.subr.bf16.mxu0 %v2437_v25 }
 0xe6e   :  { %v2552_v18 = vpop.trf.xlu1 }
 0xe70   :  { %6635 = vmatpush3.bf16.msra.mxu0 %v2437_v25 }
 0xe71   :  { %6636 = vmatprep.subr.bf16.mxu0 %v2436_v36 }
 0xe74   :  { %6637 = vmatpush3.bf16.msra.mxu0 %v2436_v36 }
 0xe75   :  { %6638 = vmatprep.subr.bf16.mxu0 %v2435_v63 }
 0xe78   :  { %6639 = vmatpush3.bf16.msra.mxu0 %v2435_v63 }
 0xe79   :  { %6837 = vmatprep.subr.msk.bf16.mxu0 %vm793_vm1, %v8546_v53  ;;  %v2553_v53 = vpop.trf.xlu1 }
 0xe7b   :  { %6641 = vmatmul.mubr.bf16.vlgmr.msra.gmra.mxu0 %v6878_v59 }
 0xe7c   :  { %6645 = vmatpush3.bf16.msra.mxu0 %v2579_v58  ;;  %6646 = vmatprep.mubr.msk.bf16.mxu0 %vm768_vm2, %v2546_v23 }
 0xe83   :  { %6647 = vmatmul.mubr.msk.bf16.vlgmr.msra.gmra.mxu0 %vm768_vm2, %v2547_v56 }
 0xe84   :  { %6650 = vmatprep.mubr.msk.bf16.mxu0 %vm768_vm2, %v2548_v48 }
 0xe8b   :  { %6651 = vmatmul.mubr.msk.bf16.gmra.mxu0 %vm768_vm2, %v2549_v15 }
 0xe8c   :  { %6654 = vmatprep.mubr.msk.bf16.mxu0 %vm768_vm2, %v2550_v44 }
 0xe93   :  { %6655 = vmatmul.mubr.msk.bf16.gmra.mxu0 %vm768_vm2, %v2551_v26 }
 0xe94   :  { %6658 = vmatprep.mubr.msk.bf16.mxu0 %vm768_vm2, %v2552_v18 }
 0xe9b   :  { %6659 = vmatmul.mubr.msk.bf16.gmra.mxu0 %vm768_vm2, %v2553_v53 }
 0xf3b   :  { %v6642_v46 = vpop.f32.mrf.mxu0 }
 0xf3c   :  { %v2506_v52 = vsub.f32 %v8383_v40, %v6642_v46 }
 0xf3d   :  { %v2489_v4 = vpop.f32.mrf.mxu0 }
 0xf3e   :  { %v6318_v2 = vpack.c.bf16 %v2506_v52, %v2506_v52  ;;  %v2504_v32 = vsub.f32 %v8408_v62, %v2489_v4 }
 0xf3f   :  { %v6643_v0 = vpop.f32.mrf.mxu0 }
 0xf40   :  { %2526 = vst [vmem:[#allocation6 + $0x10] sm:$0xf] %v6318_v2  ;;  %v6316_v13 = vpack.c.bf16 %v2504_v32, %v2504_v32  ;;  %v2507_v10 = vsub.f32 %v8396_v55, %v6643_v0 }
 0xf41   :  { %v2492_v38 = vpop.f32.mrf.mxu0 }
 0xf42   :  { %2524 = vst [vmem:[#allocation6] sm:$0xf] %v6316_v13  ;;  %v6319_v6 = vpack.c.bf16 %v2507_v10, %v2507_v10  ;;  %v2505_v24 = vsub.f32 %v8403_v31, %v2492_v38 }
 0xf43   :  { %v6648_v45 = vpop.f32.mrf.mxu0 }
 0xf44   :  { %2527 = vst [vmem:[#allocation6 + $0x18] sm:$0xf] %v6319_v6  ;;  %v6317_v51 = vpack.c.bf16 %v2505_v24, %v2505_v24  ;;  %2682 = vmax.xlane.f32.xlu1 %v6648_v45 }
 0xf45   :  { %v2615_v19 = vpop.f32.mrf.mxu0 }
 0xf46   :  { %2525 = vst [vmem:[#allocation6 + $0x8] sm:$0xf] %v6317_v51  ;;  %2678 = vmax.xlane.f32.xlu0 %v2615_v19 }
 0xf47   :  { %v6649_v40 = vpop.f32.mrf.mxu0 }
 0xf49   :  { %v2618_v12 = vpop.f32.mrf.mxu0 }
 0xf4a   :  { %2684 = vmax.xlane.f32.xlu0 %v6649_v40 }
 0xf4b   :  { %v6652_v62 = vpop.f32.mrf.mxu0 }
 0xf4d   :  { %v2631_v39 = vpop.f32.mrf.mxu0 }
 0xf4e   :  { %2680 = vmax.xlane.f32.xlu0 %v2618_v12 }
 0xf4f   :  { %v6653_v14 = vpop.f32.mrf.mxu0 }
 0xf51   :  { %v2634_v55 = vpop.f32.mrf.mxu0 }
 0xf52   :  { %2690 = vmax.xlane.f32.xlu0 %v6652_v62 }
 0xf53   :  { %v8629_v17 = vpop.f32.mrf.mxu0 }
 0xf55   :  { %v8631_v27 = vpop.f32.mrf.mxu0 }
 0xf56   :  { %2686 = vmax.xlane.f32.xlu0 %v2631_v39 }
 0xf57   :  { %v8633_v31 = vpop.f32.mrf.mxu0 }
 0xf59   :  { %v8635_v47 = vpop.f32.mrf.mxu0 }
 0xf5a   :  { %2692 = vmax.xlane.f32.xlu0 %v6653_v14 }
 0xf5b   :  { %v8637_v22 = vpop.f32.mrf.mxu0 }
 0xf5d   :  { %v8639_v28 = vpop.f32.mrf.mxu0 }
 0xf5e   :  { %2688 = vmax.xlane.f32.xlu0 %v2634_v55 }
 0xf5f   :  { %v8641_v54 = vpop.f32.mrf.mxu0 }
 0xf61   :  { %v8643_v8 = vpop.f32.mrf.mxu0 }
 0xf62   :  { %2698 = vmax.xlane.f32.xlu0 %v8629_v17  ;;  %2704 = vmax.xlane.f32.xlu1 %v8643_v8 }
 0xf66   :  { %2694 = vmax.xlane.f32.xlu0 %v8631_v27  ;;  %2708 = vmax.xlane.f32.xlu1 %v8641_v54 }
 0xf6a   :  { %2696 = vmax.xlane.f32.xlu0 %v8635_v47 }
 0xf6e   :  { %2700 = vmax.xlane.f32.xlu0 %v8633_v31 }
 0xf72   :  { %2702 = vmax.xlane.f32.xlu0 %v8639_v28 }
 0xf76   :  { %2706 = vmax.xlane.f32.xlu0 %v8637_v22 }
 0xfcd   :  { %v2683_v5 = vpop.xlane.xlu1 %2682 }
 0xfce   :  { %v2712_v49 = vsub.f32 %v6648_v45, %v2683_v5 }
 0xfcf   :  { %v2679_v41 = vpop.xlane.xlu0 %2678 }
 0xfd0   :  { %v2710_v34 = vsub.f32 %v2615_v19, %v2679_v41  ;;  %v2730_v1 = vmul.f32 1.442695, %v2712_v49  ;;  %v6066_v41 = vld [vmem:[%s9961_s10 + $0x38] sm:$0xff]  ;;  %v6063_v49 = vld [vmem:[%s9961_s10 + $0x20] sm:$0xff] }
 0xfd2   :  { %v2726_v20 = vmul.f32 1.442695, %v2710_v34  ;;  %v6065_v34 = vld [vmem:[%s9961_s10 + $0x30] sm:$0xff] }
 0xfd3   :  { %v2685_v9 = vpop.xlane.xlu0 %2684 }
 0xfd4   :  { %7140 = vpow2.f32 %v2726_v20  ;;  %v2713_v29 = vsub.f32 %v6649_v40, %v2685_v9  ;;  %v6064_v20 = vld [vmem:[%s9961_s10 + $0x28] sm:$0xff] }
 0xfd5   :  { %7142 = vpow2.f32 %v2730_v1 }
 0xfd6   :  { %v2732_v57 = vmul.f32 1.442695, %v2713_v29 }
 0xfd7   :  { %v2681_v7 = vpop.xlane.xlu0 %2680 }
 0xfd8   :  { %v2711_v50 = vsub.f32 %v2618_v12, %v2681_v7 }
 0xfda   :  { %v2728_v11 = vmul.f32 1.442695, %v2711_v50 }
 0xfdb   :  { %v2691_v21 = vpop.xlane.xlu0 %2690 }
 0xfdc   :  { %7144 = vpow2.f32 %v2728_v11  ;;  %v2716_v37 = vsub.f32 %v6652_v62, %v2691_v21 }
 0xfdd   :  { %7146 = vpow2.f32 %v2732_v57 }
 0xfde   :  { %v2738_v43 = vmul.f32 1.442695, %v2716_v37 }
 0xfdf   :  { %v2687_v61 = vpop.xlane.xlu0 %2686 }
 0xfe0   :  { %v2714_v60 = vsub.f32 %v2631_v39, %v2687_v61 }
 0xfe1   :  { %v8653_v42 = vpop.eup %7140 }
 0xfe2   :  { %v2734_v16 = vmul.f32 1.442695, %v2714_v60  ;;  %2758 = vadd.xlane.f32.xlu0 %v8653_v42  ;;  %v8656_v30 = vpop.eup %7142 }
 0xfe3   :  { %v2693_v25 = vpop.xlane.xlu0 %2692 }
 0xfe4   :  { %7148 = vpow2.f32 %v2734_v16  ;;  %v2717_v36 = vsub.f32 %v6653_v14, %v2693_v25 }
 0xfe5   :  { %7150 = vpow2.f32 %v2738_v43 }
 0xfe6   :  { %2762 = vadd.xlane.f32.xlu0 %v8656_v30  ;;  %v2740_v59 = vmul.f32 1.442695, %v2717_v36 }
 0xfe7   :  { %v2689_v23 = vpop.xlane.xlu0 %2688 }
 0xfe8   :  { %v2715_v35 = vsub.f32 %v2634_v55, %v2689_v23 }
 0xfe9   :  { %v8659_v3 = vpop.eup %7144 }
 0xfea   :  { %v2736_v63 = vmul.f32 1.442695, %v2715_v35  ;;  %2760 = vadd.xlane.f32.xlu1 %v8659_v3  ;;  %v8662_v48 = vpop.eup %7146 }
 0xfeb   :  { %v2699_v56 = vpop.xlane.xlu0 %2698  ;;  %v2705_v18 = vpop.xlane.xlu1 %2704 }
 0xfec   :  { %7152 = vpow2.f32 %v2736_v63  ;;  %v2720_v58 = vsub.f32 %v8629_v17, %v2699_v56  ;;  %v2723_v0 = vsub.f32 %v8643_v8, %v2705_v18 }
 0xfed   :  { %7154 = vpow2.f32 %v2740_v59 }
 0xfee   :  { %2764 = vadd.xlane.f32.xlu1 %v8662_v48  ;;  %v2746_v46 = vmul.f32 1.442695, %v2720_v58  ;;  %v2752_v45 = vmul.f32 1.442695, %v2723_v0 }
 0xfef   :  { %v2695_v15 = vpop.xlane.xlu0 %2694  ;;  %v2709_v10 = vpop.xlane.xlu1 %2708 }
 0xff0   :  { %v2718_v44 = vsub.f32 %v8631_v27, %v2695_v15  ;;  %v2725_v51 = vsub.f32 %v8641_v54, %v2709_v10 }
 0xff1   :  { %v8667_v26 = vpop.eup %7148 }
 0xff2   :  { %v2742_v53 = vmul.f32 1.442695, %v2718_v44  ;;  %2766 = vadd.xlane.f32.xlu0 %v8667_v26  ;;  %v8671_v2 = vpop.eup %7150  ;;  %v2756_v39 = vmul.f32 1.442695, %v2725_v51 }
 0xff3   :  { %v2697_v52 = vpop.xlane.xlu0 %2696 }
 0xff4   :  { %7156 = vpow2.f32 %v2742_v53  ;;  %v2719_v4 = vsub.f32 %v8635_v47, %v2697_v52 }
 0xff5   :  { %7158 = vpow2.f32 %v2746_v46 }
 0xff6   :  { %v2744_v32 = vmul.f32 1.442695, %v2719_v4  ;;  %2770 = vadd.xlane.f32.xlu0 %v8671_v2 }
 0xff7   :  { %v2701_v13 = vpop.xlane.xlu0 %2700 }
 0xff8   :  { %7160 = vpow2.f32 %v2744_v32  ;;  %v2721_v38 = vsub.f32 %v8633_v31, %v2701_v13 }
 0xff9   :  { %v8676_v6 = vpop.eup %7152 }
 0xffa   :  { %v2748_v24 = vmul.f32 1.442695, %v2721_v38  ;;  %2768 = vadd.xlane.f32.xlu1 %v8676_v6  ;;  %v8681_v12 = vpop.eup %7154 }
 0xffb   :  { %v2703_v19 = vpop.xlane.xlu0 %2702 }
 0xffc   :  { %7162 = vpow2.f32 %v2748_v24  ;;  %v2722_v40 = vsub.f32 %v8639_v28, %v2703_v19 }
 0xffd   :  { %7164 = vpow2.f32 %v2752_v45 }
 0xffe   :  { %v2750_v62 = vmul.f32 1.442695, %v2722_v40  ;;  %2772 = vadd.xlane.f32.xlu1 %v8681_v12 }
 0xfff   :  { %v2707_v14 = vpop.xlane.xlu0 %2706 }
0x1000   :  { %7166 = vpow2.f32 %v2750_v62  ;;  %v2724_v55 = vsub.f32 %v8637_v22, %v2707_v14 }
0x1001   :  { %v8685_v17 = vpop.eup %7156  ;;  %7168 = vpow2.f32 %v2756_v39 }
0x1002   :  { %v2754_v27 = vmul.f32 1.442695, %v2724_v55  ;;  %2774 = vadd.xlane.f32.xlu0 %v8685_v17  ;;  %v8688_v31 = vpop.eup %7158 }
0x1004   :  { %7170 = vpow2.f32 %v2754_v27 }
0x1005   :  { %v8690_v47 = vpop.eup %7160 }
0x1006   :  { %2778 = vadd.xlane.f32.xlu0 %v8688_v31  ;;  %2776 = vadd.xlane.f32.xlu1 %v8690_v47 }
0x1009   :  { %v8694_v28 = vpop.eup %7162 }
0x100a   :  { %2780 = vadd.xlane.f32.xlu1 %v8694_v28  ;;  %v8697_v22 = vpop.eup %7164 }
0x100d   :  { %v8699_v54 = vpop.eup %7166 }
0x100e   :  { %2782 = vadd.xlane.f32.xlu0 %v8699_v54  ;;  %2784 = vadd.xlane.f32.xlu1 %v8697_v22  ;;  %v8703_v8 = vpop.eup %7168 }
0x1011   :  { %v8705_v5 = vpop.eup %7170 }
0x1012   :  { %2786 = vadd.xlane.f32.xlu0 %v8705_v5  ;;  %2788 = vadd.xlane.f32.xlu1 %v8703_v8 }
0x1023   :  { %2975 = vperm.xlu1 %6847, %v6066_v41  }
0x1027   :  { %2960 = vperm.xlu1 %6847, %v6063_v49  }
0x1028   :  { %2970 = vperm.xlu0 %6846, %v6065_v34  }
0x102c   :  { %2965 = vperm.xlu0 %6846, %v6064_v20  }
0x106b   :  { %v2759_v9 = vpop.xlane.xlu0 %2758 }
0x106f   :  { %v2763_v7 = vpop.xlane.xlu0 %2762 }
0x1073   :  { %v2761_v1 = vpop.xlane.xlu1 %2760 }
0x1074   :  { %7172 = vrcp.f32 %v2761_v1 }
0x1075   :  { %7174 = vrcp.f32 %v2759_v9 }
0x1076   :  { %7176 = vrcp.f32 %v2763_v7 }
0x1077   :  { %v2765_v29 = vpop.xlane.xlu1 %2764 }
0x1078   :  { %7178 = vrcp.f32 %v2765_v29 }
0x107b   :  { %v2767_v50 = vpop.xlane.xlu0 %2766 }
0x107c   :  { %7180 = vrcp.f32 %v2767_v50 }
0x107f   :  { %v2771_v61 = vpop.xlane.xlu0 %2770 }
0x1081   :  { %v7173_v11 = vpop.eup %7172 }
0x1082   :  { %v7175_v57 = vpop.eup %7174  ;;  %v8722_v37 = vmul.f32 %v7173_v11, %v8659_v3 }
0x1083   :  { %v2769_v21 = vpop.xlane.xlu1 %2768  ;;  %v8725_v60 = vmul.f32 %v7175_v57, %v8653_v42  ;;  %v7177_v25 = vpop.eup %7176 }
0x1084   :  { %7182 = vrcp.f32 %v2769_v21  ;;  %v8730_v36 = vmul.f32 %v7177_v25, %v8656_v30 }
0x1085   :  { %7184 = vrcp.f32 %v2771_v61  ;;  %v2822_v43 = vadd.f32 %v8722_v37, %v8725_v60  ;;  %v7179_v23 = vpop.eup %7178 }
0x1086   :  { %v8734_v56 = vmul.f32 %v7179_v23, %v8662_v48 }
0x1087   :  { %v2773_v16 = vpop.xlane.xlu1 %2772  ;;  %v2823_v3 = vadd.f32 %v2822_v43, %v8730_v36 }
0x1088   :  { %7186 = vrcp.f32 %v2773_v16 }
0x1089   :  { %v7181_v63 = vpop.eup %7180  ;;  %v2824_v44 = vadd.f32 %v2823_v3, %v8734_v56 }
0x108a   :  { %v8737_v42 = vmul.f32 %v7181_v63, %v8667_v26 }
0x108b   :  { %v2775_v35 = vpop.xlane.xlu0 %2774 }
0x108c   :  { %7188 = vrcp.f32 %v2775_v35  ;;  %v2825_v18 = vadd.f32 %v2824_v44, %v8737_v42 }
0x108f   :  { %v2779_v59 = vpop.xlane.xlu0 %2778  ;;  %v2777_v58 = vpop.xlane.xlu1 %2776 }
0x1090   :  { %7190 = vrcp.f32 %v2779_v59 }
0x1091   :  { %v7183_v15 = vpop.eup %7182  ;;  %7192 = vrcp.f32 %v2777_v58 }
0x1092   :  { %v8741_v30 = vmul.f32 %v7183_v15, %v8676_v6  ;;  %v7185_v46 = vpop.eup %7184 }
0x1093   :  { %v2781_v53 = vpop.xlane.xlu1 %2780  ;;  %v2812_v26 = vmul.f32 %v7185_v46, %v8671_v2 }
0x1094   :  { %7194 = vrcp.f32 %v2781_v53  ;;  %v2826_v48 = vadd.f32 %v2825_v18, %v8741_v30 }
0x1095   :  { %v7187_v52 = vpop.eup %7186 }
0x1096   :  { %v2827_v13 = vadd.f32 %v2826_v48, %v2812_v26  ;;  %v2813_v10 = vmul.f32 %v7187_v52, %v8681_v12 }
0x1097   :  { %v2783_v4 = vpop.xlane.xlu0 %2782  ;;  %v2785_v32 = vpop.xlane.xlu1 %2784 }
0x1098   :  { %7196 = vrcp.f32 %v2783_v4  ;;  %v2828_v51 = vadd.f32 %v2827_v13, %v2813_v10 }
0x1099   :  { %v7189_v0 = vpop.eup %7188  ;;  %7198 = vrcp.f32 %v2785_v32 }
0x109a   :  { %v2814_v38 = vmul.f32 %v7189_v0, %v8685_v17 }
0x109b   :  { %v2787_v6 = vpop.xlane.xlu0 %2786  ;;  %v2789_v24 = vpop.xlane.xlu1 %2788 }
0x109c   :  { %7200 = vrcp.f32 %v2787_v6  ;;  %v2829_v40 = vadd.f32 %v2828_v51, %v2814_v38  ;;  %v8765_v6 = vld [vmem:[#allocation7 + $0x8] sm:$0xff] }
0x109d   :  { %v7191_v45 = vpop.eup %7190  ;;  %7202 = vrcp.f32 %v2789_v24 }
0x109e   :  { %v7193_v19 = vpop.eup %7192  ;;  %v2816_v39 = vmul.f32 %v7191_v45, %v8688_v31  ;;  %v8768_v45 = vld [vmem:[#allocation7 + $0x38] sm:$0xff] }
0x109f   :  { %v2815_v2 = vmul.f32 %v7193_v19, %v8690_v47 }
0x10a1   :  { %v7195_v62 = vpop.eup %7194  ;;  %v2830_v14 = vadd.f32 %v2829_v40, %v2815_v2 }
0x10a2   :  { %v2817_v55 = vmul.f32 %v7195_v62, %v8694_v28 }
0x10a3   :  { %v2831_v12 = vadd.f32 %v2830_v14, %v2816_v39 }
0x10a5   :  { %v7197_v27 = vpop.eup %7196  ;;  %v2832_v49 = vadd.f32 %v2831_v12, %v2817_v55 }
0x10a6   :  { %v7199_v41 = vpop.eup %7198  ;;  %v2818_v17 = vmul.f32 %v7197_v27, %v8699_v54  ;;  %v6882_v27 = vld [vmem:[#allocation6 + $0x10] ss:$8 sps:$4 sm:$0xff]  }
0x10a7   :  { %v2819_v34 = vmul.f32 %v7199_v41, %v8697_v22 }
0x10a8   :  { %v2833_v20 = vadd.f32 %v2832_v49, %v2818_v17  ;;  %v6886_v49 = vld [vmem:[%s9960_s9 + $0x10] sm:$0xff]  }
0x10a9   :  { %v7201_v9 = vpop.eup %7200 }
0x10aa   :  { %v7203_v1 = vpop.eup %7202  ;;  %v2820_v7 = vmul.f32 %v7201_v9, %v8705_v5  ;;  %v2834_v47 = vadd.f32 %v2833_v20, %v2819_v34 }
0x10ab   :  { %v2821_v29 = vmul.f32 %v7203_v1, %v8703_v8 }
0x10ac   :  { %v2835_v31 = vadd.f32 %v2834_v47, %v2820_v7 }
0x10ae   :  { %v2836_v50 = vadd.f32 %v2835_v31, %v2821_v29 }
0x10b0   :  { %v2837_v11 = vrot.slane %v2836_v50, 4 }
0x10b2   :  { %v2838_v28 = vadd.f32 %v2837_v11, %v2836_v50  ;;  %v2976_v11 = vpop.permute.xlu1 %2975 }
0x10b4   :  { %v2839_v21 = vrot.slane %v2838_v28, 2 }
0x10b6   :  { %v2840_v57 = vadd.f32 %v2839_v21, %v2838_v28 }
0x10b8   :  { %v2841_v61 = vrot.slane %v2840_v57, 1 }
0x10ba   :  { %v2842_v16 = vadd.f32 %v2841_v61, %v2840_v57 }
0x10bc   :  { %v2843_v54 = vadd.f32 1e-09, %v2842_v16 }
0x10be   :  { %7204 = vrcp.f32 %v2843_v54 }
0x10cb   :  { %v7205_v25 = vpop.eup %7204 }
0x10cc   :  { %v2859_v22 = vmul.f32 %v7205_v25, %v2820_v7  ;;  %v2860_v43 = vmul.f32 %v7205_v25, %v2821_v29  ;;  %v2857_v23 = vmul.f32 %v7205_v25, %v2818_v17  ;;  %v2858_v35 = vmul.f32 %v7205_v25, %v2819_v34  ;;  %v6885_v17 = vld [vmem:[#allocation6] ss:$8 sps:$4 sm:$0xff]   ;;  %v6887_v34 = vld [vmem:[%s9960_s9 + $0x18] sm:$0xff]   ;;  %v2971_v7 = vpop.permute.xlu0 %2970 }
0x10cd   :  { %v2855_v3 = vmul.f32 %v7205_v25, %v2816_v39  ;;  %v2856_v8 = vmul.f32 %v7205_v25, %v2817_v55  ;;  %v2853_v58 = vmul.f32 %v7205_v25, %v2814_v38  ;;  %v2854_v15 = vmul.f32 %v7205_v25, %v2815_v2  ;;  %v8771_v2 = vld [vmem:[#allocation7 + $0x18] sm:$0xff] }
0x10ce   :  { %v2868_v63 = vpack.c.bf16 %v2860_v43, %v2859_v22  ;;  %v2867_v5 = vpack.c.bf16 %v2858_v35, %v2857_v23  ;;  %v2851_v18 = vmul.f32 %v7205_v25, %v2812_v26  ;;  %v2852_v53 = vmul.f32 %v7205_v25, %v2813_v10 }
0x10cf   :  { %v2866_v59 = vpack.c.bf16 %v2856_v8, %v2855_v3  ;;  %v2865_v44 = vpack.c.bf16 %v2854_v15, %v2853_v58  ;;  %v2849_v48 = vmul.f32 %v7205_v25, %v8737_v42  ;;  %v2850_v52 = vmul.f32 %v7205_v25, %v8741_v30  ;;  %v6879_v42 = vld [vmem:[#allocation5 + $0x14] ss:$8 sps:$4 sm:$0xff]   ;;  %v2961_v8 = vpop.permute.xlu1 %2960 }
0x10d0   :  { %6662 = vmatprep.subr.bf16.mxu1 %v2868_v63  ;;  %v2864_v46 = vpack.c.bf16 %v2852_v53, %v2851_v18  ;;  %v2847_v32 = vmul.f32 %v7205_v25, %v8730_v36  ;;  %v2848_v0 = vmul.f32 %v7205_v25, %v8734_v56  ;;  %v2845_v26 = vmul.f32 %v7205_v25, %v8725_v60  ;;  %v8762_v36 = vld [vmem:[#allocation7 + $0x28] sm:$0xff]  ;;  %v2966_v21 = vpop.permute.xlu0 %2965 }
0x10d1   :  { %6663 = vmatpush3.bf16.msra.mxu1 %v2868_v63  ;;  %v2863_v4 = vpack.c.bf16 %v2850_v52, %v2849_v48  ;;  %v2846_v10 = vmul.f32 %v7205_v25, %v8722_v37 }
0x10d2   :  { %6664 = vmatprep.subr.bf16.mxu1 %v2867_v5  ;;  %v2862_v13 = vpack.c.bf16 %v2848_v0, %v2847_v32 }
0x10d3   :  { %v2861_v38 = vpack.c.bf16 %v2846_v10, %v2845_v26  ;;  %v6074_v26 = vld [vmem:[%s9963_s12 + $0x38] sm:$0xff] }
0x10d5   :  { %6665 = vmatpush3.bf16.msra.mxu1 %v2867_v5 }
0x10d6   :  { %6666 = vmatprep.subr.bf16.mxu1 %v2866_v59 }
0x10d9   :  { %6667 = vmatpush3.bf16.msra.mxu1 %v2866_v59 }
0x10da   :  { %6668 = vmatprep.subr.bf16.mxu1 %v2865_v44 }
0x10dd   :  { %6669 = vmatpush3.bf16.msra.mxu1 %v2865_v44 }
0x10de   :  { %6670 = vmatprep.subr.bf16.mxu1 %v2864_v46 }
0x10e1   :  { %6671 = vmatpush3.bf16.msra.mxu1 %v2864_v46 }
0x10e2   :  { %6672 = vmatprep.subr.bf16.mxu1 %v2863_v4 }
0x10e5   :  { %6673 = vmatpush3.bf16.msra.mxu1 %v2863_v4 }
0x10e6   :  { %6674 = vmatprep.subr.bf16.mxu1 %v2862_v13 }
0x10e9   :  { %6675 = vmatpush3.bf16.msra.mxu1 %v2862_v13  ;;  %v6073_v13 = vld [vmem:[%s9963_s12 + $0x30] sm:$0xff] }
0x10ea   :  { %6676 = vmatprep.subr.bf16.mxu1 %v2861_v38 }
0x10ed   :  { %6677 = vmatpush3.bf16.msra.mxu1 %v2861_v38 }
0x10f0   :  { %6679 = vmatmul.mubr.bf16.vlgmr.msra.gmra.mxu1 %v6879_v42 }
0x10f1   :  { %3046 = vmatprep.mubr.bf16.mxu1 %v9973_v33 }
0x11b0   :  { %v6680_v56 = vpop.f32.mrf.mxu1 }
0x11b1   :  { %v2932_v30 = vsub.f32 %v8762_v36, %v6680_v56 }
0x11b2   :  { %v2915_v60 = vpop.f32.mrf.mxu1 }
0x11b3   :  { %v6322_v24 = vpack.c.bf16 %v2932_v30, %v2932_v30  ;;  %v2930_v37 = vsub.f32 %v8765_v6, %v2915_v60 }
0x11b4   :  { %v6681_v51 = vpop.f32.mrf.mxu1 }
0x11b5   :  { %2952 = vst [vmem:[#allocation6 + $0x14] sm:$0xf] %v6322_v24  ;;  %v6320_v19 = vpack.c.bf16 %v2930_v37, %v2930_v37  ;;  %v2933_v40 = vsub.f32 %v8768_v45, %v6681_v51 }
0x11b6   :  { %v2918_v62 = vpop.f32.mrf.mxu1 }
0x11b7   :  { %2950 = vst [vmem:[#allocation6 + $0x4] sm:$0xf] %v6320_v19  ;;  %v6323_v39 = vpack.c.bf16 %v2933_v40, %v2933_v40  ;;  %v2931_v14 = vsub.f32 %v8771_v2, %v2918_v62 }
0x11b9   :  { %2953 = vst [vmem:[#allocation6 + $0x1c] sm:$0xf] %v6323_v39  ;;  %v6321_v55 = vpack.c.bf16 %v2931_v14, %v2931_v14 }
0x11bb   :  { %2951 = vst [vmem:[#allocation6 + $0xc] sm:$0xf] %v6321_v55 }
0x11c0   :  { %v6880_v12 = vld [vmem:[#allocation6 + $0x14] ss:$8 sps:$4 sm:$0xff]  }
0x11c1   :  { %3026 = vmatprep.subr.bf16.mxu1 %v6880_v12 }
0x11c2   :  { %v6883_v41 = vld [vmem:[#allocation6 + $0x4] ss:$8 sps:$4 sm:$0xff]   ;;  %3027 = vmatpush1.bf16.msra.mxu1 %v6882_v27 }
0x11c3   :  { %3028 = vmatprep.subr.bf16.mxu1 %v6883_v41 }
0x11c6   :  { %3029 = vmatpush1.bf16.msra.mxu1 %v6885_v17 }
0x11c9   :  { %6124 = vmatmul.mubr.msk.bf16.vlgmr.msra.gmra.mxu1 %vm84_vm0, %v6886_v49 }
0x11ca   :  { %3056 = vmatprep.mubr.bf16.mxu1 %v9973_v33 }
0x11d1   :  { %6125 = vmatmul.mubr.msk.bf16.gmra.mxu1 %vm84_vm0, %v6887_v34 }
0x11d2   :  { %3364 = vmatprep.mubr.bf16.mxu1 %v9973_v33 }
0x1289   :  { %v3048_v20 = vpop.f32.mrf.mxu1 }
0x128a   :  { %v8812_v44 = vadd.f32 %v3048_v20, %v2961_v8 }
0x128b   :  { %v3050_v9 = vpop.f32.mrf.mxu1 }
0x128c   :  { %v8806_v59 = vadd.f32 %v3050_v9, %v2961_v8  ;;  %v3091_v4 = vmul.f32 %v8812_v44, %v8812_v44  ;;  %v6068_v8 = vld [vmem:[%s9962_s11 + $0x28] sm:$0xff] }
0x128d   :  { %v3052_v1 = vpop.f32.mrf.mxu1 }
0x128e   :  { %v8796_v43 = vadd.f32 %v3052_v1, %v2966_v21  ;;  %v3092_v46 = vmul.f32 %v8806_v59, %v8806_v59  ;;  %v3075_v52 = vadd.f32 %v8806_v59, %v8812_v44 }
0x128f   :  { %v3054_v47 = vpop.f32.mrf.mxu1 }
0x1290   :  { %v8788_v61 = vadd.f32 %v3054_v47, %v2966_v21  ;;  %v3093_v48 = vmul.f32 %v8796_v43, %v8796_v43  ;;  %v3099_v0 = vadd.f32 %v3092_v46, %v3091_v4 }
0x1291   :  { %v3058_v29 = vpop.f32.mrf.mxu1 }
0x1292   :  { %v8784_v31 = vadd.f32 %v3058_v29, %v2971_v7  ;;  %v3078_v3 = vadd.f32 %v8788_v61, %v8796_v43  ;;  %v3094_v18 = vmul.f32 %v8788_v61, %v8788_v61 }
0x1293   :  { %v3060_v50 = vpop.f32.mrf.mxu1 }
0x1294   :  { %v8786_v28 = vadd.f32 %v3060_v50, %v2971_v7  ;;  %v3095_v16 = vmul.f32 %v8784_v31, %v8784_v31  ;;  %v3102_v32 = vadd.f32 %v3094_v18, %v3093_v48  ;;  %v6072_v48 = vld [vmem:[%s9963_s12 + $0x28] sm:$0xff] }
0x1295   :  { %v3062_v57 = vpop.f32.mrf.mxu1 }
0x1296   :  { %v3096_v54 = vmul.f32 %v8786_v28, %v8786_v28  ;;  %v3081_v25 = vadd.f32 %v8786_v28, %v8784_v31  ;;  %v8798_v23 = vadd.f32 %v3062_v57, %v2976_v11 }
0x1297   :  { %v3064_v22 = vpop.f32.mrf.mxu1 }
0x1298   :  { %v8800_v35 = vadd.f32 %v3064_v22, %v2976_v11  ;;  %3082 = vadd.xlane.f32.xlu1 %v3081_v25  ;;  %v3105_v63 = vadd.f32 %v3096_v54, %v3095_v16  ;;  %v3097_v58 = vmul.f32 %v8798_v23, %v8798_v23  ;;  %v6069_v54 = vld [vmem:[%s9962_s11 + $0x30] sm:$0xff] }
0x129a   :  { %v3098_v5 = vmul.f32 %v8800_v35, %v8800_v35  ;;  %3106 = vadd.xlane.f32.xlu0 %v3105_v63  ;;  %v3084_v15 = vadd.f32 %v8800_v35, %v8798_v23  ;;  %v6070_v63 = vld [vmem:[%s9962_s11 + $0x38] sm:$0xff] }
0x129c   :  { %3079 = vadd.xlane.f32.xlu1 %v3078_v3  ;;  %v3108_v53 = vadd.f32 %v3098_v5, %v3097_v58 }
0x129e   :  { %3085 = vadd.xlane.f32.xlu0 %v3084_v15  ;;  %v6067_v15 = vld [vmem:[%s9962_s11 + $0x20] sm:$0xff] }
0x12a0   :  { %3109 = vadd.xlane.f32.xlu1 %v3108_v53 }
0x12a2   :  { %3076 = vadd.xlane.f32.xlu0 %v3075_v52  ;;  %v6071_v52 = vld [vmem:[%s9963_s12 + $0x20] sm:$0xff] }
0x12a4   :  { %3103 = vadd.xlane.f32.xlu1 %v3102_v32 }
0x12a6   :  { %3100 = vadd.xlane.f32.xlu0 %v3099_v0 }
0x12b5   :  { %3187 = vperm.xlu1 %6847, %v6073_v13  }
0x12bc   :  { %3192 = vperm.xlu0 %6846, %v6074_v26  }
0x1321   :  { %v3083_v10 = vpop.xlane.xlu1 %3082 }
0x1322   :  { %v3089_v38 = vmul.f32 0.00390625, %v3083_v10 }
0x1323   :  { %v3107_v42 = vpop.xlane.xlu0 %3106 }
0x1324   :  { %v3113_v56 = vmul.f32 0.00390625, %v3107_v42  ;;  %v3117_v30 = vmul.f32 %v3089_v38, %v3089_v38  ;;  %v3143_v32 = vsub.f32 %v8784_v31, %v3089_v38  ;;  %v3144_v0 = vsub.f32 %v8786_v28, %v3089_v38 }
0x1325   :  { %v3080_v60 = vpop.xlane.xlu1 %3079 }
0x1326   :  { %v3121_v24 = vsub.f32 %v3113_v56, %v3117_v30  ;;  %v8832_v39 = vmul.f32 0.00390625, %v3080_v60 }
0x1327   :  { %v3086_v37 = vpop.xlane.xlu0 %3085 }
0x1328   :  { %v3125_v51 = vmax.f32 %v3121_v24, 0.0  ;;  %v8830_v19 = vmul.f32 0.00390625, %v3086_v37  ;;  %v3116_v34 = vmul.f32 %v8832_v39, %v8832_v39 }
0x1329   :  { %v3110_v40 = vpop.xlane.xlu1 %3109 }
0x132a   :  { %v3129_v62 = vadd.f32 1e-05, %v3125_v51  ;;  %v3118_v14 = vmul.f32 %v8830_v19, %v8830_v19  ;;  %v3114_v55 = vmul.f32 0.00390625, %v3110_v40  ;;  %v3145_v37 = vsub.f32 %v8798_v23, %v8830_v19  ;;  %v3071_v40 = vld [vmem:[#allocation7 + $0x20] sm:$0xff] }
0x132b   :  { %v3077_v12 = vpop.xlane.xlu0 %3076  ;;  %v3146_v51 = vsub.f32 %v8800_v35, %v8830_v19  ;;  %v3141_v23 = vsub.f32 %v8796_v43, %v8832_v39  ;;  %v3142_v35 = vsub.f32 %v8788_v61, %v8832_v39  ;;  %v3073_v19 = vld [vmem:[#allocation7 + $0x30] sm:$0xff] }
0x132c   :  { %7206 = vrsqrt.f32 %v3129_v62  ;;  %v3122_v27 = vsub.f32 %v3114_v55, %v3118_v14  ;;  %v8836_v41 = vmul.f32 0.00390625, %v3077_v12 }
0x132d   :  { %v3104_v17 = vpop.xlane.xlu1 %3103 }
0x132e   :  { %v3126_v49 = vmax.f32 %v3122_v27, 0.0  ;;  %v3112_v20 = vmul.f32 0.00390625, %v3104_v17  ;;  %v3115_v47 = vmul.f32 %v8836_v41, %v8836_v41 }
0x132f   :  { %v3101_v9 = vpop.xlane.xlu0 %3100 }
0x1330   :  { %v3130_v1 = vadd.f32 1e-05, %v3126_v49  ;;  %v3120_v7 = vsub.f32 %v3112_v20, %v3116_v34  ;;  %v3111_v29 = vmul.f32 0.00390625, %v3101_v9  ;;  %v3139_v34 = vsub.f32 %v8812_v44, %v8836_v41 }
0x1331   :  { %v3188_v42 = vpop.permute.xlu1 %3187 }
0x1332   :  { %7208 = vrsqrt.f32 %v3130_v1  ;;  %v3124_v50 = vmax.f32 %v3120_v7, 0.0  ;;  %v3119_v11 = vsub.f32 %v3111_v29, %v3115_v47 }
0x1334   :  { %v3128_v21 = vadd.f32 1e-05, %v3124_v50  ;;  %v3123_v57 = vmax.f32 %v3119_v11, 0.0 }
0x1336   :  { %7210 = vrsqrt.f32 %v3128_v21  ;;  %v3127_v16 = vadd.f32 1e-05, %v3123_v57 }
0x1337   :  { %v3193_v4 = vpop.permute.xlu0 %3192 }
0x1338   :  { %7212 = vrsqrt.f32 %v3127_v16 }
0x1339   :  { %v7207_v25 = vpop.eup %7206 }
0x133a   :  { %v3137_v22 = vmul.f32 %v7207_v25, %v6069_v54 }
0x133c   :  { %3159 = vperm.xlu0 %6846, %v3137_v22  }
0x133f   :  { %v7209_v5 = vpop.eup %7208 }
0x1340   :  { %v3138_v3 = vmul.f32 %v7209_v5, %v6070_v63  ;;  %v3067_v5 = vld [vmem:[#allocation7] sm:$0xff] }
0x1342   :  { %3164 = vperm.xlu1 %6847, %v3138_v3  }
0x1343   :  { %v7211_v58 = vpop.eup %7210 }
0x1344   :  { %v3136_v18 = vmul.f32 %v7211_v58, %v6068_v8 }
0x1345   :  { %v7213_v53 = vpop.eup %7212 }
0x1346   :  { %3154 = vperm.xlu0 %6846, %v3136_v18   ;;  %v3135_v46 = vmul.f32 %v7213_v53, %v6067_v15  ;;  %v6888_v18 = vld [vmem:[%s9958_s7 + $0x28] sm:$0xff]  }
0x1348   :  { %3149 = vperm.xlu1 %6847, %v3135_v46  }
0x134a   :  { %3182 = vperm.xlu0 %6846, %v6072_v48  }
0x134c   :  { %3177 = vperm.xlu1 %6847, %v6071_v52  }
0x13b7   :  { %v3160_v13 = vpop.permute.xlu0 %3159 }
0x13b8   :  { %v3171_v26 = vmul.f32 %v3160_v13, %v3143_v32  ;;  %v3172_v10 = vmul.f32 %v3160_v13, %v3144_v0 }
0x13ba   :  { %v3199_v56 = vadd.f32 %v3188_v42, %v3171_v26  ;;  %v3200_v30 = vadd.f32 %v3188_v42, %v3172_v10 }
0x13bc   :  { %v3207_v60 = vmax.f32 %v3199_v56, 0.0  ;;  %v3208_v24 = vmax.f32 %v3200_v30, 0.0 }
0x13bd   :  { %v3165_v62 = vpop.permute.xlu1 %3164 }
0x13be   :  { %v3215_v14 = vadd.f32 %v3207_v60, %v3071_v40  ;;  %v3173_v31 = vmul.f32 %v3165_v62, %v3145_v37  ;;  %v3174_v55 = vmul.f32 %v3165_v62, %v3146_v51  ;;  %v3216_v28 = vadd.f32 %v3208_v24, %v8762_v36 }
0x13bf   :  { %v3140_v36 = vsub.f32 %v8806_v59, %v8836_v41  ;;  %v3069_v41 = vld [vmem:[#allocation7 + $0x10] sm:$0xff] }
0x13c0   :  { %3223 = vst [vmem:[#allocation7 + $0x60] sm:$0xff] %v3215_v14  ;;  %v3201_v38 = vadd.f32 %v3193_v4, %v3173_v31  ;;  %v3202_v12 = vadd.f32 %v3193_v4, %v3174_v55  ;;  %3224 = vst [vmem:[#allocation7 + $0x68] sm:$0xff] %v3216_v28 }
0x13c1   :  { %v3155_v27 = vpop.permute.xlu0 %3154 }
0x13c2   :  { %v3209_v17 = vmax.f32 %v3201_v38, 0.0  ;;  %v3210_v49 = vmax.f32 %v3202_v12, 0.0  ;;  %v3169_v1 = vmul.f32 %v3155_v27, %v3141_v23  ;;  %v3170_v7 = vmul.f32 %v3155_v27, %v3142_v35 }
0x13c3   :  { %v3150_v20 = vpop.permute.xlu1 %3149 }
0x13c4   :  { %v3217_v9 = vadd.f32 %v3209_v17, %v3073_v19  ;;  %v3218_v47 = vadd.f32 %v3210_v49, %v8768_v45  ;;  %v3167_v29 = vmul.f32 %v3150_v20, %v3139_v34  ;;  %v3168_v50 = vmul.f32 %v3150_v20, %v3140_v36 }
0x13c5   :  { %v3183_v11 = vpop.permute.xlu0 %3182 }
0x13c6   :  { %3225 = vst [vmem:[#allocation7 + $0x70] sm:$0xff] %v3217_v9  ;;  %v3197_v43 = vadd.f32 %v3183_v11, %v3169_v1  ;;  %v3198_v21 = vadd.f32 %v3183_v11, %v3170_v7  ;;  %3226 = vst [vmem:[#allocation7 + $0x78] sm:$0xff] %v3218_v47  ;;  %v6373_v61 = vpack.c.bf16 %v3218_v47, %v3216_v28 }
0x13c7   :  { %v6372_v39 = vpack.c.bf16 %v3217_v9, %v3215_v14  ;;  %v3178_v57 = vpop.permute.xlu1 %3177 }
0x13c8   :  { %v3205_v44 = vmax.f32 %v3197_v43, 0.0  ;;  %v3206_v16 = vmax.f32 %v3198_v21, 0.0  ;;  %v3195_v54 = vadd.f32 %v3178_v57, %v3167_v29  ;;  %v3196_v59 = vadd.f32 %v3178_v57, %v3168_v50  ;;  %3344 = vmatprep.subr.bf16.mxu1 %v6373_v61 }
0x13c9   :  { %3345 = vmatpush1.bf16.msra.mxu1 %v6372_v39 }
0x13ca   :  { %v3213_v25 = vadd.f32 %v3205_v44, %v3069_v41  ;;  %v3203_v22 = vmax.f32 %v3195_v54, 0.0  ;;  %v3204_v45 = vmax.f32 %v3196_v59, 0.0  ;;  %v3214_v63 = vadd.f32 %v3206_v16, %v8771_v2  ;;  %v6889_v2 = vld [vmem:[%s9958_s7 + $0x30] sm:$0xff]  }
0x13cc   :  { %3221 = vst [vmem:[#allocation7 + $0x50] sm:$0xff] %v3213_v25  ;;  %v3211_v3 = vadd.f32 %v3203_v22, %v3067_v5  ;;  %v3212_v8 = vadd.f32 %v3204_v45, %v8765_v6  ;;  %3222 = vst [vmem:[#allocation7 + $0x58] sm:$0xff] %v3214_v63  ;;  %v6890_v6 = vld [vmem:[%s9958_s7 + $0x38] ss:$0 sps:$4 sm:$0xff]  }
0x13ce   :  { %3219 = vst [vmem:[#allocation7 + $0x40] sm:$0xff] %v3211_v3  ;;  %3220 = vst [vmem:[#allocation7 + $0x48] sm:$0xff] %v3212_v8  ;;  %v6371_v58 = vpack.c.bf16 %v3214_v63, %v3212_v8  ;;  %v6370_v15 = vpack.c.bf16 %v3213_v25, %v3211_v3 }
0x13d0   :  { %3346 = vmatprep.subr.bf16.mxu1 %v6371_v58 }
0x13d1   :  { %3347 = vmatpush1.bf16.msra.mxu1 %v6370_v15 }
0x13d4   :  { %6162 = vmatmul.mubr.msk.bf16.vlgmr.msra.gmra.mxu1 %vm84_vm0, %v6888_v18 }
0x13d5   :  { %3374 = vmatprep.mubr.bf16.mxu1 %v9973_v33 }
0x13dc   :  { %6163 = vmatmul.mubr.msk.bf16.gmra.mxu1 %vm84_vm0, %v6889_v2 }
0x13dd   :  { %3384 = vmatprep.mubr.bf16.mxu1 %v9973_v33 }
0x13e4   :  { %6164 = vmatmul.mubr.msk.bf16.gmra.mxu1 %vm84_vm0, %v6890_v6 }
0x1494   :  { %v8892_v53 = vpop.f32.mrf.mxu1 }
0x1496   :  { %v8894_v46 = vpop.f32.mrf.mxu1 }
0x1498   :  { %v8896_v48 = vpop.f32.mrf.mxu1 }
0x149a   :  { %v8898_v52 = vpop.f32.mrf.mxu1 }
0x149c   :  { %v8900_v4 = vpop.f32.mrf.mxu1 }
0x149e   :  { %v8902_v32 = vpop.f32.mrf.mxu1 }
0x14a0   :  { %v8904_v0 = vpop.f32.mrf.mxu1 }
0x14a2   :  { %v8906_v13 = vpop.f32.mrf.mxu1 }
0x14a4   :  { %v3386_v26 = vpop.f32.mrf.mxu1 }
0x14a6   :  { %v3388_v10 = vpop.f32.mrf.mxu1 }
0x14a7   :  { %v6332_v42 = vpack.c.bf16 %v3388_v10, %v3386_v26 }
0x14a8   :  { %v3390_v56 = vpop.f32.mrf.mxu1 }
0x14a9   :  { %3457 = vst [vmem:[#allocation4] sm:$0xff] %v6332_v42 }
0x14aa   :  { %v3391_v30 = vpop.f32.mrf.mxu1 }
0x14b0   :  { %v3883_v60 = vld [vmem:[#allocation4 + $0x4] sm:$0xf]  ;;  %v3458_v24 = vld [vmem:[#allocation4] sm:$0xf] }
0x14b1   :  { %3892 = vxpose.xlu0.c.b16.start.end [1/1] (short) %v3883_v60, 128  ;;  %3467 = vxpose.xlu1.c.b16.start.end [1/1] (short) %v3458_v24, 128  ;;  %v3508_v37 = vsel %vm793_vm1, %v3458_v24, 0  ;;  %v3933_v62 = vsel %vm793_vm1, %v3883_v60, 0 }
0x14b2   :  { %6838 = vmatprep.subr.msk.bf16.mxu0 %vm793_vm1, %v3458_v24 }
0x14b3   :  { %6683 = vmatpush3.bf16.msra.mxu0 %v3508_v37 }
0x14b4   :  { %6839 = vmatprep.subr.msk.bf16.mxu0 %vm793_vm1, %v3883_v60 }
0x1513   :  { %v3475_v51 = vpop.trf.xlu1  ;;  %v3900_v55 = vpop.trf.xlu0 }
0x1514   :  { %6684 = vmatprep.mubr.msk.bf16.mxu0 %vm768_vm2, %v3475_v51 }
0x1517   :  { %v3476_v40 = vpop.trf.xlu1  ;;  %v3901_v12 = vpop.trf.xlu0 }
0x1518   :  { %6685 = vmatmul.mubr.msk.bf16.vlgmr.msra.gmra.mxu0 %vm768_vm2, %v3476_v40 }
0x1519   :  { %6721 = vmatpush3.bf16.msra.mxu0 %v3933_v62 }
0x151b   :  { %v3477_v14 = vpop.trf.xlu1  ;;  %v3902_v17 = vpop.trf.xlu0 }
0x151c   :  { %6688 = vmatprep.mubr.msk.bf16.mxu0 %vm768_vm2, %v3477_v14 }
0x151f   :  { %v3478_v31 = vpop.trf.xlu1  ;;  %v3903_v23 = vpop.trf.xlu0 }
0x1520   :  { %6689 = vmatmul.mubr.msk.bf16.gmra.mxu0 %vm768_vm2, %v3478_v31 }
0x1523   :  { %v3479_v28 = vpop.trf.xlu1  ;;  %v3904_v35 = vpop.trf.xlu0 }
0x1524   :  { %6692 = vmatprep.mubr.msk.bf16.mxu0 %vm768_vm2, %v3479_v28 }
0x1527   :  { %v3480_v38 = vpop.trf.xlu1  ;;  %v3905_v19 = vpop.trf.xlu0 }
0x1528   :  { %6693 = vmatmul.mubr.msk.bf16.gmra.mxu0 %vm768_vm2, %v3480_v38 }
0x152b   :  { %v3481_v27 = vpop.trf.xlu1  ;;  %v3906_v34 = vpop.trf.xlu0 }
0x152c   :  { %6696 = vmatprep.mubr.msk.bf16.mxu0 %vm768_vm2, %v3481_v27 }
0x152f   :  { %v3482_v49 = vpop.trf.xlu1  ;;  %v3907_v36 = vpop.trf.xlu0 }
0x1530   :  { %6697 = vmatmul.mubr.msk.bf16.gmra.mxu0 %vm768_vm2, %v3482_v49 }
0x1531   :  { %6722 = vmatprep.mubr.msk.bf16.mxu0 %vm768_vm2, %v3900_v55 }
0x1538   :  { %6723 = vmatmul.mubr.msk.bf16.vlgmr.msra.gmra.mxu0 %vm768_vm2, %v3901_v12 }
0x1539   :  { %6726 = vmatprep.mubr.msk.bf16.mxu0 %vm768_vm2, %v3902_v17 }
0x1540   :  { %6727 = vmatmul.mubr.msk.bf16.gmra.mxu0 %vm768_vm2, %v3903_v23 }
0x1541   :  { %6730 = vmatprep.mubr.msk.bf16.mxu0 %vm768_vm2, %v3904_v35 }
0x1548   :  { %6731 = vmatmul.mubr.msk.bf16.gmra.mxu0 %vm768_vm2, %v3905_v19 }
0x1549   :  { %6734 = vmatprep.mubr.msk.bf16.mxu0 %vm768_vm2, %v3906_v34 }
0x1550   :  { %6735 = vmatmul.mubr.msk.bf16.gmra.mxu0 %vm768_vm2, %v3907_v36 }
0x1551   :  { %4400 = vmatprep.mubr.bf16.mxu0 %v9973_v33 }
0x15d8   :  { %v8929_v20 = vpop.f32.mrf.mxu0 }
0x15da   :  { %v8931_v9 = vpop.f32.mrf.mxu0 }
0x15db   :  { %3607 = vmax.xlane.f32.xlu0 %v8931_v9 }
0x15dc   :  { %v8934_v1 = vpop.f32.mrf.mxu0 }
0x15de   :  { %v8936_v7 = vpop.f32.mrf.mxu0 }
0x15df   :  { %3611 = vmax.xlane.f32.xlu0 %v8929_v20  ;;  %3609 = vmax.xlane.f32.xlu1 %v8936_v7 }
0x15e0   :  { %v8940_v47 = vpop.f32.mrf.mxu0 }
0x15e2   :  { %v8942_v29 = vpop.f32.mrf.mxu0 }
0x15e3   :  { %3613 = vmax.xlane.f32.xlu1 %v8934_v1  ;;  %3615 = vmax.xlane.f32.xlu0 %v8942_v29 }
0x15e4   :  { %v8946_v50 = vpop.f32.mrf.mxu0 }
0x15e6   :  { %v8948_v11 = vpop.f32.mrf.mxu0 }
0x15e7   :  { %3619 = vmax.xlane.f32.xlu0 %v8940_v47  ;;  %3617 = vmax.xlane.f32.xlu1 %v8948_v11 }
0x15e8   :  { %v8952_v43 = vpop.f32.mrf.mxu0 }
0x15ea   :  { %v8954_v21 = vpop.f32.mrf.mxu0 }
0x15eb   :  { %3621 = vmax.xlane.f32.xlu1 %v8946_v50  ;;  %3623 = vmax.xlane.f32.xlu0 %v8954_v21 }
0x15ec   :  { %v8958_v61 = vpop.f32.mrf.mxu0 }
0x15ee   :  { %v8960_v39 = vpop.f32.mrf.mxu0 }
0x15ef   :  { %3627 = vmax.xlane.f32.xlu0 %v8952_v43  ;;  %3625 = vmax.xlane.f32.xlu1 %v8960_v39 }
0x15f0   :  { %v8964_v57 = vpop.f32.mrf.mxu0 }
0x15f2   :  { %v8966_v44 = vpop.f32.mrf.mxu0 }
0x15f3   :  { %3629 = vmax.xlane.f32.xlu1 %v8958_v61  ;;  %3631 = vmax.xlane.f32.xlu0 %v8966_v44 }
0x15f4   :  { %v8970_v16 = vpop.f32.mrf.mxu0 }
0x15f6   :  { %v8972_v54 = vpop.f32.mrf.mxu0 }
0x15f7   :  { %3635 = vmax.xlane.f32.xlu0 %v8964_v57  ;;  %3633 = vmax.xlane.f32.xlu1 %v8972_v54 }
0x15f8   :  { %v8976_v59 = vpop.f32.mrf.mxu0 }
0x15fa   :  { %v8978_v41 = vpop.f32.mrf.mxu0 }
0x15fb   :  { %3637 = vmax.xlane.f32.xlu1 %v8970_v16  ;;  %4032 = vmax.xlane.f32.xlu0 %v8978_v41 }
0x15fc   :  { %v8982_v25 = vpop.f32.mrf.mxu0 }
0x15fe   :  { %v8984_v22 = vpop.f32.mrf.mxu0 }
0x15ff   :  { %4036 = vmax.xlane.f32.xlu0 %v8976_v59  ;;  %4034 = vmax.xlane.f32.xlu1 %v8984_v22 }
0x1600   :  { %v8988_v45 = vpop.f32.mrf.mxu0 }
0x1602   :  { %v8990_v63 = vpop.f32.mrf.mxu0 }
0x1603   :  { %4038 = vmax.xlane.f32.xlu1 %v8982_v25  ;;  %4040 = vmax.xlane.f32.xlu0 %v8990_v63 }
0x1604   :  { %v8994_v5 = vpop.f32.mrf.mxu0 }
0x1606   :  { %v8996_v3 = vpop.f32.mrf.mxu0 }
0x1607   :  { %4044 = vmax.xlane.f32.xlu0 %v8988_v45  ;;  %4042 = vmax.xlane.f32.xlu1 %v8996_v3 }
0x1608   :  { %v9000_v8 = vpop.f32.mrf.mxu0 }
0x160a   :  { %v9002_v58 = vpop.f32.mrf.mxu0 }
0x160b   :  { %4046 = vmax.xlane.f32.xlu1 %v8994_v5  ;;  %4048 = vmax.xlane.f32.xlu0 %v9002_v58 }
0x160c   :  { %v9006_v15 = vpop.f32.mrf.mxu0 }
0x160e   :  { %v9008_v18 = vpop.f32.mrf.mxu0 }
0x160f   :  { %4052 = vmax.xlane.f32.xlu0 %v9000_v8  ;;  %4050 = vmax.xlane.f32.xlu1 %v9008_v18 }
0x1610   :  { %v9012_v2 = vpop.f32.mrf.mxu0 }
0x1612   :  { %v9014_v6 = vpop.f32.mrf.mxu0 }
0x1613   :  { %4054 = vmax.xlane.f32.xlu1 %v9006_v15  ;;  %4056 = vmax.xlane.f32.xlu0 %v9014_v6 }
0x1614   :  { %v9018_v26 = vpop.f32.mrf.mxu0 }
0x1616   :  { %v9020_v10 = vpop.f32.mrf.mxu0 }
0x1617   :  { %4060 = vmax.xlane.f32.xlu0 %v9012_v2  ;;  %4058 = vmax.xlane.f32.xlu1 %v9020_v10 }
0x161b   :  { %4062 = vmax.xlane.f32.xlu1 %v9018_v26 }
0x1664   :  { %v3608_v42 = vpop.xlane.xlu0 %3607 }
0x1665   :  { %v3639_v56 = vsub.f32 %v8931_v9, %v3608_v42 }
0x1667   :  { %v3655_v30 = vmul.f32 1.442695, %v3639_v56 }
0x1668   :  { %v3612_v60 = vpop.xlane.xlu0 %3611  ;;  %v3610_v24 = vpop.xlane.xlu1 %3609 }
0x1669   :  { %7214 = vpow2.f32 %v3655_v30  ;;  %v3641_v37 = vsub.f32 %v8929_v20, %v3612_v60  ;;  %v3640_v51 = vsub.f32 %v8936_v7, %v3610_v24 }
0x166b   :  { %v3659_v40 = vmul.f32 1.442695, %v3641_v37  ;;  %v3657_v62 = vmul.f32 1.442695, %v3640_v51 }
0x166c   :  { %v3614_v14 = vpop.xlane.xlu1 %3613  ;;  %v3616_v31 = vpop.xlane.xlu0 %3615 }
0x166d   :  { %7216 = vpow2.f32 %v3659_v40  ;;  %v3642_v55 = vsub.f32 %v8934_v1, %v3614_v14  ;;  %v3643_v28 = vsub.f32 %v8942_v29, %v3616_v31 }
0x166e   :  { %7218 = vpow2.f32 %v3657_v62 }
0x166f   :  { %v3661_v38 = vmul.f32 1.442695, %v3642_v55  ;;  %v3663_v12 = vmul.f32 1.442695, %v3643_v28 }
0x1670   :  { %v3620_v27 = vpop.xlane.xlu0 %3619  ;;  %v3618_v17 = vpop.xlane.xlu1 %3617 }
0x1671   :  { %7220 = vpow2.f32 %v3661_v38  ;;  %v3645_v49 = vsub.f32 %v8940_v47, %v3620_v27  ;;  %v3644_v23 = vsub.f32 %v8948_v11, %v3618_v17 }
0x1672   :  { %7222 = vpow2.f32 %v3663_v12 }
0x1673   :  { %v3667_v35 = vmul.f32 1.442695, %v3645_v49  ;;  %v3665_v19 = vmul.f32 1.442695, %v3644_v23 }
0x1674   :  { %v3622_v34 = vpop.xlane.xlu1 %3621  ;;  %v3624_v36 = vpop.xlane.xlu0 %3623 }
0x1675   :  { %7224 = vpow2.f32 %v3667_v35  ;;  %v3646_v20 = vsub.f32 %v8946_v50, %v3622_v34  ;;  %v3647_v9 = vsub.f32 %v8954_v21, %v3624_v36 }
0x1676   :  { %v9034_v1 = vpop.eup %7214  ;;  %7226 = vpow2.f32 %v3665_v19 }
0x1677   :  { %v3669_v7 = vmul.f32 1.442695, %v3646_v20  ;;  %v3671_v29 = vmul.f32 1.442695, %v3647_v9  ;;  %3687 = vadd.xlane.f32.xlu0 %v9034_v1 }
0x1678   :  { %v3628_v47 = vpop.xlane.xlu0 %3627  ;;  %v3626_v42 = vpop.xlane.xlu1 %3625 }
0x1679   :  { %7228 = vpow2.f32 %v3669_v7  ;;  %v3649_v11 = vsub.f32 %v8952_v43, %v3628_v47  ;;  %v3648_v56 = vsub.f32 %v8960_v39, %v3626_v42 }
0x167a   :  { %v9039_v30 = vpop.eup %7216  ;;  %7230 = vpow2.f32 %v3671_v29 }
0x167b   :  { %v9041_v50 = vpop.eup %7218  ;;  %v3675_v21 = vmul.f32 1.442695, %v3649_v11  ;;  %v3673_v60 = vmul.f32 1.442695, %v3648_v56  ;;  %3691 = vadd.xlane.f32.xlu0 %v9039_v30 }
0x167c   :  { %3689 = vadd.xlane.f32.xlu1 %v9041_v50  ;;  %v3630_v24 = vpop.xlane.xlu1 %3629  ;;  %v3632_v37 = vpop.xlane.xlu0 %3631 }
0x167d   :  { %7232 = vpow2.f32 %v3675_v21  ;;  %v3650_v51 = vsub.f32 %v8958_v61, %v3630_v24  ;;  %v3651_v43 = vsub.f32 %v8966_v44, %v3632_v37 }
0x167e   :  { %v9047_v40 = vpop.eup %7220  ;;  %7234 = vpow2.f32 %v3673_v60 }
0x167f   :  { %v9049_v39 = vpop.eup %7222  ;;  %v3677_v62 = vmul.f32 1.442695, %v3650_v51  ;;  %v3679_v14 = vmul.f32 1.442695, %v3651_v43 }
0x1680   :  { %3695 = vadd.xlane.f32.xlu0 %v9049_v39  ;;  %3693 = vadd.xlane.f32.xlu1 %v9047_v40  ;;  %v3636_v31 = vpop.xlane.xlu0 %3635  ;;  %v3634_v55 = vpop.xlane.xlu1 %3633 }
0x1681   :  { %7236 = vpow2.f32 %v3677_v62  ;;  %v3653_v28 = vsub.f32 %v8964_v57, %v3636_v31  ;;  %v3652_v61 = vsub.f32 %v8972_v54, %v3634_v55 }
0x1682   :  { %v9055_v38 = vpop.eup %7224  ;;  %7238 = vpow2.f32 %v3679_v14 }
0x1683   :  { %v9057_v44 = vpop.eup %7226  ;;  %v3683_v12 = vmul.f32 1.442695, %v3653_v28  ;;  %v3681_v27 = vmul.f32 1.442695, %v3652_v61 }
0x1684   :  { %3699 = vadd.xlane.f32.xlu0 %v9055_v38  ;;  %3697 = vadd.xlane.f32.xlu1 %v9057_v44  ;;  %v3638_v17 = vpop.xlane.xlu1 %3637  ;;  %v4033_v49 = vpop.xlane.xlu0 %4032 }
0x1685   :  { %7240 = vpow2.f32 %v3683_v12  ;;  %v3654_v23 = vsub.f32 %v8970_v16, %v3638_v17  ;;  %v4064_v57 = vsub.f32 %v8978_v41, %v4033_v49 }
0x1686   :  { %v9063_v35 = vpop.eup %7228  ;;  %7242 = vpow2.f32 %v3681_v27 }
0x1687   :  { %v9065_v54 = vpop.eup %7230  ;;  %v3685_v19 = vmul.f32 1.442695, %v3654_v23  ;;  %v4080_v34 = vmul.f32 1.442695, %v4064_v57 }
0x1688   :  { %3703 = vadd.xlane.f32.xlu0 %v9065_v54  ;;  %3701 = vadd.xlane.f32.xlu1 %v9063_v35  ;;  %v4037_v36 = vpop.xlane.xlu0 %4036  ;;  %v4035_v20 = vpop.xlane.xlu1 %4034 }
0x1689   :  { %7244 = vpow2.f32 %v3685_v19  ;;  %v4066_v9 = vsub.f32 %v8976_v59, %v4037_v36  ;;  %v4065_v16 = vsub.f32 %v8984_v22, %v4035_v20 }
0x168a   :  { %v9071_v7 = vpop.eup %7232  ;;  %7246 = vpow2.f32 %v4080_v34 }
0x168b   :  { %v9073_v41 = vpop.eup %7234  ;;  %v4084_v29 = vmul.f32 1.442695, %v4066_v9  ;;  %v4082_v47 = vmul.f32 1.442695, %v4065_v16 }
0x168c   :  { %3707 = vadd.xlane.f32.xlu0 %v9071_v7  ;;  %3705 = vadd.xlane.f32.xlu1 %v9073_v41  ;;  %v4039_v42 = vpop.xlane.xlu1 %4038  ;;  %v4041_v11 = vpop.xlane.xlu0 %4040 }
0x168d   :  { %7248 = vpow2.f32 %v4084_v29  ;;  %v4067_v56 = vsub.f32 %v8982_v25, %v4039_v42  ;;  %v4068_v59 = vsub.f32 %v8990_v63, %v4041_v11 }
0x168e   :  { %v9079_v21 = vpop.eup %7236  ;;  %7250 = vpow2.f32 %v4082_v47 }
0x168f   :  { %v9081_v22 = vpop.eup %7238  ;;  %v4086_v60 = vmul.f32 1.442695, %v4067_v56  ;;  %v4088_v24 = vmul.f32 1.442695, %v4068_v59 }
0x1690   :  { %3711 = vadd.xlane.f32.xlu0 %v9081_v22  ;;  %3709 = vadd.xlane.f32.xlu1 %v9079_v21  ;;  %v4045_v37 = vpop.xlane.xlu0 %4044  ;;  %v4043_v51 = vpop.xlane.xlu1 %4042 }
0x1691   :  { %7252 = vpow2.f32 %v4086_v60  ;;  %v4070_v43 = vsub.f32 %v8988_v45, %v4045_v37  ;;  %v4069_v25 = vsub.f32 %v8996_v3, %v4043_v51 }
0x1692   :  { %v9087_v62 = vpop.eup %7240  ;;  %7254 = vpow2.f32 %v4088_v24 }
0x1693   :  { %v9089_v63 = vpop.eup %7242  ;;  %v4092_v14 = vmul.f32 1.442695, %v4070_v43  ;;  %v4090_v31 = vmul.f32 1.442695, %v4069_v25 }
0x1694   :  { %3715 = vadd.xlane.f32.xlu0 %v9087_v62  ;;  %3713 = vadd.xlane.f32.xlu1 %v9089_v63  ;;  %v4047_v55 = vpop.xlane.xlu1 %4046  ;;  %v4049_v28 = vpop.xlane.xlu0 %4048 }
0x1695   :  { %7256 = vpow2.f32 %v4092_v14  ;;  %v4071_v61 = vsub.f32 %v8994_v5, %v4047_v55  ;;  %v4072_v45 = vsub.f32 %v9002_v58, %v4049_v28 }
0x1696   :  { %v9095_v12 = vpop.eup %7244  ;;  %7258 = vpow2.f32 %v4090_v31 }
0x1697   :  { %v9097_v3 = vpop.eup %7246  ;;  %v4094_v27 = vmul.f32 1.442695, %v4071_v61  ;;  %v4096_v17 = vmul.f32 1.442695, %v4072_v45 }
0x1698   :  { %4112 = vadd.xlane.f32.xlu0 %v9097_v3  ;;  %3717 = vadd.xlane.f32.xlu1 %v9095_v12  ;;  %v4053_v49 = vpop.xlane.xlu0 %4052  ;;  %v4051_v23 = vpop.xlane.xlu1 %4050 }
0x1699   :  { %7260 = vpow2.f32 %v4094_v27  ;;  %v4074_v57 = vsub.f32 %v9000_v8, %v4053_v49  ;;  %v4073_v5 = vsub.f32 %v9008_v18, %v4051_v23  ;;  %v6136_v27 = vld [vmem:[%s9959_s8 + $0x48] sm:$0xff]  ;;  %v6137_v49 = vld [vmem:[%s9959_s8 + $0x50] sm:$0xff]  ;;  %v6138_v23 = vld [vmem:[%s9959_s8 + $0x58] sm:$0xff] }
0x169a   :  { %v9103_v19 = vpop.eup %7248  ;;  %7262 = vpow2.f32 %v4096_v17  ;;  %v6135_v17 = vld [vmem:[%s9959_s8 + $0x40] sm:$0xff] }
0x169b   :  { %v9105_v58 = vpop.eup %7250  ;;  %v4100_v34 = vmul.f32 1.442695, %v4074_v57  ;;  %v4098_v36 = vmul.f32 1.442695, %v4073_v5  ;;  %v6145_v57 = vld [vmem:[%s9961_s10 + $0x50] sm:$0xff]  ;;  %v6146_v5 = vld [vmem:[%s9961_s10 + $0x58] sm:$0xff] }
0x169c   :  { %4116 = vadd.xlane.f32.xlu0 %v9103_v19  ;;  %4114 = vadd.xlane.f32.xlu1 %v9105_v58  ;;  %v4055_v20 = vpop.xlane.xlu1 %4054  ;;  %v4057_v9 = vpop.xlane.xlu0 %4056 }
0x169d   :  { %7264 = vpow2.f32 %v4100_v34  ;;  %v4075_v16 = vsub.f32 %v9006_v15, %v4055_v20  ;;  %v4076_v8 = vsub.f32 %v9014_v6, %v4057_v9  ;;  %v6143_v34 = vld [vmem:[%s9961_s10 + $0x40] sm:$0xff] }
0x169e   :  { %v9111_v29 = vpop.eup %7252  ;;  %7266 = vpow2.f32 %v4098_v36  ;;  %v6144_v36 = vld [vmem:[%s9961_s10 + $0x48] sm:$0xff] }
0x169f   :  { %v9113_v18 = vpop.eup %7254  ;;  %v4102_v47 = vmul.f32 1.442695, %v4075_v16  ;;  %v4104_v42 = vmul.f32 1.442695, %v4076_v8 }
0x16a0   :  { %4120 = vadd.xlane.f32.xlu0 %v9113_v18  ;;  %4118 = vadd.xlane.f32.xlu1 %v9111_v29  ;;  %v4061_v11 = vpop.xlane.xlu0 %4060  ;;  %v4059_v56 = vpop.xlane.xlu1 %4058 }
0x16a1   :  { %7268 = vpow2.f32 %v4102_v47  ;;  %v4078_v59 = vsub.f32 %v9012_v2, %v4061_v11  ;;  %v4077_v15 = vsub.f32 %v9020_v10, %v4059_v56 }
0x16a2   :  { %v9119_v60 = vpop.eup %7256  ;;  %7270 = vpow2.f32 %v4104_v42 }
0x16a3   :  { %v9121_v6 = vpop.eup %7258  ;;  %v4108_v24 = vmul.f32 1.442695, %v4078_v59  ;;  %v4106_v37 = vmul.f32 1.442695, %v4077_v15 }
0x16a4   :  { %4124 = vadd.xlane.f32.xlu0 %v9119_v60  ;;  %4122 = vadd.xlane.f32.xlu1 %v9121_v6  ;;  %v4063_v51 = vpop.xlane.xlu1 %4062 }
0x16a5   :  { %7272 = vpow2.f32 %v4108_v24  ;;  %v4079_v43 = vsub.f32 %v9018_v26, %v4063_v51 }
0x16a6   :  { %v9126_v25 = vpop.eup %7260  ;;  %7274 = vpow2.f32 %v4106_v37 }
0x16a7   :  { %v9128_v2 = vpop.eup %7262  ;;  %v4110_v10 = vmul.f32 1.442695, %v4079_v43 }
0x16a8   :  { %4128 = vadd.xlane.f32.xlu0 %v9128_v2  ;;  %4126 = vadd.xlane.f32.xlu1 %v9126_v25 }
0x16a9   :  { %7276 = vpow2.f32 %v4110_v10 }
0x16aa   :  { %v9132_v14 = vpop.eup %7264 }
0x16ab   :  { %v9134_v31 = vpop.eup %7266 }
0x16ac   :  { %4132 = vadd.xlane.f32.xlu0 %v9132_v14  ;;  %4130 = vadd.xlane.f32.xlu1 %v9134_v31 }
0x16ae   :  { %v9138_v26 = vpop.eup %7268 }
0x16af   :  { %v9140_v55 = vpop.eup %7270 }
0x16b0   :  { %4136 = vadd.xlane.f32.xlu0 %v9140_v55  ;;  %4134 = vadd.xlane.f32.xlu1 %v9138_v26 }
0x16b2   :  { %v9144_v28 = vpop.eup %7272 }
0x16b3   :  { %v9146_v61 = vpop.eup %7274 }
0x16b4   :  { %4140 = vadd.xlane.f32.xlu0 %v9144_v28  ;;  %4138 = vadd.xlane.f32.xlu1 %v9146_v61 }
0x16b6   :  { %v9150_v45 = vpop.eup %7276 }
0x16b8   :  { %4142 = vadd.xlane.f32.xlu1 %v9150_v45 }
0x16c9   :  { %3400 = vperm.xlu1 %6847, %v6136_v27  }
0x16ca   :  { %3395 = vperm.xlu0 %6846, %v6135_v17  }
0x16cd   :  { %3405 = vperm.xlu1 %6847, %v6137_v49  }
0x16ce   :  { %3410 = vperm.xlu0 %6846, %v6138_v23  }
0x16d1   :  { %4324 = vperm.xlu1 %6847, %v6145_v57  }
0x16d2   :  { %4329 = vperm.xlu0 %6846, %v6146_v5  }
0x16d5   :  { %4314 = vperm.xlu1 %6847, %v6143_v34  }
0x16d6   :  { %4319 = vperm.xlu0 %6846, %v6144_v36  }
0x1700   :  { %v3688_v20 = vpop.xlane.xlu0 %3687 }
0x1701   :  { %7278 = vrcp.f32 %v3688_v20 }
0x1704   :  { %v3692_v9 = vpop.xlane.xlu0 %3691 }
0x1705   :  { %7280 = vrcp.f32 %v3692_v9  ;;  %v3690_v16 = vpop.xlane.xlu1 %3689 }
0x1706   :  { %7282 = vrcp.f32 %v3690_v16 }
0x1709   :  { %v3696_v8 = vpop.xlane.xlu0 %3695  ;;  %v3694_v47 = vpop.xlane.xlu1 %3693 }
0x170a   :  { %7284 = vrcp.f32 %v3696_v8 }
0x170b   :  { %7286 = vrcp.f32 %v3694_v47 }
0x170d   :  { %v3700_v42 = vpop.xlane.xlu0 %3699  ;;  %v3698_v11 = vpop.xlane.xlu1 %3697 }
0x170e   :  { %7288 = vrcp.f32 %v3700_v42  ;;  %v7279_v56 = vpop.eup %7278 }
0x170f   :  { %7290 = vrcp.f32 %v3698_v11  ;;  %v9178_v51 = vmul.f32 %v7279_v56, %v9034_v1 }
0x1711   :  { %v3704_v59 = vpop.xlane.xlu0 %3703  ;;  %v3702_v15 = vpop.xlane.xlu1 %3701 }
0x1712   :  { %v7281_v24 = vpop.eup %7280  ;;  %7292 = vrcp.f32 %v3704_v59 }
0x1713   :  { %v7283_v37 = vpop.eup %7282  ;;  %7294 = vrcp.f32 %v3702_v15  ;;  %v9184_v17 = vmul.f32 %v7281_v24, %v9039_v30 }
0x1714   :  { %v9181_v43 = vmul.f32 %v7283_v37, %v9041_v50 }
0x1715   :  { %v3708_v10 = vpop.xlane.xlu0 %3707  ;;  %v3706_v27 = vpop.xlane.xlu1 %3705 }
0x1716   :  { %v3751_v49 = vadd.f32 %v9181_v43, %v9178_v51  ;;  %7296 = vrcp.f32 %v3708_v10 }
0x1717   :  { %v7285_v23 = vpop.eup %7284  ;;  %7298 = vrcp.f32 %v3706_v27 }
0x1718   :  { %v7287_v57 = vpop.eup %7286  ;;  %v3752_v5 = vadd.f32 %v3751_v49, %v9184_v17  ;;  %v9193_v20 = vmul.f32 %v7285_v23, %v9049_v39 }
0x1719   :  { %v9190_v1 = vmul.f32 %v7287_v57, %v9047_v40  ;;  %v3712_v34 = vpop.xlane.xlu0 %3711  ;;  %v3710_v50 = vpop.xlane.xlu1 %3709 }
0x171a   :  { %7300 = vrcp.f32 %v3712_v34 }
0x171b   :  { %v7289_v36 = vpop.eup %7288  ;;  %v3753_v30 = vadd.f32 %v3752_v5, %v9190_v1  ;;  %7302 = vrcp.f32 %v3710_v50 }
0x171c   :  { %v7291_v9 = vpop.eup %7290  ;;  %v9201_v11 = vmul.f32 %v7289_v36, %v9055_v38 }
0x171d   :  { %v3754_v16 = vadd.f32 %v3753_v30, %v9193_v20  ;;  %v9198_v8 = vmul.f32 %v7291_v9, %v9057_v44  ;;  %v3716_v47 = vpop.xlane.xlu0 %3715  ;;  %v3714_v42 = vpop.xlane.xlu1 %3713 }
0x171e   :  { %7304 = vrcp.f32 %v3716_v47 }
0x171f   :  { %v7293_v40 = vpop.eup %7292  ;;  %v3755_v56 = vadd.f32 %v3754_v16, %v9198_v8  ;;  %7306 = vrcp.f32 %v3714_v42 }
0x1720   :  { %v7295_v39 = vpop.eup %7294  ;;  %v9209_v10 = vmul.f32 %v7293_v40, %v9065_v54 }
0x1721   :  { %v3756_v59 = vadd.f32 %v3755_v56, %v9201_v11  ;;  %v9206_v15 = vmul.f32 %v7295_v39, %v9063_v35  ;;  %v4113_v24 = vpop.xlane.xlu0 %4112  ;;  %v3718_v37 = vpop.xlane.xlu1 %3717 }
0x1722   :  { %7308 = vrcp.f32 %v3718_v37 }
0x1723   :  { %v7297_v44 = vpop.eup %7296  ;;  %v3757_v27 = vadd.f32 %v3756_v59, %v9206_v15  ;;  %7310 = vrcp.f32 %v4113_v24 }
0x1724   :  { %v7299_v38 = vpop.eup %7298  ;;  %v9217_v34 = vmul.f32 %v7297_v44, %v9071_v7 }
0x1725   :  { %v3758_v49 = vadd.f32 %v3757_v27, %v9209_v10  ;;  %v9214_v23 = vmul.f32 %v7299_v38, %v9073_v41  ;;  %v4117_v57 = vpop.xlane.xlu0 %4116  ;;  %v4115_v5 = vpop.xlane.xlu1 %4114 }
0x1726   :  { %7312 = vrcp.f32 %v4117_v57 }
0x1727   :  { %v7301_v35 = vpop.eup %7300  ;;  %v3759_v54 = vadd.f32 %v3758_v49, %v9214_v23  ;;  %7314 = vrcp.f32 %v4115_v5 }
0x1728   :  { %v7303_v50 = vpop.eup %7302  ;;  %v9225_v47 = vmul.f32 %v7301_v35, %v9081_v22 }
0x1729   :  { %v9221_v36 = vmul.f32 %v7303_v50, %v9079_v21  ;;  %v4121_v30 = vpop.xlane.xlu0 %4120  ;;  %v4119_v9 = vpop.xlane.xlu1 %4118  ;;  %v3760_v41 = vadd.f32 %v3759_v54, %v9217_v34 }
0x172a   :  { %7316 = vrcp.f32 %v4121_v30 }
0x172b   :  { %v7305_v16 = vpop.eup %7304  ;;  %7318 = vrcp.f32 %v4119_v9  ;;  %v3761_v7 = vadd.f32 %v3760_v41, %v9221_v36 }
0x172c   :  { %v7307_v42 = vpop.eup %7306  ;;  %v9233_v59 = vmul.f32 %v7305_v16, %v9087_v62 }
0x172d   :  { %v4125_v40 = vpop.xlane.xlu0 %4124  ;;  %v4123_v56 = vpop.xlane.xlu1 %4122  ;;  %v9229_v39 = vmul.f32 %v7307_v42, %v9089_v63  ;;  %v3762_v21 = vadd.f32 %v3761_v7, %v9225_v47 }
0x172e   :  { %7320 = vrcp.f32 %v4125_v40 }
0x172f   :  { %7322 = vrcp.f32 %v4123_v56  ;;  %v3763_v24 = vadd.f32 %v3762_v21, %v9229_v39  ;;  %v7309_v22 = vpop.eup %7308 }
0x1730   :  { %v9237_v27 = vmul.f32 %v7309_v22, %v9095_v12  ;;  %v7311_v49 = vpop.eup %7310 }
0x1731   :  { %v4129_v37 = vpop.xlane.xlu0 %4128  ;;  %v4127_v44 = vpop.xlane.xlu1 %4126  ;;  %v3764_v38 = vadd.f32 %v3763_v24, %v9233_v59  ;;  %v9242_v62 = vmul.f32 %v7311_v49, %v9097_v3 }
0x1732   :  { %7324 = vrcp.f32 %v4129_v37 }
0x1733   :  { %v7313_v63 = vpop.eup %7312  ;;  %7326 = vrcp.f32 %v4127_v44  ;;  %v3765_v57 = vadd.f32 %v3764_v38, %v9237_v27 }
0x1734   :  { %v7315_v5 = vpop.eup %7314  ;;  %v9248_v9 = vmul.f32 %v7313_v63, %v9103_v19 }
0x1735   :  { %v9245_v35 = vmul.f32 %v7315_v5, %v9105_v58  ;;  %v4133_v54 = vpop.xlane.xlu0 %4132  ;;  %v4131_v50 = vpop.xlane.xlu1 %4130  ;;  %v3766_v30 = vrot.slane %v3765_v57, 4 }
0x1736   :  { %7328 = vrcp.f32 %v4133_v54 }
0x1737   :  { %v7317_v12 = vpop.eup %7316  ;;  %v4176_v41 = vadd.f32 %v9245_v35, %v9242_v62  ;;  %7330 = vrcp.f32 %v4131_v50  ;;  %v3767_v16 = vadd.f32 %v3766_v30, %v3765_v57 }
0x1738   :  { %v7319_v7 = vpop.eup %7318  ;;  %v9257_v24 = vmul.f32 %v7317_v12, %v9113_v18 }
0x1739   :  { %v4177_v3 = vadd.f32 %v4176_v41, %v9248_v9  ;;  %v9254_v42 = vmul.f32 %v7319_v7, %v9111_v29  ;;  %v4137_v58 = vpop.xlane.xlu0 %4136  ;;  %v4135_v40 = vpop.xlane.xlu1 %4134  ;;  %v3768_v56 = vrot.slane %v3767_v16, 2 }
0x173a   :  { %7332 = vrcp.f32 %v4135_v40 }
0x173b   :  { %v7321_v21 = vpop.eup %7320  ;;  %v4178_v19 = vadd.f32 %v4177_v3, %v9254_v42  ;;  %v3769_v22 = vadd.f32 %v3768_v56, %v3767_v16  ;;  %7334 = vrcp.f32 %v4137_v58 }
0x173c   :  { %v7323_v37 = vpop.eup %7322  ;;  %v9265_v5 = vmul.f32 %v7321_v21, %v9119_v60 }
0x173d   :  { %v4179_v44 = vadd.f32 %v4178_v19, %v9257_v24  ;;  %v9262_v38 = vmul.f32 %v7323_v37, %v9121_v6  ;;  %v4139_v29 = vpop.xlane.xlu1 %4138  ;;  %v3770_v49 = vrot.slane %v3769_v22, 1  ;;  %v4141_v63 = vpop.xlane.xlu0 %4140 }
0x173e   :  { %7336 = vrcp.f32 %v4139_v29 }
0x173f   :  { %v7325_v57 = vpop.eup %7324  ;;  %v4180_v18 = vadd.f32 %v4179_v44, %v9262_v38  ;;  %v3771_v54 = vadd.f32 %v3770_v49, %v3769_v22  ;;  %7338 = vrcp.f32 %v4141_v63 }
0x1740   :  { %v7327_v50 = vpop.eup %7326  ;;  %v9273_v7 = vmul.f32 %v7325_v57, %v9128_v2 }
0x1741   :  { %v4181_v30 = vadd.f32 %v4180_v18, %v9265_v5  ;;  %v9270_v12 = vmul.f32 %v7327_v50, %v9126_v25  ;;  %v4143_v6 = vpop.xlane.xlu1 %4142  ;;  %v3772_v41 = vadd.f32 1e-09, %v3771_v54 }
0x1742   :  { %7340 = vrcp.f32 %v4143_v6 }
0x1743   :  { %v7329_v16 = vpop.eup %7328  ;;  %v4182_v60 = vadd.f32 %v4181_v30, %v9270_v12  ;;  %7342 = vrcp.f32 %v3772_v41 }
0x1744   :  { %v7331_v3 = vpop.eup %7330  ;;  %v9285_v37 = vmul.f32 %v7329_v16, %v9132_v14 }
0x1745   :  { %v4183_v58 = vadd.f32 %v4182_v60, %v9273_v7  ;;  %v9278_v40 = vmul.f32 %v7331_v3, %v9134_v31  ;;  %v3396_v56 = vpop.permute.xlu0 %3395  ;;  %v3401_v25 = vpop.permute.xlu1 %3400 }
0x1746   :  { %v3413_v21 = vadd.f32 %v3396_v56, %v8892_v53  ;;  %v3414_v19 = vadd.f32 %v3396_v56, %v8894_v46  ;;  %v3415_v22 = vadd.f32 %v3401_v25, %v8896_v48  ;;  %v3416_v2 = vadd.f32 %v3401_v25, %v8898_v52 }
0x1747   :  { %v4184_v44 = vadd.f32 %v4183_v58, %v9278_v40  ;;  %v7333_v29 = vpop.eup %7332 }
0x1748   :  { %v6328_v49 = vpack.c.bf16 %v3414_v19, %v3413_v21  ;;  %v6329_v63 = vpack.c.bf16 %v3416_v2, %v3415_v22  ;;  %v7335_v31 = vpop.eup %7334  ;;  %v9289_v57 = vmul.f32 %v7333_v29, %v9138_v26 }
0x1749   :  { %v3411_v18 = vpop.permute.xlu0 %3410  ;;  %v3406_v53 = vpop.permute.xlu1 %3405  ;;  %v4185_v46 = vadd.f32 %v4184_v44, %v9285_v37  ;;  %v9298_v26 = vmul.f32 %v7335_v31, %v9140_v55 }
0x174a   :  { %3445 = vst [vmem:[#allocation5] sm:$0xff] %v6328_v49  ;;  %3446 = vst [vmem:[#allocation5 + $0x8] sm:$0xff] %v6329_v63  ;;  %v3419_v48 = vadd.f32 %v3411_v18, %v8904_v0  ;;  %v3420_v52 = vadd.f32 %v3411_v18, %v8906_v13  ;;  %v3417_v14 = vadd.f32 %v3406_v53, %v8900_v4 }
0x174b   :  { %v3418_v54 = vadd.f32 %v3406_v53, %v8902_v32  ;;  %v4186_v50 = vadd.f32 %v4185_v46, %v9289_v57  ;;  %v7337_v30 = vpop.eup %7336 }
0x174c   :  { %v6331_v6 = vpack.c.bf16 %v3420_v52, %v3419_v48  ;;  %v7339_v16 = vpop.eup %7338  ;;  %v9301_v60 = vmul.f32 %v7337_v30, %v9146_v61 }
0x174d   :  { %v6330_v41 = vpack.c.bf16 %v3418_v54, %v3417_v14  ;;  %v4187_v0 = vadd.f32 %v4186_v50, %v9298_v26  ;;  %v4174_v61 = vmul.f32 %v7339_v16, %v9144_v28 }
0x174e   :  { %3448 = vst [vmem:[#allocation5 + $0x18] sm:$0xff] %v6331_v6 }
0x174f   :  { %3447 = vst [vmem:[#allocation5 + $0x10] sm:$0xff] %v6330_v41  ;;  %v7341_v13 = vpop.eup %7340  ;;  %v4188_v25 = vadd.f32 %v4187_v0, %v9301_v60 }
0x1750   :  { %v7343_v4 = vpop.eup %7342  ;;  %v4175_v19 = vmul.f32 %v7341_v13, %v9150_v45 }
0x1751   :  { %v3788_v32 = vmul.f32 %v7343_v4, %v9233_v59  ;;  %v3789_v3 = vmul.f32 %v7343_v4, %v9237_v27  ;;  %v6891_v58 = vld [vmem:[#allocation5] ss:$8 sps:$4 sm:$0xff]   ;;  %v3786_v55 = vmul.f32 %v7343_v4, %v9225_v47  ;;  %v3787_v56 = vmul.f32 %v7343_v4, %v9229_v39 }
0x1752   :  { %6716 = vmatprep.mubr.bf16.mxu1 %v6891_v58  ;;  %v3784_v22 = vmul.f32 %v7343_v4, %v9217_v34  ;;  %v3785_v2 = vmul.f32 %v7343_v4, %v9221_v36  ;;  %v3778_v59 = vmul.f32 %v7343_v4, %v9193_v20  ;;  %v3779_v27 = vmul.f32 %v7343_v4, %v9198_v8 }
0x1753   :  { %v3797_v21 = vpack.c.bf16 %v3789_v3, %v3788_v32  ;;  %v3796_v47 = vpack.c.bf16 %v3787_v56, %v3786_v55  ;;  %v3776_v39 = vmul.f32 %v7343_v4, %v9184_v17  ;;  %v3777_v44 = vmul.f32 %v7343_v4, %v9190_v1 }
0x1754   :  { %v3774_v29 = vmul.f32 %v7343_v4, %v9178_v51  ;;  %v3792_v28 = vpack.c.bf16 %v3779_v27, %v3778_v59  ;;  %v3775_v45 = vmul.f32 %v7343_v4, %v9181_v43  ;;  %v4189_v49 = vadd.f32 %v4188_v25, %v4174_v61 }
0x1755   :  { %6700 = vmatprep.subr.bf16.mxu1 %v3797_v21  ;;  %v3791_v34 = vpack.c.bf16 %v3777_v44, %v3776_v39  ;;  %v3795_v20 = vpack.c.bf16 %v3785_v2, %v3784_v22  ;;  %v3782_v8 = vmul.f32 %v7343_v4, %v9209_v10  ;;  %v3783_v31 = vmul.f32 %v7343_v4, %v9214_v23  ;;  %v9344_v22 = vld [vmem:[#allocation7 + $0x70] sm:$0xff] }
0x1756   :  { %6701 = vmatpush3.bf16.msra.mxu1 %v3797_v21  ;;  %v3790_v36 = vpack.c.bf16 %v3775_v45, %v3774_v29  ;;  %v4190_v63 = vadd.f32 %v4189_v49, %v4175_v19  ;;  %v3780_v51 = vmul.f32 %v7343_v4, %v9201_v11  ;;  %v3781_v53 = vmul.f32 %v7343_v4, %v9206_v15  ;;  %v6892_v11 = vld [vmem:[#allocation5 + $0x10] ss:$8 sps:$4 sm:$0xff]   ;;  %v6893_v15 = vld [vmem:[#allocation5 + $0x4] ss:$8 sps:$4 sm:$0xff]  }
0x1757   :  { %6702 = vmatprep.subr.bf16.mxu1 %v3796_v47  ;;  %v3794_v18 = vpack.c.bf16 %v3783_v31, %v3782_v8  ;;  %v9350_v45 = vld [vmem:[#allocation7 + $0x68] sm:$0xff]  ;;  %v9356_v31 = vld [vmem:[#allocation7 + $0x78] sm:$0xff] }
0x1758   :  { %v4191_v17 = vrot.slane %v4190_v63, 4  ;;  %v3793_v48 = vpack.c.bf16 %v3781_v53, %v3780_v51  ;;  %v9359_v51 = vld [vmem:[#allocation7 + $0x58] sm:$0xff] }
0x175a   :  { %6703 = vmatpush3.bf16.msra.mxu1 %v3796_v47  ;;  %v4192_v1 = vadd.f32 %v4191_v17, %v4190_v63  ;;  %v9347_v47 = vld [vmem:[#allocation7 + $0x50] sm:$0xff] }
0x175b   :  { %6704 = vmatprep.subr.bf16.mxu1 %v3795_v20 }
0x175c   :  { %v4193_v43 = vrot.slane %v4192_v1, 2 }
0x175e   :  { %6705 = vmatpush3.bf16.msra.mxu1 %v3795_v20  ;;  %v4194_v46 = vadd.f32 %v4193_v43, %v4192_v1 }
0x175f   :  { %6706 = vmatprep.subr.bf16.mxu1 %v3794_v18 }
0x1760   :  { %v4195_v52 = vrot.slane %v4194_v46, 1 }
0x1762   :  { %6707 = vmatpush3.bf16.msra.mxu1 %v3794_v18  ;;  %v4196_v10 = vadd.f32 %v4195_v52, %v4194_v46 }
0x1763   :  { %6708 = vmatprep.subr.bf16.mxu1 %v3793_v48 }
0x1764   :  { %v4197_v23 = vadd.f32 1e-09, %v4196_v10 }
0x1766   :  { %6709 = vmatpush3.bf16.msra.mxu1 %v3793_v48  ;;  %7344 = vrcp.f32 %v4197_v23 }
0x1767   :  { %6710 = vmatprep.subr.bf16.mxu1 %v3792_v28 }
0x176a   :  { %6711 = vmatpush3.bf16.msra.mxu1 %v3792_v28 }
0x176b   :  { %6712 = vmatprep.subr.bf16.mxu1 %v3791_v34 }
0x176e   :  { %6713 = vmatpush3.bf16.msra.mxu1 %v3791_v34 }
0x176f   :  { %6714 = vmatprep.subr.bf16.mxu1 %v3790_v36 }
0x1772   :  { %6715 = vmatpush3.bf16.msra.mxu1 %v3790_v36  ;;  %v9353_v36 = vld [vmem:[#allocation7 + $0x48] sm:$0xff] }
0x1773   :  { %v7345_v14 = vpop.eup %7344 }
0x1774   :  { %v4213_v54 = vmul.f32 %v7345_v14, %v4174_v61  ;;  %v4214_v50 = vmul.f32 %v7345_v14, %v4175_v19  ;;  %v4211_v30 = vmul.f32 %v7345_v14, %v9298_v26  ;;  %v4212_v6 = vmul.f32 %v7345_v14, %v9301_v60  ;;  %v9341_v61 = vld [vmem:[#allocation7 + $0x40] sm:$0xff] }
0x1775   :  { %6717 = vmatmul.mubr.bf16.vlgmr.msra.gmra.mxu1 %v6892_v11  ;;  %v4203_v16 = vmul.f32 %v7345_v14, %v9257_v24  ;;  %v4204_v0 = vmul.f32 %v7345_v14, %v9262_v38  ;;  %v4209_v4 = vmul.f32 %v7345_v14, %v9285_v37  ;;  %v4210_v32 = vmul.f32 %v7345_v14, %v9289_v57 }
0x1776   :  { %6754 = vmatprep.mubr.bf16.mxu1 %v6893_v15  ;;  %v4222_v41 = vpack.c.bf16 %v4214_v50, %v4213_v54  ;;  %v4221_v13 = vpack.c.bf16 %v4212_v6, %v4211_v30  ;;  %v4207_v55 = vmul.f32 %v7345_v14, %v9273_v7  ;;  %v4208_v26 = vmul.f32 %v7345_v14, %v9278_v40  ;;  %v6901_v15 = vld [vmem:[%s9960_s9 + $0x20] sm:$0xff]   ;;  %v4330_v6 = vpop.permute.xlu0 %4329 }
0x1777   :  { %v4217_v3 = vpack.c.bf16 %v4204_v0, %v4203_v16  ;;  %v4220_v58 = vpack.c.bf16 %v4210_v32, %v4209_v4  ;;  %v4205_v24 = vmul.f32 %v7345_v14, %v9265_v5  ;;  %v4206_v38 = vmul.f32 %v7345_v14, %v9270_v12  ;;  %v6894_v12 = vld [vmem:[#allocation5 + $0x14] ss:$8 sps:$4 sm:$0xff]   ;;  %v4325_v16 = vpop.permute.xlu1 %4324 }
0x1778   :  { %6738 = vmatprep.subr.bf16.mxu1 %v4222_v41  ;;  %v4219_v60 = vpack.c.bf16 %v4208_v26, %v4207_v55  ;;  %v4201_v57 = vmul.f32 %v7345_v14, %v9248_v9  ;;  %v4202_v56 = vmul.f32 %v7345_v14, %v9254_v42  ;;  %v4199_v40 = vmul.f32 %v7345_v14, %v9242_v62  ;;  %v9338_v9 = vld [vmem:[#allocation7 + $0x60] sm:$0xff] }
0x1779   :  { %6739 = vmatpush3.bf16.msra.mxu1 %v4222_v41  ;;  %v4218_v37 = vpack.c.bf16 %v4206_v38, %v4205_v24  ;;  %v4200_v25 = vmul.f32 %v7345_v14, %v9245_v35  ;;  %v6902_v14 = vld [vmem:[%s9960_s9 + $0x28] sm:$0xff]  }
0x177a   :  { %6740 = vmatprep.subr.bf16.mxu1 %v4221_v13  ;;  %v4216_v7 = vpack.c.bf16 %v4202_v56, %v4201_v57 }
0x177b   :  { %v4215_v5 = vpack.c.bf16 %v4200_v25, %v4199_v40 }
0x177d   :  { %6741 = vmatpush3.bf16.msra.mxu1 %v4221_v13 }
0x177e   :  { %6742 = vmatprep.subr.bf16.mxu1 %v4220_v58 }
0x1781   :  { %6743 = vmatpush3.bf16.msra.mxu1 %v4220_v58 }
0x1782   :  { %6744 = vmatprep.subr.bf16.mxu1 %v4219_v60 }
0x1785   :  { %6745 = vmatpush3.bf16.msra.mxu1 %v4219_v60 }
0x1786   :  { %6746 = vmatprep.subr.bf16.mxu1 %v4218_v37 }
0x1789   :  { %6747 = vmatpush3.bf16.msra.mxu1 %v4218_v37 }
0x178a   :  { %6748 = vmatprep.subr.bf16.mxu1 %v4217_v3 }
0x178d   :  { %6749 = vmatpush3.bf16.msra.mxu1 %v4217_v3  ;;  %v4320_v3 = vpop.permute.xlu0 %4319 }
0x178e   :  { %6750 = vmatprep.subr.bf16.mxu1 %v4216_v7 }
0x1791   :  { %6751 = vmatpush3.bf16.msra.mxu1 %v4216_v7 }
0x1792   :  { %6752 = vmatprep.subr.bf16.mxu1 %v4215_v5 }
0x1795   :  { %6753 = vmatpush3.bf16.msra.mxu1 %v4215_v5  ;;  %v4315_v5 = vpop.permute.xlu1 %4314 }
0x1798   :  { %6755 = vmatmul.mubr.bf16.vlgmr.msra.gmra.mxu1 %v6894_v12 }
0x1799   :  { %4718 = vmatprep.mubr.bf16.mxu1 %v9973_v33 }
0x1835   :  { %v6718_v42 = vpop.f32.mrf.mxu1 }
0x1836   :  { %v3861_v21 = vsub.f32 %v9338_v9, %v6718_v42 }
0x1837   :  { %v3844_v62 = vpop.f32.mrf.mxu1 }
0x1838   :  { %v6335_v19 = vpack.c.bf16 %v3861_v21, %v3861_v21  ;;  %v3859_v35 = vsub.f32 %v9341_v61, %v3844_v62 }
0x1839   :  { %v6719_v2 = vpop.f32.mrf.mxu1 }
0x183a   :  { %3881 = vst [vmem:[#allocation6 + $0x10] sm:$0xf] %v6335_v19  ;;  %v6333_v59 = vpack.c.bf16 %v3859_v35, %v3859_v35  ;;  %v3862_v27 = vsub.f32 %v9344_v22, %v6719_v2 }
0x183b   :  { %v3847_v39 = vpop.f32.mrf.mxu1 }
0x183c   :  { %3879 = vst [vmem:[#allocation6] sm:$0xf] %v6333_v59  ;;  %v6336_v44 = vpack.c.bf16 %v3862_v27, %v3862_v27  ;;  %v3860_v29 = vsub.f32 %v9347_v47, %v3847_v39 }
0x183e   :  { %3882 = vst [vmem:[#allocation6 + $0x18] sm:$0xf] %v6336_v44  ;;  %v6334_v28 = vpack.c.bf16 %v3860_v29, %v3860_v29 }
0x1840   :  { %3880 = vst [vmem:[#allocation6 + $0x8] sm:$0xf] %v6334_v28  ;;  %v6153_v28 = vld [vmem:[%s9963_s12 + $0x50] sm:$0xff] }
0x1845   :  { %v6897_v10 = vld [vmem:[#allocation6 + $0x10] ss:$8 sps:$4 sm:$0xff]  }
0x1847   :  { %v6900_v11 = vld [vmem:[#allocation6] ss:$8 sps:$4 sm:$0xff]  }
0x1858   :  { %v6756_v49 = vpop.f32.mrf.mxu1 }
0x1859   :  { %v4286_v34 = vsub.f32 %v9350_v45, %v6756_v49  ;;  %v6154_v49 = vld [vmem:[%s9963_s12 + $0x58] sm:$0xff] }
0x185a   :  { %v4269_v63 = vpop.f32.mrf.mxu1 }
0x185b   :  { %v6339_v20 = vpack.c.bf16 %v4286_v34, %v4286_v34  ;;  %v4284_v8 = vsub.f32 %v9353_v36, %v4269_v63 }
0x185c   :  { %v6757_v17 = vpop.f32.mrf.mxu1 }
0x185d   :  { %4306 = vst [vmem:[#allocation6 + $0x14] sm:$0xf] %v6339_v20  ;;  %v6337_v1 = vpack.c.bf16 %v4284_v8, %v4284_v8  ;;  %v4287_v18 = vsub.f32 %v9356_v31, %v6757_v17 }
0x185e   :  { %v4272_v53 = vpop.f32.mrf.mxu1 }
0x185f   :  { %4304 = vst [vmem:[#allocation6 + $0x4] sm:$0xf] %v6337_v1  ;;  %v6340_v43 = vpack.c.bf16 %v4287_v18, %v4287_v18  ;;  %v4285_v46 = vsub.f32 %v9359_v51, %v4272_v53 }
0x1861   :  { %4307 = vst [vmem:[#allocation6 + $0x1c] sm:$0xf] %v6340_v43  ;;  %v6338_v48 = vpack.c.bf16 %v4285_v46, %v4285_v46 }
0x1863   :  { %4305 = vst [vmem:[#allocation6 + $0xc] sm:$0xf] %v6338_v48 }
0x1868   :  { %v6895_v52 = vld [vmem:[#allocation6 + $0x14] ss:$8 sps:$4 sm:$0xff]  }
0x1869   :  { %4380 = vmatprep.subr.bf16.mxu0 %v6895_v52 }
0x186a   :  { %v6898_v23 = vld [vmem:[#allocation6 + $0x4] ss:$8 sps:$4 sm:$0xff]   ;;  %4381 = vmatpush1.bf16.msra.mxu0 %v6897_v10 }
0x186b   :  { %4382 = vmatprep.subr.bf16.mxu0 %v6898_v23 }
0x186e   :  { %4383 = vmatpush1.bf16.msra.mxu0 %v6900_v11 }
0x1871   :  { %6204 = vmatmul.mubr.msk.bf16.vlgmr.msra.gmra.mxu0 %vm84_vm0, %v6901_v15 }
0x1872   :  { %4410 = vmatprep.mubr.bf16.mxu0 %v9973_v33 }
0x1879   :  { %6205 = vmatmul.mubr.msk.bf16.gmra.mxu0 %vm84_vm0, %v6902_v14 }
0x1931   :  { %v4402_v54 = vpop.f32.mrf.mxu0 }
0x1932   :  { %v9399_v62 = vadd.f32 %v4402_v54, %v4315_v5 }
0x1933   :  { %v4404_v50 = vpop.f32.mrf.mxu0 }
0x1934   :  { %v9393_v12 = vadd.f32 %v4404_v50, %v4315_v5  ;;  %v4445_v39 = vmul.f32 %v9399_v62, %v9399_v62 }
0x1935   :  { %v4406_v30 = vpop.f32.mrf.mxu0 }
0x1936   :  { %v9383_v37 = vadd.f32 %v4406_v30, %v4320_v3  ;;  %v4446_v2 = vmul.f32 %v9393_v12, %v9393_v12  ;;  %v4429_v27 = vadd.f32 %v9393_v12, %v9399_v62 }
0x1937   :  { %v4408_v41 = vpop.f32.mrf.mxu0 }
0x1938   :  { %v9375_v55 = vadd.f32 %v4408_v41, %v4320_v3  ;;  %v4447_v59 = vmul.f32 %v9383_v37, %v9383_v37  ;;  %v4453_v29 = vadd.f32 %v4446_v2, %v4445_v39 }
0x1939   :  { %v4412_v0 = vpop.f32.mrf.mxu0 }
0x193a   :  { %v9371_v13 = vadd.f32 %v4412_v0, %v4325_v16  ;;  %v4432_v25 = vadd.f32 %v9375_v55, %v9383_v37  ;;  %v4448_v19 = vmul.f32 %v9375_v55, %v9375_v55 }
0x193b   :  { %v4414_v4 = vpop.f32.mrf.mxu0 }
0x193c   :  { %v9373_v32 = vadd.f32 %v4414_v4, %v4325_v16  ;;  %v4449_v26 = vmul.f32 %v9371_v13, %v9371_v13  ;;  %v4456_v44 = vadd.f32 %v4448_v19, %v4447_v59  ;;  %v6147_v59 = vld [vmem:[%s9962_s11 + $0x40] sm:$0xff] }
0x193d   :  { %v4416_v58 = vpop.f32.mrf.mxu0 }
0x193e   :  { %v4450_v60 = vmul.f32 %v9373_v32, %v9373_v32  ;;  %v4435_v24 = vadd.f32 %v9373_v32, %v9371_v13  ;;  %v9385_v57 = vadd.f32 %v4416_v58, %v4330_v6 }
0x193f   :  { %v4418_v38 = vpop.f32.mrf.mxu0 }
0x1940   :  { %v9387_v56 = vadd.f32 %v4418_v38, %v4330_v6  ;;  %4436 = vadd.xlane.f32.xlu1 %v4435_v24  ;;  %v4459_v7 = vadd.f32 %v4450_v60, %v4449_v26  ;;  %v4451_v42 = vmul.f32 %v9385_v57, %v9385_v57 }
0x1942   :  { %v4452_v40 = vmul.f32 %v9387_v56, %v9387_v56  ;;  %4460 = vadd.xlane.f32.xlu0 %v4459_v7  ;;  %v4438_v21 = vadd.f32 %v9387_v56, %v9385_v57 }
0x1944   :  { %4433 = vadd.xlane.f32.xlu1 %v4432_v25  ;;  %v4462_v35 = vadd.f32 %v4452_v40, %v4451_v42  ;;  %v6149_v40 = vld [vmem:[%s9962_s11 + $0x50] sm:$0xff]  ;;  %v6150_v42 = vld [vmem:[%s9962_s11 + $0x58] sm:$0xff] }
0x1946   :  { %4439 = vadd.xlane.f32.xlu0 %v4438_v21 }
0x1948   :  { %4463 = vadd.xlane.f32.xlu1 %v4462_v35  ;;  %v6148_v35 = vld [vmem:[%s9962_s11 + $0x48] sm:$0xff] }
0x194a   :  { %4430 = vadd.xlane.f32.xlu0 %v4429_v27 }
0x194c   :  { %4457 = vadd.xlane.f32.xlu1 %v4456_v44 }
0x194e   :  { %4454 = vadd.xlane.f32.xlu0 %v4453_v29  ;;  %v6152_v29 = vld [vmem:[%s9963_s12 + $0x48] sm:$0xff] }
0x195d   :  { %4541 = vperm.xlu1 %6847, %v6153_v28   ;;  %v6151_v28 = vld [vmem:[%s9963_s12 + $0x40] sm:$0xff] }
0x1964   :  { %4546 = vperm.xlu0 %6846, %v6154_v49  }
0x19c9   :  { %v4437_v34 = vpop.xlane.xlu1 %4436 }
0x19ca   :  { %v4443_v63 = vmul.f32 0.00390625, %v4437_v34 }
0x19cb   :  { %v4461_v20 = vpop.xlane.xlu0 %4460 }
0x19cc   :  { %v4467_v8 = vmul.f32 0.00390625, %v4461_v20  ;;  %v4471_v17 = vmul.f32 %v4443_v63, %v4443_v63  ;;  %v4497_v34 = vsub.f32 %v9371_v13, %v4443_v63  ;;  %v4498_v20 = vsub.f32 %v9373_v32, %v4443_v63 }
0x19cd   :  { %v4434_v1 = vpop.xlane.xlu1 %4433 }
0x19ce   :  { %v4475_v18 = vsub.f32 %v4467_v8, %v4471_v17  ;;  %v9419_v10 = vmul.f32 0.00390625, %v4434_v1 }
0x19cf   :  { %v4440_v53 = vpop.xlane.xlu0 %4439 }
0x19d0   :  { %v4479_v43 = vmax.f32 %v4475_v18, 0.0  ;;  %v9417_v46 = vmul.f32 0.00390625, %v4440_v53  ;;  %v4470_v6 = vmul.f32 %v9419_v10, %v9419_v10 }
0x19d1   :  { %v4464_v48 = vpop.xlane.xlu1 %4463 }
0x19d2   :  { %v4483_v52 = vadd.f32 1e-05, %v4479_v43  ;;  %v4472_v23 = vmul.f32 %v9417_v46, %v9417_v46  ;;  %v4468_v11 = vmul.f32 0.00390625, %v4464_v48 }
0x19d3   :  { %v4431_v15 = vpop.xlane.xlu0 %4430 }
0x19d4   :  { %7346 = vrsqrt.f32 %v4483_v52  ;;  %v4476_v14 = vsub.f32 %v4468_v11, %v4472_v23  ;;  %v9423_v54 = vmul.f32 0.00390625, %v4431_v15  ;;  %v4499_v23 = vsub.f32 %v9385_v57, %v9417_v46 }
0x19d5   :  { %v4458_v50 = vpop.xlane.xlu1 %4457  ;;  %v4500_v11 = vsub.f32 %v9387_v56, %v9417_v46  ;;  %v4495_v57 = vsub.f32 %v9383_v37, %v9419_v10  ;;  %v4496_v56 = vsub.f32 %v9375_v55, %v9419_v10 }
0x19d6   :  { %v4480_v30 = vmax.f32 %v4476_v14, 0.0  ;;  %v4466_v41 = vmul.f32 0.00390625, %v4458_v50  ;;  %v4469_v3 = vmul.f32 %v9423_v54, %v9423_v54 }
0x19d7   :  { %v4455_v16 = vpop.xlane.xlu0 %4454 }
0x19d8   :  { %v4484_v0 = vadd.f32 1e-05, %v4480_v30  ;;  %v4474_v4 = vsub.f32 %v4466_v41, %v4470_v6  ;;  %v4465_v58 = vmul.f32 0.00390625, %v4455_v16 }
0x19d9   :  { %v4542_v18 = vpop.permute.xlu1 %4541 }
0x19da   :  { %7348 = vrsqrt.f32 %v4484_v0  ;;  %v4478_v26 = vmax.f32 %v4474_v4, 0.0  ;;  %v4473_v60 = vsub.f32 %v4465_v58, %v4469_v3 }
0x19dc   :  { %v4482_v24 = vadd.f32 1e-05, %v4478_v26  ;;  %v4477_v38 = vmax.f32 %v4473_v60, 0.0 }
0x19de   :  { %7350 = vrsqrt.f32 %v4482_v24  ;;  %v4481_v7 = vadd.f32 1e-05, %v4477_v38 }
0x19df   :  { %v4547_v49 = vpop.permute.xlu0 %4546 }
0x19e0   :  { %7352 = vrsqrt.f32 %v4481_v7 }
0x19e1   :  { %v7347_v25 = vpop.eup %7346 }
0x19e2   :  { %v4491_v5 = vmul.f32 %v7347_v25, %v6149_v40 }
0x19e4   :  { %4513 = vperm.xlu0 %6846, %v4491_v5  }
0x19e7   :  { %v7349_v21 = vpop.eup %7348 }
0x19e8   :  { %v4492_v19 = vmul.f32 %v7349_v21, %v6150_v42 }
0x19ea   :  { %4518 = vperm.xlu1 %6847, %v4492_v19  }
0x19eb   :  { %v7351_v2 = vpop.eup %7350 }
0x19ec   :  { %v4490_v27 = vmul.f32 %v7351_v2, %v6148_v35 }
0x19ed   :  { %v7353_v39 = vpop.eup %7352 }
0x19ee   :  { %4508 = vperm.xlu0 %6846, %v4490_v27   ;;  %v4489_v44 = vmul.f32 %v7353_v39, %v6147_v59 }
0x19f0   :  { %4503 = vperm.xlu1 %6847, %v4489_v44  }
0x19f2   :  { %4536 = vperm.xlu0 %6846, %v6152_v29  }
0x19f4   :  { %4531 = vperm.xlu1 %6847, %v6151_v28  }
0x1a5f   :  { %v4514_v8 = vpop.permute.xlu0 %4513 }
0x1a60   :  { %v4525_v17 = vmul.f32 %v4514_v8, %v4497_v34  ;;  %v4526_v1 = vmul.f32 %v4514_v8, %v4498_v20 }
0x1a62   :  { %v4553_v53 = vadd.f32 %v4542_v18, %v4525_v17  ;;  %v4554_v43 = vadd.f32 %v4542_v18, %v4526_v1 }
0x1a64   :  { %v4561_v48 = vmax.f32 %v4553_v53, 0.0  ;;  %v4562_v52 = vmax.f32 %v4554_v43, 0.0 }
0x1a65   :  { %v4519_v15 = vpop.permute.xlu1 %4518 }
0x1a66   :  { %v9454_v14 = vadd.f32 %v4561_v48, %v9338_v9  ;;  %v4527_v13 = vmul.f32 %v4519_v15, %v4499_v23  ;;  %v4528_v32 = vmul.f32 %v4519_v15, %v4500_v11  ;;  %v4570_v63 = vadd.f32 %v4562_v52, %v9350_v45 }
0x1a67   :  { %v4493_v9 = vsub.f32 %v9399_v62, %v9423_v54  ;;  %v4494_v45 = vsub.f32 %v9393_v12, %v9423_v54 }
0x1a68   :  { %4577 = vst [vmem:[#allocation7 + $0xa0] sm:$0xff] %v9454_v14  ;;  %v4555_v50 = vadd.f32 %v4547_v49, %v4527_v13  ;;  %v4556_v30 = vadd.f32 %v4547_v49, %v4528_v32  ;;  %4578 = vst [vmem:[#allocation7 + $0xa8] sm:$0xff] %v4570_v63 }
0x1a69   :  { %v4509_v6 = vpop.permute.xlu0 %4508 }
0x1a6a   :  { %v4563_v41 = vmax.f32 %v4555_v50, 0.0  ;;  %v4564_v16 = vmax.f32 %v4556_v30, 0.0  ;;  %v4523_v4 = vmul.f32 %v4509_v6, %v4495_v57  ;;  %v4524_v3 = vmul.f32 %v4509_v6, %v4496_v56 }
0x1a6b   :  { %v4504_v46 = vpop.permute.xlu1 %4503 }
0x1a6c   :  { %v9467_v0 = vadd.f32 %v4563_v41, %v9344_v22  ;;  %v4572_v58 = vadd.f32 %v4564_v16, %v9356_v31  ;;  %v4521_v26 = vmul.f32 %v4504_v46, %v4493_v9  ;;  %v4522_v60 = vmul.f32 %v4504_v46, %v4494_v45 }
0x1a6d   :  { %v4537_v37 = vpop.permute.xlu0 %4536 }
0x1a6e   :  { %4579 = vst [vmem:[#allocation7 + $0xb0] sm:$0xff] %v9467_v0  ;;  %v4551_v55 = vadd.f32 %v4537_v37, %v4523_v4  ;;  %v4552_v10 = vadd.f32 %v4537_v37, %v4524_v3  ;;  %4580 = vst [vmem:[#allocation7 + $0xb8] sm:$0xff] %v4572_v58  ;;  %v6377_v62 = vpack.c.bf16 %v4572_v58, %v4570_v63 }
0x1a6f   :  { %v6376_v12 = vpack.c.bf16 %v9467_v0, %v9454_v14  ;;  %v4532_v54 = vpop.permute.xlu1 %4531 }
0x1a70   :  { %v4559_v24 = vmax.f32 %v4551_v55, 0.0  ;;  %v4560_v22 = vmax.f32 %v4552_v10, 0.0  ;;  %v4549_v38 = vadd.f32 %v4532_v54, %v4521_v26  ;;  %v4550_v7 = vadd.f32 %v4532_v54, %v4522_v60  ;;  %4698 = vmatprep.subr.bf16.mxu1 %v6377_v62 }
0x1a71   :  { %4699 = vmatpush1.bf16.msra.mxu1 %v6376_v12 }
0x1a72   :  { %v9474_v31 = vadd.f32 %v4559_v24, %v9347_v47  ;;  %v4557_v40 = vmax.f32 %v4549_v38, 0.0  ;;  %v4558_v25 = vmax.f32 %v4550_v7, 0.0  ;;  %v4568_v5 = vadd.f32 %v4560_v22, %v9359_v51  ;;  %v6903_v51 = vld [vmem:[%s9958_s7 + $0x3c] sm:$0xff]  }
0x1a74   :  { %4575 = vst [vmem:[#allocation7 + $0x90] sm:$0xff] %v9474_v31  ;;  %v9479_v42 = vadd.f32 %v4557_v40, %v9341_v61  ;;  %v4566_v21 = vadd.f32 %v4558_v25, %v9353_v36  ;;  %4576 = vst [vmem:[#allocation7 + $0x98] sm:$0xff] %v4568_v5  ;;  %v6904_v61 = vld [vmem:[%s9958_s7 + $0x44] sm:$0xff]   ;;  %v6905_v36 = vld [vmem:[%s9958_s7 + $0x4c] ss:$0 sps:$4 sm:$0xff]  }
0x1a76   :  { %4573 = vst [vmem:[#allocation7 + $0x80] sm:$0xff] %v9479_v42  ;;  %4574 = vst [vmem:[#allocation7 + $0x88] sm:$0xff] %v4566_v21  ;;  %v6375_v19 = vpack.c.bf16 %v4568_v5, %v4566_v21  ;;  %v6374_v47 = vpack.c.bf16 %v9474_v31, %v9479_v42 }
0x1a78   :  { %4700 = vmatprep.subr.bf16.mxu1 %v6375_v19 }
0x1a79   :  { %4701 = vmatpush1.bf16.msra.mxu1 %v6374_v47 }
0x1a7c   :  { %6242 = vmatmul.mubr.msk.bf16.vlgmr.msra.gmra.mxu1 %vm84_vm0, %v6903_v51 }
0x1a7d   :  { %4728 = vmatprep.mubr.bf16.mxu1 %v9973_v33 }
0x1a84   :  { %6243 = vmatmul.mubr.msk.bf16.gmra.mxu1 %vm84_vm0, %v6904_v61 }
0x1a85   :  { %4738 = vmatprep.mubr.bf16.mxu1 %v9973_v33 }
0x1a8c   :  { %6244 = vmatmul.mubr.msk.bf16.gmra.mxu1 %vm84_vm0, %v6905_v36 }
0x1b3c   :  { %v9499_v35 = vpop.f32.mrf.mxu1 }
0x1b3e   :  { %v9501_v2 = vpop.f32.mrf.mxu1 }
0x1b40   :  { %v9503_v59 = vpop.f32.mrf.mxu1 }
0x1b42   :  { %v9505_v27 = vpop.f32.mrf.mxu1 }
0x1b44   :  { %v9507_v39 = vpop.f32.mrf.mxu1 }
0x1b46   :  { %v9509_v44 = vpop.f32.mrf.mxu1 }
0x1b48   :  { %v9511_v29 = vpop.f32.mrf.mxu1 }
0x1b4a   :  { %v9513_v28 = vpop.f32.mrf.mxu1 }
0x1b4c   :  { %v4740_v49 = vpop.f32.mrf.mxu1 }
0x1b4e   :  { %v4742_v34 = vpop.f32.mrf.mxu1 }
0x1b4f   :  { %v6349_v20 = vpack.c.bf16 %v4742_v34, %v4740_v49 }
0x1b50   :  { %v4744_v8 = vpop.f32.mrf.mxu1 }
0x1b51   :  { %4811 = vst [vmem:[#allocation4] sm:$0xff] %v6349_v20 }
0x1b52   :  { %v4745_v17 = vpop.f32.mrf.mxu1 }
0x1b58   :  { %v4812_v1 = vld [vmem:[#allocation4] sm:$0xf] }
0x1b59   :  { %4821 = vxpose.xlu1.c.b16.start.end [1/1] (short) %v4812_v1, 128  ;;  %6840 = vmatprep.subr.msk.bf16.mxu0 %vm793_vm1, %v4812_v1  ;;  %v4862_v18 = vsel %vm793_vm1, %v4812_v1, 0 }
0x1b5a   :  { %6759 = vmatpush3.bf16.msra.mxu0 %v4862_v18 }
0x1bbb   :  { %v4829_v53 = vpop.trf.xlu1 }
0x1bbc   :  { %6760 = vmatprep.mubr.msk.bf16.mxu0 %vm768_vm2, %v4829_v53 }
0x1bbf   :  { %v4830_v43 = vpop.trf.xlu1 }
0x1bc0   :  { %6761 = vmatmul.mubr.msk.bf16.vlgmr.msra.gmra.mxu0 %vm768_vm2, %v4830_v43 }
0x1bc3   :  { %v4831_v48 = vpop.trf.xlu1 }
0x1bc4   :  { %6764 = vmatprep.mubr.msk.bf16.mxu0 %vm768_vm2, %v4831_v48 }
0x1bc7   :  { %v4832_v52 = vpop.trf.xlu1 }
0x1bc8   :  { %6765 = vmatmul.mubr.msk.bf16.gmra.mxu0 %vm768_vm2, %v4832_v52 }
0x1bcb   :  { %v4833_v23 = vpop.trf.xlu1 }
0x1bcc   :  { %6768 = vmatprep.mubr.msk.bf16.mxu0 %vm768_vm2, %v4833_v23 }
0x1bcf   :  { %v4834_v11 = vpop.trf.xlu1 }
0x1bd0   :  { %6769 = vmatmul.mubr.msk.bf16.gmra.mxu0 %vm768_vm2, %v4834_v11 }
0x1bd3   :  { %v4835_v15 = vpop.trf.xlu1 }
0x1bd4   :  { %6772 = vmatprep.mubr.msk.bf16.mxu0 %vm768_vm2, %v4835_v15 }
0x1bd7   :  { %v4836_v13 = vpop.trf.xlu1 }
0x1bd8   :  { %6773 = vmatmul.mubr.msk.bf16.gmra.mxu0 %vm768_vm2, %v4836_v13 }
0x1c80   :  { %v6762_v32 = vpop.f32.mrf.mxu0 }
0x1c81   :  { %4965 = vmax.xlane.f32.xlu1 %v6762_v32 }
0x1c82   :  { %v4898_v63 = vpop.f32.mrf.mxu0 }
0x1c83   :  { %4961 = vmax.xlane.f32.xlu0 %v4898_v63 }
0x1c84   :  { %v6763_v50 = vpop.f32.mrf.mxu0 }
0x1c86   :  { %v4901_v30 = vpop.f32.mrf.mxu0 }
0x1c87   :  { %4967 = vmax.xlane.f32.xlu0 %v6763_v50 }
0x1c88   :  { %v6766_v6 = vpop.f32.mrf.mxu0 }
0x1c8a   :  { %v4914_v41 = vpop.f32.mrf.mxu0 }
0x1c8b   :  { %4963 = vmax.xlane.f32.xlu0 %v4901_v30 }
0x1c8c   :  { %v6767_v16 = vpop.f32.mrf.mxu0 }
0x1c8e   :  { %v4917_v57 = vpop.f32.mrf.mxu0 }
0x1c8f   :  { %4973 = vmax.xlane.f32.xlu0 %v6766_v6 }
0x1c90   :  { %v9525_v56 = vpop.f32.mrf.mxu0 }
0x1c92   :  { %v9527_v9 = vpop.f32.mrf.mxu0 }
0x1c93   :  { %4969 = vmax.xlane.f32.xlu0 %v4914_v41 }
0x1c94   :  { %v9529_v45 = vpop.f32.mrf.mxu0 }
0x1c96   :  { %v9531_v46 = vpop.f32.mrf.mxu0 }
0x1c97   :  { %4975 = vmax.xlane.f32.xlu0 %v6767_v16 }
0x1c98   :  { %v9533_v4 = vpop.f32.mrf.mxu0 }
0x1c9a   :  { %v9535_v3 = vpop.f32.mrf.mxu0 }
0x1c9b   :  { %4971 = vmax.xlane.f32.xlu0 %v4917_v57 }
0x1c9c   :  { %v9537_v58 = vpop.f32.mrf.mxu0 }
0x1c9e   :  { %v9539_v26 = vpop.f32.mrf.mxu0 }
0x1c9f   :  { %4981 = vmax.xlane.f32.xlu0 %v9525_v56  ;;  %4987 = vmax.xlane.f32.xlu1 %v9539_v26 }
0x1ca3   :  { %4977 = vmax.xlane.f32.xlu0 %v9527_v9  ;;  %4991 = vmax.xlane.f32.xlu1 %v9537_v58 }
0x1ca7   :  { %4979 = vmax.xlane.f32.xlu0 %v9531_v46 }
0x1cab   :  { %4983 = vmax.xlane.f32.xlu0 %v9529_v45 }
0x1caf   :  { %4985 = vmax.xlane.f32.xlu0 %v9535_v3 }
0x1cb3   :  { %4989 = vmax.xlane.f32.xlu0 %v9533_v4 }
0x1d0a   :  { %v4966_v60 = vpop.xlane.xlu1 %4965 }
0x1d0b   :  { %v4995_v55 = vsub.f32 %v6762_v32, %v4966_v60 }
0x1d0c   :  { %v4962_v37 = vpop.xlane.xlu0 %4961 }
0x1d0d   :  { %v4993_v10 = vsub.f32 %v4898_v63, %v4962_v37  ;;  %v5013_v54 = vmul.f32 1.442695, %v4995_v55 }
0x1d0f   :  { %v5009_v62 = vmul.f32 1.442695, %v4993_v10 }
0x1d10   :  { %v4968_v12 = vpop.xlane.xlu0 %4967 }
0x1d11   :  { %7354 = vpow2.f32 %v5009_v62  ;;  %v4996_v22 = vsub.f32 %v6763_v50, %v4968_v12 }
0x1d12   :  { %7356 = vpow2.f32 %v5013_v54 }
0x1d13   :  { %v5015_v25 = vmul.f32 1.442695, %v4996_v22 }
0x1d14   :  { %v4964_v24 = vpop.xlane.xlu0 %4963 }
0x1d15   :  { %v4994_v38 = vsub.f32 %v4901_v30, %v4964_v24 }
0x1d17   :  { %v5011_v7 = vmul.f32 1.442695, %v4994_v38 }
0x1d18   :  { %v4974_v40 = vpop.xlane.xlu0 %4973 }
0x1d19   :  { %7358 = vpow2.f32 %v5011_v7  ;;  %v4999_v21 = vsub.f32 %v6766_v6, %v4974_v40 }
0x1d1a   :  { %7360 = vpow2.f32 %v5015_v25 }
0x1d1b   :  { %v5021_v36 = vmul.f32 1.442695, %v4999_v21  ;;  %v6217_v21 = vld [vmem:[%s9959_s8 + $0x70] sm:$0xff] }
0x1d1c   :  { %v4970_v5 = vpop.xlane.xlu0 %4969 }
0x1d1d   :  { %v4997_v19 = vsub.f32 %v4914_v41, %v4970_v5  ;;  %v6216_v5 = vld [vmem:[%s9959_s8 + $0x68] sm:$0xff] }
0x1d1e   :  { %v9549_v47 = vpop.eup %7354 }
0x1d1f   :  { %v5017_v51 = vmul.f32 1.442695, %v4997_v19  ;;  %5041 = vadd.xlane.f32.xlu0 %v9549_v47  ;;  %v9552_v49 = vpop.eup %7356  ;;  %v6215_v19 = vld [vmem:[%s9959_s8 + $0x60] sm:$0xff] }
0x1d20   :  { %v4976_v61 = vpop.xlane.xlu0 %4975 }
0x1d21   :  { %7362 = vpow2.f32 %v5017_v51  ;;  %v5000_v20 = vsub.f32 %v6767_v16, %v4976_v61  ;;  %v6218_v51 = vld [vmem:[%s9959_s8 + $0x78] sm:$0xff]  ;;  %v9617_v61 = vld [vmem:[#allocation4 + $0x4] sm:$0xf] }
0x1d22   :  { %7364 = vpow2.f32 %v5021_v36 }
0x1d23   :  { %5045 = vadd.xlane.f32.xlu0 %v9552_v49  ;;  %v5023_v53 = vmul.f32 1.442695, %v5000_v20 }
0x1d24   :  { %v4972_v34 = vpop.xlane.xlu0 %4971 }
0x1d25   :  { %v4998_v8 = vsub.f32 %v4917_v57, %v4972_v34 }
0x1d26   :  { %v9555_v17 = vpop.eup %7358 }
0x1d27   :  { %v5019_v1 = vmul.f32 1.442695, %v4998_v8  ;;  %5043 = vadd.xlane.f32.xlu1 %v9555_v17  ;;  %v9558_v43 = vpop.eup %7360 }
0x1d28   :  { %v4982_v18 = vpop.xlane.xlu0 %4981  ;;  %v4988_v15 = vpop.xlane.xlu1 %4987 }
0x1d29   :  { %7366 = vpow2.f32 %v5019_v1  ;;  %v5003_v48 = vsub.f32 %v9525_v56, %v4982_v18  ;;  %v5006_v41 = vsub.f32 %v9539_v26, %v4988_v15 }
0x1d2a   :  { %7368 = vpow2.f32 %v5023_v53 }
0x1d2b   :  { %5047 = vadd.xlane.f32.xlu1 %v9558_v43  ;;  %v5029_v32 = vmul.f32 1.442695, %v5003_v48  ;;  %v5035_v37 = vmul.f32 1.442695, %v5006_v41 }
0x1d2c   :  { %v4978_v52 = vpop.xlane.xlu0 %4977  ;;  %v4992_v57 = vpop.xlane.xlu1 %4991 }
0x1d2d   :  { %v5001_v23 = vsub.f32 %v9527_v9, %v4978_v52 }
0x1d2e   :  { %v9563_v11 = vpop.eup %7362 }
0x1d2f   :  { %v5025_v13 = vmul.f32 1.442695, %v5001_v23  ;;  %5049 = vadd.xlane.f32.xlu0 %v9563_v11  ;;  %v9567_v30 = vpop.eup %7364 }
0x1d30   :  { %v4980_v63 = vpop.xlane.xlu0 %4979 }
0x1d31   :  { %7370 = vpow2.f32 %v5025_v13  ;;  %v5002_v50 = vsub.f32 %v9531_v46, %v4980_v63  ;;  %v5008_v46 = vsub.f32 %v9537_v58, %v4992_v57 }
0x1d32   :  { %7372 = vpow2.f32 %v5029_v32 }
0x1d33   :  { %v5027_v6 = vmul.f32 1.442695, %v5002_v50  ;;  %5053 = vadd.xlane.f32.xlu0 %v9567_v30  ;;  %v5039_v12 = vmul.f32 1.442695, %v5008_v46 }
0x1d34   :  { %v4984_v16 = vpop.xlane.xlu0 %4983 }
0x1d35   :  { %7374 = vpow2.f32 %v5027_v6  ;;  %v5004_v56 = vsub.f32 %v9529_v45, %v4984_v16 }
0x1d36   :  { %v9572_v9 = vpop.eup %7366 }
0x1d37   :  { %v5031_v60 = vmul.f32 1.442695, %v5004_v56  ;;  %5051 = vadd.xlane.f32.xlu1 %v9572_v9  ;;  %v9577_v62 = vpop.eup %7368 }
0x1d38   :  { %v4986_v55 = vpop.xlane.xlu0 %4985 }
0x1d39   :  { %7376 = vpow2.f32 %v5031_v60  ;;  %v5005_v10 = vsub.f32 %v9535_v3, %v4986_v55 }
0x1d3a   :  { %7378 = vpow2.f32 %v5035_v37 }
0x1d3b   :  { %v5033_v26 = vmul.f32 1.442695, %v5005_v10  ;;  %5055 = vadd.xlane.f32.xlu1 %v9577_v62 }
0x1d3c   :  { %v4990_v45 = vpop.xlane.xlu0 %4989 }
0x1d3d   :  { %7380 = vpow2.f32 %v5033_v26  ;;  %v5007_v54 = vsub.f32 %v9533_v4, %v4990_v45 }
0x1d3e   :  { %v9581_v24 = vpop.eup %7370  ;;  %7382 = vpow2.f32 %v5039_v12 }
0x1d3f   :  { %v5037_v22 = vmul.f32 1.442695, %v5007_v54  ;;  %5057 = vadd.xlane.f32.xlu0 %v9581_v24  ;;  %v9584_v58 = vpop.eup %7372 }
0x1d41   :  { %7384 = vpow2.f32 %v5037_v22 }
0x1d42   :  { %v9586_v3 = vpop.eup %7374 }
0x1d43   :  { %5061 = vadd.xlane.f32.xlu0 %v9584_v58  ;;  %5059 = vadd.xlane.f32.xlu1 %v9586_v3 }
0x1d46   :  { %v9590_v38 = vpop.eup %7376 }
0x1d47   :  { %5063 = vadd.xlane.f32.xlu1 %v9590_v38  ;;  %v9593_v4 = vpop.eup %7378 }
0x1d4a   :  { %v9595_v7 = vpop.eup %7380 }
0x1d4b   :  { %5065 = vadd.xlane.f32.xlu0 %v9595_v7  ;;  %5067 = vadd.xlane.f32.xlu1 %v9593_v4  ;;  %v9599_v40 = vpop.eup %7382 }
0x1d4e   :  { %v9601_v25 = vpop.eup %7384 }
0x1d4f   :  { %5069 = vadd.xlane.f32.xlu0 %v9601_v25  ;;  %5071 = vadd.xlane.f32.xlu1 %v9599_v40 }
0x1d60   :  { %4754 = vperm.xlu1 %6847, %v6216_v5  }
0x1d64   :  { %4759 = vperm.xlu1 %6847, %v6217_v21  }
0x1d65   :  { %4749 = vperm.xlu0 %6846, %v6215_v19  }
0x1d69   :  { %4764 = vperm.xlu0 %6846, %v6218_v51  }
0x1d87   :  { %5246 = vxpose.xlu1.c.b16.start.end [1/1] (short) %v9617_v61, 128 }
0x1da8   :  { %v5042_v36 = vpop.xlane.xlu0 %5041 }
0x1dac   :  { %v5046_v20 = vpop.xlane.xlu0 %5045 }
0x1db0   :  { %v5044_v34 = vpop.xlane.xlu1 %5043 }
0x1db1   :  { %7386 = vrcp.f32 %v5044_v34 }
0x1db2   :  { %7388 = vrcp.f32 %v5042_v36 }
0x1db3   :  { %7390 = vrcp.f32 %v5046_v20 }
0x1db4   :  { %v5048_v8 = vpop.xlane.xlu1 %5047 }
0x1db5   :  { %7392 = vrcp.f32 %v5048_v8 }
0x1db8   :  { %v5050_v1 = vpop.xlane.xlu0 %5049 }
0x1db9   :  { %7394 = vrcp.f32 %v5050_v1 }
0x1dbc   :  { %v5054_v52 = vpop.xlane.xlu0 %5053 }
0x1dbe   :  { %v7387_v18 = vpop.eup %7386 }
0x1dbf   :  { %v7389_v48 = vpop.eup %7388  ;;  %v9621_v23 = vmul.f32 %v7387_v18, %v9555_v17 }
0x1dc0   :  { %v5052_v53 = vpop.xlane.xlu1 %5051  ;;  %v9624_v15 = vmul.f32 %v7389_v48, %v9549_v47  ;;  %v7391_v32 = vpop.eup %7390 }
0x1dc1   :  { %7396 = vrcp.f32 %v5052_v53  ;;  %v9629_v6 = vmul.f32 %v7391_v32, %v9552_v49 }
0x1dc2   :  { %7398 = vrcp.f32 %v5054_v52  ;;  %v5105_v63 = vadd.f32 %v9621_v23, %v9624_v15  ;;  %v7393_v50 = vpop.eup %7392 }
0x1dc3   :  { %v9633_v57 = vmul.f32 %v7393_v50, %v9558_v43 }
0x1dc4   :  { %v5056_v13 = vpop.xlane.xlu1 %5055  ;;  %v5106_v17 = vadd.f32 %v5105_v63, %v9629_v6 }
0x1dc5   :  { %7400 = vrcp.f32 %v5056_v13 }
0x1dc6   :  { %v7395_v16 = vpop.eup %7394  ;;  %v5107_v46 = vadd.f32 %v5106_v17, %v9633_v57 }
0x1dc7   :  { %v9636_v47 = vmul.f32 %v7395_v16, %v9563_v11 }
0x1dc8   :  { %v5058_v41 = vpop.xlane.xlu0 %5057 }
0x1dc9   :  { %7402 = vrcp.f32 %v5058_v41  ;;  %v5108_v55 = vadd.f32 %v5107_v46, %v9636_v47 }
0x1dcc   :  { %v5062_v56 = vpop.xlane.xlu0 %5061  ;;  %v5060_v60 = vpop.xlane.xlu1 %5059 }
0x1dcd   :  { %7404 = vrcp.f32 %v5062_v56 }
0x1dce   :  { %v7397_v37 = vpop.eup %7396  ;;  %7406 = vrcp.f32 %v5060_v60 }
0x1dcf   :  { %v9640_v49 = vmul.f32 %v7397_v37, %v9572_v9  ;;  %v7399_v26 = vpop.eup %7398 }
0x1dd0   :  { %v5064_v10 = vpop.xlane.xlu1 %5063  ;;  %v9645_v11 = vmul.f32 %v7399_v26, %v9567_v30 }
0x1dd1   :  { %7408 = vrcp.f32 %v5064_v10  ;;  %v5109_v43 = vadd.f32 %v5108_v55, %v9640_v49 }
0x1dd2   :  { %v7401_v12 = vpop.eup %7400 }
0x1dd3   :  { %v5110_v5 = vadd.f32 %v5109_v43, %v9645_v11  ;;  %v9649_v9 = vmul.f32 %v7401_v12, %v9577_v62 }
0x1dd4   :  { %v5066_v45 = vpop.xlane.xlu0 %5065  ;;  %v5068_v54 = vpop.xlane.xlu1 %5067 }
0x1dd5   :  { %7410 = vrcp.f32 %v5066_v45  ;;  %v5111_v30 = vadd.f32 %v5110_v5, %v9649_v9 }
0x1dd6   :  { %v7403_v22 = vpop.eup %7402  ;;  %7412 = vrcp.f32 %v5068_v54 }
0x1dd7   :  { %v9652_v21 = vmul.f32 %v7403_v22, %v9581_v24 }
0x1dd8   :  { %v5070_v19 = vpop.xlane.xlu0 %5069  ;;  %v5072_v51 = vpop.xlane.xlu1 %5071 }
0x1dd9   :  { %7414 = vrcp.f32 %v5070_v19  ;;  %v5112_v20 = vadd.f32 %v5111_v30, %v9652_v21 }
0x1dda   :  { %v7405_v36 = vpop.eup %7404  ;;  %7416 = vrcp.f32 %v5072_v51 }
0x1ddb   :  { %v7407_v34 = vpop.eup %7406  ;;  %v5099_v53 = vmul.f32 %v7405_v36, %v9584_v58 }
0x1ddc   :  { %v9657_v8 = vmul.f32 %v7407_v34, %v9586_v3  ;;  %v4755_v1 = vpop.permute.xlu1 %4754 }
0x1ddd   :  { %v4769_v62 = vadd.f32 %v4755_v1, %v9503_v59  ;;  %v4770_v18 = vadd.f32 %v4755_v1, %v9505_v27 }
0x1dde   :  { %v7409_v24 = vpop.eup %7408  ;;  %v5113_v48 = vadd.f32 %v5112_v20, %v9657_v8 }
0x1ddf   :  { %v5100_v52 = vmul.f32 %v7409_v24, %v9590_v38  ;;  %v6346_v13 = vpack.c.bf16 %v4770_v18, %v4769_v62 }
0x1de0   :  { %v4750_v32 = vpop.permute.xlu0 %4749  ;;  %v4760_v63 = vpop.permute.xlu1 %4759  ;;  %v5114_v50 = vadd.f32 %v5113_v48, %v5099_v53 }
0x1de1   :  { %4800 = vst [vmem:[#allocation5 + $0x8] sm:$0xff] %v6346_v13  ;;  %v4767_v3 = vadd.f32 %v4750_v32, %v9499_v35  ;;  %v4768_v41 = vadd.f32 %v4750_v32, %v9501_v2  ;;  %v4771_v59 = vadd.f32 %v4760_v63, %v9507_v39  ;;  %v4772_v27 = vadd.f32 %v4760_v63, %v9509_v44 }
0x1de2   :  { %v7411_v16 = vpop.eup %7410  ;;  %v5115_v38 = vadd.f32 %v5114_v50, %v5100_v52 }
0x1de3   :  { %v7413_v17 = vpop.eup %7412  ;;  %v5101_v58 = vmul.f32 %v7411_v16, %v9595_v7  ;;  %v6345_v56 = vpack.c.bf16 %v4768_v41, %v4767_v3  ;;  %v6347_v60 = vpack.c.bf16 %v4772_v27, %v4771_v59 }
0x1de4   :  { %v4765_v37 = vpop.permute.xlu0 %4764  ;;  %v5102_v2 = vmul.f32 %v7413_v17, %v9593_v4  ;;  %v5287_v17 = vsel %vm793_vm1, %v9617_v61, 0 }
0x1de5   :  { %4799 = vst [vmem:[#allocation5] sm:$0xff] %v6345_v56  ;;  %4801 = vst [vmem:[#allocation5 + $0x10] sm:$0xff] %v6347_v60  ;;  %v4773_v46 = vadd.f32 %v4765_v37, %v9511_v29  ;;  %v4774_v35 = vadd.f32 %v4765_v37, %v9513_v28  ;;  %v5116_v55 = vadd.f32 %v5115_v38, %v5101_v58 }
0x1de6   :  { %v7415_v39 = vpop.eup %7414 }
0x1de7   :  { %v7417_v10 = vpop.eup %7416  ;;  %v6348_v44 = vpack.c.bf16 %v4774_v35, %v4773_v46  ;;  %v5103_v26 = vmul.f32 %v7415_v39, %v9601_v25  ;;  %v5117_v43 = vadd.f32 %v5116_v55, %v5102_v2 }
0x1de8   :  { %v5104_v7 = vmul.f32 %v7417_v10, %v9599_v40 }
0x1de9   :  { %4802 = vst [vmem:[#allocation5 + $0x18] sm:$0xff] %v6348_v44  ;;  %v5118_v12 = vadd.f32 %v5117_v43, %v5103_v26  ;;  %v5254_v27 = vpop.trf.xlu1 }
0x1deb   :  { %v5119_v45 = vadd.f32 %v5118_v12, %v5104_v7 }
0x1dec   :  { %v6906_v54 = vld [vmem:[#allocation5] ss:$8 sps:$4 sm:$0xff]   ;;  %v6907_v22 = vld [vmem:[#allocation5 + $0x4] ss:$8 sps:$4 sm:$0xff]  }
0x1ded   :  { %v5120_v5 = vrot.slane %v5119_v45, 4  ;;  %6792 = vmatprep.mubr.bf16.mxu1 %v6906_v54  ;;  %6830 = vmatprep.mubr.bf16.mxu0 %v6907_v22 }
0x1def   :  { %v5121_v29 = vadd.f32 %v5120_v5, %v5119_v45 }
0x1df1   :  { %v5122_v28 = vrot.slane %v5121_v29, 2 }
0x1df3   :  { %v5123_v4 = vadd.f32 %v5122_v28, %v5121_v29 }
0x1df5   :  { %v5124_v19 = vrot.slane %v5123_v4, 1 }
0x1df7   :  { %v5125_v51 = vadd.f32 %v5124_v19, %v5123_v4 }
0x1df9   :  { %v5126_v36 = vadd.f32 1e-09, %v5125_v51 }
0x1dfb   :  { %7418 = vrcp.f32 %v5126_v36 }
0x1e08   :  { %v7419_v30 = vpop.eup %7418 }
0x1e09   :  { %v5142_v25 = vmul.f32 %v7419_v30, %v5103_v26  ;;  %v5143_v34 = vmul.f32 %v7419_v30, %v5104_v7  ;;  %v5140_v20 = vmul.f32 %v7419_v30, %v5101_v58  ;;  %v5141_v1 = vmul.f32 %v7419_v30, %v5102_v2 }
0x1e0a   :  { %v5138_v18 = vmul.f32 %v7419_v30, %v5099_v53  ;;  %v5139_v24 = vmul.f32 %v7419_v30, %v5100_v52  ;;  %v5136_v13 = vmul.f32 %v7419_v30, %v9652_v21  ;;  %v5137_v32 = vmul.f32 %v7419_v30, %v9657_v8 }
0x1e0b   :  { %v5151_v40 = vpack.c.bf16 %v5143_v34, %v5142_v25  ;;  %v5150_v62 = vpack.c.bf16 %v5141_v1, %v5140_v20  ;;  %v5134_v50 = vmul.f32 %v7419_v30, %v9645_v11  ;;  %v5135_v3 = vmul.f32 %v7419_v30, %v9649_v9 }
0x1e0c   :  { %v5149_v48 = vpack.c.bf16 %v5139_v24, %v5138_v18  ;;  %v5148_v63 = vpack.c.bf16 %v5137_v32, %v5136_v13  ;;  %v5132_v53 = vmul.f32 %v7419_v30, %v9636_v47  ;;  %v5133_v52 = vmul.f32 %v7419_v30, %v9640_v49  ;;  %v5255_v49 = vpop.trf.xlu1 }
0x1e0d   :  { %6776 = vmatprep.subr.bf16.mxu1 %v5151_v40  ;;  %v5147_v41 = vpack.c.bf16 %v5135_v3, %v5134_v50  ;;  %v5130_v21 = vmul.f32 %v7419_v30, %v9629_v6  ;;  %v5131_v8 = vmul.f32 %v7419_v30, %v9633_v57  ;;  %v5128_v9 = vmul.f32 %v7419_v30, %v9624_v15  ;;  %v6908_v6 = vld [vmem:[#allocation5 + $0x10] ss:$8 sps:$4 sm:$0xff]  }
0x1e0e   :  { %6777 = vmatpush3.bf16.msra.mxu1 %v5151_v40  ;;  %v5146_v59 = vpack.c.bf16 %v5133_v52, %v5132_v53  ;;  %v5129_v16 = vmul.f32 %v7419_v30, %v9621_v23 }
0x1e0f   :  { %6778 = vmatprep.subr.bf16.mxu1 %v5150_v62  ;;  %v5145_v11 = vpack.c.bf16 %v5131_v8, %v5130_v21 }
0x1e10   :  { %v5144_v47 = vpack.c.bf16 %v5129_v16, %v5128_v9  ;;  %v5256_v57 = vpop.trf.xlu1 }
0x1e12   :  { %6779 = vmatpush3.bf16.msra.mxu1 %v5150_v62 }
0x1e13   :  { %6780 = vmatprep.subr.bf16.mxu1 %v5149_v48 }
0x1e14   :  { %v5257_v23 = vpop.trf.xlu1 }
0x1e16   :  { %6781 = vmatpush3.bf16.msra.mxu1 %v5149_v48 }
0x1e17   :  { %6782 = vmatprep.subr.bf16.mxu1 %v5148_v63 }
0x1e18   :  { %v5258_v15 = vpop.trf.xlu1 }
0x1e1a   :  { %6783 = vmatpush3.bf16.msra.mxu1 %v5148_v63 }
0x1e1b   :  { %6784 = vmatprep.subr.bf16.mxu1 %v5147_v41 }
0x1e1c   :  { %v5259_v58 = vpop.trf.xlu1 }
0x1e1e   :  { %6785 = vmatpush3.bf16.msra.mxu1 %v5147_v41 }
0x1e1f   :  { %6786 = vmatprep.subr.bf16.mxu1 %v5146_v59 }
0x1e20   :  { %v5260_v56 = vpop.trf.xlu1 }
0x1e22   :  { %6787 = vmatpush3.bf16.msra.mxu1 %v5146_v59 }
0x1e23   :  { %6788 = vmatprep.subr.bf16.mxu1 %v5145_v11 }
0x1e26   :  { %6789 = vmatpush3.bf16.msra.mxu1 %v5145_v11 }
0x1e27   :  { %6790 = vmatprep.subr.bf16.mxu1 %v5144_v47 }
0x1e2a   :  { %6791 = vmatpush3.bf16.msra.mxu1 %v5144_v47 }
0x1e2b   :  { %6841 = vmatprep.subr.msk.bf16.mxu1 %vm793_vm1, %v9617_v61  ;;  %v5261_v61 = vpop.trf.xlu1 }
0x1e2d   :  { %6793 = vmatmul.mubr.bf16.vlgmr.msra.gmra.mxu1 %v6908_v6 }
0x1e2e   :  { %6797 = vmatpush3.bf16.msra.mxu1 %v5287_v17  ;;  %6798 = vmatprep.mubr.msk.bf16.mxu1 %vm768_vm2, %v5254_v27 }
0x1e35   :  { %6799 = vmatmul.mubr.msk.bf16.vlgmr.msra.gmra.mxu1 %vm768_vm2, %v5255_v49 }
0x1e36   :  { %6802 = vmatprep.mubr.msk.bf16.mxu1 %vm768_vm2, %v5256_v57 }
0x1e3d   :  { %6803 = vmatmul.mubr.msk.bf16.gmra.mxu1 %vm768_vm2, %v5257_v23 }
0x1e3e   :  { %6806 = vmatprep.mubr.msk.bf16.mxu1 %vm768_vm2, %v5258_v15 }
0x1e45   :  { %6807 = vmatmul.mubr.msk.bf16.gmra.mxu1 %vm768_vm2, %v5259_v58 }
0x1e46   :  { %6810 = vmatprep.mubr.msk.bf16.mxu1 %vm768_vm2, %v5260_v56 }
0x1e4d   :  { %6811 = vmatmul.mubr.msk.bf16.gmra.mxu1 %vm768_vm2, %v5261_v61 }
0x1eed   :  { %v6794_v60 = vpop.f32.mrf.mxu1 }
0x1eee   :  { %v5215_v38 = vsub.f32 %v9454_v14, %v6794_v60 }
0x1eef   :  { %v5198_v37 = vpop.f32.mrf.mxu1 }
0x1ef0   :  { %v6352_v46 = vpack.c.bf16 %v5215_v38, %v5215_v38  ;;  %v5213_v35 = vsub.f32 %v9479_v42, %v5198_v37 }
0x1ef1   :  { %v6795_v2 = vpop.f32.mrf.mxu1 }
0x1ef2   :  { %5235 = vst [vmem:[#allocation6 + $0x10] sm:$0xf] %v6352_v46  ;;  %v6350_v55 = vpack.c.bf16 %v5213_v35, %v5213_v35  ;;  %v5216_v39 = vsub.f32 %v9467_v0, %v6795_v2 }
0x1ef3   :  { %v5201_v10 = vpop.f32.mrf.mxu1 }
0x1ef4   :  { %5233 = vst [vmem:[#allocation6] sm:$0xf] %v6350_v55  ;;  %v6353_v44 = vpack.c.bf16 %v5216_v39, %v5216_v39  ;;  %v5214_v26 = vsub.f32 %v9474_v31, %v5201_v10 }
0x1ef5   :  { %v6800_v43 = vpop.f32.mrf.mxu1 }
0x1ef6   :  { %5236 = vst [vmem:[#allocation6 + $0x18] sm:$0xf] %v6353_v44  ;;  %v6351_v7 = vpack.c.bf16 %v5214_v26, %v5214_v26  ;;  %5390 = vmax.xlane.f32.xlu1 %v6800_v43 }
0x1ef7   :  { %v5323_v12 = vpop.f32.mrf.mxu1 }
0x1ef8   :  { %5234 = vst [vmem:[#allocation6 + $0x8] sm:$0xf] %v6351_v7  ;;  %5386 = vmax.xlane.f32.xlu0 %v5323_v12 }
0x1ef9   :  { %v6801_v14 = vpop.f32.mrf.mxu1 }
0x1efb   :  { %v5326_v45 = vpop.f32.mrf.mxu1 }
0x1efc   :  { %5392 = vmax.xlane.f32.xlu0 %v6801_v14 }
0x1efd   :  { %v6804_v42 = vpop.f32.mrf.mxu1 }
0x1eff   :  { %v5339_v54 = vpop.f32.mrf.mxu1 }
0x1f00   :  { %5388 = vmax.xlane.f32.xlu0 %v5326_v45 }
0x1f01   :  { %v6805_v22 = vpop.f32.mrf.mxu1 }
0x1f03   :  { %v5342_v0 = vpop.f32.mrf.mxu1 }
0x1f04   :  { %5398 = vmax.xlane.f32.xlu0 %v6804_v42 }
0x1f05   :  { %v9700_v5 = vpop.f32.mrf.mxu1 }
0x1f07   :  { %v9702_v29 = vpop.f32.mrf.mxu1 }
0x1f08   :  { %5394 = vmax.xlane.f32.xlu0 %v5339_v54 }
0x1f09   :  { %v9704_v31 = vpop.f32.mrf.mxu1 }
0x1f0b   :  { %v9706_v28 = vpop.f32.mrf.mxu1 }
0x1f0c   :  { %5400 = vmax.xlane.f32.xlu0 %v6805_v22 }
0x1f0d   :  { %v9708_v4 = vpop.f32.mrf.mxu1 }
0x1f0f   :  { %v9710_v19 = vpop.f32.mrf.mxu1 }
0x1f10   :  { %5396 = vmax.xlane.f32.xlu0 %v5342_v0 }
0x1f11   :  { %v9712_v51 = vpop.f32.mrf.mxu1 }
0x1f13   :  { %v9714_v36 = vpop.f32.mrf.mxu1 }
0x1f14   :  { %5406 = vmax.xlane.f32.xlu0 %v9700_v5  ;;  %5412 = vmax.xlane.f32.xlu1 %v9714_v36 }
0x1f18   :  { %5402 = vmax.xlane.f32.xlu0 %v9702_v29  ;;  %5416 = vmax.xlane.f32.xlu1 %v9712_v51 }
0x1f1c   :  { %5404 = vmax.xlane.f32.xlu0 %v9706_v28 }
0x1f20   :  { %5408 = vmax.xlane.f32.xlu0 %v9704_v31 }
0x1f24   :  { %5410 = vmax.xlane.f32.xlu0 %v9710_v19 }
0x1f28   :  { %5414 = vmax.xlane.f32.xlu0 %v9708_v4 }
0x1f7f   :  { %v5391_v30 = vpop.xlane.xlu1 %5390 }
0x1f80   :  { %v5420_v34 = vsub.f32 %v6800_v43, %v5391_v30 }
0x1f81   :  { %v5387_v25 = vpop.xlane.xlu0 %5386 }
0x1f82   :  { %v5418_v20 = vsub.f32 %v5323_v12, %v5387_v25  ;;  %v5438_v62 = vmul.f32 1.442695, %v5420_v34  ;;  %v6224_v25 = vld [vmem:[%s9961_s10 + $0x68] sm:$0xff]  ;;  %v6225_v34 = vld [vmem:[%s9961_s10 + $0x70] sm:$0xff] }
0x1f84   :  { %v5434_v1 = vmul.f32 1.442695, %v5418_v20  ;;  %v6223_v20 = vld [vmem:[%s9961_s10 + $0x60] sm:$0xff] }
0x1f85   :  { %v5393_v40 = vpop.xlane.xlu0 %5392 }
0x1f86   :  { %7420 = vpow2.f32 %v5434_v1  ;;  %v5421_v24 = vsub.f32 %v6801_v14, %v5393_v40  ;;  %v6226_v1 = vld [vmem:[%s9961_s10 + $0x78] sm:$0xff] }
0x1f87   :  { %7422 = vpow2.f32 %v5438_v62 }
0x1f88   :  { %v5440_v63 = vmul.f32 1.442695, %v5421_v24 }
0x1f89   :  { %v5389_v18 = vpop.xlane.xlu0 %5388 }
0x1f8a   :  { %v5419_v48 = vsub.f32 %v5326_v45, %v5389_v18 }
0x1f8c   :  { %v5436_v13 = vmul.f32 1.442695, %v5419_v48 }
0x1f8d   :  { %v5399_v32 = vpop.xlane.xlu0 %5398 }
0x1f8e   :  { %7424 = vpow2.f32 %v5436_v13  ;;  %v5424_v3 = vsub.f32 %v6804_v42, %v5399_v32 }
0x1f8f   :  { %7426 = vpow2.f32 %v5440_v63 }
0x1f90   :  { %v5446_v21 = vmul.f32 1.442695, %v5424_v3 }
0x1f91   :  { %v5395_v50 = vpop.xlane.xlu0 %5394 }
0x1f92   :  { %v5422_v41 = vsub.f32 %v5339_v54, %v5395_v50 }
0x1f93   :  { %v9724_v53 = vpop.eup %7420 }
0x1f94   :  { %v5442_v52 = vmul.f32 1.442695, %v5422_v41  ;;  %5466 = vadd.xlane.f32.xlu0 %v9724_v53  ;;  %v9727_v8 = vpop.eup %7422 }
0x1f95   :  { %v5401_v59 = vpop.xlane.xlu0 %5400 }
0x1f96   :  { %7428 = vpow2.f32 %v5442_v52  ;;  %v5425_v11 = vsub.f32 %v6805_v22, %v5401_v59 }
0x1f97   :  { %7430 = vpow2.f32 %v5446_v21 }
0x1f98   :  { %5470 = vadd.xlane.f32.xlu0 %v9727_v8  ;;  %v5448_v6 = vmul.f32 1.442695, %v5425_v11 }
0x1f99   :  { %v5397_v27 = vpop.xlane.xlu0 %5396 }
0x1f9a   :  { %v5423_v9 = vsub.f32 %v5342_v0, %v5397_v27 }
0x1f9b   :  { %v9730_v16 = vpop.eup %7424 }
0x1f9c   :  { %v5444_v47 = vmul.f32 1.442695, %v5423_v9  ;;  %5468 = vadd.xlane.f32.xlu1 %v9730_v16  ;;  %v9733_v57 = vpop.eup %7426 }
0x1f9d   :  { %v5407_v49 = vpop.xlane.xlu0 %5406  ;;  %v5413_v56 = vpop.xlane.xlu1 %5412 }
0x1f9e   :  { %7432 = vpow2.f32 %v5444_v47  ;;  %v5428_v17 = vsub.f32 %v9700_v5, %v5407_v49  ;;  %v5431_v2 = vsub.f32 %v9714_v36, %v5413_v56 }
0x1f9f   :  { %7434 = vpow2.f32 %v5448_v6 }
0x1fa0   :  { %5472 = vadd.xlane.f32.xlu1 %v9733_v57  ;;  %v5454_v60 = vmul.f32 1.442695, %v5428_v17  ;;  %v5460_v43 = vmul.f32 1.442695, %v5431_v2 }
0x1fa1   :  { %v5403_v23 = vpop.xlane.xlu0 %5402  ;;  %v5417_v39 = vpop.xlane.xlu1 %5416 }
0x1fa2   :  { %v5426_v15 = vsub.f32 %v9702_v29, %v5403_v23  ;;  %v5433_v7 = vsub.f32 %v9712_v51, %v5417_v39 }
0x1fa3   :  { %v9738_v58 = vpop.eup %7428 }
0x1fa4   :  { %v5450_v61 = vmul.f32 1.442695, %v5426_v15  ;;  %5474 = vadd.xlane.f32.xlu0 %v9738_v58  ;;  %v9742_v46 = vpop.eup %7430  ;;  %v5464_v54 = vmul.f32 1.442695, %v5433_v7 }
0x1fa5   :  { %v5405_v38 = vpop.xlane.xlu0 %5404 }
0x1fa6   :  { %7436 = vpow2.f32 %v5450_v61  ;;  %v5427_v37 = vsub.f32 %v9706_v28, %v5405_v38 }
0x1fa7   :  { %7438 = vpow2.f32 %v5454_v60 }
0x1fa8   :  { %v5452_v35 = vmul.f32 1.442695, %v5427_v37  ;;  %5478 = vadd.xlane.f32.xlu0 %v9742_v46 }
0x1fa9   :  { %v5409_v55 = vpop.xlane.xlu0 %5408 }
0x1faa   :  { %7440 = vpow2.f32 %v5452_v35  ;;  %v5429_v10 = vsub.f32 %v9704_v31, %v5409_v55 }
0x1fab   :  { %v9747_v44 = vpop.eup %7432 }
0x1fac   :  { %v5456_v26 = vmul.f32 1.442695, %v5429_v10  ;;  %5476 = vadd.xlane.f32.xlu1 %v9747_v44  ;;  %v9752_v45 = vpop.eup %7434 }
0x1fad   :  { %v5411_v12 = vpop.xlane.xlu0 %5410 }
0x1fae   :  { %7442 = vpow2.f32 %v5456_v26  ;;  %v5430_v14 = vsub.f32 %v9710_v19, %v5411_v12 }
0x1faf   :  { %7444 = vpow2.f32 %v5460_v43 }
0x1fb0   :  { %v5458_v42 = vmul.f32 1.442695, %v5430_v14  ;;  %5480 = vadd.xlane.f32.xlu1 %v9752_v45 }
0x1fb1   :  { %v5415_v22 = vpop.xlane.xlu0 %5414 }
0x1fb2   :  { %7446 = vpow2.f32 %v5458_v42  ;;  %v5432_v0 = vsub.f32 %v9708_v4, %v5415_v22 }
0x1fb3   :  { %v9756_v5 = vpop.eup %7436  ;;  %7448 = vpow2.f32 %v5464_v54 }
0x1fb4   :  { %v5462_v29 = vmul.f32 1.442695, %v5432_v0  ;;  %5482 = vadd.xlane.f32.xlu0 %v9756_v5  ;;  %v9759_v31 = vpop.eup %7438 }
0x1fb6   :  { %7450 = vpow2.f32 %v5462_v29 }
0x1fb7   :  { %v9761_v28 = vpop.eup %7440 }
0x1fb8   :  { %5486 = vadd.xlane.f32.xlu0 %v9759_v31  ;;  %5484 = vadd.xlane.f32.xlu1 %v9761_v28 }
0x1fbb   :  { %v9765_v19 = vpop.eup %7442 }
0x1fbc   :  { %5488 = vadd.xlane.f32.xlu1 %v9765_v19  ;;  %v9768_v4 = vpop.eup %7444 }
0x1fbf   :  { %v9770_v51 = vpop.eup %7446 }
0x1fc0   :  { %5490 = vadd.xlane.f32.xlu0 %v9770_v51  ;;  %5492 = vadd.xlane.f32.xlu1 %v9768_v4  ;;  %v9774_v36 = vpop.eup %7448 }
0x1fc3   :  { %v9776_v30 = vpop.eup %7450 }
0x1fc4   :  { %5494 = vadd.xlane.f32.xlu0 %v9776_v30  ;;  %5496 = vadd.xlane.f32.xlu1 %v9774_v36 }
0x1fd5   :  { %5673 = vperm.xlu1 %6847, %v6224_v25  }
0x1fd9   :  { %5678 = vperm.xlu1 %6847, %v6225_v34  }
0x1fda   :  { %5668 = vperm.xlu0 %6846, %v6223_v20  }
0x1fde   :  { %5683 = vperm.xlu0 %6846, %v6226_v1  }
0x201d   :  { %v5467_v40 = vpop.xlane.xlu0 %5466 }
0x2021   :  { %v5471_v18 = vpop.xlane.xlu0 %5470 }
0x2025   :  { %v5469_v62 = vpop.xlane.xlu1 %5468 }
0x2026   :  { %7452 = vrcp.f32 %v5469_v62 }
0x2027   :  { %7454 = vrcp.f32 %v5467_v40 }
0x2028   :  { %7456 = vrcp.f32 %v5471_v18 }
0x2029   :  { %v5473_v24 = vpop.xlane.xlu1 %5472 }
0x202a   :  { %7458 = vrcp.f32 %v5473_v24 }
0x202d   :  { %v5475_v48 = vpop.xlane.xlu0 %5474 }
0x202e   :  { %7460 = vrcp.f32 %v5475_v48 }
0x2031   :  { %v5479_v50 = vpop.xlane.xlu0 %5478 }
0x2033   :  { %v7453_v13 = vpop.eup %7452 }
0x2034   :  { %v7455_v63 = vpop.eup %7454  ;;  %v9793_v3 = vmul.f32 %v7453_v13, %v9730_v16 }
0x2035   :  { %v5477_v32 = vpop.xlane.xlu1 %5476  ;;  %v9796_v41 = vmul.f32 %v7455_v63, %v9724_v53  ;;  %v7457_v59 = vpop.eup %7456 }
0x2036   :  { %7462 = vrcp.f32 %v5477_v32  ;;  %v9801_v11 = vmul.f32 %v7457_v59, %v9727_v8 }
0x2037   :  { %7464 = vrcp.f32 %v5479_v50  ;;  %v5530_v21 = vadd.f32 %v9793_v3, %v9796_v41  ;;  %v7459_v27 = vpop.eup %7458 }
0x2038   :  { %v9805_v49 = vmul.f32 %v7459_v27, %v9733_v57 }
0x2039   :  { %v5481_v52 = vpop.xlane.xlu1 %5480  ;;  %v5531_v16 = vadd.f32 %v5530_v21, %v9801_v11 }
0x203a   :  { %7466 = vrcp.f32 %v5481_v52 }
0x203b   :  { %v7461_v47 = vpop.eup %7460  ;;  %v5532_v15 = vadd.f32 %v5531_v16, %v9805_v49 }
0x203c   :  { %v9808_v53 = vmul.f32 %v7461_v47, %v9738_v58 }
0x203d   :  { %v5483_v9 = vpop.xlane.xlu0 %5482 }
0x203e   :  { %7468 = vrcp.f32 %v5483_v9  ;;  %v5533_v56 = vadd.f32 %v5532_v15, %v9808_v53 }
0x2041   :  { %v5487_v6 = vpop.xlane.xlu0 %5486  ;;  %v5485_v17 = vpop.xlane.xlu1 %5484 }
0x2042   :  { %7470 = vrcp.f32 %v5487_v6 }
0x2043   :  { %v7463_v23 = vpop.eup %7462  ;;  %7472 = vrcp.f32 %v5485_v17 }
0x2044   :  { %v9812_v8 = vmul.f32 %v7463_v23, %v9747_v44  ;;  %v7465_v60 = vpop.eup %7464 }
0x2045   :  { %v5489_v61 = vpop.xlane.xlu1 %5488  ;;  %v5520_v58 = vmul.f32 %v7465_v60, %v9742_v46 }
0x2046   :  { %7474 = vrcp.f32 %v5489_v61  ;;  %v5534_v57 = vadd.f32 %v5533_v56, %v9812_v8 }
0x2047   :  { %v7467_v38 = vpop.eup %7466 }
0x2048   :  { %v5535_v55 = vadd.f32 %v5534_v57, %v5520_v58  ;;  %v5521_v39 = vmul.f32 %v7467_v38, %v9752_v45 }
0x2049   :  { %v5491_v37 = vpop.xlane.xlu0 %5490  ;;  %v5493_v35 = vpop.xlane.xlu1 %5492 }
0x204a   :  { %7476 = vrcp.f32 %v5491_v37  ;;  %v5536_v7 = vadd.f32 %v5535_v55, %v5521_v39 }
0x204b   :  { %v7469_v2 = vpop.eup %7468  ;;  %7478 = vrcp.f32 %v5493_v35 }
0x204c   :  { %v5522_v10 = vmul.f32 %v7469_v2, %v9756_v5 }
0x204d   :  { %v5495_v44 = vpop.xlane.xlu0 %5494  ;;  %v5497_v26 = vpop.xlane.xlu1 %5496 }
0x204e   :  { %7480 = vrcp.f32 %v5495_v44  ;;  %v5537_v14 = vadd.f32 %v5536_v7, %v5522_v10  ;;  %v9836_v44 = vld [vmem:[#allocation7 + $0x88] sm:$0xff] }
0x204f   :  { %v7471_v43 = vpop.eup %7470  ;;  %7482 = vrcp.f32 %v5497_v26 }
0x2050   :  { %v7473_v12 = vpop.eup %7472  ;;  %v5524_v54 = vmul.f32 %v7471_v43, %v9759_v31  ;;  %v9839_v43 = vld [vmem:[#allocation7 + $0xb8] sm:$0xff] }
0x2051   :  { %v5523_v46 = vmul.f32 %v7473_v12, %v9761_v28 }
0x2053   :  { %v7475_v42 = vpop.eup %7474  ;;  %v5538_v22 = vadd.f32 %v5537_v14, %v5523_v46 }
0x2054   :  { %v5525_v0 = vmul.f32 %v7475_v42, %v9765_v19 }
0x2055   :  { %v5539_v45 = vadd.f32 %v5538_v22, %v5524_v54 }
0x2057   :  { %v7477_v29 = vpop.eup %7476  ;;  %v5540_v34 = vadd.f32 %v5539_v45, %v5525_v0  ;;  %v6910_v45 = vld [vmem:[#allocation6 + $0x10] ss:$8 sps:$4 sm:$0xff]  }
0x2058   :  { %v7479_v25 = vpop.eup %7478  ;;  %v5526_v5 = vmul.f32 %v7477_v29, %v9770_v51 }
0x2059   :  { %v5527_v20 = vmul.f32 %v7479_v25, %v9768_v4 }
0x205a   :  { %v5541_v1 = vadd.f32 %v5540_v34, %v5526_v5  ;;  %v6916_v34 = vld [vmem:[%s9960_s9 + $0x30] sm:$0xff]  }
0x205b   :  { %v7481_v40 = vpop.eup %7480 }
0x205c   :  { %v7483_v62 = vpop.eup %7482  ;;  %v5528_v18 = vmul.f32 %v7481_v40, %v9776_v30  ;;  %v5542_v28 = vadd.f32 %v5541_v1, %v5527_v20  ;;  %v5669_v1 = vpop.permute.xlu0 %5668 }
0x205d   :  { %v5529_v24 = vmul.f32 %v7483_v62, %v9774_v36 }
0x205e   :  { %v5543_v31 = vadd.f32 %v5542_v28, %v5528_v18 }
0x2060   :  { %v5544_v48 = vadd.f32 %v5543_v31, %v5529_v24 }
0x2062   :  { %v5545_v13 = vrot.slane %v5544_v48, 4 }
0x2064   :  { %v5546_v19 = vadd.f32 %v5545_v13, %v5544_v48 }
0x2066   :  { %v5547_v32 = vrot.slane %v5546_v19, 2 }
0x2068   :  { %v5548_v63 = vadd.f32 %v5547_v32, %v5546_v19 }
0x206a   :  { %v5549_v50 = vrot.slane %v5548_v63, 1 }
0x206c   :  { %v5550_v52 = vadd.f32 %v5549_v50, %v5548_v63 }
0x206e   :  { %v5551_v51 = vadd.f32 1e-09, %v5550_v52 }
0x2070   :  { %7484 = vrcp.f32 %v5551_v51 }
0x207d   :  { %v7485_v59 = vpop.eup %7484 }
0x207e   :  { %v5567_v4 = vmul.f32 %v7485_v59, %v5528_v18  ;;  %v5568_v21 = vmul.f32 %v7485_v59, %v5529_v24  ;;  %v5565_v27 = vmul.f32 %v7485_v59, %v5526_v5  ;;  %v5566_v9 = vmul.f32 %v7485_v59, %v5527_v20  ;;  %v6913_v5 = vld [vmem:[#allocation6] ss:$8 sps:$4 sm:$0xff]   ;;  %v6917_v20 = vld [vmem:[%s9960_s9 + $0x38] sm:$0xff]   ;;  %v5674_v24 = vpop.permute.xlu1 %5673 }
0x207f   :  { %v5563_v16 = vmul.f32 %v7485_v59, %v5524_v54  ;;  %v5564_v36 = vmul.f32 %v7485_v59, %v5525_v0  ;;  %v5561_v17 = vmul.f32 %v7485_v59, %v5522_v10  ;;  %v5562_v23 = vmul.f32 %v7485_v59, %v5523_v46  ;;  %v9842_v46 = vld [vmem:[#allocation7 + $0x98] sm:$0xff] }
0x2080   :  { %v5576_v47 = vpack.c.bf16 %v5568_v21, %v5567_v4  ;;  %v5575_v30 = vpack.c.bf16 %v5566_v9, %v5565_v27  ;;  %v5559_v56 = vmul.f32 %v7485_v59, %v5520_v58  ;;  %v5560_v61 = vmul.f32 %v7485_v59, %v5521_v39 }
0x2081   :  { %v5574_v6 = vpack.c.bf16 %v5564_v36, %v5563_v16  ;;  %v5573_v15 = vpack.c.bf16 %v5562_v23, %v5561_v17  ;;  %v5557_v57 = vmul.f32 %v7485_v59, %v9808_v53  ;;  %v5558_v38 = vmul.f32 %v7485_v59, %v9812_v8  ;;  %v6909_v53 = vld [vmem:[#allocation5 + $0x14] ss:$8 sps:$4 sm:$0xff]   ;;  %v5684_v36 = vpop.permute.xlu0 %5683 }
0x2082   :  { %6814 = vmatprep.subr.bf16.mxu0 %v5576_v47  ;;  %v5572_v60 = vpack.c.bf16 %v5560_v61, %v5559_v56  ;;  %v5555_v35 = vmul.f32 %v7485_v59, %v9801_v11  ;;  %v5556_v2 = vmul.f32 %v7485_v59, %v9805_v49  ;;  %v5553_v58 = vmul.f32 %v7485_v59, %v9796_v41  ;;  %v9833_v11 = vld [vmem:[#allocation7 + $0xa8] sm:$0xff]  ;;  %v5679_v4 = vpop.permute.xlu1 %5678 }
0x2083   :  { %6815 = vmatpush3.bf16.msra.mxu0 %v5576_v47  ;;  %v5571_v37 = vpack.c.bf16 %v5558_v38, %v5557_v57  ;;  %v5554_v39 = vmul.f32 %v7485_v59, %v9793_v3 }
0x2084   :  { %6816 = vmatprep.subr.bf16.mxu0 %v5575_v30  ;;  %v5570_v55 = vpack.c.bf16 %v5556_v2, %v5555_v35  ;;  %v6231_v2 = vld [vmem:[%s9963_s12 + $0x60] sm:$0xff] }
0x2085   :  { %v5569_v10 = vpack.c.bf16 %v5554_v39, %v5553_v58 }
0x2087   :  { %6817 = vmatpush3.bf16.msra.mxu0 %v5575_v30 }
0x2088   :  { %6818 = vmatprep.subr.bf16.mxu0 %v5574_v6 }
0x208b   :  { %6819 = vmatpush3.bf16.msra.mxu0 %v5574_v6 }
0x208c   :  { %6820 = vmatprep.subr.bf16.mxu0 %v5573_v15 }
0x208f   :  { %6821 = vmatpush3.bf16.msra.mxu0 %v5573_v15 }
0x2090   :  { %6822 = vmatprep.subr.bf16.mxu0 %v5572_v60 }
0x2093   :  { %6823 = vmatpush3.bf16.msra.mxu0 %v5572_v60 }
0x2094   :  { %6824 = vmatprep.subr.bf16.mxu0 %v5571_v37 }
0x2097   :  { %6825 = vmatpush3.bf16.msra.mxu0 %v5571_v37 }
0x2098   :  { %6826 = vmatprep.subr.bf16.mxu0 %v5570_v55 }
0x209b   :  { %6827 = vmatpush3.bf16.msra.mxu0 %v5570_v55  ;;  %v6232_v55 = vld [vmem:[%s9963_s12 + $0x68] sm:$0xff] }
0x209c   :  { %6828 = vmatprep.subr.bf16.mxu0 %v5569_v10 }
0x209f   :  { %6829 = vmatpush3.bf16.msra.mxu0 %v5569_v10 }
0x20a2   :  { %6831 = vmatmul.mubr.bf16.vlgmr.msra.gmra.mxu0 %v6909_v53 }
0x20a3   :  { %5754 = vmatprep.mubr.bf16.mxu0 %v9973_v33 }
0x2162   :  { %v6832_v49 = vpop.f32.mrf.mxu0 }
0x2163   :  { %v5640_v8 = vsub.f32 %v9833_v11, %v6832_v49 }
0x2164   :  { %v5623_v41 = vpop.f32.mrf.mxu0 }
0x2165   :  { %v6356_v26 = vpack.c.bf16 %v5640_v8, %v5640_v8  ;;  %v5638_v3 = vsub.f32 %v9836_v44, %v5623_v41 }
0x2166   :  { %v6833_v7 = vpop.f32.mrf.mxu0 }
0x2167   :  { %5660 = vst [vmem:[#allocation6 + $0x14] sm:$0xf] %v6356_v26  ;;  %v6354_v12 = vpack.c.bf16 %v5638_v3, %v5638_v3  ;;  %v5641_v14 = vsub.f32 %v9839_v43, %v6833_v7 }
0x2168   :  { %v5626_v42 = vpop.f32.mrf.mxu0 }
0x2169   :  { %5658 = vst [vmem:[#allocation6 + $0x4] sm:$0xf] %v6354_v12  ;;  %v6357_v54 = vpack.c.bf16 %v5641_v14, %v5641_v14  ;;  %v5639_v22 = vsub.f32 %v9842_v46, %v5626_v42 }
0x216b   :  { %5661 = vst [vmem:[#allocation6 + $0x1c] sm:$0xf] %v6357_v54  ;;  %v6355_v0 = vpack.c.bf16 %v5639_v22, %v5639_v22 }
0x216d   :  { %5659 = vst [vmem:[#allocation6 + $0xc] sm:$0xf] %v6355_v0 }
0x2172   :  { %v6912_v29 = vld [vmem:[#allocation6 + $0x14] ss:$8 sps:$4 sm:$0xff]  }
0x2173   :  { %5734 = vmatprep.subr.bf16.mxu0 %v6912_v29 }
0x2174   :  { %v6915_v25 = vld [vmem:[#allocation6 + $0x4] ss:$8 sps:$4 sm:$0xff]   ;;  %5735 = vmatpush1.bf16.msra.mxu0 %v6910_v45 }
0x2175   :  { %5736 = vmatprep.subr.bf16.mxu0 %v6915_v25 }
0x2178   :  { %5737 = vmatpush1.bf16.msra.mxu0 %v6913_v5 }
0x217b   :  { %6284 = vmatmul.mubr.msk.bf16.vlgmr.msra.gmra.mxu0 %vm84_vm0, %v6916_v34 }
0x217c   :  { %5764 = vmatprep.mubr.bf16.mxu0 %v9973_v33 }
0x2183   :  { %6285 = vmatmul.mubr.msk.bf16.gmra.mxu0 %vm84_vm0, %v6917_v20 }
0x223b   :  { %v5756_v40 = vpop.f32.mrf.mxu0 }
0x223c   :  { %v9854_v62 = vadd.f32 %v5756_v40, %v5669_v1 }
0x223d   :  { %v5758_v18 = vpop.f32.mrf.mxu0 }
0x223e   :  { %v9856_v28 = vadd.f32 %v5758_v18, %v5669_v1  ;;  %v5799_v48 = vmul.f32 %v9854_v62, %v9854_v62 }
0x223f   :  { %v5760_v31 = vpop.f32.mrf.mxu0 }
0x2240   :  { %v5800_v33 = vmul.f32 %v9856_v28, %v9856_v28  ;;  %v9862_v13 = vadd.f32 %v5760_v31, %v5674_v24  ;;  %v5783_v19 = vadd.f32 %v9856_v28, %v9854_v62 }
0x2241   :  { %v5762_v32 = vpop.f32.mrf.mxu0 }
0x2242   :  { %v9866_v63 = vadd.f32 %v5762_v32, %v5674_v24  ;;  %5784 = vadd.xlane.f32.xlu1 %v5783_v19  ;;  %v5807_v50 = vadd.f32 %v5800_v33, %v5799_v48  ;;  %v5801_v51 = vmul.f32 %v9862_v13, %v9862_v13 }
0x2243   :  { %v5766_v52 = vpop.f32.mrf.mxu0 }
0x2244   :  { %v5802_v59 = vmul.f32 %v9866_v63, %v9866_v63  ;;  %5808 = vadd.xlane.f32.xlu0 %v5807_v50  ;;  %v5786_v9 = vadd.f32 %v9866_v63, %v9862_v13  ;;  %v9876_v16 = vadd.f32 %v5766_v52, %v5679_v4  ;;  %v6227_v50 = vld [vmem:[%s9962_s11 + $0x60] sm:$0xff] }
0x2245   :  { %v5768_v21 = vpop.f32.mrf.mxu0 }
0x2246   :  { %v9872_v27 = vadd.f32 %v5768_v21, %v5679_v4  ;;  %v5810_v47 = vadd.f32 %v5802_v59, %v5801_v51  ;;  %v5803_v61 = vmul.f32 %v9876_v16, %v9876_v16  ;;  %v6228_v4 = vld [vmem:[%s9962_s11 + $0x68] sm:$0xff] }
0x2247   :  { %v5770_v30 = vpop.f32.mrf.mxu0 }
0x2248   :  { %5787 = vadd.xlane.f32.xlu0 %v5786_v9  ;;  %5811 = vadd.xlane.f32.xlu1 %v5810_v47  ;;  %v5804_v17 = vmul.f32 %v9872_v27, %v9872_v27  ;;  %v9880_v23 = vadd.f32 %v5770_v30, %v5684_v36  ;;  %v5789_v56 = vadd.f32 %v9872_v27, %v9876_v16  ;;  %v6229_v47 = vld [vmem:[%s9962_s11 + $0x70] sm:$0xff] }
0x2249   :  { %v5772_v6 = vpop.f32.mrf.mxu0 }
0x224a   :  { %v9882_v15 = vadd.f32 %v5772_v6, %v5684_v36  ;;  %v5805_v38 = vmul.f32 %v9880_v23, %v9880_v23  ;;  %v5813_v37 = vadd.f32 %v5804_v17, %v5803_v61  ;;  %v6230_v36 = vld [vmem:[%s9962_s11 + $0x78] sm:$0xff]  ;;  %v6233_v61 = vld [vmem:[%s9963_s12 + $0x70] sm:$0xff]  ;;  %s7517_s11 = smov [#allocation7]  }
0x224c   :  { %v5806_v60 = vmul.f32 %v9882_v15, %v9882_v15  ;;  %5790 = vadd.xlane.f32.xlu0 %v5789_v56  ;;  %v5792_v57 = vadd.f32 %v9882_v15, %v9880_v23 }
0x224e   :  { %5793 = vadd.xlane.f32.xlu1 %v5792_v57  ;;  %v5816_v35 = vadd.f32 %v5806_v60, %v5805_v38  ;;  %v6234_v60 = vld [vmem:[%s9963_s12 + $0x78] sm:$0xff]  ;;  %s5968_s12 = sshll.u32 %s7517_s11, 4  ;;  %s5969_s12 = int_to_ptr.vmem [resolvable:$true] %s5968_s12 }
0x224f   :  { %s7494_s8 = scalar_lea.vmem %s5969_s12, 4096  ;;  %p7499_p1 = scmp.lt.s32.totalorder %s5969_s12, %s5969_s12 }
0x2250   :  { %5814 = vadd.xlane.f32.xlu0 %v5813_v37  ;;  %p7495_p0 = scmp.ne.s32.totalorder %s5969_s12, %s7494_s8  ;;  %p7500_p2 = scmp.lt.s32.totalorder %s7494_s8, %s7494_s8 }
0x2252   :  { %5817 = vadd.xlane.f32.xlu1 %v5816_v35  ;;  %p7501_p3 = por %p7500_p2, %p7499_p1 }
0x2254   :  { %p7502_p4 = pnand %p7501_p3, %p7495_p0 }
0x2263   :  { %5885 = vperm.xlu1 %6847, %v6231_v2  }
0x2266   :  { %5890 = vperm.xlu0 %6846, %v6232_v55  }
0x22cb   :  { %v5785_v58 = vpop.xlane.xlu1 %5784 }
0x22cc   :  { %v5795_v39 = vmul.f32 0.00390625, %v5785_v58 }
0x22cd   :  { %v5809_v10 = vpop.xlane.xlu0 %5808 }
0x22ce   :  { %v5819_v53 = vmul.f32 0.00390625, %v5809_v10  ;;  %v5823_v49 = vmul.f32 %v5795_v39, %v5795_v39  ;;  %v5847_v38 = vsub.f32 %v9854_v62, %v5795_v39  ;;  %v5848_v37 = vsub.f32 %v9856_v28, %v5795_v39 }
0x22d0   :  { %v5827_v8 = vsub.f32 %v5819_v53, %v5823_v49 }
0x22d1   :  { %v5788_v41 = vpop.xlane.xlu0 %5787  ;;  %v5812_v26 = vpop.xlane.xlu1 %5811 }
0x22d2   :  { %v5831_v3 = vmax.f32 %v5827_v8, 0.0  ;;  %v9900_v7 = vmul.f32 0.00390625, %v5788_v41  ;;  %v5820_v42 = vmul.f32 0.00390625, %v5812_v26 }
0x22d4   :  { %v5835_v12 = vadd.f32 1e-05, %v5831_v3  ;;  %v5824_v14 = vmul.f32 %v9900_v7, %v9900_v7  ;;  %v5849_v41 = vsub.f32 %v9862_v13, %v9900_v7  ;;  %v5850_v26 = vsub.f32 %v9866_v63, %v9900_v7  ;;  %v5775_v3 = vld [vmem:[#allocation7 + $0x80] sm:$0xff] }
0x22d5   :  { %v5791_v54 = vpop.xlane.xlu0 %5790 }
0x22d6   :  { %7486 = vrsqrt.f32 %v5835_v12  ;;  %v5828_v22 = vsub.f32 %v5820_v42, %v5824_v14  ;;  %v9904_v0 = vmul.f32 0.00390625, %v5791_v54 }
0x22d7   :  { %v5794_v45 = vpop.xlane.xlu1 %5793 }
0x22d8   :  { %v5832_v29 = vmax.f32 %v5828_v22, 0.0  ;;  %v9906_v25 = vmul.f32 0.00390625, %v5794_v45  ;;  %v5825_v20 = vmul.f32 %v9904_v0, %v9904_v0  ;;  %v5851_v63 = vsub.f32 %v9876_v16, %v9904_v0 }
0x22d9   :  { %v5815_v5 = vpop.xlane.xlu0 %5814  ;;  %v5852_v7 = vsub.f32 %v9872_v27, %v9904_v0 }
0x22da   :  { %v5836_v34 = vadd.f32 1e-05, %v5832_v29  ;;  %v5821_v1 = vmul.f32 0.00390625, %v5815_v5  ;;  %v5826_v24 = vmul.f32 %v9906_v25, %v9906_v25  ;;  %v5777_v29 = vld [vmem:[#allocation7 + $0x90] sm:$0xff] }
0x22db   :  { %v5818_v40 = vpop.xlane.xlu1 %5817 }
0x22dc   :  { %7488 = vrsqrt.f32 %v5836_v34  ;;  %v5829_v18 = vsub.f32 %v5821_v1, %v5825_v20  ;;  %v5822_v31 = vmul.f32 0.00390625, %v5818_v40  ;;  %v5853_v40 = vsub.f32 %v9880_v23, %v9906_v25 }
0x22de   :  { %v5833_v48 = vmax.f32 %v5829_v18, 0.0  ;;  %v5830_v33 = vsub.f32 %v5822_v31, %v5826_v24  ;;  %v5854_v18 = vsub.f32 %v9882_v15, %v9906_v25 }
0x22df   :  { %v5886_v58 = vpop.permute.xlu1 %5885 }
0x22e0   :  { %v5837_v19 = vadd.f32 1e-05, %v5833_v48  ;;  %v5834_v32 = vmax.f32 %v5830_v33, 0.0 }
0x22e1   :  { %v5891_v57 = vpop.permute.xlu0 %5890 }
0x22e2   :  { %7490 = vrsqrt.f32 %v5837_v19  ;;  %v5838_v52 = vadd.f32 1e-05, %v5834_v32 }
0x22e3   :  { %v7487_v51 = vpop.eup %7486 }
0x22e4   :  { %7492 = vrsqrt.f32 %v5838_v52  ;;  %v5843_v59 = vmul.f32 %v7487_v51, %v6227_v50  ;;  %v5779_v50 = vld [vmem:[#allocation7 + $0xa0] sm:$0xff] }
0x22e6   :  { %5857 = vperm.xlu0 %6846, %v5843_v59  }
0x22e9   :  { %v7489_v21 = vpop.eup %7488 }
0x22ea   :  { %v5844_v9 = vmul.f32 %v7489_v21, %v6228_v4  ;;  %v5781_v4 = vld [vmem:[#allocation7 + $0xb0] sm:$0xff] }
0x22ec   :  { %5862 = vperm.xlu1 %6847, %v5844_v9  }
0x22ef   :  { %v7491_v30 = vpop.eup %7490 }
0x22f0   :  { %v5845_v6 = vmul.f32 %v7491_v30, %v6229_v47 }
0x22f1   :  { %v7493_v17 = vpop.eup %7492 }
0x22f2   :  { %5867 = vperm.xlu1 %6847, %v5845_v6   ;;  %v5846_v56 = vmul.f32 %v7493_v17, %v6230_v36 }
0x22f4   :  { %5872 = vperm.xlu0 %6846, %v5846_v56  }
0x22f6   :  { %5895 = vperm.xlu1 %6847, %v6233_v61  }
0x22f8   :  { %5900 = vperm.xlu0 %6846, %v6234_v60  }
0x2361   :  { %v5858_v35 = vpop.permute.xlu0 %5857 }
0x2362   :  { %v5875_v2 = vmul.f32 %v5858_v35, %v5847_v38  ;;  %v5876_v55 = vmul.f32 %v5858_v35, %v5848_v37 }
0x2364   :  { %v5903_v10 = vadd.f32 %v5886_v58, %v5875_v2  ;;  %v5904_v53 = vadd.f32 %v5886_v58, %v5876_v55 }
0x2366   :  { %v5911_v49 = vmax.f32 %v5903_v10, 0.0  ;;  %v5912_v8 = vmax.f32 %v5904_v53, 0.0 }
0x2367   :  { %v5863_v12 = vpop.permute.xlu1 %5862 }
0x2368   :  { %v5919_v14 = vadd.f32 %v5911_v49, %v5775_v3  ;;  %v5920_v62 = vadd.f32 %v5912_v8, %v9836_v44  ;;  %v5877_v28 = vmul.f32 %v5863_v12, %v5849_v41  ;;  %v5878_v39 = vmul.f32 %v5863_v12, %v5850_v26 }
0x236a   :  { %5927 = vst [vmem:[#allocation7 + $0xc0] sm:$0xff] %v5919_v14  ;;  %5928 = vst [vmem:[#allocation7 + $0xc8] sm:$0xff] %v5920_v62  ;;  %v5905_v42 = vadd.f32 %v5891_v57, %v5877_v28  ;;  %v5906_v54 = vadd.f32 %v5891_v57, %v5878_v39 }
0x236c   :  { %v5913_v22 = vmax.f32 %v5905_v42, 0.0  ;;  %v5914_v45 = vmax.f32 %v5906_v54, 0.0 }
0x236d   :  { %v5868_v5 = vpop.permute.xlu1 %5867 }
0x236e   :  { %v5921_v34 = vadd.f32 %v5913_v22, %v5777_v29  ;;  %v5922_v13 = vadd.f32 %v5914_v45, %v9842_v46  ;;  %v5879_v20 = vmul.f32 %v5868_v5, %v5851_v63  ;;  %v5880_v1 = vmul.f32 %v5868_v5, %v5852_v7 }
0x236f   :  { %v5873_v44 = vpop.permute.xlu0 %5872 }
0x2370   :  { %5929 = vst [vmem:[#allocation7 + $0xd0] sm:$0xff] %v5921_v34  ;;  %5930 = vst [vmem:[#allocation7 + $0xd8] sm:$0xff] %v5922_v13  ;;  %v5881_v31 = vmul.f32 %v5873_v44, %v5853_v40  ;;  %v5882_v46 = vmul.f32 %v5873_v44, %v5854_v18 }
0x2371   :  { %v5896_v24 = vpop.permute.xlu1 %5895 }
0x2372   :  { %v5907_v48 = vadd.f32 %v5896_v24, %v5879_v20  ;;  %v5908_v33 = vadd.f32 %v5896_v24, %v5880_v1 }
0x2373   :  { %v5901_v16 = vpop.permute.xlu0 %5900 }
0x2374   :  { %v5915_v19 = vmax.f32 %v5907_v48, 0.0  ;;  %v5916_v32 = vmax.f32 %v5908_v33, 0.0  ;;  %v5909_v27 = vadd.f32 %v5901_v16, %v5881_v31  ;;  %v5910_v0 = vadd.f32 %v5901_v16, %v5882_v46 }
0x2376   :  { %v5923_v52 = vadd.f32 %v5915_v19, %v5779_v50  ;;  %v5924_v51 = vadd.f32 %v5916_v32, %v9833_v11  ;;  %v5917_v23 = vmax.f32 %v5909_v27, 0.0  ;;  %v5918_v59 = vmax.f32 %v5910_v0, 0.0 }
0x2378   :  { %5931 = vst [vmem:[#allocation7 + $0xe0] sm:$0xff] %v5923_v52  ;;  %5932 = vst [vmem:[#allocation7 + $0xe8] sm:$0xff] %v5924_v51  ;;  %v5925_v15 = vadd.f32 %v5917_v23, %v5781_v4  ;;  %v5926_v25 = vadd.f32 %v5918_v59, %v9839_v43 }
0x237a   :  { %5933 = vst [vmem:[#allocation7 + $0xf0] sm:$0xff] %v5925_v15  ;;  %5934 = vst [vmem:[#allocation7 + $0xf8] sm:$0xff] %v5926_v25 }
0x237b   :  { %7505 = shalt.err (!%p7502_p4)
}
0x237c   :  { %s7518_s27 = smov 256   ;;  %s7519_s28 = smov 16  }
0x237d   :  { %5974 = dma.vmem_to_hbm [thread:$0]  %s5969_s12, 4096, %s9964_s13, [#allocation8], %s7518_s27, %s7518_s27, %s7519_s28  }
0x237e   :  { %7514 = dma.done.wait [#allocation8], 4096  }
0x237f   :  { %7515 = vsyncadd [#allocation8], 4294963200 }
0x2380   :  { %5978 = vsyncpa [#allocation8], 1 }

</bundles_post_ra>
